<compile_context>
chip_gen: v7x
topology: tpu7x:2x2x1
jax: 0.10.0
libtpu: 0.0.40
codegen_flags: <defaults>
</compile_context>

<pallas_src>
import math

import jax
import jax.numpy as jnp
from jax.experimental import pallas as pl
from jax.experimental.pallas import tpu as pltpu

HIDDEN = [256, 512, 384, 256]
NUM_RES_BLOCKS = 5
INPUT_SIZE = 25
OUTPUT_SIZE = 1000           # synthetic small head (module default is 165590);
                             # the head kernel handles arbitrary N via padding
BN_EPS = 1e-5
TILE_N = 512                 # lane-dense output tile for the head
MERGED = 128 + 128 + 64 + 32 + 16            # 368
FINAL_HIDDEN = HIDDEN[min(NUM_RES_BLOCKS, len(HIDDEN) - 1)]   # 256

PATH_ORDER = ("tidal", "wave", "atm", "river", "msl")
PATH_IN = {"tidal": (0, 10), "wave": (10, 19), "atm": (19, 22),
           "river": (22, 24), "msl": (24, 25)}
PATH_WIDTH = {"tidal": 128, "wave": 128, "atm": 64, "river": 32, "msl": 16}
PATH_HAS_BN = {"tidal": True, "wave": True, "atm": True, "river": True,
               "msl": False}


# ----------------------------------------------------------------------------
# Fused trunk kernel: pathways (block-diag) -> input layer -> residual blocks.
# Single invocation, every operand resident in VMEM.
# ----------------------------------------------------------------------------
def _make_trunk_kernel(has_shortcut):
    """Ref order:
       x, Wp1, sp1, Wp2, sp2, Win, sin,
       [bn1_s, bn1_sh, W1, s1, W2, b2, (Wsc, bsc)] * num_blocks, out."""
    def kernel(*refs):
        it = iter(refs)
        x_ref = next(it)
        wp1, sp1 = next(it), next(it)
        wp2, sp2 = next(it), next(it)
        win, sin = next(it), next(it)
        blocks = []
        for hs in has_shortcut:
            blk = (next(it), next(it), next(it), next(it), next(it), next(it))
            sc = (next(it), next(it)) if hs else None
            blocks.append((blk, sc))
        o_ref = next(it)

        f32 = jnp.float32
        # pathway stage 1 + 2 (block-diagonal weights) and input layer.
        # Bias + eval-mode BN already folded into the weights / shifts.
        h = jnp.maximum(
            jnp.dot(x_ref[...], wp1[...], preferred_element_type=f32) + sp1[...],
            0.0)
        h = jnp.maximum(
            jnp.dot(h, wp2[...], preferred_element_type=f32) + sp2[...], 0.0)
        h = jnp.maximum(
            jnp.dot(h, win[...], preferred_element_type=f32) + sin[...], 0.0)

        # residual blocks (dropout = identity in eval mode)
        for (bn1_s, bn1_sh, w1, s1, w2, b2), sc in blocks:
            identity = h
            a = jnp.maximum(h * bn1_s[...] + bn1_sh[...], 0.0)          # bn1+relu
            y = jnp.maximum(
                jnp.dot(a, w1[...], preferred_element_type=f32) + s1[...], 0.0)
            y = jnp.dot(y, w2[...], preferred_element_type=f32) + b2[...]
            if sc is not None:                                          # fused proj
                wsc, bsc = sc
                y = y + jnp.dot(identity, wsc[...],
                                preferred_element_type=f32) + bsc[...]
            else:
                y = y + identity
            h = y
        o_ref[...] = h
    return kernel


def trunk_forward(folded, x):
    B = x.shape[0]
    has_shortcut = tuple("wsc" in b for b in folded["blocks"])
    args = [x.astype(jnp.float32),
            folded["wp1"], folded["sp1"],
            folded["wp2"], folded["sp2"],
            folded["win"], folded["sin"]]
    for b in folded["blocks"]:
        args += [b["bn1_s"], b["bn1_sh"], b["w1"], b["s1"], b["w2"], b["b2"]]
        if "wsc" in b:
            args += [b["wsc"], b["bsc"]]
    # No grid: single invocation, whole arrays placed in VMEM by Pallas.
    return pl.pallas_call(
        _make_trunk_kernel(has_shortcut),
        out_shape=jax.ShapeDtypeStruct((B, FINAL_HIDDEN), jnp.float32),
    )(*args)


# ----------------------------------------------------------------------------
# Output head: h(B,256) @ W(256,N) + b, N tiled in lane-dense 512-wide blocks.
# Weights stored bf16 (HBM-bandwidth bound for the real 165590-wide head).
# ----------------------------------------------------------------------------
def _head_kernel(h_ref, w_ref, b_ref, o_ref):
    # bf16 x bf16 on the MXU with f32 accumulation; bias added in f32.
    o_ref[...] = (jnp.dot(h_ref[...], w_ref[...],
                          preferred_element_type=jnp.float32) + b_ref[...])


def head_forward(folded, h):
    B, K = h.shape
    w = folded["out_w"]          # (K, Np) bf16, zero-padded to TILE_N multiple
    b = folded["out_b"]          # (1, Np) f32, zero-padded
    n_pad = w.shape[1]
    hb = h.astype(jnp.bfloat16)
    out = pl.pallas_call(
        _head_kernel,
        out_shape=jax.ShapeDtypeStruct((B, n_pad), jnp.float32),
        grid=(n_pad // TILE_N,),
        in_specs=[
            pl.BlockSpec((B, K), lambda j: (0, 0)),        # activations resident
            pl.BlockSpec((K, TILE_N), lambda j: (0, j)),   # streamed weight tile
            pl.BlockSpec((1, TILE_N), lambda j: (0, j)),   # bias tile
        ],
        out_specs=pl.BlockSpec((B, TILE_N), lambda j: (0, j)),
        compiler_params=pltpu.CompilerParams(
            dimension_semantics=("parallel",)),
    )(hb, w, b)
    return out[:, :OUTPUT_SIZE]


def forward(folded, x):
    h = trunk_forward(folded, x)
    return head_forward(folded, h)


# ----------------------------------------------------------------------------
# Deterministic synthetic parameters (torch-module-shaped "raw" params).
# ----------------------------------------------------------------------------
def _linear_params(key, fan_in, fan_out):
    k1, k2 = jax.random.split(key)
    bound = 1.0 / math.sqrt(fan_in)
    w = jax.random.uniform(k1, (fan_in, fan_out), jnp.float32, -bound, bound)
    b = jax.random.uniform(k2, (fan_out,), jnp.float32, -bound, bound)
    return w, b


def _bn_params(key, n):
    k1, k2, k3, k4 = jax.random.split(key, 4)
    return dict(
        gamma=1.0 + 0.1 * jax.random.normal(k1, (n,), jnp.float32),
        beta=0.1 * jax.random.normal(k2, (n,), jnp.float32),
        mean=0.1 * jax.random.normal(k3, (n,), jnp.float32),
        var=0.5 + jax.random.uniform(k4, (n,), jnp.float32),
    )


def build_raw_params(key):
    keys = iter(jax.random.split(key, 64))
    nk = lambda: next(keys)
    paths = {}
    for name in PATH_ORDER:
        fin = PATH_IN[name][1] - PATH_IN[name][0]
        width = PATH_WIDTH[name]
        with_bn = PATH_HAS_BN[name]
        p = {}
        p["w1"], p["b1"] = _linear_params(nk(), fin, width)
        p["bn1"] = _bn_params(nk(), width) if with_bn else None
        p["w2"], p["b2"] = _linear_params(nk(), width, width)
        p["bn2"] = _bn_params(nk(), width) if with_bn else None
        paths[name] = p
    raw = {"paths": paths}
    raw["in_w"], raw["in_b"] = _linear_params(nk(), MERGED, HIDDEN[0])
    raw["in_bn"] = _bn_params(nk(), HIDDEN[0])
    blocks = []
    for i in range(NUM_RES_BLOCKS):
        fin = HIDDEN[min(i, len(HIDDEN) - 1)]
        fout = HIDDEN[min(i + 1, len(HIDDEN) - 1)]
        blk = {}
        blk["bn1"] = _bn_params(nk(), fin)
        blk["w1"], blk["b1"] = _linear_params(nk(), fin, fout)
        blk["bn2"] = _bn_params(nk(), fout)
        blk["w2"], blk["b2"] = _linear_params(nk(), fout, fout)
        if fin != fout:
            blk["wsc"], blk["bsc"] = _linear_params(nk(), fin, fout)
        blocks.append(blk)
    raw["blocks"] = blocks
    raw["out_w"], raw["out_b"] = _linear_params(nk(), FINAL_HIDDEN, OUTPUT_SIZE)
    return raw


# ----------------------------------------------------------------------------
# Fold eval-mode BN + biases into kernel-ready weights (host side, once).
# ----------------------------------------------------------------------------
def _bn_affine(bn):
    s = bn["gamma"] / jnp.sqrt(bn["var"] + BN_EPS)
    t = bn["beta"] - bn["mean"] * s
    return s, t


def fold_params(raw):
    f32 = jnp.float32
    folded = {}

    # block-diagonal pathway stages; BN + bias folded into W / shift
    wp1 = jnp.zeros((INPUT_SIZE, MERGED), f32)
    wp2 = jnp.zeros((MERGED, MERGED), f32)
    sp1, sp2 = [], []
    col = 0
    for name in PATH_ORDER:
        p = raw["paths"][name]
        r0, r1 = PATH_IN[name]
        w = PATH_WIDTH[name]
        if p["bn1"] is not None:
            s1, t1 = _bn_affine(p["bn1"])
        else:
            s1, t1 = jnp.ones((w,), f32), jnp.zeros((w,), f32)
        if p["bn2"] is not None:
            s2, t2 = _bn_affine(p["bn2"])
        else:
            s2, t2 = jnp.ones((w,), f32), jnp.zeros((w,), f32)
        wp1 = wp1.at[r0:r1, col:col + w].set(p["w1"] * s1[None, :])
        sp1.append(p["b1"] * s1 + t1)
        wp2 = wp2.at[col:col + w, col:col + w].set(p["w2"] * s2[None, :])
        sp2.append(p["b2"] * s2 + t2)
        col += w
    folded["wp1"] = wp1
    folded["sp1"] = jnp.concatenate(sp1).reshape(1, MERGED)
    folded["wp2"] = wp2
    folded["sp2"] = jnp.concatenate(sp2).reshape(1, MERGED)

    # input layer (Linear -> BN -> ReLU)
    s, t = _bn_affine(raw["in_bn"])
    folded["win"] = raw["in_w"] * s[None, :]
    folded["sin"] = (raw["in_b"] * s + t).reshape(1, -1)

    # residual blocks: bn2 folded into linear1; bn1 stays as explicit affine
    blocks = []
    for blk in raw["blocks"]:
        s1, t1 = _bn_affine(blk["bn1"])
        s2, t2 = _bn_affine(blk["bn2"])
        fb = dict(
            bn1_s=s1.reshape(1, -1), bn1_sh=t1.reshape(1, -1),
            w1=blk["w1"] * s2[None, :],
            s1=(blk["b1"] * s2 + t2).reshape(1, -1),
            w2=blk["w2"], b2=blk["b2"].reshape(1, -1))
        if "wsc" in blk:
            fb["wsc"] = blk["wsc"]
            fb["bsc"] = blk["bsc"].reshape(1, -1)
        blocks.append(fb)
    folded["blocks"] = blocks

    # output head: bf16 weights, N padded up to a TILE_N multiple
    K, N = raw["out_w"].shape
    n_pad = ((N + TILE_N - 1) // TILE_N) * TILE_N
    folded["out_w"] = (jnp.zeros((K, n_pad), f32)
                       .at[:, :N].set(raw["out_w"]).astype(jnp.bfloat16))
    folded["out_b"] = jnp.zeros((1, n_pad), f32).at[0, :N].set(raw["out_b"])
    return folded


# ----------------------------------------------------------------------------
# Pure-JAX reference (explicit eval-mode BatchNorm, unfolded weights).
# ----------------------------------------------------------------------------
_HI = jax.lax.Precision.HIGHEST


def forward_ref(raw, x):
    def bn_eval(v, bn):
        return ((v - bn["mean"]) / jnp.sqrt(bn["var"] + BN_EPS)
                * bn["gamma"] + bn["beta"])

    def pathway(p, feats):
        h = jnp.dot(feats, p["w1"], precision=_HI) + p["b1"]
        if p["bn1"] is not None:
            h = bn_eval(h, p["bn1"])
        h = jnp.maximum(h, 0.0)
        h = jnp.dot(h, p["w2"], precision=_HI) + p["b2"]
        if p["bn2"] is not None:
            h = bn_eval(h, p["bn2"])
        return jnp.maximum(h, 0.0)

    merged = jnp.concatenate(
        [pathway(raw["paths"][n], x[:, PATH_IN[n][0]:PATH_IN[n][1]])
         for n in PATH_ORDER], axis=1)
    h = jnp.maximum(
        bn_eval(jnp.dot(merged, raw["in_w"], precision=_HI) + raw["in_b"],
                raw["in_bn"]), 0.0)
    for blk in raw["blocks"]:
        identity = h
        a = jnp.maximum(bn_eval(h, blk["bn1"]), 0.0)
        y = jnp.maximum(
            bn_eval(jnp.dot(a, blk["w1"], precision=_HI) + blk["b1"],
                    blk["bn2"]), 0.0)
        y = jnp.dot(y, blk["w2"], precision=_HI) + blk["b2"]
        sc = (jnp.dot(identity, blk["wsc"], precision=_HI) + blk["bsc"]
              if "wsc" in blk else identity)
        h = y + sc
    # Head runs in bf16 in the kernel; match that rounding here so the check
    # validates the kernel rather than bf16 quantization noise.
    hb = h.astype(jnp.bfloat16).astype(jnp.float32)
    wb = raw["out_w"].astype(jnp.bfloat16).astype(jnp.float32)
    return jnp.dot(hb, wb, precision=_HI) + raw["out_b"]


if __name__ == "__main__":
    key = jax.random.PRNGKey(0)
    k_params, k_x = jax.random.split(key)

    B = 16
    x = jax.random.normal(k_x, (B, INPUT_SIZE), jnp.float32)

    raw = build_raw_params(k_params)
    folded = fold_params(raw)

    fwd = jax.jit(forward)
    out = jax.block_until_ready(fwd(folded, x))
    assert out.shape == (B, OUTPUT_SIZE), out.shape

    ref = forward_ref(raw, x)
    err = float(jnp.max(jnp.abs(out - ref) / (1.0 + jnp.abs(ref))))
    assert err < 2e-2, f"max relative error too large: {err}"

    print("KERNEL_OK")
</pallas_src>

<mosaic_0001>
module attributes {stable_mosaic.version = 11 : i64} {
  func.func @_head_kernel(%arg0: i32, %arg1: memref<16x256xbf16, #tpu.memory_space<vmem>>, %arg2: memref<256x512xbf16, #tpu.memory_space<vmem>>, %arg3: memref<1x512xf32, #tpu.memory_space<vmem>>, %arg4: memref<16x512xf32, #tpu.memory_space<vmem>>) attributes {dimension_semantics = [#tpu.dimension_semantics<parallel>], iteration_bounds = array<i64: 2>, scalar_prefetch = 0 : i64, scratch_operands = 0 : i64, tpu.core_type = #tpu.core_type<tc>, window_params = [{pipeline_mode = #tpu.pipeline_mode<synchronous>, transform_indices = @transform_0, window_bounds = array<i64: 16, 256>}, {transform_indices = @transform_1, window_bounds = array<i64: 256, 512>}, {transform_indices = @transform_2, window_bounds = array<i64: 1, 512>}, {transform_indices = @transform_3, window_bounds = array<i64: 16, 512>}]} {
    %c0 = arith.constant 0 : index
    %c0_0 = arith.constant 0 : index
    %0 = vector.load %arg1[%c0, %c0_0] : memref<16x256xbf16, #tpu.memory_space<vmem>>, vector<16x256xbf16>
    %c0_1 = arith.constant 0 : index
    %c0_2 = arith.constant 0 : index
    %1 = vector.load %arg2[%c0_1, %c0_2] : memref<256x512xbf16, #tpu.memory_space<vmem>>, vector<256x512xbf16>
    %cst = arith.constant dense<0.000000e+00> : vector<16x512xf32>
    %2 = tpu.matmul %0, %1, %cst {dimension_numbers = #tpu.dot_dimension_numbers<[1], [0], [0], [1], [0, 0, 1, 1], [], []>} : vector<16x256xbf16>, vector<256x512xbf16>, vector<16x512xf32> -> vector<16x512xf32>
    %c0_3 = arith.constant 0 : index
    %c0_4 = arith.constant 0 : index
    %3 = vector.load %arg3[%c0_3, %c0_4] : memref<1x512xf32, #tpu.memory_space<vmem>>, vector<1x512xf32>
    %4 = vector.broadcast %3 : vector<1x512xf32> to vector<16x512xf32>
    %5 = arith.addf %2, %4 : vector<16x512xf32>
    %c0_5 = arith.constant 0 : index
    %c0_6 = arith.constant 0 : index
    %6 = vector.load %arg4[%c0_5, %c0_6] : memref<16x512xf32, #tpu.memory_space<vmem>>, vector<16x512xf32>
    tpu.vector_store %arg4[%c0_5, %c0_6], %5 {strides = array<i32>} : memref<16x512xf32, #tpu.memory_space<vmem>>, vector<16x512xf32>,
    return
  }
  func.func @transform_0(%arg0: i32) -> (i32, i32) {
    %c0_i32 = arith.constant 0 : i32
    %c0_i32_0 = arith.constant 0 : i32
    %c0_i32_1 = arith.constant 0 : i32
    return %c0_i32, %c0_i32_0 : i32, i32
  }
  func.func @transform_1(%arg0: i32) -> (i32, i32) {
    %c0_i32 = arith.constant 0 : i32
    %c0_i32_0 = arith.constant 0 : i32
    return %c0_i32, %arg0 : i32, i32
  }
  func.func @transform_2(%arg0: i32) -> (i32, i32) {
    %c0_i32 = arith.constant 0 : i32
    %c0_i32_0 = arith.constant 0 : i32
    return %c0_i32, %arg0 : i32, i32
  }
  func.func @transform_3(%arg0: i32) -> (i32, i32) {
    %c0_i32 = arith.constant 0 : i32
    %c0_i32_0 = arith.constant 0 : i32
    return %c0_i32, %arg0 : i32, i32
  }
}

module attributes {stable_mosaic.version = 11 : i64} {
  func.func @kernel(%arg0: memref<16x25xf32, #tpu.memory_space<vmem>>, %arg1: memref<25x368xf32, #tpu.memory_space<vmem>>, %arg2: memref<1x368xf32, #tpu.memory_space<vmem>>, %arg3: memref<368x368xf32, #tpu.memory_space<vmem>>, %arg4: memref<1x368xf32, #tpu.memory_space<vmem>>, %arg5: memref<368x256xf32, #tpu.memory_space<vmem>>, %arg6: memref<1x256xf32, #tpu.memory_space<vmem>>, %arg7: memref<1x256xf32, #tpu.memory_space<vmem>>, %arg8: memref<1x256xf32, #tpu.memory_space<vmem>>, %arg9: memref<256x512xf32, #tpu.memory_space<vmem>>, %arg10: memref<1x512xf32, #tpu.memory_space<vmem>>, %arg11: memref<512x512xf32, #tpu.memory_space<vmem>>, %arg12: memref<1x512xf32, #tpu.memory_space<vmem>>, %arg13: memref<256x512xf32, #tpu.memory_space<vmem>>, %arg14: memref<1x512xf32, #tpu.memory_space<vmem>>, %arg15: memref<1x512xf32, #tpu.memory_space<vmem>>, %arg16: memref<1x512xf32, #tpu.memory_space<vmem>>, %arg17: memref<512x384xf32, #tpu.memory_space<vmem>>, %arg18: memref<1x384xf32, #tpu.memory_space<vmem>>, %arg19: memref<384x384xf32, #tpu.memory_space<vmem>>, %arg20: memref<1x384xf32, #tpu.memory_space<vmem>>, %arg21: memref<512x384xf32, #tpu.memory_space<vmem>>, %arg22: memref<1x384xf32, #tpu.memory_space<vmem>>, %arg23: memref<1x384xf32, #tpu.memory_space<vmem>>, %arg24: memref<1x384xf32, #tpu.memory_space<vmem>>, %arg25: memref<384x256xf32, #tpu.memory_space<vmem>>, %arg26: memref<1x256xf32, #tpu.memory_space<vmem>>, %arg27: memref<256x256xf32, #tpu.memory_space<vmem>>, %arg28: memref<1x256xf32, #tpu.memory_space<vmem>>, %arg29: memref<384x256xf32, #tpu.memory_space<vmem>>, %arg30: memref<1x256xf32, #tpu.memory_space<vmem>>, %arg31: memref<1x256xf32, #tpu.memory_space<vmem>>, %arg32: memref<1x256xf32, #tpu.memory_space<vmem>>, %arg33: memref<256x256xf32, #tpu.memory_space<vmem>>, %arg34: memref<1x256xf32, #tpu.memory_space<vmem>>, %arg35: memref<256x256xf32, #tpu.memory_space<vmem>>, %arg36: memref<1x256xf32, #tpu.memory_space<vmem>>, %arg37: memref<1x256xf32, #tpu.memory_space<vmem>>, %arg38: memref<1x256xf32, #tpu.memory_space<vmem>>, %arg39: memref<256x256xf32, #tpu.memory_space<vmem>>, %arg40: memref<1x256xf32, #tpu.memory_space<vmem>>, %arg41: memref<256x256xf32, #tpu.memory_space<vmem>>, %arg42: memref<1x256xf32, #tpu.memory_space<vmem>>, %arg43: memref<16x256xf32, #tpu.memory_space<vmem>>) attributes {dimension_semantics = [], scalar_prefetch = 0 : i64, scratch_operands = 0 : i64, tpu.core_type = #tpu.core_type<tc>} {
    %c0 = arith.constant 0 : index
    %c0_0 = arith.constant 0 : index
    %0 = vector.load %arg0[%c0, %c0_0] : memref<16x25xf32, #tpu.memory_space<vmem>>, vector<16x25xf32>
    %c0_1 = arith.constant 0 : index
    %c0_2 = arith.constant 0 : index
    %1 = vector.load %arg1[%c0_1, %c0_2] : memref<25x368xf32, #tpu.memory_space<vmem>>, vector<25x368xf32>
    %cst = arith.constant dense<0.000000e+00> : vector<16x368xf32>
    %2 = tpu.matmul %0, %1, %cst {dimension_numbers = #tpu.dot_dimension_numbers<[1], [0], [0], [1], [0, 0, 1, 1], [], []>} : vector<16x25xf32>, vector<25x368xf32>, vector<16x368xf32> -> vector<16x368xf32>
    %c0_3 = arith.constant 0 : index
    %c0_4 = arith.constant 0 : index
    %3 = vector.load %arg2[%c0_3, %c0_4] : memref<1x368xf32, #tpu.memory_space<vmem>>, vector<1x368xf32>
    %4 = vector.broadcast %3 : vector<1x368xf32> to vector<16x368xf32>
    %5 = arith.addf %2, %4 : vector<16x368xf32>
    %cst_5 = arith.constant 0.000000e+00 : f32
    %6 = vector.broadcast %cst_5 : f32 to vector<16x368xf32>
    %7 = arith.maximumf %5, %6 : vector<16x368xf32>
    %c0_6 = arith.constant 0 : index
    %c0_7 = arith.constant 0 : index
    %8 = vector.load %arg3[%c0_6, %c0_7] : memref<368x368xf32, #tpu.memory_space<vmem>>, vector<368x368xf32>
    %cst_8 = arith.constant dense<0.000000e+00> : vector<16x368xf32>
    %9 = tpu.matmul %7, %8, %cst_8 {dimension_numbers = #tpu.dot_dimension_numbers<[1], [0], [0], [1], [0, 0, 1, 1], [], []>} : vector<16x368xf32>, vector<368x368xf32>, vector<16x368xf32> -> vector<16x368xf32>
    %c0_9 = arith.constant 0 : index
    %c0_10 = arith.constant 0 : index
    %10 = vector.load %arg4[%c0_9, %c0_10] : memref<1x368xf32, #tpu.memory_space<vmem>>, vector<1x368xf32>
    %11 = vector.broadcast %10 : vector<1x368xf32> to vector<16x368xf32>
    %12 = arith.addf %9, %11 : vector<16x368xf32>
    %cst_11 = arith.constant 0.000000e+00 : f32
    %13 = vector.broadcast %cst_11 : f32 to vector<16x368xf32>
    %14 = arith.maximumf %12, %13 : vector<16x368xf32>
    %c0_12 = arith.constant 0 : index
    %c0_13 = arith.constant 0 : index
    %15 = vector.load %arg5[%c0_12, %c0_13] : memref<368x256xf32, #tpu.memory_space<vmem>>, vector<368x256xf32>
    %cst_14 = arith.constant dense<0.000000e+00> : vector<16x256xf32>
    %16 = tpu.matmul %14, %15, %cst_14 {dimension_numbers = #tpu.dot_dimension_numbers<[1], [0], [0], [1], [0, 0, 1, 1], [], []>} : vector<16x368xf32>, vector<368x256xf32>, vector<16x256xf32> -> vector<16x256xf32>
    %c0_15 = arith.constant 0 : index
    %c0_16 = arith.constant 0 : index
    %17 = vector.load %arg6[%c0_15, %c0_16] : memref<1x256xf32, #tpu.memory_space<vmem>>, vector<1x256xf32>
    %18 = vector.broadcast %17 : vector<1x256xf32> to vector<16x256xf32>
    %19 = arith.addf %16, %18 : vector<16x256xf32>
    %cst_17 = arith.constant 0.000000e+00 : f32
    %20 = vector.broadcast %cst_17 : f32 to vector<16x256xf32>
    %21 = arith.maximumf %19, %20 : vector<16x256xf32>
    %c0_18 = arith.constant 0 : index
    %c0_19 = arith.constant 0 : index
    %22 = vector.load %arg7[%c0_18, %c0_19] : memref<1x256xf32, #tpu.memory_space<vmem>>, vector<1x256xf32>
    %23 = vector.broadcast %22 : vector<1x256xf32> to vector<16x256xf32>
    %24 = arith.mulf %21, %23 : vector<16x256xf32>
    %c0_20 = arith.constant 0 : index
    %c0_21 = arith.constant 0 : index
    %25 = vector.load %arg8[%c0_20, %c0_21] : memref<1x256xf32, #tpu.memory_space<vmem>>, vector<1x256xf32>
    %26 = vector.broadcast %25 : vector<1x256xf32> to vector<16x256xf32>
    %27 = arith.addf %24, %26 : vector<16x256xf32>
    %cst_22 = arith.constant 0.000000e+00 : f32
    %28 = vector.broadcast %cst_22 : f32 to vector<16x256xf32>
    %29 = arith.maximumf %27, %28 : vector<16x256xf32>
    %c0_23 = arith.constant 0 : index
    %c0_24 = arith.constant 0 : index
    %30 = vector.load %arg9[%c0_23, %c0_24] : memref<256x512xf32, #tpu.memory_space<vmem>>, vector<256x512xf32>
    %cst_25 = arith.constant dense<0.000000e+00> : vector<16x512xf32>
    %31 = tpu.matmul %29, %30, %cst_25 {dimension_numbers = #tpu.dot_dimension_numbers<[1], [0], [0], [1], [0, 0, 1, 1], [], []>} : vector<16x256xf32>, vector<256x512xf32>, vector<16x512xf32> -> vector<16x512xf32>
    %c0_26 = arith.constant 0 : index
    %c0_27 = arith.constant 0 : index
    %32 = vector.load %arg10[%c0_26, %c0_27] : memref<1x512xf32, #tpu.memory_space<vmem>>, vector<1x512xf32>
    %33 = vector.broadcast %32 : vector<1x512xf32> to vector<16x512xf32>
    %34 = arith.addf %31, %33 : vector<16x512xf32>
    %cst_28 = arith.constant 0.000000e+00 : f32
    %35 = vector.broadcast %cst_28 : f32 to vector<16x512xf32>
    %36 = arith.maximumf %34, %35 : vector<16x512xf32>
    %c0_29 = arith.constant 0 : index
    %c0_30 = arith.constant 0 : index
    %37 = vector.load %arg11[%c0_29, %c0_30] : memref<512x512xf32, #tpu.memory_space<vmem>>, vector<512x512xf32>
    %cst_31 = arith.constant dense<0.000000e+00> : vector<16x512xf32>
    %38 = tpu.matmul %36, %37, %cst_31 {dimension_numbers = #tpu.dot_dimension_numbers<[1], [0], [0], [1], [0, 0, 1, 1], [], []>} : vector<16x512xf32>, vector<512x512xf32>, vector<16x512xf32> -> vector<16x512xf32>
    %c0_32 = arith.constant 0 : index
    %c0_33 = arith.constant 0 : index
    %39 = vector.load %arg12[%c0_32, %c0_33] : memref<1x512xf32, #tpu.memory_space<vmem>>, vector<1x512xf32>
    %40 = vector.broadcast %39 : vector<1x512xf32> to vector<16x512xf32>
    %41 = arith.addf %38, %40 : vector<16x512xf32>
    %c0_34 = arith.constant 0 : index
    %c0_35 = arith.constant 0 : index
    %42 = vector.load %arg13[%c0_34, %c0_35] : memref<256x512xf32, #tpu.memory_space<vmem>>, vector<256x512xf32>
    %cst_36 = arith.constant dense<0.000000e+00> : vector<16x512xf32>
    %43 = tpu.matmul %21, %42, %cst_36 {dimension_numbers = #tpu.dot_dimension_numbers<[1], [0], [0], [1], [0, 0, 1, 1], [], []>} : vector<16x256xf32>, vector<256x512xf32>, vector<16x512xf32> -> vector<16x512xf32>
    %44 = arith.addf %41, %43 : vector<16x512xf32>
    %c0_37 = arith.constant 0 : index
    %c0_38 = arith.constant 0 : index
    %45 = vector.load %arg14[%c0_37, %c0_38] : memref<1x512xf32, #tpu.memory_space<vmem>>, vector<1x512xf32>
    %46 = vector.broadcast %45 : vector<1x512xf32> to vector<16x512xf32>
    %47 = arith.addf %44, %46 : vector<16x512xf32>
    %c0_39 = arith.constant 0 : index
    %c0_40 = arith.constant 0 : index
    %48 = vector.load %arg15[%c0_39, %c0_40] : memref<1x512xf32, #tpu.memory_space<vmem>>, vector<1x512xf32>
    %49 = vector.broadcast %48 : vector<1x512xf32> to vector<16x512xf32>
    %50 = arith.mulf %47, %49 : vector<16x512xf32>
    %c0_41 = arith.constant 0 : index
    %c0_42 = arith.constant 0 : index
    %51 = vector.load %arg16[%c0_41, %c0_42] : memref<1x512xf32, #tpu.memory_space<vmem>>, vector<1x512xf32>
    %52 = vector.broadcast %51 : vector<1x512xf32> to vector<16x512xf32>
    %53 = arith.addf %50, %52 : vector<16x512xf32>
    %cst_43 = arith.constant 0.000000e+00 : f32
    %54 = vector.broadcast %cst_43 : f32 to vector<16x512xf32>
    %55 = arith.maximumf %53, %54 : vector<16x512xf32>
    %c0_44 = arith.constant 0 : index
    %c0_45 = arith.constant 0 : index
    %56 = vector.load %arg17[%c0_44, %c0_45] : memref<512x384xf32, #tpu.memory_space<vmem>>, vector<512x384xf32>
    %cst_46 = arith.constant dense<0.000000e+00> : vector<16x384xf32>
    %57 = tpu.matmul %55, %56, %cst_46 {dimension_numbers = #tpu.dot_dimension_numbers<[1], [0], [0], [1], [0, 0, 1, 1], [], []>} : vector<16x512xf32>, vector<512x384xf32>, vector<16x384xf32> -> vector<16x384xf32>
    %c0_47 = arith.constant 0 : index
    %c0_48 = arith.constant 0 : index
    %58 = vector.load %arg18[%c0_47, %c0_48] : memref<1x384xf32, #tpu.memory_space<vmem>>, vector<1x384xf32>
    %59 = vector.broadcast %58 : vector<1x384xf32> to vector<16x384xf32>
    %60 = arith.addf %57, %59 : vector<16x384xf32>
    %cst_49 = arith.constant 0.000000e+00 : f32
    %61 = vector.broadcast %cst_49 : f32 to vector<16x384xf32>
    %62 = arith.maximumf %60, %61 : vector<16x384xf32>
    %c0_50 = arith.constant 0 : index
    %c0_51 = arith.constant 0 : index
    %63 = vector.load %arg19[%c0_50, %c0_51] : memref<384x384xf32, #tpu.memory_space<vmem>>, vector<384x384xf32>
    %cst_52 = arith.constant dense<0.000000e+00> : vector<16x384xf32>
    %64 = tpu.matmul %62, %63, %cst_52 {dimension_numbers = #tpu.dot_dimension_numbers<[1], [0], [0], [1], [0, 0, 1, 1], [], []>} : vector<16x384xf32>, vector<384x384xf32>, vector<16x384xf32> -> vector<16x384xf32>
    %c0_53 = arith.constant 0 : index
    %c0_54 = arith.constant 0 : index
    %65 = vector.load %arg20[%c0_53, %c0_54] : memref<1x384xf32, #tpu.memory_space<vmem>>, vector<1x384xf32>
    %66 = vector.broadcast %65 : vector<1x384xf32> to vector<16x384xf32>
    %67 = arith.addf %64, %66 : vector<16x384xf32>
    %c0_55 = arith.constant 0 : index
    %c0_56 = arith.constant 0 : index
    %68 = vector.load %arg21[%c0_55, %c0_56] : memref<512x384xf32, #tpu.memory_space<vmem>>, vector<512x384xf32>
    %cst_57 = arith.constant dense<0.000000e+00> : vector<16x384xf32>
    %69 = tpu.matmul %47, %68, %cst_57 {dimension_numbers = #tpu.dot_dimension_numbers<[1], [0], [0], [1], [0, 0, 1, 1], [], []>} : vector<16x512xf32>, vector<512x384xf32>, vector<16x384xf32> -> vector<16x384xf32>
    %70 = arith.addf %67, %69 : vector<16x384xf32>
    %c0_58 = arith.constant 0 : index
    %c0_59 = arith.constant 0 : index
    %71 = vector.load %arg22[%c0_58, %c0_59] : memref<1x384xf32, #tpu.memory_space<vmem>>, vector<1x384xf32>
    %72 = vector.broadcast %71 : vector<1x384xf32> to vector<16x384xf32>
    %73 = arith.addf %70, %72 : vector<16x384xf32>
    %c0_60 = arith.constant 0 : index
    %c0_61 = arith.constant 0 : index
    %74 = vector.load %arg23[%c0_60, %c0_61] : memref<1x384xf32, #tpu.memory_space<vmem>>, vector<1x384xf32>
    %75 = vector.broadcast %74 : vector<1x384xf32> to vector<16x384xf32>
    %76 = arith.mulf %73, %75 : vector<16x384xf32>
    %c0_62 = arith.constant 0 : index
    %c0_63 = arith.constant 0 : index
    %77 = vector.load %arg24[%c0_62, %c0_63] : memref<1x384xf32, #tpu.memory_space<vmem>>, vector<1x384xf32>
    %78 = vector.broadcast %77 : vector<1x384xf32> to vector<16x384xf32>
    %79 = arith.addf %76, %78 : vector<16x384xf32>
    %cst_64 = arith.constant 0.000000e+00 : f32
    %80 = vector.broadcast %cst_64 : f32 to vector<16x384xf32>
    %81 = arith.maximumf %79, %80 : vector<16x384xf32>
    %c0_65 = arith.constant 0 : index
    %c0_66 = arith.constant 0 : index
    %82 = vector.load %arg25[%c0_65, %c0_66] : memref<384x256xf32, #tpu.memory_space<vmem>>, vector<384x256xf32>
    %cst_67 = arith.constant dense<0.000000e+00> : vector<16x256xf32>
    %83 = tpu.matmul %81, %82, %cst_67 {dimension_numbers = #tpu.dot_dimension_numbers<[1], [0], [0], [1], [0, 0, 1, 1], [], []>} : vector<16x384xf32>, vector<384x256xf32>, vector<16x256xf32> -> vector<16x256xf32>
    %c0_68 = arith.constant 0 : index
    %c0_69 = arith.constant 0 : index
    %84 = vector.load %arg26[%c0_68, %c0_69] : memref<1x256xf32, #tpu.memory_space<vmem>>, vector<1x256xf32>
    %85 = vector.broadcast %84 : vector<1x256xf32> to vector<16x256xf32>
    %86 = arith.addf %83, %85 : vector<16x256xf32>
    %cst_70 = arith.constant 0.000000e+00 : f32
    %87 = vector.broadcast %cst_70 : f32 to vector<16x256xf32>
    %88 = arith.maximumf %86, %87 : vector<16x256xf32>
    %c0_71 = arith.constant 0 : index
    %c0_72 = arith.constant 0 : index
    %89 = vector.load %arg27[%c0_71, %c0_72] : memref<256x256xf32, #tpu.memory_space<vmem>>, vector<256x256xf32>
    %cst_73 = arith.constant dense<0.000000e+00> : vector<16x256xf32>
    %90 = tpu.matmul %88, %89, %cst_73 {dimension_numbers = #tpu.dot_dimension_numbers<[1], [0], [0], [1], [0, 0, 1, 1], [], []>} : vector<16x256xf32>, vector<256x256xf32>, vector<16x256xf32> -> vector<16x256xf32>
    %c0_74 = arith.constant 0 : index
    %c0_75 = arith.constant 0 : index
    %91 = vector.load %arg28[%c0_74, %c0_75] : memref<1x256xf32, #tpu.memory_space<vmem>>, vector<1x256xf32>
    %92 = vector.broadcast %91 : vector<1x256xf32> to vector<16x256xf32>
    %93 = arith.addf %90, %92 : vector<16x256xf32>
    %c0_76 = arith.constant 0 : index
    %c0_77 = arith.constant 0 : index
    %94 = vector.load %arg29[%c0_76, %c0_77] : memref<384x256xf32, #tpu.memory_space<vmem>>, vector<384x256xf32>
    %cst_78 = arith.constant dense<0.000000e+00> : vector<16x256xf32>
    %95 = tpu.matmul %73, %94, %cst_78 {dimension_numbers = #tpu.dot_dimension_numbers<[1], [0], [0], [1], [0, 0, 1, 1], [], []>} : vector<16x384xf32>, vector<384x256xf32>, vector<16x256xf32> -> vector<16x256xf32>
    %96 = arith.addf %93, %95 : vector<16x256xf32>
    %c0_79 = arith.constant 0 : index
    %c0_80 = arith.constant 0 : index
    %97 = vector.load %arg30[%c0_79, %c0_80] : memref<1x256xf32, #tpu.memory_space<vmem>>, vector<1x256xf32>
    %98 = vector.broadcast %97 : vector<1x256xf32> to vector<16x256xf32>
    %99 = arith.addf %96, %98 : vector<16x256xf32>
    %c0_81 = arith.constant 0 : index
    %c0_82 = arith.constant 0 : index
    %100 = vector.load %arg31[%c0_81, %c0_82] : memref<1x256xf32, #tpu.memory_space<vmem>>, vector<1x256xf32>
    %101 = vector.broadcast %100 : vector<1x256xf32> to vector<16x256xf32>
    %102 = arith.mulf %99, %101 : vector<16x256xf32>
    %c0_83 = arith.constant 0 : index
    %c0_84 = arith.constant 0 : index
    %103 = vector.load %arg32[%c0_83, %c0_84] : memref<1x256xf32, #tpu.memory_space<vmem>>, vector<1x256xf32>
    %104 = vector.broadcast %103 : vector<1x256xf32> to vector<16x256xf32>
    %105 = arith.addf %102, %104 : vector<16x256xf32>
    %cst_85 = arith.constant 0.000000e+00 : f32
    %106 = vector.broadcast %cst_85 : f32 to vector<16x256xf32>
    %107 = arith.maximumf %105, %106 : vector<16x256xf32>
    %c0_86 = arith.constant 0 : index
    %c0_87 = arith.constant 0 : index
    %108 = vector.load %arg33[%c0_86, %c0_87] : memref<256x256xf32, #tpu.memory_space<vmem>>, vector<256x256xf32>
    %cst_88 = arith.constant dense<0.000000e+00> : vector<16x256xf32>
    %109 = tpu.matmul %107, %108, %cst_88 {dimension_numbers = #tpu.dot_dimension_numbers<[1], [0], [0], [1], [0, 0, 1, 1], [], []>} : vector<16x256xf32>, vector<256x256xf32>, vector<16x256xf32> -> vector<16x256xf32>
    %c0_89 = arith.constant 0 : index
    %c0_90 = arith.constant 0 : index
    %110 = vector.load %arg34[%c0_89, %c0_90] : memref<1x256xf32, #tpu.memory_space<vmem>>, vector<1x256xf32>
    %111 = vector.broadcast %110 : vector<1x256xf32> to vector<16x256xf32>
    %112 = arith.addf %109, %111 : vector<16x256xf32>
    %cst_91 = arith.constant 0.000000e+00 : f32
    %113 = vector.broadcast %cst_91 : f32 to vector<16x256xf32>
    %114 = arith.maximumf %112, %113 : vector<16x256xf32>
    %c0_92 = arith.constant 0 : index
    %c0_93 = arith.constant 0 : index
    %115 = vector.load %arg35[%c0_92, %c0_93] : memref<256x256xf32, #tpu.memory_space<vmem>>, vector<256x256xf32>
    %cst_94 = arith.constant dense<0.000000e+00> : vector<16x256xf32>
    %116 = tpu.matmul %114, %115, %cst_94 {dimension_numbers = #tpu.dot_dimension_numbers<[1], [0], [0], [1], [0, 0, 1, 1], [], []>} : vector<16x256xf32>, vector<256x256xf32>, vector<16x256xf32> -> vector<16x256xf32>
    %c0_95 = arith.constant 0 : index
    %c0_96 = arith.constant 0 : index
    %117 = vector.load %arg36[%c0_95, %c0_96] : memref<1x256xf32, #tpu.memory_space<vmem>>, vector<1x256xf32>
    %118 = vector.broadcast %117 : vector<1x256xf32> to vector<16x256xf32>
    %119 = arith.addf %116, %118 : vector<16x256xf32>
    %120 = arith.addf %119, %99 : vector<16x256xf32>
    %c0_97 = arith.constant 0 : index
    %c0_98 = arith.constant 0 : index
    %121 = vector.load %arg37[%c0_97, %c0_98] : memref<1x256xf32, #tpu.memory_space<vmem>>, vector<1x256xf32>
    %122 = vector.broadcast %121 : vector<1x256xf32> to vector<16x256xf32>
    %123 = arith.mulf %120, %122 : vector<16x256xf32>
    %c0_99 = arith.constant 0 : index
    %c0_100 = arith.constant 0 : index
    %124 = vector.load %arg38[%c0_99, %c0_100] : memref<1x256xf32, #tpu.memory_space<vmem>>, vector<1x256xf32>
    %125 = vector.broadcast %124 : vector<1x256xf32> to vector<16x256xf32>
    %126 = arith.addf %123, %125 : vector<16x256xf32>
    %cst_101 = arith.constant 0.000000e+00 : f32
    %127 = vector.broadcast %cst_101 : f32 to vector<16x256xf32>
    %128 = arith.maximumf %126, %127 : vector<16x256xf32>
    %c0_102 = arith.constant 0 : index
    %c0_103 = arith.constant 0 : index
    %129 = vector.load %arg39[%c0_102, %c0_103] : memref<256x256xf32, #tpu.memory_space<vmem>>, vector<256x256xf32>
    %cst_104 = arith.constant dense<0.000000e+00> : vector<16x256xf32>
    %130 = tpu.matmul %128, %129, %cst_104 {dimension_numbers = #tpu.dot_dimension_numbers<[1], [0], [0], [1], [0, 0, 1, 1], [], []>} : vector<16x256xf32>, vector<256x256xf32>, vector<16x256xf32> -> vector<16x256xf32>
    %c0_105 = arith.constant 0 : index
    %c0_106 = arith.constant 0 : index
    %131 = vector.load %arg40[%c0_105, %c0_106] : memref<1x256xf32, #tpu.memory_space<vmem>>, vector<1x256xf32>
    %132 = vector.broadcast %131 : vector<1x256xf32> to vector<16x256xf32>
    %133 = arith.addf %130, %132 : vector<16x256xf32>
    %cst_107 = arith.constant 0.000000e+00 : f32
    %134 = vector.broadcast %cst_107 : f32 to vector<16x256xf32>
    %135 = arith.maximumf %133, %134 : vector<16x256xf32>
    %c0_108 = arith.constant 0 : index
    %c0_109 = arith.constant 0 : index
    %136 = vector.load %arg41[%c0_108, %c0_109] : memref<256x256xf32, #tpu.memory_space<vmem>>, vector<256x256xf32>
    %cst_110 = arith.constant dense<0.000000e+00> : vector<16x256xf32>
    %137 = tpu.matmul %135, %136, %cst_110 {dimension_numbers = #tpu.dot_dimension_numbers<[1], [0], [0], [1], [0, 0, 1, 1], [], []>} : vector<16x256xf32>, vector<256x256xf32>, vector<16x256xf32> -> vector<16x256xf32>
    %c0_111 = arith.constant 0 : index
    %c0_112 = arith.constant 0 : index
    %138 = vector.load %arg42[%c0_111, %c0_112] : memref<1x256xf32, #tpu.memory_space<vmem>>, vector<1x256xf32>
    %139 = vector.broadcast %138 : vector<1x256xf32> to vector<16x256xf32>
    %140 = arith.addf %137, %139 : vector<16x256xf32>
    %141 = arith.addf %140, %120 : vector<16x256xf32>
    %c0_113 = arith.constant 0 : index
    %c0_114 = arith.constant 0 : index
    %142 = vector.load %arg43[%c0_113, %c0_114] : memref<16x256xf32, #tpu.memory_space<vmem>>, vector<16x256xf32>
    tpu.vector_store %arg43[%c0_113, %c0_114], %141 {strides = array<i32>} : memref<16x256xf32, #tpu.memory_space<vmem>>, vector<16x256xf32>,
    return
  }
}

</mosaic_0001>

<bundles_post_ra>
// kernel: forward.3
= control target key start
LH: loop header
LB: loop body
LE: loop exit
PB: predicated region body
PF: predicated region fallthrough
CT: control target
= control target key end

     0   :  { %8 = vsyncpa [#allocation4], 0  ;;  %s1571_s0 = inlined_call_operand.vmem [shape: bf16[16,256], index: 0, kind: input, shape index: {}]   ;;  %s1572_s1 = inlined_call_operand.vmem [shape: bf16[256,1024], index: 1, kind: input, shape index: {}]   ;;  %s1573_s2 = inlined_call_operand.vmem [shape: f32[1,1024], index: 2, kind: input, shape index: {}]   ;;  %s1574_s3 = inlined_call_operand.hbm [shape: f32[16,1024], index: 3, kind: output, shape index: {}]  }
   0x1   :  { %10 = vsyncpa [#allocation4 + $0x1], 0  ;;  %s1251_s12 = smov 0   ;;  %s1253_s13 = smov 0  }
   0x2   :  { %s1255_s14 = smov 0   ;;  %s1257_s15 = smov 0  }
   0x3 LB: > { %s1272_s16 = sadd.s32 4294967295, %s1225_s15   ;;  %s939_s17 = sadd.s32 4294967294, %s1225_s15   ;;  %s1225_s15 = sphi %s1257_s15, %s1580_s15   ;;  %s1221_s14 = sphi %s1255_s14, %s1579_s14   ;;  %s1217_s13 = sphi %s1253_s13, %s1578_s13   ;;  %s1213_s12 = sphi %s1251_s12, %s1577_s12  }
   0x4   : > { %s1276_s18 = sadd.s32 1, %s1225_s15   ;;  %s44_s19 = sadd.s32 1, %s1221_s14 }
   0x5   : > { %s41_s20 = ssub.s32 %s1225_s15, %s1276_s18  ;;  %p51_p0 = scmp.ne.s32.totalorder %s1221_s14, %s1217_s13 }
   0x6   : > { %p42_p1 = scmp.eq.s32.totalorder %s41_s20, 0  ;;  %p52_p2 = scmp.eq.s32.totalorder %s1225_s15, 0 }
   0x7   : > { %p107_p3 = scmp.eq.s32.totalorder %s1272_s16, 1  ;;  %p112_p4 = scmp.ne.s32.totalorder %s1217_s13, %s1213_s12 }
   0x8   : > { %s1288_s21 = scalar_select %p42_p1, %s1221_s14, %s44_s19  }
   0x9   : > { %p53_p5 = por %p52_p2, %p51_p0  ;;  %p1290_p6 = por %p107_p3, %p51_p0 }
   0xa   : > { %p113_p7 = scmp.eq.s32.totalorder %s939_s17, 1  ;;  %p941_p9 = scmp.ge.s32.totalorder %s1225_s15, 2 }
   0xc   : > { %p1294_p8 = por %p113_p7, %p112_p4  ;;  %132 = sbr.rel (%p941_p9) target bundleno = 55 (0x37), region = 20 }
  0x13   : > { %135 = sbr.rel (!%p53_p5) target bundleno = 55 (0x37), region = 24  ;;  %s137_s24 = sand.u32 (%p53_p5), 1, %s1221_s14  }
  0x14   : > { %s1020_s25 = sshll.u32 (%p53_p5), %s1225_s15, 4  ;;  %s942_s26 = sshll.u32 (%p53_p5), %s137_s24, 9 }
  0x15   : > { %s1306_s29 = scalar_lea.vmem (%p53_p5), %s1572_s1, %s1020_s25  ;;  %s1311_s30 = scalar_lea.vmem (%p53_p5), [#allocation2], %s942_s26 }
  0x16   : > { %v155_v0 = vld [vmem:[%s1306_s29] sm:$0xff] (%p53_p5)  ;;  %v157_v1 = vld [vmem:[%s1306_s29 + $0x8] sm:$0xff] (%p53_p5) }
  0x17   : > { %v159_v2 = vld [vmem:[%s1306_s29 + $0x20] sm:$0xff] (%p53_p5)  ;;  %156 = vst [vmem:[%s1311_s30] sm:$0xff] (%p53_p5), %v155_v0  ;;  %158 = vst [vmem:[%s1311_s30 + $0x8] sm:$0xff] (%p53_p5), %v157_v1  ;;  %v161_v3 = vld [vmem:[%s1306_s29 + $0x28] sm:$0xff] (%p53_p5) }
  0x18   : > { %160 = vst [vmem:[%s1311_s30 + $0x10] sm:$0xff] (%p53_p5), %v159_v2  ;;  %v163_v4 = vld [vmem:[%s1306_s29 + $0x40] sm:$0xff] (%p53_p5)  ;;  %v165_v5 = vld [vmem:[%s1306_s29 + $0x48] sm:$0xff] (%p53_p5)  ;;  %162 = vst [vmem:[%s1311_s30 + $0x18] sm:$0xff] (%p53_p5), %v161_v3 }
  0x19   : > { %164 = vst [vmem:[%s1311_s30 + $0x20] sm:$0xff] (%p53_p5), %v163_v4  ;;  %166 = vst [vmem:[%s1311_s30 + $0x28] sm:$0xff] (%p53_p5), %v165_v5  ;;  %v167_v6 = vld [vmem:[%s1306_s29 + $0x60] sm:$0xff] (%p53_p5)  ;;  %v169_v7 = vld [vmem:[%s1306_s29 + $0x68] sm:$0xff] (%p53_p5) }
  0x1a   : > { %v171_v8 = vld [vmem:[%s1306_s29 + $0x80] sm:$0xff]  ;;  %168 = vst [vmem:[%s1311_s30 + $0x30] sm:$0xff] %v167_v6  ;;  %170 = vst [vmem:[%s1311_s30 + $0x38] sm:$0xff] %v169_v7  ;;  %v173_v9 = vld [vmem:[%s1306_s29 + $0x88] sm:$0xff] }
  0x1b   : > { %172 = vst [vmem:[%s1311_s30 + $0x40] sm:$0xff] %v171_v8  ;;  %v175_v10 = vld [vmem:[%s1306_s29 + $0xa0] sm:$0xff]  ;;  %v177_v11 = vld [vmem:[%s1306_s29 + $0xa8] sm:$0xff]  ;;  %174 = vst [vmem:[%s1311_s30 + $0x48] sm:$0xff] %v173_v9 }
  0x1c   : > { %176 = vst [vmem:[%s1311_s30 + $0x50] sm:$0xff] %v175_v10  ;;  %178 = vst [vmem:[%s1311_s30 + $0x58] sm:$0xff] %v177_v11  ;;  %v179_v12 = vld [vmem:[%s1306_s29 + $0xc0] sm:$0xff]  ;;  %v181_v13 = vld [vmem:[%s1306_s29 + $0xc8] sm:$0xff] }
  0x1d   : > { %v183_v14 = vld [vmem:[%s1306_s29 + $0xe0] sm:$0xff]  ;;  %180 = vst [vmem:[%s1311_s30 + $0x60] sm:$0xff] %v179_v12  ;;  %182 = vst [vmem:[%s1311_s30 + $0x68] sm:$0xff] %v181_v13  ;;  %v185_v15 = vld [vmem:[%s1306_s29 + $0xe8] sm:$0xff] }
  0x1e   : > { %184 = vst [vmem:[%s1311_s30 + $0x70] sm:$0xff] %v183_v14  ;;  %v187_v16 = vld [vmem:[%s1306_s29 + $0x100] sm:$0xff]  ;;  %v189_v17 = vld [vmem:[%s1306_s29 + $0x108] sm:$0xff]  ;;  %186 = vst [vmem:[%s1311_s30 + $0x78] sm:$0xff] %v185_v15 }
  0x1f   : > { %188 = vst [vmem:[%s1311_s30 + $0x80] sm:$0xff] %v187_v16  ;;  %190 = vst [vmem:[%s1311_s30 + $0x88] sm:$0xff] %v189_v17  ;;  %v191_v18 = vld [vmem:[%s1306_s29 + $0x120] sm:$0xff]  ;;  %v193_v19 = vld [vmem:[%s1306_s29 + $0x128] sm:$0xff] }
  0x20   : > { %v195_v20 = vld [vmem:[%s1306_s29 + $0x140] sm:$0xff]  ;;  %192 = vst [vmem:[%s1311_s30 + $0x90] sm:$0xff] %v191_v18  ;;  %194 = vst [vmem:[%s1311_s30 + $0x98] sm:$0xff] %v193_v19  ;;  %v197_v21 = vld [vmem:[%s1306_s29 + $0x148] sm:$0xff] }
  0x21   : > { %196 = vst [vmem:[%s1311_s30 + $0xa0] sm:$0xff] %v195_v20  ;;  %v199_v22 = vld [vmem:[%s1306_s29 + $0x160] sm:$0xff]  ;;  %v201_v23 = vld [vmem:[%s1306_s29 + $0x168] sm:$0xff]  ;;  %198 = vst [vmem:[%s1311_s30 + $0xa8] sm:$0xff] %v197_v21 }
  0x22   : > { %200 = vst [vmem:[%s1311_s30 + $0xb0] sm:$0xff] %v199_v22  ;;  %202 = vst [vmem:[%s1311_s30 + $0xb8] sm:$0xff] %v201_v23  ;;  %v203_v24 = vld [vmem:[%s1306_s29 + $0x180] sm:$0xff]  ;;  %v205_v25 = vld [vmem:[%s1306_s29 + $0x188] sm:$0xff] }
  0x23   : > { %v207_v26 = vld [vmem:[%s1306_s29 + $0x1a0] sm:$0xff]  ;;  %204 = vst [vmem:[%s1311_s30 + $0xc0] sm:$0xff] %v203_v24  ;;  %206 = vst [vmem:[%s1311_s30 + $0xc8] sm:$0xff] %v205_v25  ;;  %v209_v27 = vld [vmem:[%s1306_s29 + $0x1a8] sm:$0xff] }
  0x24   : > { %208 = vst [vmem:[%s1311_s30 + $0xd0] sm:$0xff] %v207_v26  ;;  %v211_v28 = vld [vmem:[%s1306_s29 + $0x1c0] sm:$0xff]  ;;  %v213_v29 = vld [vmem:[%s1306_s29 + $0x1c8] sm:$0xff]  ;;  %210 = vst [vmem:[%s1311_s30 + $0xd8] sm:$0xff] %v209_v27 }
  0x25   : > { %212 = vst [vmem:[%s1311_s30 + $0xe0] sm:$0xff] %v211_v28  ;;  %214 = vst [vmem:[%s1311_s30 + $0xe8] sm:$0xff] %v213_v29  ;;  %v215_v30 = vld [vmem:[%s1306_s29 + $0x1e0] sm:$0xff]  ;;  %v217_v31 = vld [vmem:[%s1306_s29 + $0x1e8] sm:$0xff] }
  0x26   : > { %v219_v32 = vld [vmem:[%s1306_s29 + $0x200] sm:$0xff]  ;;  %216 = vst [vmem:[%s1311_s30 + $0xf0] sm:$0xff] %v215_v30  ;;  %218 = vst [vmem:[%s1311_s30 + $0xf8] sm:$0xff] %v217_v31  ;;  %v221_v33 = vld [vmem:[%s1306_s29 + $0x208] sm:$0xff] }
  0x27   : > { %220 = vst [vmem:[%s1311_s30 + $0x100] sm:$0xff] %v219_v32  ;;  %v223_v34 = vld [vmem:[%s1306_s29 + $0x220] sm:$0xff]  ;;  %v225_v35 = vld [vmem:[%s1306_s29 + $0x228] sm:$0xff]  ;;  %222 = vst [vmem:[%s1311_s30 + $0x108] sm:$0xff] %v221_v33 }
  0x28   : > { %224 = vst [vmem:[%s1311_s30 + $0x110] sm:$0xff] %v223_v34  ;;  %226 = vst [vmem:[%s1311_s30 + $0x118] sm:$0xff] %v225_v35  ;;  %v227_v36 = vld [vmem:[%s1306_s29 + $0x240] sm:$0xff]  ;;  %v229_v37 = vld [vmem:[%s1306_s29 + $0x248] sm:$0xff] }
  0x29   : > { %v231_v38 = vld [vmem:[%s1306_s29 + $0x260] sm:$0xff]  ;;  %228 = vst [vmem:[%s1311_s30 + $0x120] sm:$0xff] %v227_v36  ;;  %230 = vst [vmem:[%s1311_s30 + $0x128] sm:$0xff] %v229_v37  ;;  %v233_v39 = vld [vmem:[%s1306_s29 + $0x268] sm:$0xff] }
  0x2a   : > { %232 = vst [vmem:[%s1311_s30 + $0x130] sm:$0xff] %v231_v38  ;;  %v235_v40 = vld [vmem:[%s1306_s29 + $0x280] sm:$0xff]  ;;  %v237_v41 = vld [vmem:[%s1306_s29 + $0x288] sm:$0xff]  ;;  %234 = vst [vmem:[%s1311_s30 + $0x138] sm:$0xff] %v233_v39 }
  0x2b   : > { %236 = vst [vmem:[%s1311_s30 + $0x140] sm:$0xff] %v235_v40  ;;  %238 = vst [vmem:[%s1311_s30 + $0x148] sm:$0xff] %v237_v41  ;;  %v239_v42 = vld [vmem:[%s1306_s29 + $0x2a0] sm:$0xff]  ;;  %v241_v43 = vld [vmem:[%s1306_s29 + $0x2a8] sm:$0xff] }
  0x2c   : > { %v243_v44 = vld [vmem:[%s1306_s29 + $0x2c0] sm:$0xff]  ;;  %240 = vst [vmem:[%s1311_s30 + $0x150] sm:$0xff] %v239_v42  ;;  %242 = vst [vmem:[%s1311_s30 + $0x158] sm:$0xff] %v241_v43  ;;  %v245_v45 = vld [vmem:[%s1306_s29 + $0x2c8] sm:$0xff] }
  0x2d   : > { %244 = vst [vmem:[%s1311_s30 + $0x160] sm:$0xff] %v243_v44  ;;  %v247_v46 = vld [vmem:[%s1306_s29 + $0x2e0] sm:$0xff]  ;;  %v249_v47 = vld [vmem:[%s1306_s29 + $0x2e8] sm:$0xff]  ;;  %246 = vst [vmem:[%s1311_s30 + $0x168] sm:$0xff] %v245_v45 }
  0x2e   : > { %248 = vst [vmem:[%s1311_s30 + $0x170] sm:$0xff] %v247_v46  ;;  %250 = vst [vmem:[%s1311_s30 + $0x178] sm:$0xff] %v249_v47  ;;  %v251_v48 = vld [vmem:[%s1306_s29 + $0x300] sm:$0xff]  ;;  %v253_v49 = vld [vmem:[%s1306_s29 + $0x308] sm:$0xff] }
  0x2f   : > { %v255_v50 = vld [vmem:[%s1306_s29 + $0x320] sm:$0xff]  ;;  %252 = vst [vmem:[%s1311_s30 + $0x180] sm:$0xff] %v251_v48  ;;  %254 = vst [vmem:[%s1311_s30 + $0x188] sm:$0xff] %v253_v49  ;;  %v257_v51 = vld [vmem:[%s1306_s29 + $0x328] sm:$0xff] }
  0x30   : > { %256 = vst [vmem:[%s1311_s30 + $0x190] sm:$0xff] %v255_v50  ;;  %v259_v52 = vld [vmem:[%s1306_s29 + $0x340] sm:$0xff]  ;;  %v261_v53 = vld [vmem:[%s1306_s29 + $0x348] sm:$0xff]  ;;  %258 = vst [vmem:[%s1311_s30 + $0x198] sm:$0xff] %v257_v51 }
  0x31   : > { %260 = vst [vmem:[%s1311_s30 + $0x1a0] sm:$0xff] %v259_v52  ;;  %262 = vst [vmem:[%s1311_s30 + $0x1a8] sm:$0xff] %v261_v53  ;;  %v263_v54 = vld [vmem:[%s1306_s29 + $0x360] sm:$0xff]  ;;  %v265_v55 = vld [vmem:[%s1306_s29 + $0x368] sm:$0xff] }
  0x32   : > { %v267_v56 = vld [vmem:[%s1306_s29 + $0x380] sm:$0xff]  ;;  %264 = vst [vmem:[%s1311_s30 + $0x1b0] sm:$0xff] %v263_v54  ;;  %266 = vst [vmem:[%s1311_s30 + $0x1b8] sm:$0xff] %v265_v55  ;;  %v269_v57 = vld [vmem:[%s1306_s29 + $0x388] sm:$0xff] }
  0x33   : > { %268 = vst [vmem:[%s1311_s30 + $0x1c0] sm:$0xff] %v267_v56  ;;  %v271_v58 = vld [vmem:[%s1306_s29 + $0x3a0] sm:$0xff]  ;;  %v273_v59 = vld [vmem:[%s1306_s29 + $0x3a8] sm:$0xff]  ;;  %270 = vst [vmem:[%s1311_s30 + $0x1c8] sm:$0xff] %v269_v57 }
  0x34   : > { %272 = vst [vmem:[%s1311_s30 + $0x1d0] sm:$0xff] %v271_v58  ;;  %274 = vst [vmem:[%s1311_s30 + $0x1d8] sm:$0xff] %v273_v59  ;;  %v275_v60 = vld [vmem:[%s1306_s29 + $0x3c0] sm:$0xff]  ;;  %v277_v61 = vld [vmem:[%s1306_s29 + $0x3c8] sm:$0xff] }
  0x35   : > { %v279_v62 = vld [vmem:[%s1306_s29 + $0x3e0] sm:$0xff]  ;;  %276 = vst [vmem:[%s1311_s30 + $0x1e0] sm:$0xff] %v275_v60  ;;  %278 = vst [vmem:[%s1311_s30 + $0x1e8] sm:$0xff] %v277_v61  ;;  %v281_v63 = vld [vmem:[%s1306_s29 + $0x3e8] sm:$0xff] }
  0x36   : > { %280 = vst [vmem:[%s1311_s30 + $0x1f0] sm:$0xff] %v279_v62  ;;  %282 = vst [vmem:[%s1311_s30 + $0x1f8] sm:$0xff] %v281_v63 }
  0x37 PF: > { %p945_p10 = scmp.ge.s32.totalorder %s1225_s15, 1  ;;  %p295_p11 = scmp.lt.s32.totalorder %s1225_s15, 3 }
  0x39   : > { %p296_p12 = pnand %p945_p10, %p295_p11 }
  0x3a   : > { %s1441_s4 = sand.u32 (!%p296_p12), 1, %s1217_s13   ;;  %v1162_v0 = vld [vmem:[%s1571_s0 + $0x4] ss:$8 sps:$4 sm:$0xff] (!%p296_p12)   ;;  %s948_s11 = sshll.u32 (!%p296_p12), %s1272_s16, 2 }
  0x3b   : > { %299 = sbr.rel (%p296_p12) target bundleno = 359 (0x167), region = 51  ;;  %s946_s5 = sshll.u32 (!%p296_p12), %s1441_s4, 9  ;;  %786 = vmatprep.mubr.bf16.mxu0 (!%p296_p12), %v1162_v0  ;;  %829 = vmatprep.mubr.bf16.mxu1 (!%p296_p12), %v1162_v0 }
  0x3c   : > { %s1447_s8 = scalar_lea.vmem (!%p296_p12), [#allocation2], %s946_s5  ;;  %p331_p13 = scmp.lt.s32.totalorder (!%p296_p12), %s948_s11, 7 }
  0x3d   : > { %v1064_v1 = vld [vmem:[%s1447_s8 + $0x4] ss:$16 sps:$4 sm:$0xff] (!%p296_p12)   ;;  %v1066_v2 = vld [vmem:[%s1447_s8 + $0xc] ss:$16 sps:$4 sm:$0xff] (!%p296_p12)   ;;  %v1068_v3 = vld [vmem:[%s1447_s8] ss:$16 sps:$4 sm:$0xff] (!%p296_p12)  }
  0x3e   : > { %754 = vmatprep.subr.bf16.mxu0 (!%p296_p12), %v1064_v1  ;;  %v1069_v4 = vld [vmem:[%s1447_s8 + $0x8] ss:$16 sps:$4 sm:$0xff] (!%p296_p12)   ;;  %797 = vmatprep.subr.bf16.mxu1 (!%p296_p12), %v1066_v2  ;;  %v1070_v5 = vld [vmem:[%s1447_s8 + $0x24] ss:$16 sps:$4 sm:$0xff] (!%p296_p12)   ;;  %v1072_v6 = vld [vmem:[%s1447_s8 + $0x2c] ss:$16 sps:$4 sm:$0xff] (!%p296_p12)   ;;  %v404_v2 = vlaneseq (!%p296_p12) }
  0x3f   : > { %755 = vmatpush1.bf16.msra.mxu0 (!%p296_p12), %v1068_v3  ;;  %798 = vmatpush1.bf16.msra.mxu1 (!%p296_p12), %v1069_v4  ;;  %v1074_v7 = vld [vmem:[%s1447_s8 + $0x20] ss:$16 sps:$4 sm:$0xff] (!%p296_p12)   ;;  %v1075_v8 = vld [vmem:[%s1447_s8 + $0x28] ss:$16 sps:$4 sm:$0xff] (!%p296_p12)   ;;  %v1076_v9 = vld [vmem:[%s1447_s8 + $0x44] ss:$16 sps:$4 sm:$0xff] (!%p296_p12)  }
  0x40   : > { %756 = vmatprep.subr.bf16.mxu0 (!%p296_p12), %v1070_v5  ;;  %799 = vmatprep.subr.bf16.mxu1 (!%p296_p12), %v1072_v6  ;;  %v1078_v10 = vld [vmem:[%s1447_s8 + $0x4c] ss:$16 sps:$4 sm:$0xff] (!%p296_p12)   ;;  %v1080_v11 = vld [vmem:[%s1447_s8 + $0x40] ss:$16 sps:$4 sm:$0xff] (!%p296_p12)   ;;  %v1081_v12 = vld [vmem:[%s1447_s8 + $0x48] ss:$16 sps:$4 sm:$0xff] (!%p296_p12)  }
  0x41   : > { %v1082_v13 = vld [vmem:[%s1447_s8 + $0x64] ss:$16 sps:$4 sm:$0xff] (!%p296_p12)   ;;  %v1084_v14 = vld [vmem:[%s1447_s8 + $0x6c] ss:$16 sps:$4 sm:$0xff] (!%p296_p12)   ;;  %v1086_v15 = vld [vmem:[%s1447_s8 + $0x60] ss:$16 sps:$4 sm:$0xff] (!%p296_p12)  }
  0x42   : > { %v1087_v16 = vld [vmem:[%s1447_s8 + $0x68] ss:$16 sps:$4 sm:$0xff]   ;;  %v1088_v17 = vld [vmem:[%s1447_s8 + $0x84] ss:$16 sps:$4 sm:$0xff]   ;;  %v1090_v18 = vld [vmem:[%s1447_s8 + $0x8c] ss:$16 sps:$4 sm:$0xff]  }
  0x43   : > { %757 = vmatpush1.bf16.msra.mxu0 %v1074_v7  ;;  %800 = vmatpush1.bf16.msra.mxu1 %v1075_v8  ;;  %v1092_v19 = vld [vmem:[%s1447_s8 + $0x80] ss:$16 sps:$4 sm:$0xff]   ;;  %v1093_v20 = vld [vmem:[%s1447_s8 + $0x88] ss:$16 sps:$4 sm:$0xff]   ;;  %v1094_v21 = vld [vmem:[%s1447_s8 + $0xa4] ss:$16 sps:$4 sm:$0xff]  }
  0x44   : > { %758 = vmatprep.subr.bf16.mxu0 %v1076_v9  ;;  %801 = vmatprep.subr.bf16.mxu1 %v1078_v10  ;;  %v1096_v22 = vld [vmem:[%s1447_s8 + $0xac] ss:$16 sps:$4 sm:$0xff]   ;;  %v1098_v23 = vld [vmem:[%s1447_s8 + $0xa0] ss:$16 sps:$4 sm:$0xff]   ;;  %v1099_v24 = vld [vmem:[%s1447_s8 + $0xa8] ss:$16 sps:$4 sm:$0xff]  }
  0x45   : > { %v1100_v25 = vld [vmem:[%s1447_s8 + $0xc4] ss:$16 sps:$4 sm:$0xff]   ;;  %v1102_v26 = vld [vmem:[%s1447_s8 + $0xcc] ss:$16 sps:$4 sm:$0xff]   ;;  %v1104_v27 = vld [vmem:[%s1447_s8 + $0xc0] ss:$16 sps:$4 sm:$0xff]  }
  0x46   : > { %v1105_v28 = vld [vmem:[%s1447_s8 + $0xc8] ss:$16 sps:$4 sm:$0xff]   ;;  %v1106_v29 = vld [vmem:[%s1447_s8 + $0xe4] ss:$16 sps:$4 sm:$0xff]   ;;  %v1108_v30 = vld [vmem:[%s1447_s8 + $0xec] ss:$16 sps:$4 sm:$0xff]  }
  0x47   : > { %759 = vmatpush1.bf16.msra.mxu0 %v1080_v11  ;;  %802 = vmatpush1.bf16.msra.mxu1 %v1081_v12  ;;  %v1110_v31 = vld [vmem:[%s1447_s8 + $0xe0] ss:$16 sps:$4 sm:$0xff]   ;;  %v1111_v32 = vld [vmem:[%s1447_s8 + $0xe8] ss:$16 sps:$4 sm:$0xff]   ;;  %v1112_v33 = vld [vmem:[%s1447_s8 + $0x104] ss:$16 sps:$4 sm:$0xff]  }
  0x48   : > { %760 = vmatprep.subr.bf16.mxu0 %v1082_v13  ;;  %803 = vmatprep.subr.bf16.mxu1 %v1084_v14  ;;  %v1114_v34 = vld [vmem:[%s1447_s8 + $0x10c] ss:$16 sps:$4 sm:$0xff]   ;;  %v1116_v35 = vld [vmem:[%s1447_s8 + $0x100] ss:$16 sps:$4 sm:$0xff]   ;;  %v1117_v36 = vld [vmem:[%s1447_s8 + $0x108] ss:$16 sps:$4 sm:$0xff]  }
  0x49   : > { %v1118_v37 = vld [vmem:[%s1447_s8 + $0x124] ss:$16 sps:$4 sm:$0xff]   ;;  %v1120_v38 = vld [vmem:[%s1447_s8 + $0x12c] ss:$16 sps:$4 sm:$0xff]   ;;  %v1122_v39 = vld [vmem:[%s1447_s8 + $0x120] ss:$16 sps:$4 sm:$0xff]  }
  0x4a   : > { %v1123_v40 = vld [vmem:[%s1447_s8 + $0x128] ss:$16 sps:$4 sm:$0xff]   ;;  %v1124_v41 = vld [vmem:[%s1447_s8 + $0x144] ss:$16 sps:$4 sm:$0xff]   ;;  %v1126_v42 = vld [vmem:[%s1447_s8 + $0x14c] ss:$16 sps:$4 sm:$0xff]  }
  0x4b   : > { %761 = vmatpush1.bf16.msra.mxu0 %v1086_v15  ;;  %804 = vmatpush1.bf16.msra.mxu1 %v1087_v16  ;;  %v1128_v43 = vld [vmem:[%s1447_s8 + $0x140] ss:$16 sps:$4 sm:$0xff]   ;;  %v1129_v44 = vld [vmem:[%s1447_s8 + $0x148] ss:$16 sps:$4 sm:$0xff]   ;;  %v1130_v45 = vld [vmem:[%s1447_s8 + $0x164] ss:$16 sps:$4 sm:$0xff]  }
  0x4c   : > { %762 = vmatprep.subr.bf16.mxu0 %v1088_v17  ;;  %805 = vmatprep.subr.bf16.mxu1 %v1090_v18  ;;  %v1132_v46 = vld [vmem:[%s1447_s8 + $0x16c] ss:$16 sps:$4 sm:$0xff]   ;;  %v1134_v47 = vld [vmem:[%s1447_s8 + $0x160] ss:$16 sps:$4 sm:$0xff]   ;;  %v1135_v48 = vld [vmem:[%s1447_s8 + $0x168] ss:$16 sps:$4 sm:$0xff]  }
  0x4d   : > { %v1136_v49 = vld [vmem:[%s1447_s8 + $0x184] ss:$16 sps:$4 sm:$0xff]   ;;  %v1138_v50 = vld [vmem:[%s1447_s8 + $0x18c] ss:$16 sps:$4 sm:$0xff]   ;;  %v1140_v51 = vld [vmem:[%s1447_s8 + $0x180] ss:$16 sps:$4 sm:$0xff]  }
  0x4e   : > { %v1141_v52 = vld [vmem:[%s1447_s8 + $0x188] ss:$16 sps:$4 sm:$0xff]   ;;  %v1142_v53 = vld [vmem:[%s1447_s8 + $0x1a4] ss:$16 sps:$4 sm:$0xff]   ;;  %v1144_v54 = vld [vmem:[%s1447_s8 + $0x1ac] ss:$16 sps:$4 sm:$0xff]  }
  0x4f   : > { %763 = vmatpush1.bf16.msra.mxu0 %v1092_v19  ;;  %806 = vmatpush1.bf16.msra.mxu1 %v1093_v20  ;;  %v1146_v55 = vld [vmem:[%s1447_s8 + $0x1a0] ss:$16 sps:$4 sm:$0xff]   ;;  %v1147_v56 = vld [vmem:[%s1447_s8 + $0x1a8] ss:$16 sps:$4 sm:$0xff]   ;;  %v1148_v57 = vld [vmem:[%s1447_s8 + $0x1c4] ss:$16 sps:$4 sm:$0xff]  }
  0x50   : > { %764 = vmatprep.subr.bf16.mxu0 %v1094_v21  ;;  %807 = vmatprep.subr.bf16.mxu1 %v1096_v22  ;;  %v1150_v58 = vld [vmem:[%s1447_s8 + $0x1cc] ss:$16 sps:$4 sm:$0xff]   ;;  %v1152_v59 = vld [vmem:[%s1447_s8 + $0x1c0] ss:$16 sps:$4 sm:$0xff]   ;;  %v1153_v60 = vld [vmem:[%s1447_s8 + $0x1c8] ss:$16 sps:$4 sm:$0xff]  }
  0x51   : > { %v1154_v61 = vld [vmem:[%s1447_s8 + $0x1e4] ss:$16 sps:$4 sm:$0xff]   ;;  %v1156_v62 = vld [vmem:[%s1447_s8 + $0x1ec] ss:$16 sps:$4 sm:$0xff]   ;;  %v1158_v63 = vld [vmem:[%s1447_s8 + $0x1e0] ss:$16 sps:$4 sm:$0xff]  }
  0x52   : > { %v1159_v0 = vld [vmem:[%s1447_s8 + $0x1e8] ss:$16 sps:$4 sm:$0xff]   ;;  %s1582_s11 = smov (!%p331_p13, %s948_s11), 7  ;;  %v405_v3 = vshrl.u32 %v404_v2, 7  ;;  %s947_s24 = sshll.u32 %s1441_s4, 6 }
  0x53   : > { %765 = vmatpush1.bf16.msra.mxu0 %v1098_v23  ;;  %808 = vmatpush1.bf16.msra.mxu1 %v1099_v24  ;;  %v1160_v1 = vld [vmem:[%s1571_s0] ss:$8 sps:$4 sm:$0xff]   ;;  %s333_s20 = scalar_lea.vmem %s1573_s2, %s1582_s11  ;;  %s328_s25 = scalar_lea.vmem [#allocation3], %s947_s24 }
  0x54   : > { %766 = vmatprep.subr.bf16.mxu0 %v1100_v25  ;;  %809 = vmatprep.subr.bf16.mxu1 %v1102_v26  ;;  %v406_v4 = vsub.s32 0, %v405_v3  ;;  %v414_v5 = vsub.s32 2, %v405_v3  ;;  %v402_v6 = vld [vmem:[%s333_s20] sm:$0xf]  ;;  %v410_v7 = vsub.s32 1, %v405_v3  ;;  %v418_v8 = vsub.s32 3, %v405_v3 }
  0x55   : > { %s862_s26 = sshll.u32 %s328_s25, 4  ;;  %s1021_s27 = sshll.u32 %s1272_s16, 9  ;;  %s1522_s26 = int_to_ptr.vmem [resolvable:$true] %s862_s26 }
  0x56   : > { %v407_v9 = vrot.slane %v402_v6, %v406_v4  ;;  %v415_v10 = vrot.slane %v402_v6, %v414_v5  ;;  %v411_v11 = vrot.slane %v402_v6, %v410_v7  ;;  %v419_v12 = vrot.slane %v402_v6, %v418_v8  ;;  %s1527_s29 = scalar_lea.hbm %s1574_s3, %s1021_s27  ;;  %s849_s30 = scalar_lea.sflag [#allocation4], %s1441_s4 }
  0x57   : > { %767 = vmatpush1.bf16.msra.mxu0 %v1104_v27  ;;  %810 = vmatpush1.bf16.msra.mxu1 %v1105_v28  ;;  %s1163_s5 = scalar_lea.vmem %s1522_s26, 1024  ;;  %s1227_s6 = smov [#allocation3]  }
  0x58   : > { %768 = vmatprep.subr.bf16.mxu0 %v1106_v29  ;;  %811 = vmatprep.subr.bf16.mxu1 %v1108_v30  ;;  %p1164_p0 = scmp.ne.s32.totalorder %s1522_s26, %s1163_s5  ;;  %s1167_s7 = sshll.u32 %s1227_s6, 4  ;;  %s1168_s7 = int_to_ptr.vmem [resolvable:$false] %s1167_s7 }
  0x59   : > { %s1169_s8 = scalar_lea.vmem %s1168_s7, 2048  ;;  %p1170_p3 = scmp.lt.s32.totalorder %s1522_s26, %s1168_s7 }
  0x5a   : > { %p1165_p1 = pnand %p1164_p0, %p1290_p6  ;;  %p1171_p4 = scmp.lt.s32.totalorder %s1169_s8, %s1163_s5 }
  0x5b   : > { %769 = vmatpush1.bf16.msra.mxu0 %v1110_v31  ;;  %812 = vmatpush1.bf16.msra.mxu1 %v1111_v32 }
  0x5c   : > { %770 = vmatprep.subr.bf16.mxu0 %v1112_v33  ;;  %813 = vmatprep.subr.bf16.mxu1 %v1114_v34  ;;  %p1166_p2 = pneg %p1165_p1  ;;  %p1172_p5 = por %p1171_p4, %p1170_p3 }
  0x5e   : > { %p1173_p7 = pnand %p1172_p5, %p1166_p2 }
  0x5f   : > { %771 = vmatpush1.bf16.msra.mxu0 %v1116_v35  ;;  %814 = vmatpush1.bf16.msra.mxu1 %v1117_v36 }
  0x60   : > { %772 = vmatprep.subr.bf16.mxu0 %v1118_v37  ;;  %815 = vmatprep.subr.bf16.mxu1 %v1120_v38 }
  0x63   : > { %773 = vmatpush1.bf16.msra.mxu0 %v1122_v39  ;;  %816 = vmatpush1.bf16.msra.mxu1 %v1123_v40 }
  0x64   : > { %774 = vmatprep.subr.bf16.mxu0 %v1124_v41  ;;  %817 = vmatprep.subr.bf16.mxu1 %v1126_v42 }
  0x67   : > { %775 = vmatpush1.bf16.msra.mxu0 %v1128_v43  ;;  %818 = vmatpush1.bf16.msra.mxu1 %v1129_v44 }
  0x68   : > { %776 = vmatprep.subr.bf16.mxu0 %v1130_v45  ;;  %819 = vmatprep.subr.bf16.mxu1 %v1132_v46 }
  0x6b   : > { %777 = vmatpush1.bf16.msra.mxu0 %v1134_v47  ;;  %820 = vmatpush1.bf16.msra.mxu1 %v1135_v48 }
  0x6c   : > { %778 = vmatprep.subr.bf16.mxu0 %v1136_v49  ;;  %821 = vmatprep.subr.bf16.mxu1 %v1138_v50 }
  0x6f   : > { %779 = vmatpush1.bf16.msra.mxu0 %v1140_v51  ;;  %822 = vmatpush1.bf16.msra.mxu1 %v1141_v52 }
  0x70   : > { %780 = vmatprep.subr.bf16.mxu0 %v1142_v53  ;;  %823 = vmatprep.subr.bf16.mxu1 %v1144_v54 }
  0x73   : > { %781 = vmatpush1.bf16.msra.mxu0 %v1146_v55  ;;  %824 = vmatpush1.bf16.msra.mxu1 %v1147_v56 }
  0x74   : > { %782 = vmatprep.subr.bf16.mxu0 %v1148_v57  ;;  %825 = vmatprep.subr.bf16.mxu1 %v1150_v58 }
  0x77   : > { %783 = vmatpush1.bf16.msra.mxu0 %v1152_v59  ;;  %826 = vmatpush1.bf16.msra.mxu1 %v1153_v60 }
  0x78   : > { %784 = vmatprep.subr.bf16.mxu0 %v1154_v61  ;;  %827 = vmatprep.subr.bf16.mxu1 %v1156_v62 }
  0x7b   : > { %785 = vmatpush1.bf16.msra.mxu0 %v1158_v63  ;;  %828 = vmatpush1.bf16.msra.mxu1 %v1159_v0 }
  0x7e   : > { %787 = vmatmul.mubr.bf16.vlgmr.msra.gmra.mrb[0].mxu0 %v1160_v1  ;;  %830 = vmatmul.mubr.bf16.vlgmr.msra.gmra.mrb[0].mxu1 %v1160_v1 }
 0x151   : > { %v788_v13 = vpop.f32.mrb[0].mxu0  ;;  %v831_v14 = vpop.f32.mrb[0].mxu1 }
 0x152   : > { %v789_v15 = vadd.f32 %v788_v13, %v407_v9  ;;  %v832_v16 = vadd.f32 %v831_v14, %v415_v10  ;;  %v790_v17 = vpop.f32.mrb[1].mxu0  ;;  %v833_v18 = vpop.f32.mrb[1].mxu1 }
 0x153   : > { %v791_v19 = vadd.f32 %v790_v17, %v411_v11  ;;  %v834_v20 = vadd.f32 %v833_v18, %v419_v12  ;;  %v792_v21 = vpop.f32.mrb[2].mxu0  ;;  %v835_v22 = vpop.f32.mrb[2].mxu1 }
 0x154   : > { %840 = vst [vmem:[%s328_s25] sm:$0xff] %v789_v15  ;;  %842 = vst [vmem:[%s328_s25 + $0x10] sm:$0xff] %v832_v16  ;;  %v793_v23 = vadd.f32 %v792_v21, %v407_v9  ;;  %v836_v24 = vadd.f32 %v835_v22, %v415_v10  ;;  %v794_v25 = vpop.f32.mrb[3].mxu0  ;;  %v837_v26 = vpop.f32.mrb[3].mxu1 }
 0x155   : > { %841 = vst [vmem:[%s328_s25 + $0x8] sm:$0xff] %v791_v19  ;;  %843 = vst [vmem:[%s328_s25 + $0x18] sm:$0xff] %v834_v20  ;;  %v795_v27 = vadd.f32 %v794_v25, %v411_v11  ;;  %v838_v28 = vadd.f32 %v837_v26, %v419_v12 }
 0x156   : > { %844 = vst [vmem:[%s328_s25 + $0x20] sm:$0xff] %v793_v23  ;;  %846 = vst [vmem:[%s328_s25 + $0x30] sm:$0xff] %v836_v24 }
 0x157   : > { %845 = vst [vmem:[%s328_s25 + $0x28] sm:$0xff] %v795_v27  ;;  %847 = vst [vmem:[%s328_s25 + $0x38] sm:$0xff] %v838_v28 }
 0x158   : > { %1176 = shalt.err (!%p1173_p7)
}
 0x159   : > { %s1177_s9 = scalar_lea.hbm %s1527_s29, 1024  ;;  %s1181_s17 = scalar_lea.hbm %s1574_s3, 2048 }
 0x15a   : > { %p1178_p10 = scmp.ne.s32.totalorder %s1527_s29, %s1177_s9  ;;  %p1182_p13 = scmp.lt.u32.totalorder %s1527_s29, %s1574_s3 }
 0x15b   : > { %p1183_p0 = scmp.lt.u32.totalorder %s1181_s17, %s1177_s9  ;;  %p1185_p2 = scmp.lt.u32.totalorder %s1177_s9, %s1527_s29 }
 0x15c   : > { %p1179_p11 = pnand %p1178_p10, %p1290_p6 }
 0x15d   : > { %p1184_p1 = por %p1183_p0, %p1182_p13 }
 0x15e   : > { %p1180_p12 = pneg %p1179_p11 }
 0x15f   : > { %p1186_p3 = por %p1185_p2, %p1184_p1 }
 0x161   : > { %p1187_p4 = pnand %p1186_p3, %p1180_p12 }
 0x163   : > { %1190 = shalt.err (!%p1187_p4)
}
 0x164   : > { %s1228_s24 = smov 512   ;;  %s1229_s25 = smov 1024  }
 0x165   : > { %s1230_s27 = smov 32  }
 0x166   : > { %1022 = dma.vmem_to_hbm [thread:$0]  (%p1290_p6), %s1522_s26, 1024, %s1527_s29, %s849_s30, %s1228_s24, %s1229_s25, %s1230_s27  }
 0x167 PF: > { %s877_s16 = sand.u32 1, %s1213_s12   ;;  %p1025_p5 = pnand %p941_p9, %p1294_p8 }
 0x168   : > { %s878_s28 = scalar_lea.sflag [#allocation4], %s877_s16 }
 0x169   : > { %1208 = dma.done.wait (!%p1025_p5), %s878_s28, 1024  }
 0x16a   : > { %1210 = vsyncadd (!%p1025_p5), %s878_s28, 4294966272  ;;  %p13_p7 = scmp.ge.s32.totalorder %s1276_s18, 4   ;;  %s1577_s12 = smov %s1217_s13 }
 0x16b   : > { %s1578_s13 = smov %s1221_s14  ;;  %s1579_s14 = smov %s1288_s21 }
 0x16c   : > { %s1580_s15 = smov %s1276_s18  ;;  %15 = sbr.rel (!%p13_p7) target bundleno = 3 (0x3), region = 98 }
 0x173   :  { %883 = vsyncpa [#allocation4], 1 }
 0x174   :  { %885 = vsyncpa [#allocation4 + $0x1], 1 }

// kernel: forward.2
= control target key start
LH: loop header
LB: loop body
LE: loop exit
PB: predicated region body
PF: predicated region fallthrough
CT: control target
= control target key end

     0   :  { %s8670_s6 = smov 1   ;;  %s8671_s10 = smov 2   ;;  %s9569_s0 = inlined_call_operand.smem [shape: u32[44], index: -1, kind: input, shape index: {}] }
   0x1   :  { %s8753_s5 = sld [smem:[%s9569_s0]]   ;;  %s8672_s14 = smov 3  }
   0x2   :  { %s8758_s9 = sld [smem:[%s9569_s0 + %s8670_s6]]   ;;  %s8673_s18 = smov 4  }
   0x3   :  { %s8763_s13 = sld [smem:[%s9569_s0 + %s8671_s10]]   ;;  %s8674_s22 = smov 5  }
   0x4   :  { %s8768_s17 = sld [smem:[%s9569_s0 + %s8672_s14]]   ;;  %s8675_s26 = smov 6  }
   0x5   :  { %s8773_s21 = sld [smem:[%s9569_s0 + %s8673_s18]]   ;;  %s8676_s30 = smov 7  }
   0x6   :  { %s8778_s25 = sld [smem:[%s9569_s0 + %s8674_s22]]   ;;  %s8677_s4 = smov 8  }
   0x7   :  { %9579 = sst [smem:[#allocation52_spill]] %s8753_s5  ;;  %s8678_s10 = smov 9  }
   0x8   :  { %9580 = sst [smem:[#allocation53_spill]] %s8758_s9  ;;  %s8679_s15 = smov 10  }
   0x9   :  { %9581 = sst [smem:[#allocation54_spill]] %s8763_s13  ;;  %s8680_s20 = smov 11  }
   0xa   :  { %s8783_s29 = sld [smem:[%s9569_s0 + %s8675_s26]]   ;;  %s8681_s26 = smov 12  }
   0xb   :  { %9582 = sst [smem:[#allocation55_spill]] %s8773_s21  ;;  %s8682_s1 = smov 13  }
   0xc   :  { %s8788_s3 = sld [smem:[%s9569_s0 + %s8676_s30]]   ;;  %s8683_s7 = smov 14  }
   0xd   :  { %s8793_s8 = sld [smem:[%s9569_s0 + %s8677_s4]]   ;;  %s8685_s22 = smov 16  }
   0xe   :  { %s8798_s14 = sld [smem:[%s9569_s0 + %s8678_s10]]   ;;  %s8686_s28 = smov 17  }
   0xf   :  { %s8803_s19 = sld [smem:[%s9569_s0 + %s8679_s15]]   ;;  %s8684_s15 = smov 15  }
  0x10   :  { %9583 = sst [smem:[#allocation56_spill]] %s8783_s29 }
  0x11   :  { %s8808_s24 = sld [smem:[%s9569_s0 + %s8680_s20]]  }
  0x12   :  { %s8813_s30 = sld [smem:[%s9569_s0 + %s8681_s26]]  }
  0x13   :  { %s8818_s6 = sld [smem:[%s9569_s0 + %s8682_s1]]  }
  0x14   :  { %s8823_s12 = sld [smem:[%s9569_s0 + %s8683_s7]]   ;;  %s8687_s7 = smov 18  }
  0x15   :  { %9584 = sst [smem:[#allocation57_spill]] %s8803_s19 }
  0x16   :  { %s8828_s20 = sld [smem:[%s9569_s0 + %s8684_s15]]   ;;  %s8688_s15 = smov 19  }
  0x17   :  { %s8833_s27 = sld [smem:[%s9569_s0 + %s8685_s22]]   ;;  %s8689_s22 = smov 20  }
  0x18   :  { %s8838_s4 = sld [smem:[%s9569_s0 + %s8686_s28]]   ;;  %s8690_s28 = smov 21  }
  0x19   :  { %s8858_s19 = sld [smem:[%s9569_s0 + %s8690_s28]]   ;;  %s8694_s28 = smov 25  }
  0x1a   :  { %9585 = sst [smem:[#allocation58_spill]] %s8823_s12 }
  0x1b   :  { %s8843_s12 = sld [smem:[%s9569_s0 + %s8687_s7]]   ;;  %s8691_s7 = smov 22  }
  0x1c   :  { %9586 = sst [smem:[#allocation59_spill]] %s8828_s20 }
  0x1d   :  { %9587 = sst [smem:[#allocation60_spill]] %s8833_s27 }
  0x1e   :  { %9588 = sst [smem:[#allocation61_spill]] %s8838_s4 }
  0x1f   :  { %s8848_s20 = sld [smem:[%s9569_s0 + %s8688_s15]]   ;;  %s8692_s15 = smov 23  }
  0x20   :  { %s8853_s27 = sld [smem:[%s9569_s0 + %s8689_s22]]   ;;  %s8693_s22 = smov 24  }
  0x21   :  { %9589 = sst [smem:[#allocation62_spill]] %s8843_s12 }
  0x22   :  { %s8863_s12 = sld [smem:[%s9569_s0 + %s8691_s7]]   ;;  %s8695_s7 = smov 26  }
  0x23   :  { %s8868_s29 = sld [smem:[%s9569_s0 + %s8692_s15]]   ;;  %s8696_s15 = smov 27  }
  0x24   :  { %s8873_s21 = sld [smem:[%s9569_s0 + %s8693_s22]]   ;;  %s8697_s22 = smov 28  }
  0x25   :  { %s8878_s13 = sld [smem:[%s9569_s0 + %s8694_s28]]   ;;  %s8698_s28 = smov 29  }
  0x26   :  { %9590 = sst [smem:[#allocation63_spill]] %s8853_s27 }
  0x27   :  { %s8883_s5 = sld [smem:[%s9569_s0 + %s8695_s7]]   ;;  %s8699_s7 = smov 30  }
  0x28   :  { %9591 = sst [smem:[#allocation64_spill]] %s8863_s12 }
  0x29   :  { %9592 = sst [smem:[#allocation65_spill]] %s8868_s29 }
  0x2a   :  { %9593 = sst [smem:[#allocation66_spill]] %s8873_s21 }
  0x2b   :  { %s8888_s29 = sld [smem:[%s9569_s0 + %s8696_s15]]   ;;  %s8700_s15 = smov 31  }
  0x2c   :  { %s8893_s21 = sld [smem:[%s9569_s0 + %s8697_s22]]   ;;  %s8701_s22 = smov 32  }
  0x2d   :  { %9594 = sst [smem:[#allocation67_spill]] %s8883_s5 }
  0x2e   :  { %s8898_s9 = sld [smem:[%s9569_s0 + %s8698_s28]]   ;;  %s8702_s28 = smov 33  }
  0x2f   :  { %s8903_s5 = sld [smem:[%s9569_s0 + %s8699_s7]]   ;;  %s8703_s7 = smov 34  }
  0x30   :  { %s8918_s12 = sld [smem:[%s9569_s0 + %s8702_s28]]   ;;  %s8706_s28 = smov 37  }
  0x31   :  { %9595 = sst [smem:[#allocation68_spill]] %s8888_s29 }
  0x32   :  { %9596 = sst [smem:[#allocation69_spill]] %s8893_s21 }
  0x33   :  { %s8908_s29 = sld [smem:[%s9569_s0 + %s8700_s15]]   ;;  %s8704_s15 = smov 35  }
  0x34   :  { %s8913_s21 = sld [smem:[%s9569_s0 + %s8701_s22]]   ;;  %s8705_s22 = smov 36  }
  0x35   :  { %9597 = sst [smem:[#allocation70_spill]] %s8903_s5 }
  0x36   :  { %9600 = sst [smem:[#allocation73_spill]] %s8918_s12 }
  0x37   :  { %s8923_s5 = sld [smem:[%s9569_s0 + %s8703_s7]]   ;;  %s8707_s7 = smov 38  }
  0x38   :  { %s8938_s12 = sld [smem:[%s9569_s0 + %s8706_s28]]   ;;  %s8710_s28 = smov 41  }
  0x39   :  { %9598 = sst [smem:[#allocation71_spill]] %s8908_s29 }
  0x3a   :  { %9599 = sst [smem:[#allocation72_spill]] %s8913_s21 }
  0x3b   :  { %s8928_s29 = sld [smem:[%s9569_s0 + %s8704_s15]]   ;;  %s8708_s15 = smov 39  }
  0x3c   :  { %s8933_s21 = sld [smem:[%s9569_s0 + %s8705_s22]]   ;;  %s8709_s22 = smov 40  }
  0x3d   :  { %9601 = sst [smem:[#allocation74_spill]] %s8923_s5 }
  0x3e   :  { %9603 = sst [smem:[#allocation76_spill]] %s8938_s12 }
  0x3f   :  { %s8943_s5 = sld [smem:[%s9569_s0 + %s8707_s7]]   ;;  %s8711_s7 = smov 42  }
  0x40   :  { %s8948_s27 = sld [smem:[%s9569_s0 + %s8708_s15]]   ;;  %s8712_s15 = smov 43  }
  0x41   :  { %s8958_s12 = sld [smem:[%s9569_s0 + %s8710_s28]]  }
  0x42   :  { %9602 = sst [smem:[#allocation75_spill]] %s8933_s21 }
  0x43   :  { %s8953_s21 = sld [smem:[%s9569_s0 + %s8709_s22]]  }
  0x44   :  { %s8963_s4 = sld [smem:[%s9569_s0 + %s8711_s7]]  }
  0x46   :  { %9604 = sst [smem:[#allocation77_spill]] %s8948_s27 }
  0x47   :  { %s8968_s27 = sld [smem:[%s9569_s0 + %s8712_s15]]  }
  0x48   :  { %92 = vsyncpa [#allocation3], 0 }
  0x49   :  { %93 = vsyncpa [#allocation5], 0 }
  0x4a   :  { %94 = vsyncpa [#allocation8], 0 }
  0x4b   :  { %95 = vsyncpa [#allocation11], 0 }
  0x4c   :  { %96 = vsyncpa [#allocation14], 0 }
  0x4d   :  { %97 = vsyncpa [#allocation17], 0 }
  0x4e   :  { %98 = vsyncpa [#allocation20], 0 }
  0x4f   :  { %99 = vsyncpa [#allocation23], 0 }
  0x50   :  { %100 = vsyncpa [#allocation26], 0 }
  0x51   :  { %101 = vsyncpa [#allocation29], 0 }
  0x52   :  { %102 = vsyncpa [#allocation32], 0 }
  0x53   :  { %103 = vsyncpa [#allocation35], 0 }
  0x54   :  { %104 = vsyncpa [#allocation38], 0  ;;  %s8713_s22 = smov [#allocation4]   ;;  %s8116_s0 = scalar_lea.hbm %s8778_s25, 11776 }
  0x55   :  { %s130_s23 = sshll.u32 %s8713_s22, 4  ;;  %p8117_p0 = scmp.ne.s32.totalorder %s8778_s25, %s8116_s0  ;;  %s131_s23 = int_to_ptr.vmem [resolvable:$true] %s130_s23 }
  0x56   :  { %p8120_p1 = scmp.lt.u32.totalorder %s8116_s0, %s8778_s25 }
  0x58   :  { %p8122_p2 = pnand %p8120_p1, %p8117_p0 }
  0x5a   :  { %8125 = shalt.err (!%p8122_p2)
}
  0x5b   :  { %s8126_s26 = scalar_lea.vmem %s131_s23, 11776  ;;  %p8131_p4 = scmp.lt.s32.totalorder %s131_s23, %s131_s23 }
  0x5c   :  { %p8127_p3 = scmp.ne.s32.totalorder %s131_s23, %s8126_s26  ;;  %p8132_p5 = scmp.lt.s32.totalorder %s8126_s26, %s8126_s26 }
  0x5e   :  { %p8133_p6 = por %p8132_p5, %p8131_p4 }
  0x60   :  { %p8134_p7 = pnand %p8133_p6, %p8127_p3 }
  0x62   :  { %8137 = shalt.err (!%p8134_p7)
}
  0x63   :  { %s8714_s28 = smov 256   ;;  %s8715_s1 = smov 16  }
  0x64   :  { %136 = dma.hbm_to_vmem [thread:$0]  %s8778_s25, 11776, %s131_s23, [#allocation5], %s8714_s28, %s8714_s28, %s8715_s1  }
  0x65   :  { %s8716_s2 = smov [#allocation7]   ;;  %s8138_s10 = scalar_lea.hbm %s8793_s8, 32 }
  0x66   :  { %s155_s7 = sshll.u32 %s8716_s2, 4  ;;  %p8139_p8 = scmp.ne.s32.totalorder %s8793_s8, %s8138_s10  ;;  %s156_s7 = int_to_ptr.vmem [resolvable:$true] %s155_s7 }
  0x67   :  { %p8142_p9 = scmp.lt.u32.totalorder %s8138_s10, %s8793_s8 }
  0x69   :  { %p8144_p10 = pnand %p8142_p9, %p8139_p8 }
  0x6b   :  { %8147 = shalt.err (!%p8144_p10)
}
  0x6c   :  { %s8148_s11 = scalar_lea.vmem %s156_s7, 32  ;;  %p8153_p12 = scmp.lt.s32.totalorder %s156_s7, %s156_s7 }
  0x6d   :  { %p8149_p11 = scmp.ne.s32.totalorder %s156_s7, %s8148_s11  ;;  %p8154_p13 = scmp.lt.s32.totalorder %s8148_s11, %s8148_s11 }
  0x6f   :  { %p8155_p0 = por %p8154_p13, %p8153_p12 }
  0x71   :  { %p8156_p1 = pnand %p8155_p0, %p8149_p11 }
  0x73   :  { %8159 = shalt.err (!%p8156_p1)
}
  0x74   :  { %158 = dma.hbm_to_vmem [thread:$0]  %s8793_s8, 32, %s156_s7, [#allocation8]  }
  0x75   :  { %s8717_s25 = smov [#allocation10]   ;;  %s8718_s16 = smov [#allocation13]  }
  0x76   :  { %s178_s15 = sshll.u32 %s8717_s25, 4  ;;  %s200_s18 = sshll.u32 %s8718_s16, 4  ;;  %s179_s15 = int_to_ptr.vmem [resolvable:$true] %s178_s15  ;;  %s8981_s18 = int_to_ptr.vmem [resolvable:$true] %s200_s18 }
  0x77   :  { %s8160_s22 = scalar_lea.hbm %s8808_s24, 32768 }
  0x78   :  { %p8161_p2 = scmp.ne.s32.totalorder %s8808_s24, %s8160_s22  ;;  %p8164_p3 = scmp.lt.u32.totalorder %s8160_s22, %s8808_s24 }
  0x7a   :  { %p8166_p4 = pnand %p8164_p3, %p8161_p2 }
  0x7c   :  { %8169 = shalt.err (!%p8166_p4)
}
  0x7d   :  { %s8170_s23 = scalar_lea.vmem %s179_s15, 32768  ;;  %p8175_p6 = scmp.lt.s32.totalorder %s179_s15, %s179_s15 }
  0x7e   :  { %p8171_p5 = scmp.ne.s32.totalorder %s179_s15, %s8170_s23  ;;  %p8176_p7 = scmp.lt.s32.totalorder %s8170_s23, %s8170_s23 }
  0x80   :  { %p8177_p8 = por %p8176_p7, %p8175_p6 }
  0x82   :  { %p8178_p9 = pnand %p8177_p8, %p8171_p5 }
  0x84   :  { %8181 = shalt.err (!%p8178_p9)
}
  0x85   :  { %s8719_s8 = smov 512   ;;  %s8720_s0 = smov 32  }
  0x86   :  { %184 = dma.hbm_to_vmem [thread:$0]  %s8808_s24, 32768, %s179_s15, [#allocation11], %s8719_s8, %s8719_s8, %s8720_s0  }
  0x87   :  { %s8182_s26 = scalar_lea.hbm %s8818_s6, 16384 }
  0x88   :  { %p8183_p10 = scmp.ne.s32.totalorder %s8818_s6, %s8182_s26  ;;  %p8186_p11 = scmp.lt.u32.totalorder %s8182_s26, %s8818_s6 }
  0x8a   :  { %p8188_p12 = pnand %p8186_p11, %p8183_p10 }
  0x8c   :  { %8191 = shalt.err (!%p8188_p12)
}
  0x8d   :  { %s8192_s2 = scalar_lea.vmem %s8981_s18, 16384  ;;  %p8197_p0 = scmp.lt.s32.totalorder %s8981_s18, %s8981_s18 }
  0x8e   :  { %p8193_p13 = scmp.ne.s32.totalorder %s8981_s18, %s8192_s2  ;;  %p8198_p1 = scmp.lt.s32.totalorder %s8192_s2, %s8192_s2 }
  0x90   :  { %p8199_p2 = por %p8198_p1, %p8197_p0 }
  0x92   :  { %p8200_p3 = pnand %p8199_p2, %p8193_p13 }
  0x94   :  { %8203 = shalt.err (!%p8200_p3)
}
  0x95   :  { %206 = dma.hbm_to_vmem [thread:$0]  %s8818_s6, 16384, %s8981_s18, [#allocation14], %s8719_s8, %s8719_s8, %s8720_s0  }
  0x96   :  { %s8721_s24 = smov [#allocation16]   ;;  %s8722_s10 = smov [#allocation19]  }
  0x97   :  { %s232_s7 = sshll.u32 %s8721_s24, 4  ;;  %s254_s11 = sshll.u32 %s8722_s10, 4  ;;  %s233_s7 = int_to_ptr.vmem [resolvable:$true] %s232_s7  ;;  %s9002_s11 = int_to_ptr.vmem [resolvable:$true] %s254_s11 }
  0x98   :  { %s8204_s25 = scalar_lea.hbm %s8848_s20, 18432 }
  0x99   :  { %p8205_p4 = scmp.ne.s32.totalorder %s8848_s20, %s8204_s25  ;;  %p8208_p5 = scmp.lt.u32.totalorder %s8204_s25, %s8848_s20 }
  0x9b   :  { %p8210_p6 = pnand %p8208_p5, %p8205_p4 }
  0x9d   :  { %8213 = shalt.err (!%p8210_p6)
}
  0x9e   :  { %s8214_s15 = scalar_lea.vmem %s233_s7, 18432  ;;  %p8219_p8 = scmp.lt.s32.totalorder %s233_s7, %s233_s7 }
  0x9f   :  { %p8215_p7 = scmp.ne.s32.totalorder %s233_s7, %s8214_s15  ;;  %p8220_p9 = scmp.lt.s32.totalorder %s8214_s15, %s8214_s15 }
  0xa1   :  { %p8221_p10 = por %p8220_p9, %p8219_p8 }
  0xa3   :  { %p8222_p11 = pnand %p8221_p10, %p8215_p7 }
  0xa5   :  { %8225 = shalt.err (!%p8222_p11)
}
  0xa6   :  { %s8723_s6 = smov 384   ;;  %s8724_s16 = smov 24  }
  0xa7   :  { %238 = dma.hbm_to_vmem [thread:$0]  %s8848_s20, 18432, %s233_s7, [#allocation17], %s8723_s6, %s8723_s6, %s8724_s16  }
  0xa8   :  { %s8226_s18 = scalar_lea.hbm %s8858_s19, 24576 }
  0xa9   :  { %p8227_p12 = scmp.ne.s32.totalorder %s8858_s19, %s8226_s18  ;;  %p8230_p13 = scmp.lt.u32.totalorder %s8226_s18, %s8858_s19 }
  0xab   :  { %p8232_p0 = pnand %p8230_p13, %p8227_p12 }
  0xad   :  { %8235 = shalt.err (!%p8232_p0)
}
  0xae   :  { %s8236_s22 = scalar_lea.vmem %s9002_s11, 24576  ;;  %p8241_p2 = scmp.lt.s32.totalorder %s9002_s11, %s9002_s11 }
  0xaf   :  { %p8237_p1 = scmp.ne.s32.totalorder %s9002_s11, %s8236_s22  ;;  %p8242_p3 = scmp.lt.s32.totalorder %s8236_s22, %s8236_s22 }
  0xb1   :  { %p8243_p4 = por %p8242_p3, %p8241_p2 }
  0xb3   :  { %p8244_p5 = pnand %p8243_p4, %p8237_p1 }
  0xb5   :  { %8247 = shalt.err (!%p8244_p5)
}
  0xb6   :  { %260 = dma.hbm_to_vmem [thread:$0]  %s8858_s19, 24576, %s9002_s11, [#allocation20], %s8723_s6, %s8723_s6, %s8724_s16  }
  0xb7   :  { %s8725_s20 = smov [#allocation22]   ;;  %s8726_s26 = smov [#allocation25]  }
  0xb8   :  { %s280_s23 = sshll.u32 %s8725_s20, 4  ;;  %s308_s2 = sshll.u32 %s8726_s26, 4  ;;  %s281_s23 = int_to_ptr.vmem [resolvable:$true] %s280_s23  ;;  %s9023_s2 = int_to_ptr.vmem [resolvable:$true] %s308_s2 }
  0xb9   :  { %s8248_s24 = scalar_lea.hbm %s8878_s13, 12288 }
  0xba   :  { %p8249_p6 = scmp.ne.s32.totalorder %s8878_s13, %s8248_s24  ;;  %p8252_p7 = scmp.lt.u32.totalorder %s8248_s24, %s8878_s13 }
  0xbc   :  { %p8254_p8 = pnand %p8252_p7, %p8249_p6 }
  0xbe   :  { %8257 = shalt.err (!%p8254_p8)
}
  0xbf   :  { %s8258_s7 = scalar_lea.vmem %s281_s23, 12288  ;;  %p8263_p10 = scmp.lt.s32.totalorder %s281_s23, %s281_s23 }
  0xc0   :  { %p8259_p9 = scmp.ne.s32.totalorder %s281_s23, %s8258_s7  ;;  %p8264_p11 = scmp.lt.s32.totalorder %s8258_s7, %s8258_s7 }
  0xc2   :  { %p8265_p12 = por %p8264_p11, %p8263_p10 }
  0xc4   :  { %p8266_p13 = pnand %p8265_p12, %p8259_p9 }
  0xc6   :  { %8269 = shalt.err (!%p8266_p13)
}
  0xc7   :  { %286 = dma.hbm_to_vmem [thread:$0]  %s8878_s13, 12288, %s281_s23, [#allocation23], %s8714_s28, %s8714_s28, %s8715_s1  }
  0xc8   :  { %s8270_s19 = scalar_lea.hbm %s8898_s9, 12288 }
  0xc9   :  { %p8271_p0 = scmp.ne.s32.totalorder %s8898_s9, %s8270_s19  ;;  %p8274_p1 = scmp.lt.u32.totalorder %s8270_s19, %s8898_s9 }
  0xcb   :  { %p8276_p2 = pnand %p8274_p1, %p8271_p0 }
  0xcd   :  { %8279 = shalt.err (!%p8276_p2)
}
  0xce   :  { %s8280_s10 = scalar_lea.vmem %s9023_s2, 12288  ;;  %p8285_p4 = scmp.lt.s32.totalorder %s9023_s2, %s9023_s2 }
  0xcf   :  { %p8281_p3 = scmp.ne.s32.totalorder %s9023_s2, %s8280_s10  ;;  %p8286_p5 = scmp.lt.s32.totalorder %s8280_s10, %s8280_s10 }
  0xd1   :  { %p8287_p6 = por %p8286_p5, %p8285_p4 }
  0xd3   :  { %p8288_p7 = pnand %p8287_p6, %p8281_p3 }
  0xd5   :  { %8291 = shalt.err (!%p8288_p7)
}
  0xd6   :  { %314 = dma.hbm_to_vmem [thread:$0]  %s8898_s9, 12288, %s9023_s2, [#allocation26], %s8714_s28, %s8714_s28, %s8715_s1  }
  0xd7   :  { %s8727_s13 = smov [#allocation28]   ;;  %s8728_s25 = smov [#allocation31]  }
  0xd8   :  { %s340_s11 = sshll.u32 %s8727_s13, 4  ;;  %s365_s15 = sshll.u32 %s8728_s25, 4  ;;  %s341_s11 = int_to_ptr.vmem [resolvable:$true] %s340_s11  ;;  %s366_s15 = int_to_ptr.vmem [resolvable:$true] %s365_s15 }
  0xd9   :  { %s8292_s18 = scalar_lea.hbm %s8928_s29, 8192 }
  0xda   :  { %p8293_p8 = scmp.ne.s32.totalorder %s8928_s29, %s8292_s18  ;;  %p8296_p9 = scmp.lt.u32.totalorder %s8292_s18, %s8928_s29 }
  0xdc   :  { %p8298_p10 = pnand %p8296_p9, %p8293_p8 }
  0xde   :  { %8301 = shalt.err (!%p8298_p10)
}
  0xdf   :  { %s8302_s22 = scalar_lea.vmem %s341_s11, 8192  ;;  %p8307_p12 = scmp.lt.s32.totalorder %s341_s11, %s341_s11 }
  0xe0   :  { %p8303_p11 = scmp.ne.s32.totalorder %s341_s11, %s8302_s22  ;;  %p8308_p13 = scmp.lt.s32.totalorder %s8302_s22, %s8302_s22 }
  0xe2   :  { %p8309_p0 = por %p8308_p13, %p8307_p12 }
  0xe4   :  { %p8310_p1 = pnand %p8309_p0, %p8303_p11 }
  0xe6   :  { %8313 = shalt.err (!%p8310_p1)
}
  0xe7   :  { %346 = dma.hbm_to_vmem [thread:$0]  %s8928_s29, 8192, %s341_s11, [#allocation29], %s8714_s28, %s8714_s28, %s8715_s1  }
  0xe8   :  { %s8314_s9 = scalar_lea.hbm %s8943_s5, 32 }
  0xe9   :  { %p8315_p2 = scmp.ne.s32.totalorder %s8943_s5, %s8314_s9  ;;  %p8318_p3 = scmp.lt.u32.totalorder %s8314_s9, %s8943_s5 }
  0xeb   :  { %p8320_p4 = pnand %p8318_p3, %p8315_p2 }
  0xed   :  { %8323 = shalt.err (!%p8320_p4)
}
  0xee   :  { %s8324_s20 = scalar_lea.vmem %s366_s15, 32  ;;  %p8329_p6 = scmp.lt.s32.totalorder %s366_s15, %s366_s15 }
  0xef   :  { %p8325_p5 = scmp.ne.s32.totalorder %s366_s15, %s8324_s20  ;;  %p8330_p7 = scmp.lt.s32.totalorder %s8324_s20, %s8324_s20 }
  0xf1   :  { %p8331_p8 = por %p8330_p7, %p8329_p6 }
  0xf3   :  { %p8332_p9 = pnand %p8331_p8, %p8325_p5 }
  0xf5   :  { %8335 = shalt.err (!%p8332_p9)
}
  0xf6   :  { %368 = dma.hbm_to_vmem [thread:$0]  %s8943_s5, 32, %s366_s15, [#allocation32]  }
  0xf7   :  { %s8729_s23 = smov [#allocation34]   ;;  %s8730_s29 = smov [#allocation2]  }
  0xf8   :  { %s387_s26 = sshll.u32 %s8729_s23, 4  ;;  %s116_s2 = sshll.u32 %s8730_s29, 4  ;;  %s388_s26 = int_to_ptr.vmem [resolvable:$true] %s387_s26  ;;  %s9055_s2 = int_to_ptr.vmem [resolvable:$true] %s116_s2 }
  0xf9   :  { %s8336_s24 = scalar_lea.hbm %s8953_s21, 32 }
  0xfa   :  { %p8337_p10 = scmp.ne.s32.totalorder %s8953_s21, %s8336_s24  ;;  %p8340_p11 = scmp.lt.u32.totalorder %s8336_s24, %s8953_s21 }
  0xfc   :  { %p8342_p12 = pnand %p8340_p11, %p8337_p10 }
  0xfe   :  { %8345 = shalt.err (!%p8342_p12)
}
  0xff   :  { %s8346_s7 = scalar_lea.vmem %s388_s26, 32  ;;  %p8351_p0 = scmp.lt.s32.totalorder %s388_s26, %s388_s26 }
 0x100   :  { %p8347_p13 = scmp.ne.s32.totalorder %s388_s26, %s8346_s7  ;;  %p8352_p1 = scmp.lt.s32.totalorder %s8346_s7, %s8346_s7 }
 0x102   :  { %p8353_p2 = por %p8352_p1, %p8351_p0 }
 0x104   :  { %p8354_p3 = pnand %p8353_p2, %p8347_p13 }
 0x106   :  { %8357 = shalt.err (!%p8354_p3)
}
 0x107   :  { %390 = dma.hbm_to_vmem [thread:$0]  %s8953_s21, 32, %s388_s26, [#allocation35]  }
 0x108   :  { %s8358_s5 = scalar_lea.hbm %s8768_s17, 17664 }
 0x109   :  { %p8359_p4 = scmp.ne.s32.totalorder %s8768_s17, %s8358_s5  ;;  %p8362_p5 = scmp.lt.u32.totalorder %s8358_s5, %s8768_s17 }
 0x10b   :  { %p8364_p6 = pnand %p8362_p5, %p8359_p4 }
 0x10d   :  { %8367 = shalt.err (!%p8364_p6)
}
 0x10e   :  { %s8368_s19 = scalar_lea.vmem %s9055_s2, 17664  ;;  %p8373_p8 = scmp.lt.s32.totalorder %s9055_s2, %s9055_s2 }
 0x10f   :  { %p8369_p7 = scmp.ne.s32.totalorder %s9055_s2, %s8368_s19  ;;  %p8374_p9 = scmp.lt.s32.totalorder %s8368_s19, %s8368_s19 }
 0x111   :  { %p8375_p10 = por %p8374_p9, %p8373_p8 }
 0x113   :  { %p8376_p11 = pnand %p8375_p10, %p8369_p7 }
 0x115   :  { %8379 = shalt.err (!%p8376_p11)
}
 0x116   :  { %122 = dma.hbm_to_vmem [thread:$0]  %s8768_s17, 17664, %s9055_s2, [#allocation3], %s8723_s6, %s8723_s6, %s8724_s16  }
 0x117   :  { %s8731_s21 = smov [#allocation6]   ;;  %s8732_s13 = smov [#allocation9]  }
 0x118   :  { %s145_s10 = sshll.u32 %s8731_s21, 4  ;;  %s164_s11 = sshll.u32 %s8732_s13, 4  ;;  %s146_s10 = int_to_ptr.vmem [resolvable:$true] %s145_s10  ;;  %s9073_s11 = int_to_ptr.vmem [resolvable:$true] %s164_s11 }
 0x119   :  { %s8380_s25 = scalar_lea.hbm %s8788_s3, 32 }
 0x11a   :  { %p8381_p12 = scmp.ne.s32.totalorder %s8788_s3, %s8380_s25  ;;  %p8384_p13 = scmp.lt.u32.totalorder %s8380_s25, %s8788_s3 }
 0x11c   :  { %p8386_p0 = pnand %p8384_p13, %p8381_p12 }
 0x11e   :  { %8389 = shalt.err (!%p8386_p0)
}
 0x11f   :  { %s8390_s15 = scalar_lea.vmem %s146_s10, 32  ;;  %p8395_p2 = scmp.lt.s32.totalorder %s146_s10, %s146_s10 }
 0x120   :  { %p8391_p1 = scmp.ne.s32.totalorder %s146_s10, %s8390_s15  ;;  %p8396_p3 = scmp.lt.s32.totalorder %s8390_s15, %s8390_s15 }
 0x122   :  { %p8397_p4 = por %p8396_p3, %p8395_p2 }
 0x124   :  { %p8398_p5 = pnand %p8397_p4, %p8391_p1 }
 0x126   :  { %8401 = shalt.err (!%p8398_p5)
}
 0x127   :  { %148 = dma.hbm_to_vmem [thread:$0]  %s8788_s3, 32, %s146_s10, [#allocation5]  }
 0x128   :  { %s8402_s17 = scalar_lea.hbm %s8798_s14, 16384 }
 0x129   :  { %p8403_p6 = scmp.ne.s32.totalorder %s8798_s14, %s8402_s17  ;;  %p8406_p7 = scmp.lt.u32.totalorder %s8402_s17, %s8798_s14 }
 0x12b   :  { %p8408_p8 = pnand %p8406_p7, %p8403_p6 }
 0x12d   :  { %8411 = shalt.err (!%p8408_p8)
}
 0x12e   :  { %s8412_s18 = scalar_lea.vmem %s9073_s11, 16384  ;;  %p8417_p10 = scmp.lt.s32.totalorder %s9073_s11, %s9073_s11 }
 0x12f   :  { %p8413_p9 = scmp.ne.s32.totalorder %s9073_s11, %s8412_s18  ;;  %p8418_p11 = scmp.lt.s32.totalorder %s8412_s18, %s8412_s18 }
 0x131   :  { %p8419_p12 = por %p8418_p11, %p8417_p10 }
 0x133   :  { %p8420_p13 = pnand %p8419_p12, %p8413_p9 }
 0x135   :  { %8423 = shalt.err (!%p8420_p13)
}
 0x136   :  { %170 = dma.hbm_to_vmem [thread:$0]  %s8798_s14, 16384, %s9073_s11, [#allocation8], %s8719_s8, %s8719_s8, %s8720_s0  }
 0x137   :  { %s8733_s3 = smov [#allocation12]   ;;  %s8734_s9 = smov [#allocation15]  }
 0x138   :  { %s191_s22 = sshll.u32 %s8733_s3, 4  ;;  %s218_s20 = sshll.u32 %s8734_s9, 4  ;;  %s192_s22 = int_to_ptr.vmem [resolvable:$true] %s191_s22  ;;  %s9091_s20 = int_to_ptr.vmem [resolvable:$true] %s218_s20 }
 0x139   :  { %s8424_s23 = scalar_lea.hbm %s8813_s30, 64 }
 0x13a   :  { %p8425_p0 = scmp.ne.s32.totalorder %s8813_s30, %s8424_s23  ;;  %p8428_p1 = scmp.lt.u32.totalorder %s8424_s23, %s8813_s30 }
 0x13c   :  { %p8430_p2 = pnand %p8428_p1, %p8425_p0 }
 0x13e   :  { %8433 = shalt.err (!%p8430_p2)
}
 0x13f   :  { %s8434_s26 = scalar_lea.vmem %s192_s22, 64  ;;  %p8439_p4 = scmp.lt.s32.totalorder %s192_s22, %s192_s22 }
 0x140   :  { %p8435_p3 = scmp.ne.s32.totalorder %s192_s22, %s8434_s26  ;;  %p8440_p5 = scmp.lt.s32.totalorder %s8434_s26, %s8434_s26 }
 0x142   :  { %p8441_p6 = por %p8440_p5, %p8439_p4 }
 0x144   :  { %p8442_p7 = pnand %p8441_p6, %p8435_p3 }
 0x146   :  { %8445 = shalt.err (!%p8442_p7)
}
 0x147   :  { %s9605_s14 = sld [smem:[#allocation61_spill]] }
 0x148   :  { %194 = dma.hbm_to_vmem [thread:$0]  %s8813_s30, 64, %s192_s22, [#allocation11]  }
 0x14d   :  { %s8446_s8 = scalar_lea.hbm %s9605_s14, 24576 }
 0x14e   :  { %p8447_p8 = scmp.ne.s32.totalorder %s9605_s14, %s8446_s8  ;;  %p8450_p9 = scmp.lt.u32.totalorder %s8446_s8, %s9605_s14 }
 0x150   :  { %p8452_p10 = pnand %p8450_p9, %p8447_p8 }
 0x152   :  { %8455 = shalt.err (!%p8452_p10)
}
 0x153   :  { %s8456_s0 = scalar_lea.vmem %s9091_s20, 24576  ;;  %p8461_p12 = scmp.lt.s32.totalorder %s9091_s20, %s9091_s20 }
 0x154   :  { %p8457_p11 = scmp.ne.s32.totalorder %s9091_s20, %s8456_s0  ;;  %p8462_p13 = scmp.lt.s32.totalorder %s8456_s0, %s8456_s0 }
 0x156   :  { %p8463_p0 = por %p8462_p13, %p8461_p12 }
 0x158   :  { %p8464_p1 = pnand %p8463_p0, %p8457_p11 }
 0x15a   :  { %8467 = shalt.err (!%p8464_p1)
}
 0x15b   :  { %s9606_s30 = sld [smem:[#allocation63_spill]]  ;;  %s8735_s29 = smov [#allocation18]  }
 0x15c   :  { %224 = dma.hbm_to_vmem [thread:$0]  %s9605_s14, 24576, %s9091_s20, [#allocation14], %s8723_s6, %s8723_s6, %s8724_s16  }
 0x15d   :  { %s245_s2 = sshll.u32 %s8735_s29, 4  ;;  %s8736_s24 = smov [#allocation21]   ;;  %s246_s2 = int_to_ptr.vmem [resolvable:$true] %s245_s2 }
 0x15e   :  { %s267_s7 = sshll.u32 %s8736_s24, 4  ;;  %s268_s7 = int_to_ptr.vmem [resolvable:$true] %s267_s7 }
 0x161   :  { %s8468_s5 = scalar_lea.hbm %s9606_s30, 48 }
 0x162   :  { %p8469_p2 = scmp.ne.s32.totalorder %s9606_s30, %s8468_s5  ;;  %p8472_p3 = scmp.lt.u32.totalorder %s8468_s5, %s9606_s30 }
 0x164   :  { %p8474_p4 = pnand %p8472_p3, %p8469_p2 }
 0x166   :  { %8477 = shalt.err (!%p8474_p4)
}
 0x167   :  { %s8478_s19 = scalar_lea.vmem %s246_s2, 48  ;;  %s8482_s21 = scalar_lea.vmem %s246_s2, 64 }
 0x168   :  { %p8479_p5 = scmp.ne.s32.totalorder %s246_s2, %s8478_s19  ;;  %p8483_p6 = scmp.lt.s32.totalorder %s246_s2, %s246_s2 }
 0x169   :  { %p8484_p7 = scmp.lt.s32.totalorder %s8482_s21, %s8478_s19 }
 0x16b   :  { %p8485_p8 = por %p8484_p7, %p8483_p6 }
 0x16d   :  { %p8486_p9 = pnand %p8485_p8, %p8479_p5 }
 0x16f   :  { %8489 = shalt.err (!%p8486_p9)
}
 0x170   :  { %s9607_s6 = sld [smem:[#allocation64_spill]] }
 0x171   :  { %248 = dma.hbm_to_vmem [thread:$0]  %s9606_s30, 48, %s246_s2, [#allocation17]  }
 0x176   :  { %s8490_s16 = scalar_lea.hbm %s9607_s6, 48 }
 0x177   :  { %p8491_p10 = scmp.ne.s32.totalorder %s9607_s6, %s8490_s16  ;;  %p8494_p11 = scmp.lt.u32.totalorder %s8490_s16, %s9607_s6 }
 0x179   :  { %p8496_p12 = pnand %p8494_p11, %p8491_p10 }
 0x17b   :  { %8499 = shalt.err (!%p8496_p12)
}
 0x17c   :  { %s8500_s10 = scalar_lea.vmem %s268_s7, 48  ;;  %s8504_s13 = scalar_lea.vmem %s268_s7, 64 }
 0x17d   :  { %p8501_p13 = scmp.ne.s32.totalorder %s268_s7, %s8500_s10  ;;  %p8505_p0 = scmp.lt.s32.totalorder %s268_s7, %s268_s7 }
 0x17e   :  { %p8506_p1 = scmp.lt.s32.totalorder %s8504_s13, %s8500_s10 }
 0x180   :  { %p8507_p2 = por %p8506_p1, %p8505_p0 }
 0x182   :  { %p8508_p3 = pnand %p8507_p2, %p8501_p13 }
 0x184   :  { %8511 = shalt.err (!%p8508_p3)
}
 0x185   :  { %s9608_s11 = sld [smem:[#allocation68_spill]]  ;;  %s8737_s25 = smov [#allocation24]  }
 0x186   :  { %270 = dma.hbm_to_vmem [thread:$0]  %s9607_s6, 48, %s268_s7, [#allocation20]  }
 0x187   :  { %s294_s15 = sshll.u32 %s8737_s25, 4  ;;  %s8738_s17 = smov [#allocation27]   ;;  %s295_s15 = int_to_ptr.vmem [resolvable:$true] %s294_s15 }
 0x188   :  { %s326_s18 = sshll.u32 %s8738_s17, 4  ;;  %s9117_s18 = int_to_ptr.vmem [resolvable:$true] %s326_s18 }
 0x18b   :  { %s8512_s3 = scalar_lea.hbm %s9608_s11, 8192 }
 0x18c   :  { %p8513_p4 = scmp.ne.s32.totalorder %s9608_s11, %s8512_s3  ;;  %p8516_p5 = scmp.lt.u32.totalorder %s8512_s3, %s9608_s11 }
 0x18e   :  { %p8518_p6 = pnand %p8516_p5, %p8513_p4 }
 0x190   :  { %8521 = shalt.err (!%p8518_p6)
}
 0x191   :  { %s8522_s22 = scalar_lea.vmem %s295_s15, 8192  ;;  %p8527_p8 = scmp.lt.s32.totalorder %s295_s15, %s295_s15 }
 0x192   :  { %p8523_p7 = scmp.ne.s32.totalorder %s295_s15, %s8522_s22  ;;  %p8528_p9 = scmp.lt.s32.totalorder %s8522_s22, %s8522_s22 }
 0x194   :  { %p8529_p10 = por %p8528_p9, %p8527_p8 }
 0x196   :  { %p8530_p11 = pnand %p8529_p10, %p8523_p7 }
 0x198   :  { %8533 = shalt.err (!%p8530_p11)
}
 0x199   :  { %s9609_s9 = sld [smem:[#allocation73_spill]] }
 0x19a   :  { %300 = dma.hbm_to_vmem [thread:$0]  %s9608_s11, 8192, %s295_s15, [#allocation23], %s8714_s28, %s8714_s28, %s8715_s1  }
 0x19f   :  { %s8534_s20 = scalar_lea.hbm %s9609_s9, 8192 }
 0x1a0   :  { %p8535_p12 = scmp.ne.s32.totalorder %s9609_s9, %s8534_s20  ;;  %p8538_p13 = scmp.lt.u32.totalorder %s8534_s20, %s9609_s9 }
 0x1a2   :  { %p8540_p0 = pnand %p8538_p13, %p8535_p12 }
 0x1a4   :  { %8543 = shalt.err (!%p8540_p0)
}
 0x1a5   :  { %s8544_s23 = scalar_lea.vmem %s9117_s18, 8192  ;;  %p8549_p2 = scmp.lt.s32.totalorder %s9117_s18, %s9117_s18 }
 0x1a6   :  { %p8545_p1 = scmp.ne.s32.totalorder %s9117_s18, %s8544_s23  ;;  %p8550_p3 = scmp.lt.s32.totalorder %s8544_s23, %s8544_s23 }
 0x1a8   :  { %p8551_p4 = por %p8550_p3, %p8549_p2 }
 0x1aa   :  { %p8552_p5 = pnand %p8551_p4, %p8545_p1 }
 0x1ac   :  { %8555 = shalt.err (!%p8552_p5)
}
 0x1ad   :  { %s9610_s26 = sld [smem:[#allocation76_spill]]  ;;  %s8739_s14 = smov [#allocation30]  }
 0x1ae   :  { %332 = dma.hbm_to_vmem [thread:$0]  %s9609_s9, 8192, %s9117_s18, [#allocation26], %s8714_s28, %s8714_s28, %s8715_s1  }
 0x1af   :  { %s355_s8 = sshll.u32 %s8739_s14, 4  ;;  %s8740_s0 = smov [#allocation33]   ;;  %s356_s8 = int_to_ptr.vmem [resolvable:$true] %s355_s8 }
 0x1b0   :  { %s374_s30 = sshll.u32 %s8740_s0, 4  ;;  %s9138_s30 = int_to_ptr.vmem [resolvable:$true] %s374_s30 }
 0x1b3   :  { %s8556_s29 = scalar_lea.hbm %s9610_s26, 32 }
 0x1b4   :  { %p8557_p6 = scmp.ne.s32.totalorder %s9610_s26, %s8556_s29  ;;  %p8560_p7 = scmp.lt.u32.totalorder %s8556_s29, %s9610_s26 }
 0x1b6   :  { %p8562_p8 = pnand %p8560_p7, %p8557_p6 }
 0x1b8   :  { %8565 = shalt.err (!%p8562_p8)
}
 0x1b9   :  { %s8566_s2 = scalar_lea.vmem %s356_s8, 32  ;;  %p8571_p10 = scmp.lt.s32.totalorder %s356_s8, %s356_s8 }
 0x1ba   :  { %p8567_p9 = scmp.ne.s32.totalorder %s356_s8, %s8566_s2  ;;  %p8572_p11 = scmp.lt.s32.totalorder %s8566_s2, %s8566_s2 }
 0x1bc   :  { %p8573_p12 = por %p8572_p11, %p8571_p10 }
 0x1be   :  { %p8574_p13 = pnand %p8573_p12, %p8567_p9 }
 0x1c0   :  { %8577 = shalt.err (!%p8574_p13)
}
 0x1c1   :  { %s9611_s24 = sld [smem:[#allocation77_spill]] }
 0x1c2   :  { %358 = dma.hbm_to_vmem [thread:$0]  %s9610_s26, 32, %s356_s8, [#allocation29]  }
 0x1c7   :  { %s8578_s7 = scalar_lea.hbm %s9611_s24, 8192 }
 0x1c8   :  { %p8579_p0 = scmp.ne.s32.totalorder %s9611_s24, %s8578_s7  ;;  %p8582_p1 = scmp.lt.u32.totalorder %s8578_s7, %s9611_s24 }
 0x1ca   :  { %p8584_p2 = pnand %p8582_p1, %p8579_p0 }
 0x1cc   :  { %8587 = shalt.err (!%p8584_p2)
}
 0x1cd   :  { %s8588_s5 = scalar_lea.vmem %s9138_s30, 8192  ;;  %p8593_p4 = scmp.lt.s32.totalorder %s9138_s30, %s9138_s30 }
 0x1ce   :  { %p8589_p3 = scmp.ne.s32.totalorder %s9138_s30, %s8588_s5  ;;  %p8594_p5 = scmp.lt.s32.totalorder %s8588_s5, %s8588_s5 }
 0x1d0   :  { %p8595_p6 = por %p8594_p5, %p8593_p4 }
 0x1d2   :  { %p8596_p7 = pnand %p8595_p6, %p8589_p3 }
 0x1d4   :  { %8599 = shalt.err (!%p8596_p7)
}
 0x1d5   :  { %380 = dma.hbm_to_vmem [thread:$0]  %s9611_s24, 8192, %s9138_s30, [#allocation32], %s8714_s28, %s8714_s28, %s8715_s1  }
 0x1d6   :  { %s8741_s19 = smov [#allocation36]   ;;  %s8742_s6 = smov [#allocation37]  }
 0x1d7   :  { %s396_s21 = sshll.u32 %s8741_s19, 4  ;;  %s409_s16 = sshll.u32 %s8742_s6, 4  ;;  %s397_s21 = int_to_ptr.vmem [resolvable:$true] %s396_s21  ;;  %s410_s16 = int_to_ptr.vmem [resolvable:$true] %s409_s16 }
 0x1d8   :  { %s8600_s10 = scalar_lea.hbm %s8958_s12, 8192 }
 0x1d9   :  { %p8601_p8 = scmp.ne.s32.totalorder %s8958_s12, %s8600_s10  ;;  %p8604_p9 = scmp.lt.u32.totalorder %s8600_s10, %s8958_s12 }
 0x1db   :  { %p8606_p10 = pnand %p8604_p9, %p8601_p8 }
 0x1dd   :  { %8609 = shalt.err (!%p8606_p10)
}
 0x1de   :  { %s8610_s13 = scalar_lea.vmem %s397_s21, 8192  ;;  %p8615_p12 = scmp.lt.s32.totalorder %s397_s21, %s397_s21 }
 0x1df   :  { %p8611_p11 = scmp.ne.s32.totalorder %s397_s21, %s8610_s13  ;;  %p8616_p13 = scmp.lt.s32.totalorder %s8610_s13, %s8610_s13 }
 0x1e1   :  { %p8617_p0 = por %p8616_p13, %p8615_p12 }
 0x1e3   :  { %p8618_p1 = pnand %p8617_p0, %p8611_p11 }
 0x1e5   :  { %8621 = shalt.err (!%p8618_p1)
}
 0x1e6   :  { %402 = dma.hbm_to_vmem [thread:$0]  %s8958_s12, 8192, %s397_s21, [#allocation35], %s8714_s28, %s8714_s28, %s8715_s1  }
 0x1e7   :  { %s8622_s11 = scalar_lea.hbm %s8963_s4, 32 }
 0x1e8   :  { %p8623_p2 = scmp.ne.s32.totalorder %s8963_s4, %s8622_s11  ;;  %p8626_p3 = scmp.lt.u32.totalorder %s8622_s11, %s8963_s4 }
 0x1ea   :  { %p8628_p4 = pnand %p8626_p3, %p8623_p2 }
 0x1ec   :  { %8631 = shalt.err (!%p8628_p4)
}
 0x1ed   :  { %s8632_s25 = scalar_lea.vmem %s410_s16, 32  ;;  %p8637_p6 = scmp.lt.s32.totalorder %s410_s16, %s410_s16 }
 0x1ee   :  { %p8633_p5 = scmp.ne.s32.totalorder %s410_s16, %s8632_s25  ;;  %p8638_p7 = scmp.lt.s32.totalorder %s8632_s25, %s8632_s25 }
 0x1f0   :  { %p8639_p8 = por %p8638_p7, %p8637_p6 }
 0x1f2   :  { %p8640_p9 = pnand %p8639_p8, %p8633_p5 }
 0x1f4   :  { %8643 = shalt.err (!%p8640_p9)
}
 0x1f5   :  { %412 = dma.hbm_to_vmem [thread:$0]  %s8963_s4, 32, %s410_s16, [#allocation38]  }
 0x1f6   :  { %8644 = dma.done.wait [#allocation3], 17664  }
 0x1f7   :  { %8645 = vsyncadd [#allocation3], 4294949632 }
 0x1f8   :  { %8646 = dma.done.wait [#allocation5], 11808  }
 0x1f9   :  { %8647 = vsyncadd [#allocation5], 4294955488 }
 0x1fa   :  { %8648 = dma.done.wait [#allocation8], 16416  }
 0x1fb   :  { %8649 = vsyncadd [#allocation8], 4294950880 }
 0x1fc   :  { %8650 = dma.done.wait [#allocation11], 32832  }
 0x1fd   :  { %8651 = vsyncadd [#allocation11], 4294934464 }
 0x1fe   :  { %8652 = dma.done.wait [#allocation14], 40960  }
 0x1ff   :  { %8653 = vsyncadd [#allocation14], 4294926336 }
 0x200   :  { %8654 = dma.done.wait [#allocation17], 18480  }
 0x201   :  { %8655 = vsyncadd [#allocation17], 4294948816 }
 0x202   :  { %8656 = dma.done.wait [#allocation20], 24624  }
 0x203   :  { %8657 = vsyncadd [#allocation20], 4294942672 }
 0x204   :  { %8658 = dma.done.wait [#allocation23], 20480  }
 0x205   :  { %8659 = vsyncadd [#allocation23], 4294946816 }
 0x206   :  { %8660 = dma.done.wait [#allocation26], 20480  }
 0x207   :  { %8661 = vsyncadd [#allocation26], 4294946816 }
 0x208   :  { %8662 = dma.done.wait [#allocation29], 8224  }
 0x209   :  { %8663 = vsyncadd [#allocation29], 4294959072 }
 0x20a   :  { %8664 = dma.done.wait [#allocation32], 8224  }
 0x20b   :  { %8665 = vsyncadd [#allocation32], 4294959072 }
 0x20c   :  { %8666 = dma.done.wait [#allocation35], 8224  }
 0x20d   :  { %8667 = vsyncadd [#allocation35], 4294959072 }
 0x20e   :  { %8668 = dma.done.wait [#allocation38], 32  }
 0x20f   :  { %8669 = vsyncadd [#allocation38], 4294967264  ;;  %s9612_s12 = sld [smem:[#allocation53_spill]]  ;;  %v8743_v0 = vmov 0.0   ;;  %vm523_vm0 = vcmask 1040384   ;;  %s9613_s4 = sld [smem:[#allocation52_spill]] }
 0x210   :  { %597 = vmatprep.mubr.f32.mxu0 %v8743_v0  ;;  %vm8744_vm1 = vmmov 1   ;;  %vm516_vm3 = vcmask 203776   ;;  %v692_v21 = vld [vmem:[#allocation2 + $0x8] sm:$0xff]  ;;  %v695_v22 = vld [vmem:[#allocation2 + $0x20] sm:$0xff]  ;;  %v694_v26 = vld [vmem:[#allocation2 + $0x18] sm:$0xff]  ;;  %s9616_s28 = sld [smem:[#allocation54_spill]] }
 0x211   :  { %vm9174_vm2 = vmpackc.low %vm523_vm0, %vm8744_vm1  ;;  %v6145_v24 = vpack.c.bf16 %v695_v22, %v692_v21  ;;  %v691_v25 = vld [vmem:[#allocation2] sm:$0xff]  ;;  %v698_v27 = vld [vmem:[#allocation2 + $0x38] sm:$0xff]  ;;  %vm846_vm4 = vcmask 916480   ;;  %s9617_s1 = sld [smem:[#allocation55_spill]]  ;;  %s9618_s15 = sld [smem:[#allocation56_spill]] }
 0x212   :  { %v701_v28 = vld [vmem:[#allocation2 + $0x50] sm:$0xff]  ;;  %v6147_v29 = vpack.c.bf16 %v694_v26, %v691_v25  ;;  %v744_v32 = vld [vmem:[#allocation2 + $0x1a8] sm:$0xff]  ;;  %v707_v39 = vld [vmem:[#allocation2 + $0x80] sm:$0xff]  ;;  %s9619_s17 = sld [smem:[#allocation57_spill]]  ;;  %s9620_s18 = sld [smem:[#allocation58_spill]] }
 0x213   :  { %v697_v30 = vld [vmem:[#allocation2 + $0x30] sm:$0xff]  ;;  %v6149_v33 = vpack.c.bf16 %v701_v28, %v698_v27  ;;  %v700_v34 = vld [vmem:[#allocation2 + $0x48] sm:$0xff]  ;;  %v747_v41 = vld [vmem:[#allocation2 + $0x1c0] sm:$0xff]  ;;  %s9621_s3 = sld [smem:[#allocation59_spill]]  ;;  %s9622_s22 = sld [smem:[#allocation60_spill]] }
 0x214   :  { %v741_v31 = vld [vmem:[#allocation2 + $0x190] sm:$0xff]  ;;  %v696_v37 = vld [vmem:[#allocation2 + $0x28] sm:$0xff]  ;;  %v750_v42 = vld [vmem:[#allocation2 + $0x1d8] sm:$0xff]  ;;  %v6151_v43 = vpack.c.bf16 %v700_v34, %v697_v30  ;;  %s9623_s9 = sld [smem:[#allocation62_spill]]  ;;  %s9624_s20 = sld [smem:[#allocation65_spill]] }
 0x215   :  { %v488_v1 = vld [vmem:[%s9612_s12 + $0x8] sm:$0xff]  ;;  %v491_v2 = vld [vmem:[%s9612_s12 + $0x20] sm:$0xff]  ;;  %v490_v5 = vld [vmem:[%s9612_s12 + $0x18] sm:$0xff]  ;;  %v6237_v35 = vpack.c.bf16 %v744_v32, %v741_v31  ;;  %v6241_v45 = vpack.c.bf16 %v750_v42, %v747_v41  ;;  %s9625_s23 = sld [smem:[#allocation66_spill]]  ;;  %s9626_s26 = sld [smem:[#allocation67_spill]] }
 0x216   :  { %v487_v3 = vld [vmem:[%s9612_s12] sm:$0xff]  ;;  %v6125_v4 = vpack.c.bf16 %v491_v2, %v488_v1  ;;  %v494_v6 = vld [vmem:[%s9612_s12 + $0x38] sm:$0xff]  ;;  %v497_v7 = vld [vmem:[%s9612_s12 + $0x50] sm:$0x1]  ;;  %s9627_s14 = sld [smem:[#allocation69_spill]]  ;;  %s9628_s8 = sld [smem:[#allocation70_spill]] }
 0x217   :  { %v6127_v8 = vpack.c.bf16 %v490_v5, %v487_v3  ;;  %v6129_v9 = vpack.c.bf16 %v497_v7, %v494_v6  ;;  %v493_v11 = vld [vmem:[%s9612_s12 + $0x30] sm:$0xff]  ;;  %v496_v12 = vld [vmem:[%s9612_s12 + $0x48] sm:$0x1]  ;;  %v495_v17 = vld [vmem:[%s9612_s12 + $0x40] sm:$0xff]  ;;  %6238 = vmatprep.subr.bf16.mxu1 %v6237_v35  ;;  %s9629_s0 = sld [smem:[#allocation71_spill]]  ;;  %s9630_s30 = sld [smem:[#allocation72_spill]] }
 0x218   :  { %6126 = vmatprep.subr.bf16.mxu0 %v6125_v4  ;;  %v489_v13 = vld [vmem:[%s9612_s12 + $0x10] sm:$0xff]  ;;  %v492_v14 = vld [vmem:[%s9612_s12 + $0x28] sm:$0xff]  ;;  %v6132_v15 = vpack.c.bf16 %v496_v12, %v493_v11  ;;  %v498_v18 = vld [vmem:[%s9612_s12 + $0x58] sm:$0x1]  ;;  %s9631_s29 = sld [smem:[#allocation74_spill]]  ;;  %s9632_s2 = sld [smem:[#allocation75_spill]] }
 0x219   :  { %6128 = vmatpush1.bf16.msra.mxu0 %v6127_v8  ;;  %v6135_v16 = vpack.c.bf16 %v492_v14, %v489_v13  ;;  %v485_v19 = vld [vmem:[%s9613_s4] sm:$0xff]  ;;  %v6139_v20 = vpack.c.bf16 %v498_v18, %v495_v17  ;;  %v486_v23 = vld [vmem:[%s9613_s4 + $0x8] sm:$0xff]  ;;  %v703_v44 = vld [vmem:[#allocation2 + $0x60] sm:$0xff] }
 0x21a   :  { %6131 = vmatprep.subr.msk.bf16.mxu0 %vm9174_vm2, %v6129_v9  ;;  %v693_v36 = vld [vmem:[#allocation2 + $0x10] sm:$0xff]  ;;  %v704_v38 = vld [vmem:[#allocation2 + $0x68] sm:$0xff]  ;;  %v699_v46 = vld [vmem:[#allocation2 + $0x40] sm:$0xff] }
 0x21b   :  { %v6239_v40 = vpack.c.bf16 %v696_v37, %v693_v36  ;;  %v702_v47 = vld [vmem:[#allocation2 + $0x58] sm:$0xff]  ;;  %v6153_v48 = vpack.c.bf16 %v707_v39, %v704_v38  ;;  %v753_v51 = vld [vmem:[#allocation2 + $0x1f0] sm:$0xff]  ;;  %v756_v52 = vld [vmem:[#allocation2 + $0x208] sm:$0xff] }
 0x21c   :  { %v706_v49 = vld [vmem:[#allocation2 + $0x78] sm:$0xff]  ;;  %v6243_v50 = vpack.c.bf16 %v702_v47, %v699_v46  ;;  %v713_v54 = vld [vmem:[#allocation2 + $0xb0] sm:$0xff]  ;;  %v6245_v55 = vpack.c.bf16 %v756_v52, %v753_v51  ;;  %v708_v57 = vld [vmem:[#allocation2 + $0x88] sm:$0xff] }
 0x21d   :  { %6134 = vmatpush1.bf16.msk.msra.mxu0 %vm9174_vm2, %v6132_v15  ;;  %6240 = vmatpush3.bf16.msra.mxu1 %v6239_v40  ;;  %v710_v53 = vld [vmem:[#allocation2 + $0x98] sm:$0xff]  ;;  %v705_v56 = vld [vmem:[#allocation2 + $0x70] sm:$0xff]  ;;  %v6155_v58 = vpack.c.bf16 %v706_v49, %v703_v44  ;;  %v759_v61 = vld [vmem:[#allocation2 + $0x220] sm:$0xff] }
 0x21e   :  { %6136 = vmatprep.subr.bf16.mxu0 %v6135_v16  ;;  %6242 = vmatprep.subr.bf16.mxu1 %v6241_v45  ;;  %v709_v59 = vld [vmem:[#allocation2 + $0x90] sm:$0xff]  ;;  %v6247_v60 = vpack.c.bf16 %v708_v57, %v705_v56  ;;  %v762_v62 = vld [vmem:[#allocation2 + $0x238] sm:$0xff]  ;;  %v6157_v63 = vpack.c.bf16 %v713_v54, %v710_v53  ;;  %v712_v1 = vld [vmem:[#allocation2 + $0xa8] sm:$0xff] }
 0x21f   :  { %v6249_v2 = vpack.c.bf16 %v762_v62, %v759_v61  ;;  %v711_v3 = vld [vmem:[#allocation2 + $0xa0] sm:$0xff]  ;;  %v714_v4 = vld [vmem:[#allocation2 + $0xb8] sm:$0xff]  ;;  %v716_v5 = vld [vmem:[#allocation2 + $0xc8] sm:$0xff]  ;;  %v6159_v9 = vpack.c.bf16 %v712_v1, %v709_v59 }
 0x220   :  { %5769 = vmatmul.mubr.msk.f32.vlgmr.msra.gmra.mrb[0].mxu0 %vm516_vm3, %v485_v19  ;;  %v719_v6 = vld [vmem:[#allocation2 + $0xe0] sm:$0xff]  ;;  %v765_v7 = vld [vmem:[#allocation2 + $0x250] sm:$0xff]  ;;  %v768_v8 = vld [vmem:[#allocation2 + $0x268] sm:$0xff]  ;;  %v6251_v12 = vpack.c.bf16 %v714_v4, %v711_v3 }
 0x221   :  { %603 = vmatprep.mubr.f32.mxu0 %v8743_v0  ;;  %6138 = vmatpush3.bf16.msra.mxu0 %v6135_v16  ;;  %v715_v10 = vld [vmem:[#allocation2 + $0xc0] sm:$0xff]  ;;  %v718_v11 = vld [vmem:[#allocation2 + $0xd8] sm:$0xff]  ;;  %v6161_v13 = vpack.c.bf16 %v719_v6, %v716_v5  ;;  %v6253_v15 = vpack.c.bf16 %v768_v8, %v765_v7  ;;  %v717_v16 = vld [vmem:[#allocation2 + $0xd0] sm:$0xff] }
 0x222   :  { %6141 = vmatprep.subr.msk.bf16.mxu0 %vm9174_vm2, %v6139_v20  ;;  %6244 = vmatpush3.bf16.msra.mxu1 %v6243_v50  ;;  %v722_v14 = vld [vmem:[#allocation2 + $0xf8] sm:$0xff]  ;;  %v720_v17 = vld [vmem:[#allocation2 + $0xe8] sm:$0xff]  ;;  %v725_v18 = vld [vmem:[#allocation2 + $0x110] sm:$0xff]  ;;  %v6163_v21 = vpack.c.bf16 %v718_v11, %v715_v10 }
 0x223   :  { %6246 = vmatprep.subr.bf16.mxu1 %v6245_v55  ;;  %v721_v22 = vld [vmem:[#allocation2 + $0xf0] sm:$0xff]  ;;  %v6165_v25 = vpack.c.bf16 %v725_v18, %v722_v14  ;;  %v728_v26 = vld [vmem:[#allocation2 + $0x128] sm:$0xff]  ;;  %v723_v28 = vld [vmem:[#allocation2 + $0x100] sm:$0xff] }
 0x224   :  { %5770 = vmatmul.mubr.msk.f32.gmra.mrb[2].mxu0 %vm516_vm3, %v486_v23  ;;  %v731_v30 = vld [vmem:[#allocation2 + $0x140] sm:$0xff]  ;;  %v777_v31 = vld [vmem:[#allocation2 + $0x2b0] sm:$0xff]  ;;  %v780_v32 = vld [vmem:[#allocation2 + $0x2c8] sm:$0xff] }
 0x225   :  { %6144 = vmatpush3.bf16.msk.msra.mxu0 %vm9174_vm2, %v6139_v20  ;;  %6056 = vmatprep.mubr.msk.f32.mxu0 %vm516_vm3, %v485_v19  ;;  %v771_v19 = vld [vmem:[#allocation2 + $0x280] sm:$0xff]  ;;  %v774_v20 = vld [vmem:[#allocation2 + $0x298] sm:$0xff]  ;;  %v6169_v36 = vpack.c.bf16 %v731_v30, %v728_v26  ;;  %v6261_v38 = vpack.c.bf16 %v780_v32, %v777_v31  ;;  %v729_v39 = vld [vmem:[#allocation2 + $0x130] sm:$0xff] }
 0x226   :  { %6146 = vmatprep.subr.bf16.mxu0 %v6145_v24  ;;  %6248 = vmatpush3.bf16.msra.mxu1 %v6247_v60  ;;  %v6255_v24 = vpack.c.bf16 %v720_v17, %v717_v16  ;;  %v6257_v27 = vpack.c.bf16 %v774_v20, %v771_v19  ;;  %v727_v34 = vld [vmem:[#allocation2 + $0x120] sm:$0xff]  ;;  %v730_v37 = vld [vmem:[#allocation2 + $0x138] sm:$0xff]  ;;  %v732_v40 = vld [vmem:[#allocation2 + $0x148] sm:$0xff] }
 0x227   :  { %6250 = vmatprep.subr.bf16.mxu1 %v6249_v2  ;;  %v734_v41 = vld [vmem:[#allocation2 + $0x158] sm:$0xff]  ;;  %v737_v42 = vld [vmem:[#allocation2 + $0x170] sm:$0xff]  ;;  %v6263_v44 = vpack.c.bf16 %v732_v40, %v729_v39  ;;  %v736_v47 = vld [vmem:[#allocation2 + $0x168] sm:$0xff] }
 0x228   :  { %6057 = vmatmul.mubr.msk.f32.vlgmr.msra.gmra.mrb[4].mxu0 %vm516_vm3, %v486_v23  ;;  %v724_v23 = vld [vmem:[#allocation2 + $0x108] sm:$0xff]  ;;  %v6173_v45 = vpack.c.bf16 %v737_v42, %v734_v41  ;;  %v733_v46 = vld [vmem:[#allocation2 + $0x150] sm:$0xff]  ;;  %v743_v49 = vld [vmem:[#allocation2 + $0x1a0] sm:$0xff] }
 0x229   :  { %6148 = vmatpush1.bf16.msra.mxu0 %v6147_v29  ;;  %v726_v29 = vld [vmem:[#allocation2 + $0x118] sm:$0xff]  ;;  %v6175_v50 = vpack.c.bf16 %v736_v47, %v733_v46  ;;  %v739_v52 = vld [vmem:[#allocation2 + $0x180] sm:$0xff]  ;;  %v749_v55 = vld [vmem:[#allocation2 + $0x1d0] sm:$0xff]  ;;  %v501_v46 = vlaneseq }
 0x22a   :  { %6150 = vmatprep.subr.bf16.mxu0 %v6149_v33  ;;  %6252 = vmatpush3.bf16.msra.mxu1 %v6251_v12  ;;  %v6167_v33 = vpack.c.bf16 %v724_v23, %v721_v22  ;;  %v6259_v35 = vpack.c.bf16 %v726_v29, %v723_v28  ;;  %v742_v53 = vld [vmem:[#allocation2 + $0x198] sm:$0xff]  ;;  %v748_v59 = vld [vmem:[#allocation2 + $0x1c8] sm:$0xff]  ;;  %v755_v61 = vld [vmem:[#allocation2 + $0x200] sm:$0xff] }
 0x22b   :  { %6254 = vmatprep.subr.bf16.mxu1 %v6253_v15  ;;  %v746_v54 = vld [vmem:[#allocation2 + $0x1b8] sm:$0xff]  ;;  %v6179_v56 = vpack.c.bf16 %v742_v53, %v739_v52  ;;  %v752_v60 = vld [vmem:[#allocation2 + $0x1e8] sm:$0xff]  ;;  %v751_v1 = vld [vmem:[#allocation2 + $0x1e0] sm:$0xff]  ;;  %v9199_v47 = vshrl.u32 %v501_v46, 7 }
 0x22c   :  { %v6181_v57 = vpack.c.bf16 %v749_v55, %v746_v54  ;;  %v754_v2 = vld [vmem:[#allocation2 + $0x1f8] sm:$0xff]  ;;  %v761_v4 = vld [vmem:[#allocation2 + $0x230] sm:$0xff]  ;;  %v760_v8 = vld [vmem:[#allocation2 + $0x228] sm:$0xff] }
 0x22d   :  { %6152 = vmatpush1.bf16.msra.mxu0 %v6151_v43  ;;  %v6171_v43 = vpack.c.bf16 %v730_v37, %v727_v34  ;;  %v758_v3 = vld [vmem:[#allocation2 + $0x218] sm:$0xff]  ;;  %v6187_v5 = vpack.c.bf16 %v754_v2, %v751_v1  ;;  %v757_v7 = vld [vmem:[#allocation2 + $0x210] sm:$0xff]  ;;  %v767_v10 = vld [vmem:[#allocation2 + $0x260] sm:$0xff] }
 0x22e   :  { %6154 = vmatprep.subr.bf16.mxu0 %v6153_v48  ;;  %6256 = vmatpush3.bf16.msra.mxu1 %v6255_v24  ;;  %v740_v48 = vld [vmem:[#allocation2 + $0x188] sm:$0xff]  ;;  %v6189_v6 = vpack.c.bf16 %v761_v4, %v758_v3  ;;  %v6191_v11 = vpack.c.bf16 %v760_v8, %v757_v7  ;;  %v766_v14 = vld [vmem:[#allocation2 + $0x258] sm:$0xff]  ;;  %v773_v16 = vld [vmem:[#allocation2 + $0x290] sm:$0xff] }
 0x22f   :  { %6258 = vmatprep.subr.bf16.mxu1 %v6257_v27  ;;  %v6177_v51 = vpack.c.bf16 %v743_v49, %v740_v48  ;;  %v770_v15 = vld [vmem:[#allocation2 + $0x278] sm:$0xff]  ;;  %v769_v19 = vld [vmem:[#allocation2 + $0x270] sm:$0xff]  ;;  %v772_v20 = vld [vmem:[#allocation2 + $0x288] sm:$0xff]  ;;  %v9202_v48 = vsub.s32 0, %v9199_v47 }
 0x230   :  { %v6197_v18 = vpack.c.bf16 %v773_v16, %v770_v15  ;;  %v779_v22 = vld [vmem:[#allocation2 + $0x2c0] sm:$0xff]  ;;  %v6199_v23 = vpack.c.bf16 %v772_v20, %v769_v19  ;;  %v778_v26 = vld [vmem:[#allocation2 + $0x2b8] sm:$0xff]  ;;  %v785_v29 = vld [vmem:[#allocation2 + $0x2f0] sm:$0xff] }
 0x231   :  { %6156 = vmatpush1.bf16.msra.mxu0 %v6155_v58  ;;  %v745_v58 = vld [vmem:[#allocation2 + $0x1b0] sm:$0xff]  ;;  %v782_v28 = vld [vmem:[#allocation2 + $0x2d8] sm:$0xff]  ;;  %v783_v30 = vld [vmem:[#allocation2 + $0x2e0] sm:$0xff] }
 0x232   :  { %6158 = vmatprep.subr.bf16.mxu0 %v6157_v63  ;;  %6260 = vmatpush3.bf16.msra.mxu1 %v6259_v35  ;;  %v6183_v62 = vpack.c.bf16 %v748_v59, %v745_v58  ;;  %v6185_v63 = vpack.c.bf16 %v755_v61, %v752_v60  ;;  %v6205_v31 = vpack.c.bf16 %v785_v29, %v782_v28  ;;  %v786_v32 = vld [vmem:[#allocation2 + $0x2f8] sm:$0xff]  ;;  %v784_v34 = vld [vmem:[#allocation2 + $0x2e8] sm:$0xff]  ;;  %v735_v37 = vld [vmem:[#allocation2 + $0x160] sm:$0xff] }
 0x233   :  { %6262 = vmatprep.subr.bf16.mxu1 %v6261_v38  ;;  %v6265_v35 = vpack.c.bf16 %v786_v32, %v783_v30  ;;  %v738_v38 = vld [vmem:[#allocation2 + $0x178] sm:$0xff]  ;;  %v788_v40 = vld [vmem:[#allocation2 + $0x308] sm:$0xff]  ;;  %v791_v41 = vld [vmem:[#allocation2 + $0x320] sm:$0xff] }
 0x234   :  { %v6267_v39 = vpack.c.bf16 %v738_v38, %v735_v37  ;;  %v789_v42 = vld [vmem:[#allocation2 + $0x310] sm:$0xff]  ;;  %v499_v49 = vld [vmem:[%s9616_s28] sm:$0x7]  ;;  %v794_v58 = vld [vmem:[#allocation2 + $0x338] sm:$0xff] }
 0x235   :  { %6160 = vmatpush1.bf16.msra.mxu0 %v6159_v9  ;;  %v764_v9 = vld [vmem:[#allocation2 + $0x248] sm:$0xff]  ;;  %v797_v60 = vld [vmem:[#allocation2 + $0x350] sm:$0xff]  ;;  %v795_v61 = vld [vmem:[#allocation2 + $0x340] sm:$0xff] }
 0x236   :  { %6162 = vmatprep.subr.bf16.mxu0 %v6161_v13  ;;  %6264 = vmatpush3.bf16.msra.mxu1 %v6263_v44  ;;  %v6193_v12 = vpack.c.bf16 %v767_v10, %v764_v9  ;;  %v763_v13 = vld [vmem:[#allocation2 + $0x240] sm:$0xff]  ;;  %v792_v44 = vld [vmem:[#allocation2 + $0x328] sm:$0xff]  ;;  %v793_v7 = vld [vmem:[#allocation2 + $0x330] sm:$0xff] }
 0x237   :  { %v6195_v17 = vpack.c.bf16 %v766_v14, %v763_v13  ;;  %6266 = vmatprep.subr.bf16.mxu1 %v6265_v35  ;;  %v796_v8 = vld [vmem:[#allocation2 + $0x348] sm:$0xff]  ;;  %v801_v13 = vld [vmem:[#allocation2 + $0x370] sm:$0xff]  ;;  %v807_v28 = vld [vmem:[#allocation2 + $0x3a0] sm:$0xff] }
 0x238   :  { %v800_v9 = vld [vmem:[#allocation2 + $0x368] sm:$0xff]  ;;  %v810_v29 = vld [vmem:[#allocation2 + $0x3b8] sm:$0xff]  ;;  %v805_v35 = vld [vmem:[#allocation2 + $0x390] sm:$0xff] }
 0x239   :  { %6164 = vmatpush1.bf16.msra.mxu0 %v6163_v21  ;;  %v776_v21 = vld [vmem:[#allocation2 + $0x2a8] sm:$0xff]  ;;  %v815_v38 = vld [vmem:[#allocation2 + $0x3e0] sm:$0xff]  ;;  %v818_v46 = vld [vmem:[#allocation2 + $0x3f8] sm:$0xff] }
 0x23a   :  { %6166 = vmatprep.subr.bf16.mxu0 %v6165_v25  ;;  %v6201_v24 = vpack.c.bf16 %v779_v22, %v776_v21  ;;  %v775_v25 = vld [vmem:[#allocation2 + $0x2a0] sm:$0xff]  ;;  %6268 = vmatpush3.bf16.msra.mxu1 %v6267_v39  ;;  %v804_v14 = vld [vmem:[#allocation2 + $0x388] sm:$0xff]  ;;  %v813_v39 = vld [vmem:[#allocation2 + $0x3d0] sm:$0xff] }
 0x23b   :  { %v6203_v27 = vpack.c.bf16 %v778_v26, %v775_v25  ;;  %v6277_v22 = vpack.c.bf16 %v804_v14, %v801_v13  ;;  %v806_v25 = vld [vmem:[#allocation2 + $0x398] sm:$0xff]  ;;  %v812_v37 = vld [vmem:[#allocation2 + $0x3c8] sm:$0xff] }
 0x23c   :  { %v1170_v13 = vld [vmem:[#allocation4 + $0x38] sm:$0xff] }
 0x23d   :  { %6168 = vmatpush1.bf16.msra.mxu0 %v6167_v33  ;;  %v781_v33 = vld [vmem:[#allocation2 + $0x2d0] sm:$0xff] }
 0x23e   :  { %6170 = vmatprep.subr.bf16.mxu0 %v6169_v36  ;;  %v6207_v36 = vpack.c.bf16 %v784_v34, %v781_v33  ;;  %v6281_v34 = vpack.c.bf16 %v810_v29, %v807_v28  ;;  %v1175_v29 = vld [vmem:[#allocation4 + $0x60] sm:$0xff] }
 0x241   :  { %6172 = vmatpush1.bf16.msra.mxu0 %v6171_v43  ;;  %v6209_v43 = vpack.c.bf16 %v791_v41, %v788_v40  ;;  %v816_v40 = vld [vmem:[#allocation2 + $0x3e8] sm:$0xff] }
 0x242   :  { %6174 = vmatprep.subr.bf16.mxu0 %v6173_v45  ;;  %v6269_v45 = vpack.c.bf16 %v792_v44, %v789_v42  ;;  %v6225_v42 = vpack.c.bf16 %v815_v38, %v812_v37  ;;  %v811_v44 = vld [vmem:[#allocation2 + $0x3c0] sm:$0xff]  ;;  %v1184_v37 = vld [vmem:[#allocation4 + $0xa8] sm:$0xff]  ;;  %v1186_v38 = vld [vmem:[#allocation4 + $0xb8] sm:$0xff] }
 0x244   :  { %6270 = vmatprep.subr.bf16.mxu1 %v6269_v45 }
 0x245   :  { %6176 = vmatpush1.bf16.msra.mxu0 %v6175_v50  ;;  %v9206_v50 = vsub.s32 1, %v9199_v47 }
 0x246   :  { %6178 = vmatprep.subr.bf16.mxu0 %v6177_v51  ;;  %v504_v51 = vrot.slane %v499_v49, %v9202_v48 }
 0x247   :  { %v508_v52 = vrot.slane %v499_v49, %v9206_v50 }
 0x249   :  { %6180 = vmatpush1.bf16.msra.mxu0 %v6179_v56  ;;  %v787_v56 = vld [vmem:[#allocation2 + $0x300] sm:$0xff] }
 0x24a   :  { %6182 = vmatprep.subr.bf16.mxu0 %v6181_v57  ;;  %v790_v57 = vld [vmem:[#allocation2 + $0x318] sm:$0xff] }
 0x24b   :  { %v6211_v2 = vpack.c.bf16 %v790_v57, %v787_v56  ;;  %v817_v56 = vld [vmem:[#allocation2 + $0x3f0] sm:$0xff]  ;;  %v820_v57 = vld [vmem:[#allocation2 + $0x408] sm:$0xff] }
 0x24d   :  { %6184 = vmatpush1.bf16.msra.mxu0 %v6183_v62  ;;  %v798_v62 = vld [vmem:[#allocation2 + $0x358] sm:$0xff] }
 0x24e   :  { %6186 = vmatprep.subr.bf16.mxu0 %v6185_v63  ;;  %v9211_v63 = vsub.s32 2, %v9199_v47 }
 0x250   :  { %v9214_v16 = vrot.slane %v499_v49, %v9211_v63  ;;  %v821_v49 = vld [vmem:[#allocation2 + $0x410] sm:$0xff] }
 0x251   :  { %6188 = vmatpush1.bf16.msra.mxu0 %v6187_v5  ;;  %v6213_v5 = vpack.c.bf16 %v797_v60, %v794_v58  ;;  %v824_v58 = vld [vmem:[#allocation2 + $0x428] sm:$0xff]  ;;  %v825_v60 = vld [vmem:[#allocation2 + $0x430] sm:$0xff] }
 0x252   :  { %6190 = vmatprep.subr.bf16.mxu0 %v6189_v6  ;;  %v6273_v6 = vpack.c.bf16 %v798_v62, %v795_v61  ;;  %v828_v61 = vld [vmem:[#allocation2 + $0x448] sm:$0xff]  ;;  %v6231_v62 = vpack.c.bf16 %v820_v57, %v817_v56  ;;  %v1191_v56 = vld [vmem:[#allocation4 + $0xe0] sm:$0xff]  ;;  %v1193_v57 = vld [vmem:[#allocation4 + $0xf0] sm:$0xff] }
 0x255   :  { %6192 = vmatpush1.bf16.msra.mxu0 %v6191_v11 }
 0x256   :  { %6194 = vmatprep.subr.bf16.mxu0 %v6193_v12  ;;  %v803_v12 = vld [vmem:[#allocation2 + $0x380] sm:$0xff] }
 0x257   :  { %v6217_v21 = vpack.c.bf16 %v803_v12, %v800_v9  ;;  %v1168_v12 = vld [vmem:[#allocation4 + $0x28] sm:$0xff] }
 0x259   :  { %6196 = vmatpush1.bf16.msra.mxu0 %v6195_v17 }
 0x25a   :  { %6198 = vmatprep.subr.bf16.mxu0 %v6197_v18  ;;  %v6215_v18 = vpack.c.bf16 %v796_v8, %v793_v7 }
 0x25d   :  { %6200 = vmatpush1.bf16.msra.mxu0 %v6199_v23  ;;  %v799_v23 = vld [vmem:[#allocation2 + $0x360] sm:$0xff] }
 0x25e   :  { %6202 = vmatprep.subr.bf16.mxu0 %v6201_v24  ;;  %v802_v24 = vld [vmem:[#allocation2 + $0x378] sm:$0xff] }
 0x261   :  { %6204 = vmatpush1.bf16.msra.mxu0 %v6203_v27  ;;  %v809_v27 = vld [vmem:[#allocation2 + $0x3b0] sm:$0xff] }
 0x262   :  { %6206 = vmatprep.subr.bf16.mxu0 %v6205_v31  ;;  %v6219_v31 = vpack.c.bf16 %v802_v24, %v799_v23  ;;  %v6221_v33 = vpack.c.bf16 %v809_v27, %v806_v25  ;;  %v1171_v23 = vld [vmem:[#allocation4 + $0x40] sm:$0xff]  ;;  %v1173_v24 = vld [vmem:[#allocation4 + $0x50] sm:$0xff]  ;;  %v1176_v25 = vld [vmem:[#allocation4 + $0x68] sm:$0xff] }
 0x263   :  { %v6307_v27 = vpack.c.bf16 %v1173_v24, %v1171_v23  ;;  %v1211_v24 = vld [vmem:[#allocation4 + $0x180] sm:$0xff] }
 0x265   :  { %6208 = vmatpush1.bf16.msra.mxu0 %v6207_v36  ;;  %v808_v36 = vld [vmem:[#allocation2 + $0x3a8] sm:$0xff] }
 0x266   :  { %6210 = vmatprep.subr.bf16.mxu0 %v6209_v43  ;;  %v6223_v41 = vpack.c.bf16 %v808_v36, %v805_v35  ;;  %v6285_v43 = vpack.c.bf16 %v816_v40, %v813_v39  ;;  %v1179_v35 = vld [vmem:[#allocation4 + $0x80] sm:$0xff]  ;;  %v1181_v36 = vld [vmem:[#allocation4 + $0x90] sm:$0xff]  ;;  %v6317_v40 = vpack.c.bf16 %v1186_v38, %v1184_v37 }
 0x267   :  { %v6315_v39 = vpack.c.bf16 %v1181_v36, %v1179_v35  ;;  %v1219_v36 = vld [vmem:[#allocation4 + $0x1c0] sm:$0xff]  ;;  %v1221_v37 = vld [vmem:[#allocation4 + $0x1d0] sm:$0xff] }
 0x268   :  { %v6355_v38 = vpack.c.bf16 %v1221_v37, %v1219_v36  ;;  %v1532_v36 = vld [vmem:[#allocation9 + $0x208] sm:$0xff] }
 0x269   :  { %v1536_v37 = vld [vmem:[#allocation9 + $0x228] sm:$0xff] }
 0x2f3   :  { %v599_v53 = vpop.f32.mrb[0].mxu0 }
 0x2f4   :  { %v600_v54 = vadd.f32 %v599_v53, %v504_v51  ;;  %v601_v55 = vpop.f32.mrb[1].mxu0 }
 0x2f5   :  { %v602_v59 = vadd.f32 %v601_v55, %v508_v52 }
 0x2f6   :  { %v685_v4 = vmax.f32 %v600_v54, 0.0  ;;  %v6229_v54 = vpack.c.bf16 %v821_v49, %v818_v46  ;;  %v1187_v49 = vld [vmem:[#allocation4 + $0xc0] sm:$0xff] }
 0x2f7   :  { %v686_v1 = vmax.f32 %v602_v59, 0.0  ;;  %v605_v3 = vpop.f32.mrb[2].mxu0  ;;  %v827_v59 = vld [vmem:[#allocation2 + $0x440] sm:$0xff] }
 0x2f8   :  { %v606_v10 = vadd.f32 %v605_v3, %v504_v51  ;;  %v607_v11 = vpop.f32.mrb[3].mxu0  ;;  %v819_v51 = vld [vmem:[#allocation2 + $0x400] sm:$0xff] }
 0x2f9   :  { %917 = vmatprep.mubr.f32.mxu0 %v686_v1  ;;  %1071 = vmatprep.mubr.f32.mxu1 %v686_v1  ;;  %v608_v15 = vadd.f32 %v607_v11, %v508_v52  ;;  %v822_v52 = vld [vmem:[#allocation2 + $0x418] sm:$0xff]  ;;  %v6233_v1 = vpack.c.bf16 %v827_v59, %v824_v58  ;;  %v823_v3 = vld [vmem:[#allocation2 + $0x420] sm:$0xff]  ;;  %v6327_v58 = vpack.c.bf16 %v1193_v57, %v1191_v56 }
 0x2fa   :  { %918 = vmatmul.mubr.f32.vlgmr.msra.gmra.mrb[6].mxu0 %v685_v4  ;;  %1072 = vmatmul.mubr.f32.vlgmr.msra.gmra.mrb[0].mxu1 %v685_v4  ;;  %v688_v17 = vmax.f32 %v606_v10, 0.0  ;;  %v6289_v55 = vpack.c.bf16 %v822_v52, %v819_v51  ;;  %v826_v4 = vld [vmem:[#allocation2 + $0x438] sm:$0xff]  ;;  %v1163_v10 = vld [vmem:[#allocation4] sm:$0xff]  ;;  %v1165_v11 = vld [vmem:[#allocation4 + $0x10] sm:$0xff] }
 0x2fb   :  { %6212 = vmatpush1.bf16.msra.mxu0 %v6211_v2  ;;  %6272 = vmatpush3.bf16.msra.mxu1 %v6269_v45  ;;  %v689_v19 = vmax.f32 %v608_v15, 0.0  ;;  %v9216_v20 = vpop.f32.mrb[4].mxu0  ;;  %v814_v45 = vld [vmem:[#allocation2 + $0x3d8] sm:$0xff]  ;;  %v6293_v2 = vpack.c.bf16 %v828_v61, %v825_v60  ;;  %v6235_v8 = vpack.c.bf16 %v826_v4, %v823_v3  ;;  %v6299_v15 = vpack.c.bf16 %v1165_v11, %v1163_v10  ;;  %v1189_v51 = vld [vmem:[#allocation4 + $0xd0] sm:$0xff]  ;;  %v1198_v60 = vld [vmem:[#allocation4 + $0x118] sm:$0xff] }
 0x2fc   :  { %6214 = vmatprep.subr.bf16.mxu0 %v6213_v5  ;;  %6274 = vmatprep.subr.bf16.mxu1 %v6273_v6  ;;  %v676_v26 = vpop.f32.mrb[5].mxu0  ;;  %v6227_v53 = vpack.c.bf16 %v814_v45, %v811_v44  ;;  %v1164_v5 = vld [vmem:[#allocation4 + $0x8] sm:$0xff]  ;;  %v682_v7 = vadd.f32 %v9216_v20, %v9214_v16  ;;  %v1190_v44 = vld [vmem:[#allocation4 + $0xd8] sm:$0xff] }
 0x2fd   :  { %1076 = vmatprep.mubr.f32.mxu1 %v689_v19  ;;  %923 = vmatprep.mubr.f32.mxu0 %v689_v19  ;;  %v9219_v30 = vadd.f32 %v676_v26, %v9214_v16  ;;  %v1169_v19 = vld [vmem:[#allocation4 + $0x30] sm:$0xff]  ;;  %v1174_v16 = vld [vmem:[#allocation4 + $0x58] sm:$0xff]  ;;  %v1192_v52 = vld [vmem:[#allocation4 + $0xe8] sm:$0xff] }
 0x2fe   :  { %1077 = vmatmul.mubr.f32.gmra.mrb[2].mxu1 %v688_v17  ;;  %924 = vmatmul.mubr.f32.gmra.mrb[8].mxu0 %v688_v17  ;;  %v690_v14 = vmax.f32 %v682_v7, 0.0  ;;  %v6301_v17 = vpack.c.bf16 %v1170_v13, %v1168_v12  ;;  %v1178_v26 = vld [vmem:[#allocation4 + $0x78] sm:$0xff]  ;;  %v1196_v59 = vld [vmem:[#allocation4 + $0x108] sm:$0xff]  ;;  %v1201_v7 = vld [vmem:[#allocation4 + $0x130] sm:$0xff] }
 0x2ff   :  { %6216 = vmatpush1.bf16.msra.mxu0 %v6215_v18  ;;  %6276 = vmatpush3.bf16.msra.mxu1 %v6273_v6  ;;  %v687_v32 = vmax.f32 %v9219_v30, 0.0  ;;  %v1166_v6 = vld [vmem:[#allocation4 + $0x18] sm:$0xff]  ;;  %v1167_v18 = vld [vmem:[#allocation4 + $0x20] sm:$0xff]  ;;  %v6309_v28 = vpack.c.bf16 %v1178_v26, %v1176_v25  ;;  %v1177_v30 = vld [vmem:[#allocation4 + $0x70] sm:$0xff]  ;;  %v6329_v61 = vpack.c.bf16 %v1198_v60, %v1196_v59 }
 0x300   :  { %6218 = vmatprep.subr.bf16.mxu0 %v6217_v21  ;;  %6278 = vmatprep.subr.bf16.mxu1 %v6277_v22  ;;  %v6297_v9 = vpack.c.bf16 %v1166_v6, %v1164_v5  ;;  %v1172_v21 = vld [vmem:[#allocation4 + $0x48] sm:$0xff]  ;;  %v6303_v20 = vpack.c.bf16 %v1169_v19, %v1167_v18  ;;  %v1202_v4 = vld [vmem:[#allocation4 + $0x138] sm:$0xff]  ;;  %v1199_v5 = vld [vmem:[#allocation4 + $0x120] sm:$0xff] }
 0x301   :  { %994 = vmatprep.mubr.f32.mxu0 %v8743_v0  ;;  %6087 = vmatprep.mubr.msk.f32.mxu1 %vm846_vm4, %v687_v32  ;;  %v1200_v3 = vld [vmem:[#allocation4 + $0x128] sm:$0xff]  ;;  %v6335_v10 = vpack.c.bf16 %v1201_v7, %v1199_v5  ;;  %v1203_v12 = vld [vmem:[#allocation4 + $0x140] sm:$0xff]  ;;  %v1205_v13 = vld [vmem:[#allocation4 + $0x150] sm:$0xff] }
 0x302   :  { %v6333_v6 = vpack.c.bf16 %v1202_v4, %v1200_v3  ;;  %v1207_v19 = vld [vmem:[#allocation4 + $0x160] sm:$0xff]  ;;  %v1213_v25 = vld [vmem:[#allocation4 + $0x190] sm:$0xff]  ;;  %v1216_v26 = vld [vmem:[#allocation4 + $0x1a8] sm:$0xff] }
 0x303   :  { %6220 = vmatpush1.bf16.msra.mxu0 %v6219_v31  ;;  %6280 = vmatpush3.bf16.msra.mxu1 %v6277_v22  ;;  %v6305_v22 = vpack.c.bf16 %v1174_v16, %v1172_v21  ;;  %v1180_v31 = vld [vmem:[#allocation4 + $0x88] sm:$0xff]  ;;  %v1209_v21 = vld [vmem:[#allocation4 + $0x170] sm:$0xff] }
 0x304   :  { %6222 = vmatprep.subr.bf16.mxu0 %v6221_v33  ;;  %6282 = vmatprep.subr.bf16.mxu1 %v6281_v34  ;;  %v6311_v33 = vpack.c.bf16 %v1177_v30, %v1175_v29  ;;  %v1212_v16 = vld [vmem:[#allocation4 + $0x188] sm:$0xff]  ;;  %v1215_v30 = vld [vmem:[#allocation4 + $0x1a0] sm:$0xff] }
 0x305   :  { %v1476_v57 = vld [vmem:[#allocation9 + $0x48] sm:$0xff]  ;;  %v1475_v60 = vld [vmem:[#allocation9 + $0x40] sm:$0xff] }
 0x306   :  { %v1483_v4 = vld [vmem:[#allocation9 + $0x80] sm:$0xff]  ;;  %v1492_v7 = vld [vmem:[#allocation9 + $0xc8] sm:$0xff] }
 0x307   :  { %6224 = vmatpush1.bf16.msra.mxu0 %v6223_v41  ;;  %6284 = vmatpush3.bf16.msra.mxu1 %v6281_v34  ;;  %v1183_v41 = vld [vmem:[#allocation4 + $0xa0] sm:$0xff] }
 0x308   :  { %6226 = vmatprep.subr.bf16.mxu0 %v6225_v42  ;;  %6286 = vmatprep.subr.bf16.mxu1 %v6285_v43  ;;  %v1185_v42 = vld [vmem:[#allocation4 + $0xb0] sm:$0xff]  ;;  %v1487_v5 = vld [vmem:[#allocation9 + $0xa0] sm:$0xff] }
 0x309   :  { %v6319_v45 = vpack.c.bf16 %v1185_v42, %v1183_v41  ;;  %v1223_v42 = vld [vmem:[#allocation4 + $0x1e0] sm:$0xff] }
 0x30b   :  { %6228 = vmatpush1.bf16.msra.mxu0 %v6227_v53  ;;  %6288 = vmatpush3.bf16.msra.mxu1 %v6285_v43  ;;  %v1188_v43 = vld [vmem:[#allocation4 + $0xc8] sm:$0xff]  ;;  %v1194_v53 = vld [vmem:[#allocation4 + $0xf8] sm:$0xff] }
 0x30c   :  { %6230 = vmatprep.subr.bf16.mxu0 %v6229_v54  ;;  %6290 = vmatprep.subr.bf16.mxu1 %v6289_v55  ;;  %v6321_v46 = vpack.c.bf16 %v1190_v44, %v1188_v43  ;;  %v6323_v54 = vpack.c.bf16 %v1189_v51, %v1187_v49  ;;  %v1225_v43 = vld [vmem:[#allocation4 + $0x1f0] sm:$0xff] }
 0x30d   :  { %v6359_v44 = vpack.c.bf16 %v1225_v43, %v1223_v42  ;;  %v1468_v51 = vld [vmem:[#allocation9 + $0x8] sm:$0xff] }
 0x30e   :  { %v1540_v42 = vld [vmem:[#allocation9 + $0x248] sm:$0xff] }
 0x30f   :  { %6232 = vmatpush1.bf16.msra.mxu0 %v6231_v62  ;;  %6292 = vmatpush3.bf16.msra.mxu1 %v6289_v55  ;;  %v6325_v55 = vpack.c.bf16 %v1194_v53, %v1192_v52  ;;  %v1195_v62 = vld [vmem:[#allocation4 + $0x100] sm:$0xff]  ;;  %v1472_v52 = vld [vmem:[#allocation9 + $0x28] sm:$0xff] }
 0x310   :  { %6234 = vmatprep.subr.bf16.mxu0 %v6233_v1  ;;  %6294 = vmatprep.subr.bf16.mxu1 %v6293_v2  ;;  %v1197_v1 = vld [vmem:[#allocation4 + $0x110] sm:$0xff]  ;;  %v6389_v53 = vpack.c.bf16 %v1472_v52, %v1468_v51 }
 0x311   :  { %v1544_v43 = vld [vmem:[#allocation9 + $0x268] sm:$0xff] }
 0x312   :  { %v1548_v51 = vld [vmem:[#allocation9 + $0x288] sm:$0xff] }
 0x313   :  { %6236 = vmatpush1.bf16.msra.mxu0 %v6235_v8  ;;  %6296 = vmatpush3.bf16.msra.mxu1 %v6293_v2  ;;  %v6331_v2 = vpack.c.bf16 %v1197_v1, %v1195_v62  ;;  %v1204_v8 = vld [vmem:[#allocation4 + $0x148] sm:$0xff] }
 0x314   :  { %6298 = vmatprep.subr.bf16.mxu1 %v6297_v9  ;;  %v1206_v9 = vld [vmem:[#allocation4 + $0x158] sm:$0xff]  ;;  %6390 = vmatprep.subr.bf16.mxu0 %v6389_v53  ;;  %v1484_v1 = vld [vmem:[#allocation9 + $0x88] sm:$0xff] }
 0x315   :  { %v6337_v11 = vpack.c.bf16 %v1206_v9, %v1204_v8  ;;  %v1496_v8 = vld [vmem:[#allocation9 + $0xe8] sm:$0xff] }
 0x316   :  { %5774 = vmatmul.mubr.msk.f32.vlgmr.msra.gmra.mrb[6].mxu0 %vm846_vm4, %v687_v32  ;;  %6088 = vmatmul.mubr.msk.f32.vlgmr.msra.gmra.mrb[4].mxu1 %vm846_vm4, %v690_v14  ;;  %v1182_v32 = vld [vmem:[#allocation4 + $0x98] sm:$0xff]  ;;  %v6401_v9 = vpack.c.bf16 %v1496_v8, %v1492_v7  ;;  %v1552_v52 = vld [vmem:[#allocation9 + $0x2a8] sm:$0xff] }
 0x317   :  { %1000 = vmatprep.mubr.f32.mxu0 %v8743_v0  ;;  %6300 = vmatpush1.bf16.msra.mxu1 %v6299_v15  ;;  %v6313_v34 = vpack.c.bf16 %v1182_v32, %v1180_v31  ;;  %v1210_v15 = vld [vmem:[#allocation4 + $0x178] sm:$0xff]  ;;  %v1217_v31 = vld [vmem:[#allocation4 + $0x1b0] sm:$0xff]  ;;  %v1220_v32 = vld [vmem:[#allocation4 + $0x1c8] sm:$0xff] }
 0x318   :  { %6302 = vmatprep.subr.bf16.mxu1 %v6301_v17  ;;  %v6339_v17 = vpack.c.bf16 %v1205_v13, %v1203_v12  ;;  %v1500_v12 = vld [vmem:[#allocation9 + $0x108] sm:$0xff] }
 0x319   :  { %v1504_v13 = vld [vmem:[#allocation9 + $0x128] sm:$0xff] }
 0x31a   :  { %5775 = vmatmul.mubr.msk.f32.gmra.mrb[8].mxu0 %vm846_vm4, %v690_v14  ;;  %v1208_v14 = vld [vmem:[#allocation4 + $0x168] sm:$0xff] }
 0x31b   :  { %6304 = vmatpush1.bf16.msra.mxu1 %v6303_v20  ;;  %v6341_v18 = vpack.c.bf16 %v1210_v15, %v1208_v14  ;;  %v1214_v20 = vld [vmem:[#allocation4 + $0x198] sm:$0xff]  ;;  %v6405_v15 = vpack.c.bf16 %v1504_v13, %v1500_v12 }
 0x31c   :  { %6306 = vmatprep.subr.bf16.mxu1 %v6305_v22  ;;  %v6343_v22 = vpack.c.bf16 %v1209_v21, %v1207_v19  ;;  %v6345_v23 = vpack.c.bf16 %v1214_v20, %v1212_v16  ;;  %v1508_v19 = vld [vmem:[#allocation9 + $0x148] sm:$0xff] }
 0x31d   :  { %v1512_v21 = vld [vmem:[#allocation9 + $0x168] sm:$0xff] }
 0x31e   :  { %v6409_v20 = vpack.c.bf16 %v1512_v21, %v1508_v19 }
 0x31f   :  { %6308 = vmatpush1.bf16.msra.mxu1 %v6307_v27  ;;  %v1218_v27 = vld [vmem:[#allocation4 + $0x1b8] sm:$0xff] }
 0x320   :  { %6310 = vmatprep.subr.bf16.mxu1 %v6309_v28  ;;  %v6347_v28 = vpack.c.bf16 %v1213_v25, %v1211_v24  ;;  %v6349_v29 = vpack.c.bf16 %v1218_v27, %v1216_v26  ;;  %v1516_v24 = vld [vmem:[#allocation9 + $0x188] sm:$0xff] }
 0x321   :  { %v1520_v25 = vld [vmem:[#allocation9 + $0x1a8] sm:$0xff] }
 0x322   :  { %v6413_v27 = vpack.c.bf16 %v1520_v25, %v1516_v24 }
 0x323   :  { %6312 = vmatpush1.bf16.msra.mxu1 %v6311_v33  ;;  %v1222_v33 = vld [vmem:[#allocation4 + $0x1d8] sm:$0xff] }
 0x324   :  { %6314 = vmatprep.subr.bf16.mxu1 %v6313_v34  ;;  %v6351_v34 = vpack.c.bf16 %v1217_v31, %v1215_v30  ;;  %v6353_v35 = vpack.c.bf16 %v1222_v33, %v1220_v32  ;;  %v1524_v30 = vld [vmem:[#allocation9 + $0x1c8] sm:$0xff] }
 0x325   :  { %v1528_v31 = vld [vmem:[#allocation9 + $0x1e8] sm:$0xff] }
 0x326   :  { %v6417_v33 = vpack.c.bf16 %v1528_v31, %v1524_v30  ;;  %v1232_v30 = vld [vmem:[#allocation4 + $0x228] sm:$0xff]  ;;  %v1234_v31 = vld [vmem:[#allocation4 + $0x238] sm:$0xff] }
 0x327   :  { %6316 = vmatpush1.bf16.msra.mxu1 %v6315_v39  ;;  %v1224_v39 = vld [vmem:[#allocation4 + $0x1e8] sm:$0xff] }
 0x328   :  { %6318 = vmatprep.subr.bf16.mxu1 %v6317_v40  ;;  %v1226_v40 = vld [vmem:[#allocation4 + $0x1f8] sm:$0xff] }
 0x329   :  { %v6357_v41 = vpack.c.bf16 %v1226_v40, %v1224_v39  ;;  %v6421_v39 = vpack.c.bf16 %v1536_v37, %v1532_v36  ;;  %v1531_v40 = vld [vmem:[#allocation9 + $0x200] sm:$0xff] }
 0x32b   :  { %6320 = vmatpush1.bf16.msra.mxu1 %v6319_v45  ;;  %v1228_v45 = vld [vmem:[#allocation4 + $0x208] sm:$0xff] }
 0x32c   :  { %6322 = vmatprep.subr.bf16.mxu1 %v6321_v46  ;;  %v1230_v46 = vld [vmem:[#allocation4 + $0x218] sm:$0xff] }
 0x32d   :  { %v6361_v49 = vpack.c.bf16 %v1230_v46, %v1228_v45  ;;  %v6425_v45 = vpack.c.bf16 %v1544_v43, %v1540_v42  ;;  %v1539_v46 = vld [vmem:[#allocation9 + $0x240] sm:$0xff]  ;;  %v1238_v43 = vld [vmem:[#allocation4 + $0x258] sm:$0xff] }
 0x32e   :  { %v1236_v42 = vld [vmem:[#allocation4 + $0x248] sm:$0xff] }
 0x32f   :  { %6324 = vmatpush1.bf16.msra.mxu1 %v6323_v54  ;;  %v1467_v54 = vld [vmem:[#allocation9] sm:$0xff] }
 0x330   :  { %6326 = vmatprep.subr.bf16.mxu1 %v6325_v55  ;;  %v1471_v55 = vld [vmem:[#allocation9 + $0x20] sm:$0xff] }
 0x331   :  { %v6391_v56 = vpack.c.bf16 %v1471_v55, %v1467_v54  ;;  %v6429_v54 = vpack.c.bf16 %v1552_v52, %v1548_v51  ;;  %v1547_v55 = vld [vmem:[#allocation9 + $0x280] sm:$0xff]  ;;  %v1237_v52 = vld [vmem:[#allocation4 + $0x250] sm:$0xff] }
 0x332   :  { %v1235_v51 = vld [vmem:[#allocation4 + $0x240] sm:$0xff] }
 0x333   :  { %6328 = vmatpush1.bf16.msra.mxu1 %v6327_v58  ;;  %v1480_v58 = vld [vmem:[#allocation9 + $0x68] sm:$0xff]  ;;  %6392 = vmatpush1.bf16.msra.mxu0 %v6391_v56  ;;  %v1551_v56 = vld [vmem:[#allocation9 + $0x2a0] sm:$0xff] }
 0x334   :  { %6330 = vmatprep.subr.bf16.mxu1 %v6329_v61  ;;  %v6393_v59 = vpack.c.bf16 %v1480_v58, %v1476_v57  ;;  %v1479_v61 = vld [vmem:[#allocation9 + $0x60] sm:$0xff]  ;;  %v1556_v57 = vld [vmem:[#allocation9 + $0x2c8] sm:$0xff] }
 0x335   :  { %v6395_v62 = vpack.c.bf16 %v1479_v61, %v1475_v60  ;;  %v1560_v58 = vld [vmem:[#allocation9 + $0x2e8] sm:$0xff]  ;;  %v1555_v61 = vld [vmem:[#allocation9 + $0x2c0] sm:$0xff] }
 0x336   :  { %6394 = vmatprep.subr.bf16.mxu0 %v6393_v59  ;;  %v6431_v59 = vpack.c.bf16 %v1551_v56, %v1547_v55  ;;  %v6433_v60 = vpack.c.bf16 %v1560_v58, %v1556_v57  ;;  %v6371_v55 = vpack.c.bf16 %v1237_v52, %v1235_v51  ;;  %v1239_v57 = vld [vmem:[#allocation4 + $0x260] sm:$0xff]  ;;  %v1241_v58 = vld [vmem:[#allocation4 + $0x270] sm:$0xff] }
 0x337   :  { %6332 = vmatpush1.bf16.msra.mxu1 %v6331_v2  ;;  %v1488_v2 = vld [vmem:[#allocation9 + $0xa8] sm:$0xff]  ;;  %6396 = vmatpush1.bf16.msra.mxu0 %v6395_v62  ;;  %v1559_v62 = vld [vmem:[#allocation9 + $0x2e0] sm:$0xff]  ;;  %v1514_v51 = vld [vmem:[#allocation9 + $0x178] sm:$0xff] }
 0x338   :  { %6334 = vmatprep.subr.bf16.mxu1 %v6333_v6  ;;  %v6397_v3 = vpack.c.bf16 %v1488_v2, %v1484_v1  ;;  %v6399_v6 = vpack.c.bf16 %v1487_v5, %v1483_v4  ;;  %v1564_v1 = vld [vmem:[#allocation9 + $0x308] sm:$0xff]  ;;  %v1563_v5 = vld [vmem:[#allocation9 + $0x300] sm:$0xff] }
 0x339   :  { %v1568_v2 = vld [vmem:[#allocation9 + $0x328] sm:$0xff] }
 0x33a   :  { %6398 = vmatprep.subr.bf16.mxu0 %v6397_v3  ;;  %v6435_v3 = vpack.c.bf16 %v1559_v62, %v1555_v61  ;;  %v6437_v4 = vpack.c.bf16 %v1568_v2, %v1564_v1  ;;  %v6375_v61 = vpack.c.bf16 %v1241_v58, %v1239_v57  ;;  %v1243_v1 = vld [vmem:[#allocation4 + $0x280] sm:$0xff]  ;;  %v1245_v2 = vld [vmem:[#allocation4 + $0x290] sm:$0xff] }
 0x33b   :  { %6336 = vmatpush1.bf16.msra.mxu1 %v6335_v10  ;;  %v1491_v10 = vld [vmem:[#allocation9 + $0xc0] sm:$0xff]  ;;  %6400 = vmatpush1.bf16.msra.mxu0 %v6399_v6  ;;  %v1522_v57 = vld [vmem:[#allocation9 + $0x1b8] sm:$0xff] }
 0x33c   :  { %6338 = vmatprep.subr.bf16.mxu1 %v6337_v11  ;;  %v1495_v11 = vld [vmem:[#allocation9 + $0xe0] sm:$0xff]  ;;  %6402 = vmatprep.subr.bf16.mxu0 %v6401_v9 }
 0x33d   :  { %v6403_v14 = vpack.c.bf16 %v1495_v11, %v1491_v10  ;;  %v1567_v6 = vld [vmem:[#allocation9 + $0x320] sm:$0xff] }
 0x33e   :  { %v6439_v7 = vpack.c.bf16 %v1567_v6, %v1563_v5  ;;  %v6379_v5 = vpack.c.bf16 %v1245_v2, %v1243_v1  ;;  %v1530_v1 = vld [vmem:[#allocation9 + $0x1f8] sm:$0xff] }
 0x33f   :  { %6340 = vmatpush1.bf16.msra.mxu1 %v6339_v17  ;;  %v1499_v17 = vld [vmem:[#allocation9 + $0x100] sm:$0xff]  ;;  %6404 = vmatpush1.bf16.msra.mxu0 %v6403_v14  ;;  %v829_v14 = vld [vmem:[%s9617_s1] sm:$0x7] }
 0x340   :  { %6342 = vmatprep.subr.bf16.mxu1 %v6341_v18  ;;  %v1503_v18 = vld [vmem:[#allocation9 + $0x120] sm:$0xff]  ;;  %6406 = vmatprep.subr.bf16.mxu0 %v6405_v15  ;;  %v842_v15 = vrot.slane %v829_v14, %v9211_v63 }
 0x341   :  { %v6407_v16 = vpack.c.bf16 %v1503_v18, %v1499_v17  ;;  %v834_v17 = vrot.slane %v829_v14, %v9202_v48  ;;  %v838_v18 = vrot.slane %v829_v14, %v9206_v50  ;;  %v1253_v14 = vld [vmem:[#allocation4 + $0x2d0] sm:$0xff] }
 0x343   :  { %6344 = vmatpush1.bf16.msra.mxu1 %v6343_v22  ;;  %v1507_v22 = vld [vmem:[#allocation9 + $0x140] sm:$0xff]  ;;  %6408 = vmatpush1.bf16.msra.mxu0 %v6407_v16 }
 0x344   :  { %6346 = vmatprep.subr.bf16.mxu1 %v6345_v23  ;;  %v1511_v23 = vld [vmem:[#allocation9 + $0x160] sm:$0xff]  ;;  %6410 = vmatprep.subr.bf16.mxu0 %v6409_v20 }
 0x345   :  { %v6411_v26 = vpack.c.bf16 %v1511_v23, %v1507_v22 }
 0x347   :  { %6348 = vmatpush1.bf16.msra.mxu1 %v6347_v28  ;;  %v1515_v28 = vld [vmem:[#allocation9 + $0x180] sm:$0xff]  ;;  %6412 = vmatpush1.bf16.msra.mxu0 %v6411_v26 }
 0x348   :  { %6350 = vmatprep.subr.bf16.mxu1 %v6349_v29  ;;  %v1519_v29 = vld [vmem:[#allocation9 + $0x1a0] sm:$0xff]  ;;  %6414 = vmatprep.subr.bf16.mxu0 %v6413_v27  ;;  %v1229_v27 = vld [vmem:[#allocation4 + $0x210] sm:$0xff] }
 0x349   :  { %v6415_v32 = vpack.c.bf16 %v1519_v29, %v1515_v28  ;;  %v1227_v26 = vld [vmem:[#allocation4 + $0x200] sm:$0xff] }
 0x34b   :  { %6352 = vmatpush1.bf16.msra.mxu1 %v6351_v34  ;;  %v1523_v34 = vld [vmem:[#allocation9 + $0x1c0] sm:$0xff]  ;;  %6416 = vmatpush1.bf16.msra.mxu0 %v6415_v32 }
 0x34c   :  { %6354 = vmatprep.subr.bf16.mxu1 %v6353_v35  ;;  %v1527_v35 = vld [vmem:[#allocation9 + $0x1e0] sm:$0xff]  ;;  %6418 = vmatprep.subr.bf16.mxu0 %v6417_v33 }
 0x34f   :  { %6356 = vmatpush1.bf16.msra.mxu1 %v6355_v38  ;;  %v6419_v38 = vpack.c.bf16 %v1527_v35, %v1523_v34  ;;  %v6363_v34 = vpack.c.bf16 %v1229_v27, %v1227_v26  ;;  %v1477_v27 = vld [vmem:[#allocation9 + $0x50] sm:$0xff] }
 0x350   :  { %6358 = vmatprep.subr.bf16.mxu1 %v6357_v41  ;;  %v1535_v41 = vld [vmem:[#allocation9 + $0x220] sm:$0xff] }
 0x351   :  { %6420 = vmatpush1.bf16.msra.mxu0 %v6419_v38  ;;  %v6365_v38 = vpack.c.bf16 %v1234_v31, %v1232_v30  ;;  %v1486_v30 = vld [vmem:[#allocation9 + $0x98] sm:$0xff] }
 0x352   :  { %6422 = vmatprep.subr.bf16.mxu0 %v6421_v39  ;;  %v1231_v39 = vld [vmem:[#allocation4 + $0x220] sm:$0xff] }
 0x353   :  { %6360 = vmatpush1.bf16.msra.mxu1 %v6359_v44  ;;  %v6423_v44 = vpack.c.bf16 %v1535_v41, %v1531_v40  ;;  %v1233_v40 = vld [vmem:[#allocation4 + $0x230] sm:$0xff]  ;;  %v1490_v31 = vld [vmem:[#allocation9 + $0xb8] sm:$0xff] }
 0x354   :  { %6362 = vmatprep.subr.bf16.mxu1 %v6361_v49  ;;  %v1543_v49 = vld [vmem:[#allocation9 + $0x260] sm:$0xff] }
 0x355   :  { %6424 = vmatpush1.bf16.msra.mxu0 %v6423_v44  ;;  %v6427_v53 = vpack.c.bf16 %v1543_v49, %v1539_v46  ;;  %v6369_v49 = vpack.c.bf16 %v1238_v43, %v1236_v42  ;;  %v1502_v42 = vld [vmem:[#allocation9 + $0x118] sm:$0xff] }
 0x356   :  { %6426 = vmatprep.subr.bf16.mxu0 %v6425_v45  ;;  %v6367_v45 = vpack.c.bf16 %v1233_v40, %v1231_v39  ;;  %v1493_v40 = vld [vmem:[#allocation9 + $0xd0] sm:$0xff]  ;;  %v1506_v43 = vld [vmem:[#allocation9 + $0x138] sm:$0xff] }
 0x359   :  { %6428 = vmatpush1.bf16.msra.mxu0 %v6427_v53  ;;  %v1240_v53 = vld [vmem:[#allocation4 + $0x268] sm:$0xff] }
 0x35a   :  { %6430 = vmatprep.subr.bf16.mxu0 %v6429_v54  ;;  %v1242_v54 = vld [vmem:[#allocation4 + $0x278] sm:$0xff] }
 0x35b   :  { %v6373_v56 = vpack.c.bf16 %v1242_v54, %v1240_v53  ;;  %v1509_v54 = vld [vmem:[#allocation9 + $0x150] sm:$0xff] }
 0x35d   :  { %6432 = vmatpush1.bf16.msra.mxu0 %v6431_v59  ;;  %v1244_v59 = vld [vmem:[#allocation4 + $0x288] sm:$0xff] }
 0x35e   :  { %6434 = vmatprep.subr.bf16.mxu0 %v6433_v60  ;;  %v1246_v60 = vld [vmem:[#allocation4 + $0x298] sm:$0xff] }
 0x35f   :  { %v6377_v62 = vpack.c.bf16 %v1246_v60, %v1244_v59  ;;  %v1517_v60 = vld [vmem:[#allocation9 + $0x190] sm:$0xff] }
 0x361   :  { %6436 = vmatpush1.bf16.msra.mxu0 %v6435_v3  ;;  %v1248_v3 = vld [vmem:[#allocation4 + $0x2a8] sm:$0xff] }
 0x362   :  { %6438 = vmatprep.subr.bf16.mxu0 %v6437_v4  ;;  %v1250_v4 = vld [vmem:[#allocation4 + $0x2b8] sm:$0xff] }
 0x363   :  { %v6381_v6 = vpack.c.bf16 %v1250_v4, %v1248_v3  ;;  %v1525_v4 = vld [vmem:[#allocation9 + $0x1d0] sm:$0xff] }
 0x365   :  { %6440 = vmatpush1.bf16.msra.mxu0 %v6439_v7  ;;  %v1247_v7 = vld [vmem:[#allocation4 + $0x2a0] sm:$0xff] }
 0x3cd   :  { %v5818_v8 = vpop.f32.mrb[0].mxu1 }
 0x3ce   :  { %v5819_v9 = vpop.f32.mrb[1].mxu1 }
 0x3cf   :  { %v5820_v10 = vadd.f32 %v5819_v9, %v5818_v8  ;;  %v1249_v8 = vld [vmem:[#allocation4 + $0x2b0] sm:$0xff]  ;;  %v1252_v9 = vld [vmem:[#allocation4 + $0x2c8] sm:$0xff] }
 0x3d1   :  { %v5821_v11 = vpop.f32.mrb[2].mxu1  ;;  %v1074_v20 = vadd.f32 %v5820_v10, %v842_v15  ;;  %v1254_v10 = vld [vmem:[#allocation4 + $0x2d8] sm:$0xff] }
 0x3d2   :  { %v5822_v12 = vpop.f32.mrb[3].mxu1 }
 0x3d3   :  { %v5823_v13 = vadd.f32 %v5822_v12, %v5821_v11  ;;  %v6383_v11 = vpack.c.bf16 %v1249_v8, %v1247_v7  ;;  %v6385_v12 = vpack.c.bf16 %v1254_v10, %v1252_v9  ;;  %v1538_v7 = vld [vmem:[#allocation9 + $0x238] sm:$0xff]  ;;  %v1533_v10 = vld [vmem:[#allocation9 + $0x210] sm:$0xff] }
 0x3d5   :  { %v1079_v19 = vadd.f32 %v5823_v13, %v842_v15  ;;  %v1251_v13 = vld [vmem:[#allocation4 + $0x2c0] sm:$0xff] }
 0x3d6   :  { %v1470_v15 = vld [vmem:[#allocation9 + $0x18] sm:$0xff] }
 0x3e9   :  { %v996_v21 = vpop.f32.mrb[6].mxu0  ;;  %v6089_v16 = vpop.f32.mrb[4].mxu1 }
 0x3ea   :  { %v7957_v22 = vadd.f32 %v996_v21, %v834_v17  ;;  %v9238_v23 = vadd.f32 %v6089_v16, %v1079_v19  ;;  %v998_v24 = vpop.f32.mrb[7].mxu0  ;;  %v1148_v25 = vpop.f32.mrb[5].mxu1  ;;  %v1469_v21 = vld [vmem:[#allocation9 + $0x10] sm:$0xff] }
 0x3eb   :  { %v7958_v28 = vadd.f32 %v998_v24, %v838_v18  ;;  %v9240_v29 = vadd.f32 %v1148_v25, %v1074_v20  ;;  %v1473_v16 = vld [vmem:[#allocation9 + $0x30] sm:$0xff]  ;;  %v1478_v20 = vld [vmem:[#allocation9 + $0x58] sm:$0xff] }
 0x3ec   :  { %v1157_v35 = vmax.f32 %v7957_v22, 0.0  ;;  %v1482_v22 = vld [vmem:[#allocation9 + $0x78] sm:$0xff]  ;;  %v6455_v24 = vpack.c.bf16 %v1473_v16, %v1469_v21 }
 0x3ed   :  { %v1158_v32 = vmax.f32 %v7958_v28, 0.0  ;;  %v1002_v33 = vpop.f32.mrb[8].mxu0  ;;  %v1159_v25 = vmax.f32 %v9240_v29, 0.0  ;;  %v6457_v26 = vpack.c.bf16 %v1482_v22, %v1478_v20  ;;  %v1481_v28 = vld [vmem:[#allocation9 + $0x70] sm:$0xff]  ;;  %v1498_v29 = vld [vmem:[#allocation9 + $0xf8] sm:$0xff] }
 0x3ee   :  { %v7959_v36 = vadd.f32 %v1002_v33, %v834_v17  ;;  %v1004_v37 = vpop.f32.mrb[9].mxu0  ;;  %v1474_v17 = vld [vmem:[#allocation9 + $0x38] sm:$0xff]  ;;  %v1162_v33 = vmax.f32 %v9238_v23, 0.0  ;;  %v6469_v23 = vpack.c.bf16 %v1506_v43, %v1502_v42  ;;  %v1549_v22 = vld [vmem:[#allocation9 + $0x290] sm:$0xff]  ;;  %v1571_v43 = vld [vmem:[#allocation9 + $0x340] sm:$0xff] }
 0x3ef   :  { %v7960_v41 = vadd.f32 %v1004_v37, %v838_v18  ;;  %1337 = vmatprep.mubr.f32.mxu1 %v1158_v32  ;;  %v6387_v18 = vpack.c.bf16 %v1253_v14, %v1251_v13  ;;  %v6453_v19 = vpack.c.bf16 %v1474_v17, %v1470_v15  ;;  %v6459_v32 = vpack.c.bf16 %v1481_v28, %v1477_v27  ;;  %v1494_v37 = vld [vmem:[#allocation9 + $0xd8] sm:$0xff]  ;;  %v1541_v17 = vld [vmem:[#allocation9 + $0x250] sm:$0xff] }
 0x3f0   :  { %1338 = vmatmul.mubr.f32.vlgmr.msra.gmra.mrb[6].mxu1 %v1157_v35  ;;  %v1160_v46 = vmax.f32 %v7959_v36, 0.0  ;;  %v1485_v35 = vld [vmem:[#allocation9 + $0x90] sm:$0xff]  ;;  %v6465_v39 = vpack.c.bf16 %v1498_v29, %v1494_v37  ;;  %v1546_v13 = vld [vmem:[#allocation9 + $0x278] sm:$0xff] }
 0x3f1   :  { %v1161_v44 = vmax.f32 %v7960_v41, 0.0  ;;  %6364 = vmatpush1.bf16.msra.mxu1 %v6363_v34  ;;  %v6461_v34 = vpack.c.bf16 %v1490_v31, %v1486_v30  ;;  %v1489_v36 = vld [vmem:[#allocation9 + $0xb0] sm:$0xff]  ;;  %v1554_v21 = vld [vmem:[#allocation9 + $0x2b8] sm:$0xff] }
 0x3f2   :  { %6366 = vmatprep.subr.bf16.mxu1 %v6365_v38  ;;  %v6463_v38 = vpack.c.bf16 %v1489_v36, %v1485_v35  ;;  %v1497_v41 = vld [vmem:[#allocation9 + $0xf0] sm:$0xff]  ;;  %v1578_v42 = vld [vmem:[#allocation9 + $0x378] sm:$0xff] }
 0x3f3   :  { %1343 = vmatprep.mubr.f32.mxu1 %v1161_v44  ;;  %v6467_v44 = vpack.c.bf16 %v1497_v41, %v1493_v40  ;;  %v1557_v30 = vld [vmem:[#allocation9 + $0x2d0] sm:$0xff]  ;;  %v1574_v40 = vld [vmem:[#allocation9 + $0x358] sm:$0xff] }
 0x3f4   :  { %1344 = vmatmul.mubr.f32.gmra.mrb[8].mxu1 %v1160_v46  ;;  %v1505_v46 = vld [vmem:[#allocation9 + $0x130] sm:$0xff] }
 0x3f5   :  { %6368 = vmatpush1.bf16.msra.mxu1 %v6367_v45  ;;  %1414 = vmatprep.mubr.f32.mxu1 %v8743_v0  ;;  %v1501_v45 = vld [vmem:[#allocation9 + $0x110] sm:$0xff] }
 0x3f6   :  { %6370 = vmatprep.subr.bf16.mxu1 %v6369_v49  ;;  %v1510_v49 = vld [vmem:[#allocation9 + $0x158] sm:$0xff]  ;;  %v6471_v52 = vpack.c.bf16 %v1505_v46, %v1501_v45  ;;  %v1561_v31 = vld [vmem:[#allocation9 + $0x2f0] sm:$0xff] }
 0x3f7   :  { %v6473_v53 = vpack.c.bf16 %v1514_v51, %v1510_v49  ;;  %v1565_v36 = vld [vmem:[#allocation9 + $0x310] sm:$0xff] }
 0x3f8   :  { %v1569_v37 = vld [vmem:[#allocation9 + $0x330] sm:$0xff] }
 0x3f9   :  { %6372 = vmatpush1.bf16.msra.mxu1 %v6371_v55  ;;  %v1513_v55 = vld [vmem:[#allocation9 + $0x170] sm:$0xff]  ;;  %v6503_v29 = vpack.c.bf16 %v1569_v37, %v1565_v36 }
 0x3fa   :  { %6374 = vmatprep.subr.bf16.mxu1 %v6373_v56  ;;  %v1518_v56 = vld [vmem:[#allocation9 + $0x198] sm:$0xff]  ;;  %v6475_v58 = vpack.c.bf16 %v1513_v55, %v1509_v54  ;;  %v1573_v46 = vld [vmem:[#allocation9 + $0x350] sm:$0xff] }
 0x3fb   :  { %v6477_v59 = vpack.c.bf16 %v1522_v57, %v1518_v56  ;;  %v1577_v49 = vld [vmem:[#allocation9 + $0x370] sm:$0xff]  ;;  %v1582_v55 = vld [vmem:[#allocation9 + $0x398] sm:$0xff]  ;;  %v1579_v57 = vld [vmem:[#allocation9 + $0x380] sm:$0xff] }
 0x3fc   :  { %v6507_v51 = vpack.c.bf16 %v1577_v49, %v1573_v46  ;;  %v1586_v56 = vld [vmem:[#allocation9 + $0x3b8] sm:$0xff]  ;;  %v1785_v46 = vld [vmem:[#allocation10 + $0x30] sm:$0xff]  ;;  %v1788_v49 = vld [vmem:[#allocation10 + $0x48] sm:$0xff] }
 0x3fd   :  { %6376 = vmatpush1.bf16.msra.mxu1 %v6375_v61  ;;  %v1521_v61 = vld [vmem:[#allocation9 + $0x1b0] sm:$0xff] }
 0x3fe   :  { %6378 = vmatprep.subr.bf16.mxu1 %v6377_v62  ;;  %v1526_v62 = vld [vmem:[#allocation9 + $0x1d8] sm:$0xff]  ;;  %v6479_v2 = vpack.c.bf16 %v1521_v61, %v1517_v60  ;;  %v1581_v60 = vld [vmem:[#allocation9 + $0x390] sm:$0xff] }
 0x3ff   :  { %v6481_v3 = vpack.c.bf16 %v1530_v1, %v1526_v62  ;;  %v1585_v62 = vld [vmem:[#allocation9 + $0x3b0] sm:$0xff] }
 0x400   :  { %v6511_v1 = vpack.c.bf16 %v1585_v62, %v1581_v60  ;;  %v1791_v62 = vld [vmem:[#allocation10 + $0x60] sm:$0xff] }
 0x401   :  { %6380 = vmatpush1.bf16.msra.mxu1 %v6379_v5  ;;  %v1529_v5 = vld [vmem:[#allocation9 + $0x1f0] sm:$0xff] }
 0x402   :  { %6382 = vmatprep.subr.bf16.mxu1 %v6381_v6  ;;  %v1534_v6 = vld [vmem:[#allocation9 + $0x218] sm:$0xff]  ;;  %v6483_v8 = vpack.c.bf16 %v1529_v5, %v1525_v4 }
 0x403   :  { %v6485_v9 = vpack.c.bf16 %v1538_v7, %v1534_v6  ;;  %v1590_v4 = vld [vmem:[#allocation9 + $0x3d8] sm:$0xff]  ;;  %v1587_v7 = vld [vmem:[#allocation9 + $0x3c0] sm:$0xff] }
 0x404   :  { %v1594_v6 = vld [vmem:[#allocation9 + $0x3f8] sm:$0xff] }
 0x405   :  { %6384 = vmatpush1.bf16.msra.mxu1 %v6383_v11  ;;  %v1537_v11 = vld [vmem:[#allocation9 + $0x230] sm:$0xff] }
 0x406   :  { %6386 = vmatprep.subr.bf16.mxu1 %v6385_v12  ;;  %v1542_v12 = vld [vmem:[#allocation9 + $0x258] sm:$0xff]  ;;  %v6487_v14 = vpack.c.bf16 %v1537_v11, %v1533_v10  ;;  %v1589_v11 = vld [vmem:[#allocation9 + $0x3d0] sm:$0xff] }
 0x407   :  { %v6489_v15 = vpack.c.bf16 %v1546_v13, %v1542_v12  ;;  %v1593_v12 = vld [vmem:[#allocation9 + $0x3f0] sm:$0xff] }
 0x408   :  { %v6515_v13 = vpack.c.bf16 %v1593_v12, %v1589_v11  ;;  %v1802_v11 = vld [vmem:[#allocation10 + $0xb8] sm:$0xff] }
 0x409   :  { %6388 = vmatpush1.bf16.msra.mxu1 %v6387_v18  ;;  %v1545_v18 = vld [vmem:[#allocation9 + $0x270] sm:$0xff] }
 0x40a   :  { %6454 = vmatprep.subr.bf16.mxu1 %v6453_v19  ;;  %v1550_v19 = vld [vmem:[#allocation9 + $0x298] sm:$0xff]  ;;  %v6491_v16 = vpack.c.bf16 %v1545_v18, %v1541_v17 }
 0x40b   :  { %v6493_v20 = vpack.c.bf16 %v1554_v21, %v1550_v19  ;;  %v1782_v17 = vld [vmem:[#allocation10 + $0x18] sm:$0xff] }
 0x40c   :  { %5778 = vmatmul.mubr.msk.f32.vlgmr.msra.gmra.mrb[6].mxu1 %vm846_vm4, %v1159_v25  ;;  %v1558_v25 = vld [vmem:[#allocation9 + $0x2d8] sm:$0xff] }
 0x40d   :  { %1420 = vmatprep.mubr.f32.mxu1 %v8743_v0  ;;  %6456 = vmatpush1.bf16.msra.mxu1 %v6455_v24  ;;  %v1553_v24 = vld [vmem:[#allocation9 + $0x2b0] sm:$0xff]  ;;  %v1786_v19 = vld [vmem:[#allocation10 + $0x38] sm:$0xff] }
 0x40e   :  { %6458 = vmatprep.subr.bf16.mxu1 %v6457_v26  ;;  %v1562_v26 = vld [vmem:[#allocation9 + $0x2f8] sm:$0xff]  ;;  %v6495_v27 = vpack.c.bf16 %v1553_v24, %v1549_v22  ;;  %v6645_v21 = vpack.c.bf16 %v1786_v19, %v1782_v17  ;;  %v1799_v17 = vld [vmem:[#allocation10 + $0xa0] sm:$0xff] }
 0x40f   :  { %v6497_v28 = vpack.c.bf16 %v1562_v26, %v1558_v25  ;;  %v1431_v22 = vld [vmem:[#allocation6] sm:$0x3]  ;;  %v1447_v26 = vld [vmem:[#allocation7] sm:$0x3] }
 0x410   :  { %5779 = vmatmul.mubr.msk.f32.gmra.mrb[8].mxu1 %vm846_vm4, %v1162_v33  ;;  %v1570_v33 = vld [vmem:[#allocation9 + $0x338] sm:$0xff]  ;;  %v1456_v37 = vrot.slane %v1447_v26, %v9206_v50 }
 0x411   :  { %6460 = vmatpush1.bf16.msra.mxu1 %v6459_v32  ;;  %v1566_v32 = vld [vmem:[#allocation9 + $0x318] sm:$0xff] }
 0x412   :  { %6462 = vmatprep.subr.bf16.mxu1 %v6461_v34  ;;  %v6499_v34 = vpack.c.bf16 %v1561_v31, %v1557_v30  ;;  %v6501_v35 = vpack.c.bf16 %v1570_v33, %v1566_v32  ;;  %v1440_v32 = vrot.slane %v1431_v22, %v9206_v50 }
 0x415   :  { %6464 = vmatpush1.bf16.msra.mxu1 %v6463_v38  ;;  %v1572_v38 = vld [vmem:[#allocation9 + $0x348] sm:$0xff] }
 0x416   :  { %6466 = vmatprep.subr.bf16.mxu1 %v6465_v39  ;;  %v1576_v39 = vld [vmem:[#allocation9 + $0x368] sm:$0xff] }
 0x417   :  { %v6441_v41 = vpack.c.bf16 %v1576_v39, %v1572_v38 }
 0x419   :  { %6468 = vmatpush1.bf16.msra.mxu1 %v6467_v44  ;;  %v1575_v44 = vld [vmem:[#allocation9 + $0x360] sm:$0xff]  ;;  %6442 = vmatprep.subr.bf16.mxu0 %v6441_v41 }
 0x41a   :  { %6470 = vmatprep.subr.bf16.mxu1 %v6469_v23  ;;  %v6505_v23 = vpack.c.bf16 %v1578_v42, %v1574_v40  ;;  %v6443_v45 = vpack.c.bf16 %v1575_v44, %v1571_v43  ;;  %v1779_v42 = vld [vmem:[#allocation10] sm:$0xff] }
 0x41b   :  { %v1783_v43 = vld [vmem:[#allocation10 + $0x20] sm:$0xff] }
 0x41c   :  { %6444 = vmatpush1.bf16.msra.mxu0 %v6443_v45  ;;  %v1781_v45 = vld [vmem:[#allocation10 + $0x10] sm:$0xff] }
 0x41d   :  { %6472 = vmatpush1.bf16.msra.mxu1 %v6471_v52  ;;  %v1580_v52 = vld [vmem:[#allocation9 + $0x388] sm:$0xff]  ;;  %v6647_v60 = vpack.c.bf16 %v1785_v46, %v1781_v45 }
 0x41e   :  { %6474 = vmatprep.subr.bf16.mxu1 %v6473_v53  ;;  %v1584_v53 = vld [vmem:[#allocation9 + $0x3a8] sm:$0xff] }
 0x41f   :  { %v6445_v54 = vpack.c.bf16 %v1584_v53, %v1580_v52  ;;  %v1792_v53 = vld [vmem:[#allocation10 + $0x68] sm:$0xff] }
 0x421   :  { %6476 = vmatpush1.bf16.msra.mxu1 %v6475_v58  ;;  %v6509_v58 = vpack.c.bf16 %v1586_v56, %v1582_v55  ;;  %6446 = vmatprep.subr.bf16.mxu0 %v6445_v54  ;;  %v1790_v54 = vld [vmem:[#allocation10 + $0x58] sm:$0xff] }
 0x422   :  { %6478 = vmatprep.subr.bf16.mxu1 %v6477_v59  ;;  %v1583_v59 = vld [vmem:[#allocation9 + $0x3a0] sm:$0xff]  ;;  %v1794_v55 = vld [vmem:[#allocation10 + $0x78] sm:$0xff] }
 0x423   :  { %v6447_v61 = vpack.c.bf16 %v1583_v59, %v1579_v57  ;;  %v6519_v59 = vpack.c.bf16 %v1783_v43, %v1779_v42  ;;  %v1811_v43 = vld [vmem:[#allocation10 + $0x100] sm:$0xff] }
 0x425   :  { %6480 = vmatpush1.bf16.msra.mxu1 %v6479_v2  ;;  %v1588_v2 = vld [vmem:[#allocation9 + $0x3c8] sm:$0xff]  ;;  %6448 = vmatpush1.bf16.msra.mxu0 %v6447_v61  ;;  %v1787_v61 = vld [vmem:[#allocation10 + $0x40] sm:$0xff] }
 0x426   :  { %6482 = vmatprep.subr.bf16.mxu1 %v6481_v3  ;;  %v1592_v3 = vld [vmem:[#allocation9 + $0x3e8] sm:$0xff] }
 0x427   :  { %v6449_v5 = vpack.c.bf16 %v1592_v3, %v1588_v2  ;;  %v6521_v3 = vpack.c.bf16 %v1792_v53, %v1788_v49  ;;  %v1813_v49 = vld [vmem:[#allocation10 + $0x110] sm:$0xff]  ;;  %v1820_v53 = vld [vmem:[#allocation10 + $0x148] sm:$0xff] }
 0x429   :  { %6484 = vmatpush1.bf16.msra.mxu1 %v6483_v8  ;;  %v1591_v8 = vld [vmem:[#allocation9 + $0x3e0] sm:$0xff]  ;;  %6450 = vmatprep.subr.bf16.mxu0 %v6449_v5  ;;  %v1789_v5 = vld [vmem:[#allocation10 + $0x50] sm:$0xff] }
 0x42a   :  { %6486 = vmatprep.subr.bf16.mxu1 %v6485_v9  ;;  %v6513_v9 = vpack.c.bf16 %v1594_v6, %v1590_v4  ;;  %v6451_v10 = vpack.c.bf16 %v1591_v8, %v1587_v7  ;;  %v6649_v4 = vpack.c.bf16 %v1794_v55, %v1790_v54  ;;  %v1793_v6 = vld [vmem:[#allocation10 + $0x70] sm:$0xff]  ;;  %v1796_v7 = vld [vmem:[#allocation10 + $0x88] sm:$0xff]  ;;  %v1822_v55 = vld [vmem:[#allocation10 + $0x158] sm:$0xff] }
 0x42b   :  { %v1824_v54 = vld [vmem:[#allocation10 + $0x168] sm:$0xff] }
 0x42c   :  { %6452 = vmatpush1.bf16.msra.mxu0 %v6451_v10  ;;  %v1798_v10 = vld [vmem:[#allocation10 + $0x98] sm:$0xff] }
 0x42d   :  { %6488 = vmatpush1.bf16.msra.mxu1 %v6487_v14  ;;  %v1780_v14 = vld [vmem:[#allocation10 + $0x8] sm:$0xff] }
 0x42e   :  { %6490 = vmatprep.subr.bf16.mxu1 %v6489_v15  ;;  %v1784_v15 = vld [vmem:[#allocation10 + $0x28] sm:$0xff] }
 0x42f   :  { %v6517_v18 = vpack.c.bf16 %v1784_v15, %v1780_v14  ;;  %v6651_v14 = vpack.c.bf16 %v1793_v6, %v1789_v5  ;;  %v1795_v15 = vld [vmem:[#allocation10 + $0x80] sm:$0xff]  ;;  %v1830_v5 = vld [vmem:[#allocation10 + $0x198] sm:$0xff] }
 0x430   :  { %v1834_v6 = vld [vmem:[#allocation10 + $0x1b8] sm:$0xff] }
 0x431   :  { %6492 = vmatpush1.bf16.msra.mxu1 %v6491_v16  ;;  %6518 = vmatprep.subr.bf16.mxu0 %v6517_v18  ;;  %v1255_v16 = vld [vmem:[%s9618_s15] sm:$0x3] }
 0x432   :  { %6494 = vmatprep.subr.bf16.mxu1 %v6493_v20  ;;  %v1260_v20 = vrot.slane %v1255_v16, %v9202_v48  ;;  %v1264_v24 = vrot.slane %v1255_v16, %v9206_v50  ;;  %v1797_v16 = vld [vmem:[#allocation10 + $0x90] sm:$0xff] }
 0x435   :  { %6496 = vmatpush1.bf16.msra.mxu1 %v6495_v27 }
 0x436   :  { %6498 = vmatprep.subr.bf16.mxu1 %v6497_v28  ;;  %v1436_v28 = vrot.slane %v1431_v22, %v9202_v48  ;;  %v1804_v22 = vld [vmem:[#allocation10 + $0xc8] sm:$0xff] }
 0x439   :  { %6500 = vmatpush1.bf16.msra.mxu1 %v6499_v34  ;;  %v1452_v34 = vrot.slane %v1447_v26, %v9202_v48  ;;  %v1810_v26 = vld [vmem:[#allocation10 + $0xf8] sm:$0xff] }
 0x43a   :  { %6502 = vmatprep.subr.bf16.mxu1 %v6501_v35 }
 0x43d   :  { %6504 = vmatpush1.bf16.msra.mxu1 %v6503_v29 }
 0x43e   :  { %6506 = vmatprep.subr.bf16.mxu1 %v6505_v23 }
 0x441   :  { %6508 = vmatpush1.bf16.msra.mxu1 %v6507_v51 }
 0x442   :  { %6510 = vmatprep.subr.bf16.mxu1 %v6509_v58 }
 0x445   :  { %6512 = vmatpush1.bf16.msra.mxu1 %v6511_v1 }
 0x446   :  { %6514 = vmatprep.subr.bf16.mxu1 %v6513_v9  ;;  %v1800_v9 = vld [vmem:[#allocation10 + $0xa8] sm:$0xff] }
 0x447   :  { %v6525_v19 = vpack.c.bf16 %v1800_v9, %v1796_v7  ;;  %v1827_v9 = vld [vmem:[#allocation10 + $0x180] sm:$0xff] }
 0x449   :  { %6516 = vmatpush1.bf16.msra.mxu1 %v6515_v13  ;;  %v6523_v13 = vpack.c.bf16 %v1791_v62, %v1787_v61  ;;  %v6537_v61 = vpack.c.bf16 %v1824_v54, %v1820_v53  ;;  %v1855_v53 = vld [vmem:[#allocation10 + $0x260] sm:$0xff] }
 0x44a   :  { %6646 = vmatprep.subr.bf16.mxu1 %v6645_v21  ;;  %v6653_v21 = vpack.c.bf16 %v1802_v11, %v1798_v10  ;;  %v1831_v10 = vld [vmem:[#allocation10 + $0x1a0] sm:$0xff] }
 0x4df   :  { %v1416_v25 = vpop.f32.mrb[6].mxu1 }
 0x4e0   :  { %v7961_v27 = vadd.f32 %v1416_v25, %v1260_v20  ;;  %v1418_v30 = vpop.f32.mrb[7].mxu1  ;;  %v1806_v25 = vld [vmem:[#allocation10 + $0xd8] sm:$0xff] }
 0x4e1   :  { %v7962_v31 = vadd.f32 %v1418_v30, %v1264_v24  ;;  %v1803_v30 = vld [vmem:[#allocation10 + $0xc0] sm:$0xff] }
 0x4e2   :  { %v9253_v33 = vmax.f32 %v7961_v27, 0.0  ;;  %v6527_v27 = vpack.c.bf16 %v1799_v17, %v1795_v15  ;;  %v1836_v15 = vld [vmem:[#allocation10 + $0x1c8] sm:$0xff] }
 0x4e3   :  { %v9256_v35 = vmax.f32 %v7962_v31, 0.0  ;;  %v1422_v36 = vpop.f32.mrb[8].mxu1  ;;  %v1807_v31 = vld [vmem:[#allocation10 + $0xe0] sm:$0xff]  ;;  %v1840_v17 = vld [vmem:[#allocation10 + $0x1e8] sm:$0xff] }
 0x4e4   :  { %v1443_v29 = vmul.f32 %v1436_v28, %v9253_v33  ;;  %v7963_v38 = vadd.f32 %v1422_v36, %v1260_v20  ;;  %v1424_v39 = vpop.f32.mrb[9].mxu1  ;;  %v1801_v20 = vld [vmem:[#allocation10 + $0xb0] sm:$0xff] }
 0x4e5   :  { %v1444_v40 = vmul.f32 %v1440_v32, %v9256_v35  ;;  %v7964_v41 = vadd.f32 %v1424_v39, %v1264_v24  ;;  %v1808_v24 = vld [vmem:[#allocation10 + $0xe8] sm:$0xff]  ;;  %v1805_v36 = vld [vmem:[#allocation10 + $0xd0] sm:$0xff]  ;;  %v1814_v39 = vld [vmem:[#allocation10 + $0x118] sm:$0xff] }
 0x4e6   :  { %v1459_v44 = vadd.f32 %v1452_v34, %v1443_v29  ;;  %v9261_v23 = vmax.f32 %v7963_v38, 0.0  ;;  %v1812_v29 = vld [vmem:[#allocation10 + $0x108] sm:$0xff] }
 0x4e7   :  { %v9263_v51 = vmax.f32 %v7964_v41, 0.0  ;;  %v1460_v52 = vadd.f32 %v1456_v37, %v1444_v40  ;;  %v1816_v38 = vld [vmem:[#allocation10 + $0x128] sm:$0xff]  ;;  %v1818_v40 = vld [vmem:[#allocation10 + $0x138] sm:$0xff]  ;;  %v6531_v41 = vpack.c.bf16 %v1807_v31, %v1803_v30 }
 0x4e8   :  { %v1445_v56 = vmul.f32 %v1436_v28, %v9261_v23  ;;  %v1463_v1 = vmax.f32 %v1459_v44, 0.0  ;;  %v6655_v28 = vpack.c.bf16 %v1801_v20, %v1797_v16  ;;  %v1815_v44 = vld [vmem:[#allocation10 + $0x120] sm:$0xff]  ;;  %v6533_v45 = vpack.c.bf16 %v1816_v38, %v1812_v29  ;;  %v1848_v30 = vld [vmem:[#allocation10 + $0x228] sm:$0xff]  ;;  %v1846_v31 = vld [vmem:[#allocation10 + $0x218] sm:$0xff] }
 0x4e9   :  { %v1446_v57 = vmul.f32 %v1440_v32, %v9263_v51  ;;  %v1464_v58 = vmax.f32 %v1460_v52, 0.0  ;;  %v6529_v32 = vpack.c.bf16 %v1808_v24, %v1804_v22  ;;  %v6661_v46 = vpack.c.bf16 %v1818_v40, %v1814_v39  ;;  %v1817_v52 = vld [vmem:[#allocation10 + $0x130] sm:$0xff]  ;;  %v1835_v20 = vld [vmem:[#allocation10 + $0x1c0] sm:$0xff] }
 0x4ea   :  { %v1461_v2 = vadd.f32 %v1452_v34, %v1445_v56  ;;  %v6657_v34 = vpack.c.bf16 %v1810_v26, %v1806_v25  ;;  %v1826_v56 = vld [vmem:[#allocation10 + $0x178] sm:$0xff]  ;;  %v1839_v22 = vld [vmem:[#allocation10 + $0x1e0] sm:$0xff]  ;;  %v6545_v24 = vpack.c.bf16 %v1840_v17, %v1836_v15  ;;  %v1837_v26 = vld [vmem:[#allocation10 + $0x1d0] sm:$0xff] }
 0x4eb   :  { %1681 = vmatprep.mubr.f32.mxu0 %v1464_v58  ;;  %1758 = vmatprep.mubr.f32.mxu1 %v1464_v58  ;;  %v1462_v8 = vadd.f32 %v1456_v37, %v1446_v57  ;;  %v1809_v37 = vld [vmem:[#allocation10 + $0xf0] sm:$0xff]  ;;  %v6535_v57 = vpack.c.bf16 %v1815_v44, %v1811_v43  ;;  %v6663_v58 = vpack.c.bf16 %v1817_v52, %v1813_v49  ;;  %v1847_v29 = vld [vmem:[#allocation10 + $0x220] sm:$0xff]  ;;  %v1856_v43 = vld [vmem:[#allocation10 + $0x268] sm:$0xff] }
 0x4ec   :  { %1682 = vmatmul.mubr.f32.vlgmr.msra.gmra.mrb[10].mxu0 %v1463_v1  ;;  %1759 = vmatmul.mubr.f32.vlgmr.msra.gmra.mrb[10].mxu1 %v1463_v1  ;;  %v1465_v18 = vmax.f32 %v1461_v2, 0.0  ;;  %v6659_v42 = vpack.c.bf16 %v1809_v37, %v1805_v36  ;;  %v6665_v62 = vpack.c.bf16 %v1826_v56, %v1822_v55  ;;  %v1821_v1 = vld [vmem:[#allocation10 + $0x150] sm:$0xff]  ;;  %v1843_v37 = vld [vmem:[#allocation10 + $0x200] sm:$0xff]  ;;  %v1854_v44 = vld [vmem:[#allocation10 + $0x258] sm:$0xff] }
 0x4ed   :  { %v1466_v12 = vmax.f32 %v1462_v8, 0.0  ;;  %6520 = vmatpush1.bf16.msra.mxu0 %v6519_v59  ;;  %6648 = vmatpush1.bf16.msra.mxu1 %v6647_v60  ;;  %v1819_v59 = vld [vmem:[#allocation10 + $0x140] sm:$0xff]  ;;  %v1825_v2 = vld [vmem:[#allocation10 + $0x170] sm:$0xff] }
 0x4ee   :  { %6522 = vmatprep.subr.bf16.mxu0 %v6521_v3  ;;  %6650 = vmatprep.subr.bf16.mxu1 %v6649_v4  ;;  %v1823_v60 = vld [vmem:[#allocation10 + $0x160] sm:$0xff]  ;;  %v1828_v3 = vld [vmem:[#allocation10 + $0x188] sm:$0xff]  ;;  %v6667_v8 = vpack.c.bf16 %v1825_v2, %v1821_v1  ;;  %v1845_v40 = vld [vmem:[#allocation10 + $0x210] sm:$0xff] }
 0x4ef   :  { %1687 = vmatprep.mubr.f32.mxu0 %v1466_v12  ;;  %1764 = vmatprep.mubr.f32.mxu1 %v1466_v12  ;;  %v1832_v4 = vld [vmem:[#allocation10 + $0x1a8] sm:$0xff]  ;;  %v6539_v7 = vpack.c.bf16 %v1823_v60, %v1819_v59  ;;  %v6669_v12 = vpack.c.bf16 %v1834_v6, %v1830_v5  ;;  %v1851_v52 = vld [vmem:[#allocation10 + $0x240] sm:$0xff]  ;;  %v1853_v56 = vld [vmem:[#allocation10 + $0x250] sm:$0xff] }
 0x4f0   :  { %1688 = vmatmul.mubr.f32.gmra.mrb[12].mxu0 %v1465_v18  ;;  %1765 = vmatmul.mubr.f32.gmra.mrb[12].mxu1 %v1465_v18  ;;  %v6541_v11 = vpack.c.bf16 %v1832_v4, %v1828_v3  ;;  %v1838_v18 = vld [vmem:[#allocation10 + $0x1d8] sm:$0xff]  ;;  %v1864_v59 = vld [vmem:[#allocation10 + $0x2a8] sm:$0xff]  ;;  %v1859_v2 = vld [vmem:[#allocation10 + $0x280] sm:$0xff] }
 0x4f1   :  { %6524 = vmatpush1.bf16.msra.mxu0 %v6523_v13  ;;  %6652 = vmatpush1.bf16.msra.mxu1 %v6651_v14  ;;  %v1829_v13 = vld [vmem:[#allocation10 + $0x190] sm:$0xff]  ;;  %v1862_v60 = vld [vmem:[#allocation10 + $0x298] sm:$0xff]  ;;  %v1863_v3 = vld [vmem:[#allocation10 + $0x2a0] sm:$0xff] }
 0x4f2   :  { %6526 = vmatprep.subr.bf16.mxu0 %v6525_v19  ;;  %6654 = vmatprep.subr.bf16.mxu1 %v6653_v21  ;;  %v1833_v14 = vld [vmem:[#allocation10 + $0x1b0] sm:$0xff]  ;;  %v1842_v19 = vld [vmem:[#allocation10 + $0x1f8] sm:$0xff]  ;;  %v6543_v21 = vpack.c.bf16 %v1831_v10, %v1827_v9  ;;  %v1872_v9 = vld [vmem:[#allocation10 + $0x2e8] sm:$0xff] }
 0x4f3   :  { %v6671_v16 = vpack.c.bf16 %v1833_v14, %v1829_v13  ;;  %v6673_v25 = vpack.c.bf16 %v1842_v19, %v1838_v18  ;;  %v1861_v6 = vld [vmem:[#allocation10 + $0x290] sm:$0xff]  ;;  %v1870_v10 = vld [vmem:[#allocation10 + $0x2d8] sm:$0xff]  ;;  %v1867_v14 = vld [vmem:[#allocation10 + $0x2c0] sm:$0xff] }
 0x4f4   :  { %v1871_v15 = vld [vmem:[#allocation10 + $0x2e0] sm:$0xff]  ;;  %v1869_v19 = vld [vmem:[#allocation10 + $0x2d0] sm:$0xff] }
 0x4f5   :  { %6528 = vmatpush1.bf16.msra.mxu0 %v6527_v27  ;;  %6656 = vmatpush1.bf16.msra.mxu1 %v6655_v28  ;;  %v1841_v27 = vld [vmem:[#allocation10 + $0x1f0] sm:$0xff]  ;;  %v1844_v28 = vld [vmem:[#allocation10 + $0x208] sm:$0xff] }
 0x4f6   :  { %6530 = vmatprep.subr.bf16.mxu0 %v6529_v32  ;;  %6658 = vmatprep.subr.bf16.mxu1 %v6657_v34  ;;  %v1850_v32 = vld [vmem:[#allocation10 + $0x238] sm:$0xff]  ;;  %v6547_v34 = vpack.c.bf16 %v1839_v22, %v1835_v20  ;;  %v6675_v36 = vpack.c.bf16 %v1841_v27, %v1837_v26  ;;  %v6549_v38 = vpack.c.bf16 %v1848_v30, %v1844_v28  ;;  %v1880_v20 = vld [vmem:[#allocation10 + $0x328] sm:$0xff]  ;;  %v1875_v27 = vld [vmem:[#allocation10 + $0x300] sm:$0xff] }
 0x4f7   :  { %v6677_v39 = vpack.c.bf16 %v1850_v32, %v1846_v31  ;;  %v1878_v22 = vld [vmem:[#allocation10 + $0x318] sm:$0xff]  ;;  %v1879_v28 = vld [vmem:[#allocation10 + $0x320] sm:$0xff]  ;;  %v1877_v32 = vld [vmem:[#allocation10 + $0x310] sm:$0xff] }
 0x4f9   :  { %6532 = vmatpush1.bf16.msra.mxu0 %v6531_v41  ;;  %6660 = vmatpush1.bf16.msra.mxu1 %v6659_v42  ;;  %v1849_v41 = vld [vmem:[#allocation10 + $0x230] sm:$0xff]  ;;  %v1852_v42 = vld [vmem:[#allocation10 + $0x248] sm:$0xff] }
 0x4fa   :  { %6534 = vmatprep.subr.bf16.mxu0 %v6533_v45  ;;  %6662 = vmatprep.subr.bf16.mxu1 %v6661_v46  ;;  %v1858_v45 = vld [vmem:[#allocation10 + $0x278] sm:$0xff]  ;;  %v6551_v46 = vpack.c.bf16 %v1847_v29, %v1843_v37  ;;  %v6679_v49 = vpack.c.bf16 %v1849_v41, %v1845_v40  ;;  %v6553_v54 = vpack.c.bf16 %v1856_v43, %v1852_v42  ;;  %v1888_v37 = vld [vmem:[#allocation10 + $0x368] sm:$0xff]  ;;  %v1883_v41 = vld [vmem:[#allocation10 + $0x340] sm:$0xff] }
 0x4fb   :  { %v6681_v55 = vpack.c.bf16 %v1858_v45, %v1854_v44  ;;  %v1886_v29 = vld [vmem:[#allocation10 + $0x358] sm:$0xff]  ;;  %v1887_v42 = vld [vmem:[#allocation10 + $0x360] sm:$0xff]  ;;  %v1885_v45 = vld [vmem:[#allocation10 + $0x350] sm:$0xff] }
 0x4fd   :  { %6536 = vmatpush1.bf16.msra.mxu0 %v6535_v57  ;;  %6664 = vmatpush1.bf16.msra.mxu1 %v6663_v58  ;;  %v1857_v57 = vld [vmem:[#allocation10 + $0x270] sm:$0xff]  ;;  %v1860_v58 = vld [vmem:[#allocation10 + $0x288] sm:$0xff] }
 0x4fe   :  { %6538 = vmatprep.subr.bf16.mxu0 %v6537_v61  ;;  %6666 = vmatprep.subr.bf16.mxu1 %v6665_v62  ;;  %v1866_v61 = vld [vmem:[#allocation10 + $0x2b8] sm:$0xff]  ;;  %v6555_v62 = vpack.c.bf16 %v1855_v53, %v1851_v52  ;;  %v6683_v1 = vpack.c.bf16 %v1857_v57, %v1853_v56  ;;  %v6557_v4 = vpack.c.bf16 %v1864_v59, %v1860_v58  ;;  %v1896_v52 = vld [vmem:[#allocation10 + $0x3a8] sm:$0xff]  ;;  %v1891_v57 = vld [vmem:[#allocation10 + $0x380] sm:$0xff] }
 0x4ff   :  { %v6685_v5 = vpack.c.bf16 %v1866_v61, %v1862_v60  ;;  %v1894_v53 = vld [vmem:[#allocation10 + $0x398] sm:$0xff]  ;;  %v1895_v60 = vld [vmem:[#allocation10 + $0x3a0] sm:$0xff]  ;;  %v1893_v61 = vld [vmem:[#allocation10 + $0x390] sm:$0xff] }
 0x501   :  { %6540 = vmatpush1.bf16.msra.mxu0 %v6539_v7  ;;  %6668 = vmatpush1.bf16.msra.mxu1 %v6667_v8  ;;  %v1865_v7 = vld [vmem:[#allocation10 + $0x2b0] sm:$0xff]  ;;  %v1868_v8 = vld [vmem:[#allocation10 + $0x2c8] sm:$0xff] }
 0x502   :  { %6542 = vmatprep.subr.bf16.mxu0 %v6541_v11  ;;  %6670 = vmatprep.subr.bf16.mxu1 %v6669_v12  ;;  %v1874_v11 = vld [vmem:[#allocation10 + $0x2f8] sm:$0xff]  ;;  %v6559_v12 = vpack.c.bf16 %v1863_v3, %v1859_v2  ;;  %v6687_v13 = vpack.c.bf16 %v1865_v7, %v1861_v6  ;;  %v6561_v17 = vpack.c.bf16 %v1872_v9, %v1868_v8  ;;  %v1900_v3 = vld [vmem:[#allocation10 + $0x3c8] sm:$0xff]  ;;  %v1899_v8 = vld [vmem:[#allocation10 + $0x3c0] sm:$0xff] }
 0x503   :  { %v6689_v18 = vpack.c.bf16 %v1874_v11, %v1870_v10  ;;  %v1906_v7 = vld [vmem:[#allocation10 + $0x3f8] sm:$0xff]  ;;  %v1903_v9 = vld [vmem:[#allocation10 + $0x3e0] sm:$0xff] }
 0x504   :  { %v6579_v11 = vpack.c.bf16 %v1903_v9, %v1899_v8  ;;  %v1923_v8 = vld [vmem:[#allocation10 + $0x480] sm:$0xff] }
 0x505   :  { %6544 = vmatpush1.bf16.msra.mxu0 %v6543_v21  ;;  %6672 = vmatpush1.bf16.msra.mxu1 %v6671_v16  ;;  %v1873_v21 = vld [vmem:[#allocation10 + $0x2f0] sm:$0xff]  ;;  %v1876_v16 = vld [vmem:[#allocation10 + $0x308] sm:$0xff]  ;;  %v1927_v9 = vld [vmem:[#allocation10 + $0x4a0] sm:$0xff] }
 0x506   :  { %6546 = vmatprep.subr.bf16.mxu0 %v6545_v24  ;;  %6674 = vmatprep.subr.bf16.mxu1 %v6673_v25  ;;  %v1882_v24 = vld [vmem:[#allocation10 + $0x338] sm:$0xff]  ;;  %v6563_v25 = vpack.c.bf16 %v1871_v15, %v1867_v14  ;;  %v6691_v26 = vpack.c.bf16 %v1873_v21, %v1869_v19  ;;  %v6565_v30 = vpack.c.bf16 %v1880_v20, %v1876_v16  ;;  %v1908_v15 = vld [vmem:[#allocation10 + $0x408] sm:$0xff]  ;;  %v9268_v20 = vld [vmem:[%s9619_s17] sm:$0xf] }
 0x507   :  { %v6693_v31 = vpack.c.bf16 %v1882_v24, %v1878_v22  ;;  %v1914_v21 = vld [vmem:[#allocation10 + $0x438] sm:$0xff]  ;;  %v1600_v22 = vrot.slane %v9268_v20, %v9202_v48  ;;  %v1604_v24 = vrot.slane %v9268_v20, %v9206_v50 }
 0x509   :  { %6548 = vmatpush1.bf16.msra.mxu0 %v6547_v34  ;;  %6676 = vmatpush1.bf16.msra.mxu1 %v6675_v36  ;;  %v1881_v34 = vld [vmem:[#allocation10 + $0x330] sm:$0xff]  ;;  %v1884_v36 = vld [vmem:[#allocation10 + $0x348] sm:$0xff] }
 0x50a   :  { %6550 = vmatprep.subr.bf16.mxu0 %v6549_v38  ;;  %6678 = vmatprep.subr.bf16.mxu1 %v6677_v39  ;;  %v1890_v38 = vld [vmem:[#allocation10 + $0x378] sm:$0xff]  ;;  %v6567_v39 = vpack.c.bf16 %v1879_v28, %v1875_v27  ;;  %v6695_v40 = vpack.c.bf16 %v1881_v34, %v1877_v32  ;;  %v6569_v43 = vpack.c.bf16 %v1888_v37, %v1884_v36  ;;  %v1907_v28 = vld [vmem:[#allocation10 + $0x400] sm:$0xff]  ;;  %v1909_v36 = vld [vmem:[#allocation10 + $0x410] sm:$0xff] }
 0x50b   :  { %v6697_v44 = vpack.c.bf16 %v1890_v38, %v1886_v29  ;;  %v1913_v37 = vld [vmem:[#allocation10 + $0x430] sm:$0xff]  ;;  %v1916_v29 = vld [vmem:[#allocation10 + $0x448] sm:$0xff] }
 0x50d   :  { %6552 = vmatpush1.bf16.msra.mxu0 %v6551_v46  ;;  %6680 = vmatpush1.bf16.msra.mxu1 %v6679_v49  ;;  %v1889_v46 = vld [vmem:[#allocation10 + $0x370] sm:$0xff]  ;;  %v1892_v49 = vld [vmem:[#allocation10 + $0x388] sm:$0xff] }
 0x50e   :  { %6554 = vmatprep.subr.bf16.mxu0 %v6553_v54  ;;  %6682 = vmatprep.subr.bf16.mxu1 %v6681_v55  ;;  %v1898_v54 = vld [vmem:[#allocation10 + $0x3b8] sm:$0xff]  ;;  %v6571_v55 = vpack.c.bf16 %v1887_v42, %v1883_v41  ;;  %v6699_v56 = vpack.c.bf16 %v1889_v46, %v1885_v45  ;;  %v6573_v58 = vpack.c.bf16 %v1896_v52, %v1892_v49  ;;  %v1915_v49 = vld [vmem:[#allocation10 + $0x440] sm:$0xff] }
 0x50f   :  { %v6701_v59 = vpack.c.bf16 %v1898_v54, %v1894_v53  ;;  %v1922_v41 = vld [vmem:[#allocation10 + $0x478] sm:$0xff]  ;;  %v6711_v46 = vpack.c.bf16 %v1913_v37, %v1909_v36  ;;  %v1944_v36 = vld [vmem:[#allocation10 + $0x528] sm:$0xff] }
 0x510   :  { %v1942_v37 = vld [vmem:[#allocation10 + $0x518] sm:$0xff] }
 0x511   :  { %6556 = vmatpush1.bf16.msra.mxu0 %v6555_v62  ;;  %6684 = vmatpush1.bf16.msra.mxu1 %v6683_v1  ;;  %v1897_v62 = vld [vmem:[#allocation10 + $0x3b0] sm:$0xff]  ;;  %v6575_v1 = vpack.c.bf16 %v1895_v60, %v1891_v57 }
 0x512   :  { %6558 = vmatprep.subr.bf16.mxu0 %v6557_v4  ;;  %6686 = vmatprep.subr.bf16.mxu1 %v6685_v5  ;;  %v6703_v2 = vpack.c.bf16 %v1897_v62, %v1893_v61  ;;  %v1904_v4 = vld [vmem:[#allocation10 + $0x3e8] sm:$0xff]  ;;  %v1902_v5 = vld [vmem:[#allocation10 + $0x3d8] sm:$0xff]  ;;  %v1921_v60 = vld [vmem:[#allocation10 + $0x470] sm:$0xff] }
 0x513   :  { %v6577_v6 = vpack.c.bf16 %v1904_v4, %v1900_v3  ;;  %v6705_v10 = vpack.c.bf16 %v1906_v7, %v1902_v5  ;;  %v1924_v62 = vld [vmem:[#allocation10 + $0x488] sm:$0xff]  ;;  %v1926_v3 = vld [vmem:[#allocation10 + $0x498] sm:$0xff] }
 0x514   :  { %v1930_v4 = vld [vmem:[#allocation10 + $0x4b8] sm:$0xff] }
 0x515   :  { %6560 = vmatpush1.bf16.msra.mxu0 %v6559_v12  ;;  %6688 = vmatpush1.bf16.msra.mxu1 %v6687_v13  ;;  %v1901_v12 = vld [vmem:[#allocation10 + $0x3d0] sm:$0xff] }
 0x516   :  { %6562 = vmatprep.subr.bf16.mxu0 %v6561_v17  ;;  %6690 = vmatprep.subr.bf16.mxu1 %v6689_v18  ;;  %v1905_v13 = vld [vmem:[#allocation10 + $0x3f0] sm:$0xff]  ;;  %v1912_v17 = vld [vmem:[#allocation10 + $0x428] sm:$0xff]  ;;  %v1910_v18 = vld [vmem:[#allocation10 + $0x418] sm:$0xff] }
 0x517   :  { %v6707_v14 = vpack.c.bf16 %v1905_v13, %v1901_v12  ;;  %v6581_v19 = vpack.c.bf16 %v1912_v17, %v1908_v15  ;;  %v6709_v16 = vpack.c.bf16 %v1914_v21, %v1910_v18  ;;  %v1929_v12 = vld [vmem:[#allocation10 + $0x4b0] sm:$0xff]  ;;  %v1932_v13 = vld [vmem:[#allocation10 + $0x4c8] sm:$0xff]  ;;  %v6717_v15 = vpack.c.bf16 %v1930_v4, %v1926_v3  ;;  %v1934_v18 = vld [vmem:[#allocation10 + $0x4d8] sm:$0xff] }
 0x518   :  { %v1936_v17 = vld [vmem:[#allocation10 + $0x4e8] sm:$0xff]  ;;  %v1958_v4 = vld [vmem:[#allocation10 + $0x598] sm:$0xff] }
 0x519   :  { %6564 = vmatpush1.bf16.msra.mxu0 %v6563_v25  ;;  %6692 = vmatpush1.bf16.msra.mxu1 %v6691_v26  ;;  %v9275_v25 = vsub.s32 3, %v9199_v47  ;;  %v1960_v3 = vld [vmem:[#allocation10 + $0x5a8] sm:$0xff] }
 0x51a   :  { %6566 = vmatprep.subr.bf16.mxu0 %v6565_v30  ;;  %6694 = vmatprep.subr.bf16.mxu1 %v6693_v31  ;;  %v1911_v30 = vld [vmem:[#allocation10 + $0x420] sm:$0xff] }
 0x51b   :  { %v9281_v42 = vrot.slane %v9268_v20, %v9275_v25  ;;  %v6583_v45 = vpack.c.bf16 %v1911_v30, %v1907_v28  ;;  %v6593_v28 = vpack.c.bf16 %v1936_v17, %v1932_v13  ;;  %v1961_v13 = vld [vmem:[#allocation10 + $0x5b0] sm:$0xff]  ;;  %v1966_v17 = vld [vmem:[#allocation10 + $0x5d8] sm:$0xff] }
 0x51d   :  { %6568 = vmatpush1.bf16.msra.mxu0 %v6567_v39  ;;  %6696 = vmatpush1.bf16.msra.mxu1 %v6695_v40  ;;  %v1920_v39 = vld [vmem:[#allocation10 + $0x468] sm:$0xff]  ;;  %v1918_v40 = vld [vmem:[#allocation10 + $0x458] sm:$0xff] }
 0x51e   :  { %6570 = vmatprep.subr.bf16.mxu0 %v6569_v43  ;;  %6698 = vmatprep.subr.bf16.mxu1 %v6697_v44  ;;  %v6713_v57 = vpack.c.bf16 %v1922_v41, %v1918_v40  ;;  %v1939_v40 = vld [vmem:[#allocation10 + $0x500] sm:$0xff] }
 0x51f   :  { %v1943_v41 = vld [vmem:[#allocation10 + $0x520] sm:$0xff] }
 0x521   :  { %6572 = vmatpush1.bf16.msra.mxu0 %v6571_v55  ;;  %6700 = vmatpush1.bf16.msra.mxu1 %v6699_v56  ;;  %v6585_v56 = vpack.c.bf16 %v1920_v39, %v1916_v29  ;;  %v1946_v29 = vld [vmem:[#allocation10 + $0x538] sm:$0xff] }
 0x522   :  { %6574 = vmatprep.subr.bf16.mxu0 %v6573_v58  ;;  %6702 = vmatprep.subr.bf16.mxu1 %v6701_v59  ;;  %v1919_v58 = vld [vmem:[#allocation10 + $0x460] sm:$0xff]  ;;  %v1917_v59 = vld [vmem:[#allocation10 + $0x450] sm:$0xff] }
 0x523   :  { %v6715_v7 = vpack.c.bf16 %v1921_v60, %v1917_v59  ;;  %v1951_v59 = vld [vmem:[#allocation10 + $0x560] sm:$0xff] }
 0x525   :  { %6576 = vmatpush1.bf16.msra.mxu0 %v6575_v1  ;;  %6704 = vmatpush1.bf16.msra.mxu1 %v6703_v2  ;;  %v1928_v2 = vld [vmem:[#allocation10 + $0x4a8] sm:$0xff] }
 0x526   :  { %6578 = vmatprep.subr.bf16.mxu0 %v6577_v6  ;;  %6706 = vmatprep.subr.bf16.mxu1 %v6705_v10  ;;  %v6587_v6 = vpack.c.bf16 %v1919_v58, %v1915_v49  ;;  %v1948_v49 = vld [vmem:[#allocation10 + $0x548] sm:$0xff]  ;;  %v1947_v58 = vld [vmem:[#allocation10 + $0x540] sm:$0xff] }
 0x529   :  { %6580 = vmatpush1.bf16.msra.mxu0 %v6579_v11  ;;  %6708 = vmatpush1.bf16.msra.mxu1 %v6707_v14  ;;  %v1925_v11 = vld [vmem:[#allocation10 + $0x490] sm:$0xff]  ;;  %v6589_v14 = vpack.c.bf16 %v1928_v2, %v1924_v62  ;;  %v1956_v2 = vld [vmem:[#allocation10 + $0x588] sm:$0xff] }
 0x52a   :  { %6582 = vmatprep.subr.bf16.mxu0 %v6581_v19  ;;  %6710 = vmatprep.subr.bf16.mxu1 %v6709_v16  ;;  %v1938_v19 = vld [vmem:[#allocation10 + $0x4f8] sm:$0xff]  ;;  %v6591_v16 = vpack.c.bf16 %v1927_v9, %v1923_v8  ;;  %v1949_v62 = vld [vmem:[#allocation10 + $0x550] sm:$0xff]  ;;  %v1955_v8 = vld [vmem:[#allocation10 + $0x580] sm:$0xff] }
 0x52b   :  { %v6721_v30 = vpack.c.bf16 %v1938_v19, %v1934_v18  ;;  %v1959_v9 = vld [vmem:[#allocation10 + $0x5a0] sm:$0xff]  ;;  %v1970_v18 = vld [vmem:[#allocation10 + $0x5f8] sm:$0xff] }
 0x52c   :  { %v6607_v19 = vpack.c.bf16 %v1959_v9, %v1955_v8 }
 0x5bf   :  { %v1683_v26 = vpop.f32.mrb[10].mxu0  ;;  %v9277_v27 = vpop.f32.mrb[10].mxu1 }
 0x5c0   :  { %v1684_v31 = vadd.f32 %v1683_v26, %v1600_v22  ;;  %v1685_v32 = vpop.f32.mrb[11].mxu0  ;;  %v1762_v34 = vpop.f32.mrb[11].mxu1  ;;  %v1935_v26 = vld [vmem:[#allocation10 + $0x4e0] sm:$0xff] }
 0x5c1   :  { %v1686_v38 = vadd.f32 %v1685_v32, %v1604_v24  ;;  %v1763_v1 = vadd.f32 %v1762_v34, %v9281_v42  ;;  %v1937_v32 = vld [vmem:[#allocation10 + $0x4f0] sm:$0xff]  ;;  %v1940_v34 = vld [vmem:[#allocation10 + $0x508] sm:$0xff] }
 0x5c2   :  { %v1771_v52 = vmax.f32 %v1684_v31, 0.0  ;;  %v1933_v31 = vld [vmem:[#allocation10 + $0x4d0] sm:$0xff] }
 0x5c3   :  { %v1772_v47 = vmax.f32 %v1686_v38, 0.0  ;;  %v1689_v43 = vpop.f32.mrb[12].mxu0  ;;  %v9283_v44 = vpop.f32.mrb[12].mxu1  ;;  %v1774_v21 = vmax.f32 %v1763_v1, 0.0  ;;  %v6723_v39 = vpack.c.bf16 %v1937_v32, %v1933_v31  ;;  %v1953_v1 = vld [vmem:[#allocation10 + $0x570] sm:$0xff]  ;;  %v1972_v31 = vld [vmem:[#allocation10 + $0x608] sm:$0xff] }
 0x5c4   :  { %v1690_v53 = vadd.f32 %v1689_v43, %v1600_v22  ;;  %v1691_v54 = vpop.f32.mrb[13].mxu0  ;;  %v9285_v55 = vpop.f32.mrb[13].mxu1  ;;  %v6719_v22 = vpack.c.bf16 %v1929_v12, %v1925_v11  ;;  %v6725_v43 = vpack.c.bf16 %v1946_v29, %v1942_v37  ;;  %v1957_v12 = vld [vmem:[#allocation10 + $0x590] sm:$0xff]  ;;  %v1976_v32 = vld [vmem:[#allocation10 + $0x628] sm:$0xff] }
 0x5c5   :  { %v1692_v61 = vadd.f32 %v1691_v54, %v1604_v24  ;;  %2121 = vmatprep.mubr.f32.mxu0 %v1772_v47  ;;  %2275 = vmatprep.mubr.f32.mxu1 %v1772_v47  ;;  %v1931_v24 = vld [vmem:[#allocation10 + $0x4c0] sm:$0xff]  ;;  %v6597_v47 = vpack.c.bf16 %v1944_v36, %v1940_v34  ;;  %v1954_v54 = vld [vmem:[#allocation10 + $0x578] sm:$0xff] }
 0x5c6   :  { %2122 = vmatmul.mubr.f32.vlgmr.msra.gmra.mrb[14].mxu0 %v1771_v52  ;;  %2276 = vmatmul.mubr.f32.vlgmr.msra.gmra.mrb[14].mxu1 %v1771_v52  ;;  %v1775_v10 = vmax.f32 %v1690_v53, 0.0  ;;  %v6595_v38 = vpack.c.bf16 %v1935_v26, %v1931_v24  ;;  %v1952_v52 = vld [vmem:[#allocation10 + $0x568] sm:$0xff]  ;;  %v1950_v53 = vld [vmem:[#allocation10 + $0x558] sm:$0xff]  ;;  %v6737_v26 = vpack.c.bf16 %v1970_v18, %v1966_v17 }
 0x5c7   :  { %v1776_v5 = vmax.f32 %v1692_v61, 0.0  ;;  %6584 = vmatpush1.bf16.msra.mxu0 %v6583_v45  ;;  %6712 = vmatpush1.bf16.msra.mxu1 %v6711_v46  ;;  %v1941_v45 = vld [vmem:[#allocation10 + $0x510] sm:$0xff]  ;;  %v6601_v60 = vpack.c.bf16 %v1952_v52, %v1948_v49  ;;  %v6729_v61 = vpack.c.bf16 %v1954_v54, %v1950_v53  ;;  %v1974_v34 = vld [vmem:[#allocation10 + $0x618] sm:$0xff] }
 0x5c8   :  { %6586 = vmatprep.subr.bf16.mxu0 %v6585_v56  ;;  %6714 = vmatprep.subr.bf16.mxu1 %v6713_v57  ;;  %v1945_v46 = vld [vmem:[#allocation10 + $0x530] sm:$0xff]  ;;  %v6599_v56 = vpack.c.bf16 %v1943_v41, %v1939_v40  ;;  %v1978_v36 = vld [vmem:[#allocation10 + $0x638] sm:$0xff]  ;;  %v6613_v40 = vpack.c.bf16 %v1976_v32, %v1972_v31 }
 0x5c9   :  { %2127 = vmatprep.mubr.f32.mxu0 %v1776_v5  ;;  %2281 = vmatprep.mubr.f32.mxu1 %v1776_v5  ;;  %v6727_v57 = vpack.c.bf16 %v1945_v46, %v1941_v45  ;;  %v1962_v5 = vld [vmem:[#allocation10 + $0x5b8] sm:$0xff]  ;;  %v6741_v41 = vpack.c.bf16 %v1978_v36, %v1974_v34  ;;  %v1980_v45 = vld [vmem:[#allocation10 + $0x648] sm:$0xff] }
 0x5ca   :  { %2128 = vmatmul.mubr.f32.gmra.mrb[16].mxu0 %v1775_v10  ;;  %2282 = vmatmul.mubr.f32.gmra.mrb[16].mxu1 %v1775_v10  ;;  %v6605_v10 = vpack.c.bf16 %v1960_v3, %v1956_v2  ;;  %v6733_v11 = vpack.c.bf16 %v1962_v5, %v1958_v4  ;;  %v1984_v46 = vld [vmem:[#allocation10 + $0x668] sm:$0xff]  ;;  %v1982_v49 = vld [vmem:[#allocation10 + $0x658] sm:$0xff] }
 0x5cb   :  { %6588 = vmatpush1.bf16.msra.mxu0 %v6587_v6  ;;  %6716 = vmatpush1.bf16.msra.mxu1 %v6715_v7  ;;  %v6603_v6 = vpack.c.bf16 %v1951_v59, %v1947_v58  ;;  %v6731_v7 = vpack.c.bf16 %v1953_v1, %v1949_v62  ;;  %v1986_v52 = vld [vmem:[#allocation10 + $0x678] sm:$0xff]  ;;  %v6617_v58 = vpack.c.bf16 %v1984_v46, %v1980_v45  ;;  %v1988_v62 = vld [vmem:[#allocation10 + $0x688] sm:$0xff] }
 0x5cc   :  { %2198 = vmatprep.mubr.f32.mxu0 %v1774_v21  ;;  %2352 = vmatprep.mubr.f32.mxu1 %v1774_v21  ;;  %v6735_v21 = vpack.c.bf16 %v1961_v13, %v1957_v12  ;;  %v6745_v59 = vpack.c.bf16 %v1986_v52, %v1982_v49  ;;  %v1992_v1 = vld [vmem:[#allocation10 + $0x6a8] sm:$0xff]  ;;  %v1990_v2 = vld [vmem:[#allocation10 + $0x698] sm:$0xff] }
 0x5cd   :  { %6590 = vmatprep.subr.bf16.mxu0 %v6589_v14  ;;  %6718 = vmatprep.subr.bf16.mxu1 %v6717_v15  ;;  %v1964_v14 = vld [vmem:[#allocation10 + $0x5c8] sm:$0xff]  ;;  %v1994_v3 = vld [vmem:[#allocation10 + $0x6b8] sm:$0xff]  ;;  %v6621_v8 = vpack.c.bf16 %v1992_v1, %v1988_v62 }
 0x5ce   :  { %v1968_v15 = vld [vmem:[#allocation10 + $0x5e8] sm:$0xff]  ;;  %v6749_v9 = vpack.c.bf16 %v1994_v3, %v1990_v2  ;;  %v2006_v31 = vld [vmem:[#allocation10 + $0x718] sm:$0xff] }
 0x5cf   :  { %6592 = vmatpush1.bf16.msra.mxu0 %v6591_v16  ;;  %6720 = vmatpush1.bf16.msra.mxu1 %v6719_v22  ;;  %v1963_v16 = vld [vmem:[#allocation10 + $0x5c0] sm:$0xff]  ;;  %v6609_v24 = vpack.c.bf16 %v1968_v15, %v1964_v14  ;;  %v1996_v12 = vld [vmem:[#allocation10 + $0x6c8] sm:$0xff]  ;;  %v1998_v14 = vld [vmem:[#allocation10 + $0x6d8] sm:$0xff] }
 0x5d0   :  { %6594 = vmatprep.subr.bf16.mxu0 %v6593_v28  ;;  %6722 = vmatprep.subr.bf16.mxu1 %v6721_v30  ;;  %v1967_v22 = vld [vmem:[#allocation10 + $0x5e0] sm:$0xff]  ;;  %v1965_v28 = vld [vmem:[#allocation10 + $0x5d0] sm:$0xff]  ;;  %v2000_v13 = vld [vmem:[#allocation10 + $0x6e8] sm:$0xff] }
 0x5d1   :  { %v1969_v30 = vld [vmem:[#allocation10 + $0x5f0] sm:$0xff]  ;;  %v6611_v37 = vpack.c.bf16 %v1967_v22, %v1963_v16  ;;  %v2002_v15 = vld [vmem:[#allocation10 + $0x6f8] sm:$0xff]  ;;  %v6625_v16 = vpack.c.bf16 %v2000_v13, %v1996_v12 }
 0x5d2   :  { %v6739_v29 = vpack.c.bf16 %v1969_v30, %v1965_v28  ;;  %v6753_v22 = vpack.c.bf16 %v2002_v15, %v1998_v14  ;;  %v2004_v28 = vld [vmem:[#allocation10 + $0x708] sm:$0xff]  ;;  %v2010_v32 = vld [vmem:[#allocation10 + $0x738] sm:$0xff] }
 0x5d3   :  { %6596 = vmatpush1.bf16.msra.mxu0 %v6595_v38  ;;  %6724 = vmatpush1.bf16.msra.mxu1 %v6723_v39  ;;  %v1971_v38 = vld [vmem:[#allocation10 + $0x600] sm:$0xff]  ;;  %v2008_v30 = vld [vmem:[#allocation10 + $0x728] sm:$0xff]  ;;  %v2014_v45 = vld [vmem:[#allocation10 + $0x758] sm:$0xff] }
 0x5d4   :  { %6598 = vmatprep.subr.bf16.mxu0 %v6597_v47  ;;  %6726 = vmatprep.subr.bf16.mxu1 %v6725_v43  ;;  %v1975_v39 = vld [vmem:[#allocation10 + $0x620] sm:$0xff]  ;;  %v1973_v47 = vld [vmem:[#allocation10 + $0x610] sm:$0xff]  ;;  %v2018_v46 = vld [vmem:[#allocation10 + $0x778] sm:$0xff] }
 0x5d5   :  { %v1977_v43 = vld [vmem:[#allocation10 + $0x630] sm:$0xff]  ;;  %v6615_v53 = vpack.c.bf16 %v1975_v39, %v1971_v38  ;;  %v6629_v38 = vpack.c.bf16 %v2008_v30, %v2004_v28  ;;  %v6757_v39 = vpack.c.bf16 %v2010_v32, %v2006_v31  ;;  %v2022_v62 = vld [vmem:[#allocation10 + $0x798] sm:$0xff] }
 0x5d6   :  { %v6743_v54 = vpack.c.bf16 %v1977_v43, %v1973_v47  ;;  %v2012_v47 = vld [vmem:[#allocation10 + $0x748] sm:$0xff]  ;;  %v2026_v1 = vld [vmem:[#allocation10 + $0x7b8] sm:$0xff] }
 0x5d7   :  { %6600 = vmatpush1.bf16.msra.mxu0 %v6599_v56  ;;  %6728 = vmatpush1.bf16.msra.mxu1 %v6727_v57  ;;  %v1979_v56 = vld [vmem:[#allocation10 + $0x640] sm:$0xff]  ;;  %v2016_v43 = vld [vmem:[#allocation10 + $0x768] sm:$0xff]  ;;  %v2030_v12 = vld [vmem:[#allocation10 + $0x7d8] sm:$0xff] }
 0x5d8   :  { %6602 = vmatprep.subr.bf16.mxu0 %v6601_v60  ;;  %6730 = vmatprep.subr.bf16.mxu1 %v6729_v61  ;;  %v1983_v57 = vld [vmem:[#allocation10 + $0x660] sm:$0xff]  ;;  %v1981_v60 = vld [vmem:[#allocation10 + $0x650] sm:$0xff]  ;;  %v2034_v13 = vld [vmem:[#allocation10 + $0x7f8] sm:$0xff] }
 0x5d9   :  { %v1985_v61 = vld [vmem:[#allocation10 + $0x670] sm:$0xff]  ;;  %v6619_v4 = vpack.c.bf16 %v1983_v57, %v1979_v56  ;;  %v6633_v56 = vpack.c.bf16 %v2016_v43, %v2012_v47  ;;  %v6761_v57 = vpack.c.bf16 %v2018_v46, %v2014_v45  ;;  %v2368_v30 = vld [vmem:[#allocation13 + $0x18] sm:$0xff] }
 0x5da   :  { %v6747_v5 = vpack.c.bf16 %v1985_v61, %v1981_v60  ;;  %v2020_v60 = vld [vmem:[#allocation10 + $0x788] sm:$0xff]  ;;  %v2372_v31 = vld [vmem:[#allocation13 + $0x38] sm:$0xff] }
 0x5db   :  { %6604 = vmatpush1.bf16.msra.mxu0 %v6603_v6  ;;  %6732 = vmatpush1.bf16.msra.mxu1 %v6731_v7  ;;  %v1987_v6 = vld [vmem:[#allocation10 + $0x680] sm:$0xff]  ;;  %v2024_v61 = vld [vmem:[#allocation10 + $0x7a8] sm:$0xff] }
 0x5dc   :  { %6606 = vmatprep.subr.bf16.mxu0 %v6605_v10  ;;  %6734 = vmatprep.subr.bf16.mxu1 %v6733_v11  ;;  %v1991_v7 = vld [vmem:[#allocation10 + $0x6a0] sm:$0xff]  ;;  %v1989_v10 = vld [vmem:[#allocation10 + $0x690] sm:$0xff] }
 0x5dd   :  { %v1993_v11 = vld [vmem:[#allocation10 + $0x6b0] sm:$0xff]  ;;  %v6623_v17 = vpack.c.bf16 %v1991_v7, %v1987_v6  ;;  %v6637_v6 = vpack.c.bf16 %v2024_v61, %v2020_v60  ;;  %v6765_v7 = vpack.c.bf16 %v2026_v1, %v2022_v62  ;;  %v2376_v45 = vld [vmem:[#allocation13 + $0x58] sm:$0xff] }
 0x5de   :  { %v6751_v18 = vpack.c.bf16 %v1993_v11, %v1989_v10  ;;  %v2028_v10 = vld [vmem:[#allocation10 + $0x7c8] sm:$0xff]  ;;  %v2380_v46 = vld [vmem:[#allocation13 + $0x78] sm:$0xff] }
 0x5df   :  { %6608 = vmatpush1.bf16.msra.mxu0 %v6607_v19  ;;  %6736 = vmatpush1.bf16.msra.mxu1 %v6735_v21  ;;  %v1995_v19 = vld [vmem:[#allocation10 + $0x6c0] sm:$0xff]  ;;  %v2032_v11 = vld [vmem:[#allocation10 + $0x7e8] sm:$0xff] }
 0x5e0   :  { %6610 = vmatprep.subr.bf16.mxu0 %v6609_v24  ;;  %6738 = vmatprep.subr.bf16.mxu1 %v6737_v26  ;;  %v1999_v21 = vld [vmem:[#allocation10 + $0x6e0] sm:$0xff]  ;;  %v1997_v24 = vld [vmem:[#allocation10 + $0x6d0] sm:$0xff] }
 0x5e1   :  { %v2001_v26 = vld [vmem:[#allocation10 + $0x6f0] sm:$0xff]  ;;  %v6627_v34 = vpack.c.bf16 %v1999_v21, %v1995_v19  ;;  %v1608_v19 = vrot.slane %v9268_v20, %v9211_v63  ;;  %v6641_v21 = vpack.c.bf16 %v2032_v11, %v2028_v10  ;;  %v6837_v20 = vpack.c.bf16 %v2372_v31, %v2368_v30  ;;  %v2384_v62 = vld [vmem:[#allocation13 + $0x98] sm:$0xff] }
 0x5e2   :  { %v6755_v36 = vpack.c.bf16 %v2001_v26, %v1997_v24  ;;  %v2033_v24 = vld [vmem:[#allocation10 + $0x7f0] sm:$0xff]  ;;  %v2388_v1 = vld [vmem:[#allocation13 + $0xb8] sm:$0xff] }
 0x5e3   :  { %6612 = vmatpush1.bf16.msra.mxu0 %v6611_v37  ;;  %6740 = vmatpush1.bf16.msra.mxu1 %v6739_v29  ;;  %v2003_v37 = vld [vmem:[#allocation10 + $0x700] sm:$0xff]  ;;  %v2366_v26 = vld [vmem:[#allocation13 + $0x8] sm:$0xff] }
 0x5e4   :  { %6614 = vmatprep.subr.bf16.mxu0 %v6613_v40  ;;  %6742 = vmatprep.subr.bf16.mxu1 %v6741_v41  ;;  %v2007_v29 = vld [vmem:[#allocation10 + $0x720] sm:$0xff]  ;;  %v2005_v40 = vld [vmem:[#allocation10 + $0x710] sm:$0xff] }
 0x5e5   :  { %v2009_v41 = vld [vmem:[#allocation10 + $0x730] sm:$0xff]  ;;  %v6631_v49 = vpack.c.bf16 %v2007_v29, %v2003_v37  ;;  %v2365_v29 = vld [vmem:[#allocation13] sm:$0xff]  ;;  %v2404_v30 = vld [vmem:[#allocation13 + $0x138] sm:$0xff] }
 0x5e6   :  { %v6759_v52 = vpack.c.bf16 %v2009_v41, %v2005_v40  ;;  %v2370_v28 = vld [vmem:[#allocation13 + $0x28] sm:$0xff]  ;;  %v2367_v40 = vld [vmem:[#allocation13 + $0x10] sm:$0xff] }
 0x5e7   :  { %6616 = vmatpush1.bf16.msra.mxu0 %v6615_v53  ;;  %6744 = vmatpush1.bf16.msra.mxu1 %v6743_v54  ;;  %v2011_v53 = vld [vmem:[#allocation10 + $0x740] sm:$0xff]  ;;  %v6773_v37 = vpack.c.bf16 %v2370_v28, %v2366_v26  ;;  %v2371_v41 = vld [vmem:[#allocation13 + $0x30] sm:$0xff]  ;;  %v2374_v47 = vld [vmem:[#allocation13 + $0x48] sm:$0xff] }
 0x5e8   :  { %6618 = vmatprep.subr.bf16.mxu0 %v6617_v58  ;;  %6746 = vmatprep.subr.bf16.mxu1 %v6745_v59  ;;  %v2015_v54 = vld [vmem:[#allocation10 + $0x760] sm:$0xff]  ;;  %v2013_v58 = vld [vmem:[#allocation10 + $0x750] sm:$0xff] }
 0x5e9   :  { %v2017_v59 = vld [vmem:[#allocation10 + $0x770] sm:$0xff]  ;;  %v6635_v2 = vpack.c.bf16 %v2015_v54, %v2011_v53  ;;  %v6839_v53 = vpack.c.bf16 %v2371_v41, %v2367_v40  ;;  %v2373_v54 = vld [vmem:[#allocation13 + $0x40] sm:$0xff]  ;;  %v2400_v28 = vld [vmem:[#allocation13 + $0x118] sm:$0xff] }
 0x5ea   :  { %v6763_v3 = vpack.c.bf16 %v2017_v59, %v2013_v58  ;;  %v2378_v43 = vld [vmem:[#allocation13 + $0x68] sm:$0xff]  ;;  %v2379_v59 = vld [vmem:[#allocation13 + $0x70] sm:$0xff]  ;;  %v2408_v40 = vld [vmem:[#allocation13 + $0x158] sm:$0xff] }
 0x5eb   :  { %6620 = vmatpush1.bf16.msra.mxu0 %v6619_v4  ;;  %6748 = vmatpush1.bf16.msra.mxu1 %v6747_v5  ;;  %v2019_v4 = vld [vmem:[#allocation10 + $0x780] sm:$0xff]  ;;  %v6777_v58 = vpack.c.bf16 %v2378_v43, %v2374_v47  ;;  %v2382_v60 = vld [vmem:[#allocation13 + $0x88] sm:$0xff] }
 0x5ec   :  { %6622 = vmatprep.subr.bf16.mxu0 %v6621_v8  ;;  %6750 = vmatprep.subr.bf16.mxu1 %v6749_v9  ;;  %v2023_v5 = vld [vmem:[#allocation10 + $0x7a0] sm:$0xff]  ;;  %v2021_v8 = vld [vmem:[#allocation10 + $0x790] sm:$0xff] }
 0x5ed   :  { %v2025_v9 = vld [vmem:[#allocation10 + $0x7b0] sm:$0xff]  ;;  %v6639_v14 = vpack.c.bf16 %v2023_v5, %v2019_v4  ;;  %v2381_v4 = vld [vmem:[#allocation13 + $0x80] sm:$0xff]  ;;  %v2412_v41 = vld [vmem:[#allocation13 + $0x178] sm:$0xff] }
 0x5ee   :  { %v6767_v15 = vpack.c.bf16 %v2025_v9, %v2021_v8  ;;  %v2386_v61 = vld [vmem:[#allocation13 + $0xa8] sm:$0xff]  ;;  %v2385_v5 = vld [vmem:[#allocation13 + $0xa0] sm:$0xff]  ;;  %v2383_v8 = vld [vmem:[#allocation13 + $0x90] sm:$0xff] }
 0x5ef   :  { %6624 = vmatpush1.bf16.msra.mxu0 %v6623_v17  ;;  %6752 = vmatpush1.bf16.msra.mxu1 %v6751_v18  ;;  %v2027_v17 = vld [vmem:[#allocation10 + $0x7c0] sm:$0xff]  ;;  %v2387_v9 = vld [vmem:[#allocation13 + $0xb0] sm:$0xff]  ;;  %v2390_v10 = vld [vmem:[#allocation13 + $0xc8] sm:$0xff] }
 0x5f0   :  { %6626 = vmatprep.subr.bf16.mxu0 %v6625_v16  ;;  %6754 = vmatprep.subr.bf16.mxu1 %v6753_v22  ;;  %v2031_v18 = vld [vmem:[#allocation10 + $0x7e0] sm:$0xff]  ;;  %v6769_v16 = vpack.c.bf16 %v2034_v13, %v2030_v12  ;;  %v2029_v22 = vld [vmem:[#allocation10 + $0x7d0] sm:$0xff] }
 0x5f1   :  { %v6643_v32 = vpack.c.bf16 %v2031_v18, %v2027_v17  ;;  %v2394_v11 = vld [vmem:[#allocation13 + $0xe8] sm:$0xff]  ;;  %v2392_v12 = vld [vmem:[#allocation13 + $0xd8] sm:$0xff]  ;;  %v2389_v17 = vld [vmem:[#allocation13 + $0xc0] sm:$0xff] }
 0x5f2   :  { %v2396_v13 = vld [vmem:[#allocation13 + $0xf8] sm:$0xff]  ;;  %v2393_v18 = vld [vmem:[#allocation13 + $0xe0] sm:$0xff]  ;;  %v2402_v26 = vld [vmem:[#allocation13 + $0x128] sm:$0xff] }
 0x5f3   :  { %6628 = vmatpush1.bf16.msra.mxu0 %v6627_v34  ;;  %6756 = vmatpush1.bf16.msra.mxu1 %v6755_v36  ;;  %v6771_v34 = vpack.c.bf16 %v2033_v24, %v2029_v22  ;;  %v1761_v36 = vadd.f32 %v9277_v27, %v1608_v19  ;;  %v1767_v27 = vadd.f32 %v9283_v44, %v1608_v19  ;;  %v2395_v22 = vld [vmem:[#allocation13 + $0xf0] sm:$0xff]  ;;  %v2398_v24 = vld [vmem:[#allocation13 + $0x108] sm:$0xff] }
 0x5f4   :  { %6630 = vmatprep.subr.bf16.mxu0 %v6629_v38  ;;  %6758 = vmatprep.subr.bf16.mxu1 %v6757_v39  ;;  %v2369_v38 = vld [vmem:[#allocation13 + $0x20] sm:$0xff]  ;;  %v1769_v39 = vadd.f32 %v9285_v55, %v9281_v42  ;;  %v6841_v42 = vpack.c.bf16 %v2380_v46, %v2376_v45  ;;  %v2375_v55 = vld [vmem:[#allocation13 + $0x50] sm:$0xff]  ;;  %v6785_v19 = vpack.c.bf16 %v2394_v11, %v2390_v10 }
 0x5f5   :  { %v1777_v44 = vmax.f32 %v1767_v27, 0.0  ;;  %v6787_v31 = vpack.c.bf16 %v2393_v18, %v2389_v17  ;;  %v2405_v45 = vld [vmem:[#allocation13 + $0x140] sm:$0xff]  ;;  %v6857_v27 = vpack.c.bf16 %v2412_v41, %v2408_v40  ;;  %v2432_v17 = vld [vmem:[#allocation13 + $0x218] sm:$0xff]  ;;  %v2439_v40 = vld [vmem:[#allocation13 + $0x250] sm:$0xff] }
 0x5f6   :  { %v2409_v46 = vld [vmem:[#allocation13 + $0x160] sm:$0xff]  ;;  %v2436_v18 = vld [vmem:[#allocation13 + $0x238] sm:$0xff]  ;;  %v2443_v41 = vld [vmem:[#allocation13 + $0x270] sm:$0xff] }
 0x5f7   :  { %6632 = vmatpush1.bf16.msra.mxu0 %v6631_v49  ;;  %6760 = vmatpush1.bf16.msra.mxu1 %v6759_v52  ;;  %v1773_v49 = vmax.f32 %v1761_v36, 0.0  ;;  %v6775_v52 = vpack.c.bf16 %v2369_v38, %v2365_v29  ;;  %v6789_v36 = vpack.c.bf16 %v2402_v26, %v2398_v24  ;;  %v2403_v29 = vld [vmem:[#allocation13 + $0x130] sm:$0xff]  ;;  %v2406_v38 = vld [vmem:[#allocation13 + $0x148] sm:$0xff]  ;;  %v6869_v26 = vpack.c.bf16 %v2436_v18, %v2432_v17 }
 0x5f8   :  { %6634 = vmatprep.subr.bf16.mxu0 %v6633_v56  ;;  %6762 = vmatprep.subr.bf16.mxu1 %v6761_v57  ;;  %v2377_v56 = vld [vmem:[#allocation13 + $0x60] sm:$0xff]  ;;  %v1778_v57 = vmax.f32 %v1769_v39, 0.0  ;;  %v2410_v39 = vld [vmem:[#allocation13 + $0x168] sm:$0xff]  ;;  %v2463_v17 = vld [vmem:[#allocation13 + $0x310] sm:$0xff] }
 0x5f9   :  { %v2467_v18 = vld [vmem:[#allocation13 + $0x330] sm:$0xff] }
 0x5fb   :  { %6636 = vmatpush1.bf16.msra.mxu0 %v6635_v2  ;;  %6764 = vmatpush1.bf16.msra.mxu1 %v6763_v3  ;;  %v6779_v2 = vpack.c.bf16 %v2377_v56, %v2373_v54  ;;  %v6843_v3 = vpack.c.bf16 %v2379_v59, %v2375_v55  ;;  %v2414_v54 = vld [vmem:[#allocation13 + $0x188] sm:$0xff]  ;;  %v2413_v59 = vld [vmem:[#allocation13 + $0x180] sm:$0xff] }
 0x5fc   :  { %6638 = vmatprep.subr.bf16.mxu0 %v6637_v6  ;;  %6766 = vmatprep.subr.bf16.mxu1 %v6765_v7  ;;  %v6781_v6 = vpack.c.bf16 %v2386_v61, %v2382_v60  ;;  %v6845_v7 = vpack.c.bf16 %v2388_v1, %v2384_v62  ;;  %v2418_v56 = vld [vmem:[#allocation13 + $0x1a8] sm:$0xff]  ;;  %v2417_v60 = vld [vmem:[#allocation13 + $0x1a0] sm:$0xff]  ;;  %v2415_v1 = vld [vmem:[#allocation13 + $0x190] sm:$0xff] }
 0x5fd   :  { %v6797_v61 = vpack.c.bf16 %v2418_v56, %v2414_v54 }
 0x5ff   :  { %6640 = vmatpush1.bf16.msra.mxu0 %v6639_v14  ;;  %6768 = vmatpush1.bf16.msra.mxu1 %v6767_v15  ;;  %v6783_v14 = vpack.c.bf16 %v2385_v5, %v2381_v4  ;;  %v6847_v15 = vpack.c.bf16 %v2387_v9, %v2383_v8  ;;  %v2424_v4 = vld [vmem:[#allocation13 + $0x1d8] sm:$0xff]  ;;  %v2421_v8 = vld [vmem:[#allocation13 + $0x1c0] sm:$0xff] }
 0x600   :  { %6642 = vmatprep.subr.bf16.mxu0 %v6641_v21  ;;  %6770 = vmatprep.subr.bf16.mxu1 %v6769_v16  ;;  %v6849_v21 = vpack.c.bf16 %v2396_v13, %v2392_v12  ;;  %v2391_v16 = vld [vmem:[#allocation13 + $0xd0] sm:$0xff]  ;;  %v2428_v5 = vld [vmem:[#allocation13 + $0x1f8] sm:$0xff]  ;;  %v2425_v9 = vld [vmem:[#allocation13 + $0x1e0] sm:$0xff] }
 0x601   :  { %v6865_v11 = vpack.c.bf16 %v2428_v5, %v2424_v4  ;;  %v2423_v12 = vld [vmem:[#allocation13 + $0x1d0] sm:$0xff] }
 0x602   :  { %v2427_v13 = vld [vmem:[#allocation13 + $0x1f0] sm:$0xff] }
 0x603   :  { %6644 = vmatpush1.bf16.msra.mxu0 %v6643_v32  ;;  %6772 = vmatpush1.bf16.msra.mxu1 %v6771_v34  ;;  %v2397_v32 = vld [vmem:[#allocation13 + $0x100] sm:$0xff]  ;;  %v2455_v4 = vld [vmem:[#allocation13 + $0x2d0] sm:$0xff] }
 0x604   :  { %6774 = vmatprep.subr.bf16.mxu0 %v6773_v37  ;;  %6838 = vmatprep.subr.bf16.mxu1 %v6837_v20  ;;  %v2401_v34 = vld [vmem:[#allocation13 + $0x120] sm:$0xff]  ;;  %v6853_v37 = vpack.c.bf16 %v2404_v30, %v2400_v28  ;;  %v2399_v20 = vld [vmem:[#allocation13 + $0x110] sm:$0xff] }
 0x605   :  { %v6791_v47 = vpack.c.bf16 %v2401_v34, %v2397_v32  ;;  %v6855_v43 = vpack.c.bf16 %v2403_v29, %v2399_v20  ;;  %v2431_v28 = vld [vmem:[#allocation13 + $0x210] sm:$0xff]  ;;  %v2440_v32 = vld [vmem:[#allocation13 + $0x258] sm:$0xff]  ;;  %v2437_v20 = vld [vmem:[#allocation13 + $0x240] sm:$0xff] }
 0x606   :  { %2199 = vmatmul.mubr.f32.vlgmr.msra.gmra.mrb[14].mxu0 %v1773_v49  ;;  %2353 = vmatmul.mubr.f32.vlgmr.msra.gmra.mrb[14].mxu1 %v1773_v49  ;;  %v6793_v49 = vpack.c.bf16 %v2410_v39, %v2406_v38  ;;  %v2435_v30 = vld [vmem:[#allocation13 + $0x230] sm:$0xff]  ;;  %v2444_v34 = vld [vmem:[#allocation13 + $0x278] sm:$0xff]  ;;  %v2441_v29 = vld [vmem:[#allocation13 + $0x260] sm:$0xff] }
 0x607   :  { %2204 = vmatprep.mubr.f32.mxu0 %v1778_v57  ;;  %2358 = vmatprep.mubr.f32.mxu1 %v1778_v57  ;;  %v2416_v57 = vld [vmem:[#allocation13 + $0x198] sm:$0xff]  ;;  %v6873_v39 = vpack.c.bf16 %v2444_v34, %v2440_v32  ;;  %v2459_v5 = vld [vmem:[#allocation13 + $0x2f0] sm:$0xff] }
 0x608   :  { %6776 = vmatpush1.bf16.msra.mxu0 %v6775_v52  ;;  %6840 = vmatpush1.bf16.msra.mxu1 %v6839_v53  ;;  %v2407_v52 = vld [vmem:[#allocation13 + $0x150] sm:$0xff] }
 0x609   :  { %6778 = vmatprep.subr.bf16.mxu0 %v6777_v58  ;;  %6842 = vmatprep.subr.bf16.mxu1 %v6841_v42  ;;  %v2411_v53 = vld [vmem:[#allocation13 + $0x170] sm:$0xff]  ;;  %v2420_v58 = vld [vmem:[#allocation13 + $0x1b8] sm:$0xff]  ;;  %v6795_v42 = vpack.c.bf16 %v2409_v46, %v2405_v45 }
 0x60a   :  { %2205 = vmatmul.mubr.f32.gmra.mrb[16].mxu0 %v1777_v44  ;;  %2359 = vmatmul.mubr.f32.gmra.mrb[16].mxu1 %v1777_v44  ;;  %v6859_v55 = vpack.c.bf16 %v2411_v53, %v2407_v52  ;;  %v6861_v62 = vpack.c.bf16 %v2420_v58, %v2416_v57  ;;  %v2419_v44 = vld [vmem:[#allocation13 + $0x1b0] sm:$0xff]  ;;  %v2448_v45 = vld [vmem:[#allocation13 + $0x298] sm:$0xff]  ;;  %v2445_v52 = vld [vmem:[#allocation13 + $0x280] sm:$0xff] }
 0x60b   :  { %2557 = vmatprep.mubr.f32.mxu0 %v9256_v35  ;;  %2634 = vmatprep.mubr.f32.mxu1 %v9256_v35  ;;  %v6851_v35 = vpack.c.bf16 %v2395_v22, %v2391_v16  ;;  %v2429_v16 = vld [vmem:[#allocation13 + $0x200] sm:$0xff]  ;;  %v2452_v46 = vld [vmem:[#allocation13 + $0x2b8] sm:$0xff]  ;;  %v2447_v57 = vld [vmem:[#allocation13 + $0x290] sm:$0xff] }
 0x60c   :  { %6780 = vmatpush1.bf16.msra.mxu0 %v6779_v2  ;;  %6844 = vmatpush1.bf16.msra.mxu1 %v6843_v3  ;;  %v2422_v2 = vld [vmem:[#allocation13 + $0x1c8] sm:$0xff]  ;;  %v2433_v22 = vld [vmem:[#allocation13 + $0x220] sm:$0xff]  ;;  %v6877_v56 = vpack.c.bf16 %v2452_v46, %v2448_v45  ;;  %v2451_v58 = vld [vmem:[#allocation13 + $0x2b0] sm:$0xff] }
 0x60d   :  { %6782 = vmatprep.subr.bf16.mxu0 %v6781_v6  ;;  %6846 = vmatprep.subr.bf16.mxu1 %v6845_v7  ;;  %v2426_v3 = vld [vmem:[#allocation13 + $0x1e8] sm:$0xff]  ;;  %v6799_v6 = vpack.c.bf16 %v2417_v60, %v2413_v59  ;;  %v6863_v7 = vpack.c.bf16 %v2419_v44, %v2415_v1  ;;  %v2449_v53 = vld [vmem:[#allocation13 + $0x2a0] sm:$0xff]  ;;  %v2456_v59 = vld [vmem:[#allocation13 + $0x2d8] sm:$0xff] }
 0x60e   :  { %v6801_v10 = vpack.c.bf16 %v2426_v3, %v2422_v2  ;;  %v2460_v60 = vld [vmem:[#allocation13 + $0x2f8] sm:$0xff]  ;;  %v2453_v1 = vld [vmem:[#allocation13 + $0x2c0] sm:$0xff]  ;;  %v2471_v32 = vld [vmem:[#allocation13 + $0x350] sm:$0xff] }
 0x60f   :  { %v2457_v44 = vld [vmem:[#allocation13 + $0x2e0] sm:$0xff]  ;;  %v6881_v3 = vpack.c.bf16 %v2460_v60, %v2456_v59  ;;  %v2475_v34 = vld [vmem:[#allocation13 + $0x370] sm:$0xff] }
 0x610   :  { %6784 = vmatpush1.bf16.msra.mxu0 %v6783_v14  ;;  %6848 = vmatpush1.bf16.msra.mxu1 %v6847_v15  ;;  %v2430_v14 = vld [vmem:[#allocation13 + $0x208] sm:$0xff]  ;;  %v2479_v45 = vld [vmem:[#allocation13 + $0x390] sm:$0xff] }
 0x611   :  { %6786 = vmatprep.subr.bf16.mxu0 %v6785_v19  ;;  %6850 = vmatprep.subr.bf16.mxu1 %v6849_v21  ;;  %v2434_v15 = vld [vmem:[#allocation13 + $0x228] sm:$0xff]  ;;  %v6803_v19 = vpack.c.bf16 %v2425_v9, %v2421_v8  ;;  %v6867_v21 = vpack.c.bf16 %v2427_v13, %v2423_v12  ;;  %v2464_v8 = vld [vmem:[#allocation13 + $0x318] sm:$0xff]  ;;  %v2461_v12 = vld [vmem:[#allocation13 + $0x300] sm:$0xff] }
 0x612   :  { %v6805_v24 = vpack.c.bf16 %v2434_v15, %v2430_v14  ;;  %v2468_v9 = vld [vmem:[#allocation13 + $0x338] sm:$0xff]  ;;  %v2465_v13 = vld [vmem:[#allocation13 + $0x320] sm:$0xff]  ;;  %v2483_v46 = vld [vmem:[#allocation13 + $0x3b0] sm:$0xff] }
 0x613   :  { %v6885_v15 = vpack.c.bf16 %v2468_v9, %v2464_v8  ;;  %v2487_v59 = vld [vmem:[#allocation13 + $0x3d0] sm:$0xff]  ;;  %v2760_v8 = vld [vmem:[#allocation15 + $0x38] sm:$0xff] }
 0x614   :  { %6788 = vmatpush1.bf16.msra.mxu0 %v6787_v31  ;;  %6852 = vmatpush1.bf16.msra.mxu1 %v6851_v35  ;;  %v2438_v31 = vld [vmem:[#allocation13 + $0x248] sm:$0xff]  ;;  %v2491_v60 = vld [vmem:[#allocation13 + $0x3f0] sm:$0xff] }
 0x615   :  { %6790 = vmatprep.subr.bf16.mxu0 %v6789_v36  ;;  %6854 = vmatprep.subr.bf16.mxu1 %v6853_v37  ;;  %v2442_v35 = vld [vmem:[#allocation13 + $0x268] sm:$0xff]  ;;  %v6807_v36 = vpack.c.bf16 %v2433_v22, %v2429_v16  ;;  %v6871_v37 = vpack.c.bf16 %v2435_v30, %v2431_v28  ;;  %v2472_v16 = vld [vmem:[#allocation13 + $0x358] sm:$0xff]  ;;  %v2469_v28 = vld [vmem:[#allocation13 + $0x340] sm:$0xff] }
 0x616   :  { %v6809_v38 = vpack.c.bf16 %v2442_v35, %v2438_v31  ;;  %v2476_v22 = vld [vmem:[#allocation13 + $0x378] sm:$0xff]  ;;  %v2473_v30 = vld [vmem:[#allocation13 + $0x360] sm:$0xff]  ;;  %v2755_v9 = vld [vmem:[#allocation15 + $0x10] sm:$0xff] }
 0x617   :  { %v6889_v35 = vpack.c.bf16 %v2476_v22, %v2472_v16  ;;  %v2761_v22 = vld [vmem:[#allocation15 + $0x40] sm:$0xff] }
 0x618   :  { %6792 = vmatpush1.bf16.msra.mxu0 %v6791_v47  ;;  %6856 = vmatpush1.bf16.msra.mxu1 %v6855_v43  ;;  %v2446_v47 = vld [vmem:[#allocation13 + $0x288] sm:$0xff] }
 0x619   :  { %6794 = vmatprep.subr.bf16.mxu0 %v6793_v49  ;;  %6858 = vmatprep.subr.bf16.mxu1 %v6857_v27  ;;  %v2450_v43 = vld [vmem:[#allocation13 + $0x2a8] sm:$0xff]  ;;  %v6811_v49 = vpack.c.bf16 %v2441_v29, %v2437_v20  ;;  %v6875_v27 = vpack.c.bf16 %v2443_v41, %v2439_v40  ;;  %v2480_v20 = vld [vmem:[#allocation13 + $0x398] sm:$0xff]  ;;  %v2477_v40 = vld [vmem:[#allocation13 + $0x380] sm:$0xff] }
 0x61a   :  { %v6813_v54 = vpack.c.bf16 %v2450_v43, %v2446_v47  ;;  %v2484_v29 = vld [vmem:[#allocation13 + $0x3b8] sm:$0xff]  ;;  %v2481_v41 = vld [vmem:[#allocation13 + $0x3a0] sm:$0xff] }
 0x61b   :  { %v6893_v43 = vpack.c.bf16 %v2484_v29, %v2480_v20  ;;  %v2767_v29 = vld [vmem:[#allocation15 + $0x70] sm:$0xff] }
 0x61c   :  { %6796 = vmatpush1.bf16.msra.mxu0 %v6795_v42  ;;  %6860 = vmatpush1.bf16.msra.mxu1 %v6859_v55  ;;  %v2454_v42 = vld [vmem:[#allocation13 + $0x2c8] sm:$0xff] }
 0x61d   :  { %6798 = vmatprep.subr.bf16.mxu0 %v6797_v61  ;;  %6862 = vmatprep.subr.bf16.mxu1 %v6861_v62  ;;  %v2458_v55 = vld [vmem:[#allocation13 + $0x2e8] sm:$0xff]  ;;  %v6815_v61 = vpack.c.bf16 %v2449_v53, %v2445_v52  ;;  %v6879_v62 = vpack.c.bf16 %v2451_v58, %v2447_v57  ;;  %v2488_v52 = vld [vmem:[#allocation13 + $0x3d8] sm:$0xff]  ;;  %v2485_v57 = vld [vmem:[#allocation13 + $0x3c0] sm:$0xff] }
 0x61e   :  { %v6817_v2 = vpack.c.bf16 %v2458_v55, %v2454_v42  ;;  %v2492_v53 = vld [vmem:[#allocation13 + $0x3f8] sm:$0xff]  ;;  %v2489_v58 = vld [vmem:[#allocation13 + $0x3e0] sm:$0xff] }
 0x61f   :  { %v6897_v55 = vpack.c.bf16 %v2492_v53, %v2488_v52  ;;  %v2776_v52 = vld [vmem:[#allocation15 + $0xb8] sm:$0xff]  ;;  %v2781_v53 = vld [vmem:[#allocation15 + $0xe0] sm:$0xff] }
 0x620   :  { %6800 = vmatpush1.bf16.msra.mxu0 %v6799_v6  ;;  %6864 = vmatpush1.bf16.msra.mxu1 %v6863_v7  ;;  %v2462_v6 = vld [vmem:[#allocation13 + $0x308] sm:$0xff] }
 0x621   :  { %6802 = vmatprep.subr.bf16.mxu0 %v6801_v10  ;;  %6866 = vmatprep.subr.bf16.mxu1 %v6865_v11  ;;  %v2466_v7 = vld [vmem:[#allocation13 + $0x328] sm:$0xff]  ;;  %v6819_v10 = vpack.c.bf16 %v2457_v44, %v2453_v1  ;;  %v6883_v11 = vpack.c.bf16 %v2459_v5, %v2455_v4  ;;  %v2803_v1 = vld [vmem:[#allocation15 + $0x190] sm:$0xff]  ;;  %v2753_v5 = vld [vmem:[#allocation15] sm:$0xff] }
 0x622   :  { %v6821_v14 = vpack.c.bf16 %v2466_v7, %v2462_v6  ;;  %v2806_v44 = vld [vmem:[#allocation15 + $0x1a8] sm:$0xff]  ;;  %v2756_v6 = vld [vmem:[#allocation15 + $0x18] sm:$0xff] }
 0x623   :  { %v7029_v7 = vpack.c.bf16 %v2806_v44, %v2803_v1  ;;  %v2787_v1 = vld [vmem:[#allocation15 + $0x110] sm:$0xff] }
 0x624   :  { %6804 = vmatpush1.bf16.msra.mxu0 %v6803_v19  ;;  %6868 = vmatpush1.bf16.msra.mxu1 %v6867_v21  ;;  %v2470_v19 = vld [vmem:[#allocation13 + $0x348] sm:$0xff] }
 0x625   :  { %6806 = vmatprep.subr.bf16.mxu0 %v6805_v24  ;;  %6870 = vmatprep.subr.bf16.mxu1 %v6869_v26  ;;  %v2474_v21 = vld [vmem:[#allocation13 + $0x368] sm:$0xff]  ;;  %v6823_v24 = vpack.c.bf16 %v2465_v13, %v2461_v12  ;;  %v6887_v26 = vpack.c.bf16 %v2467_v18, %v2463_v17  ;;  %v2809_v12 = vld [vmem:[#allocation15 + $0x1c0] sm:$0xff]  ;;  %v2812_v13 = vld [vmem:[#allocation15 + $0x1d8] sm:$0xff] }
 0x626   :  { %v6825_v31 = vpack.c.bf16 %v2474_v21, %v2470_v19  ;;  %v2762_v17 = vld [vmem:[#allocation15 + $0x48] sm:$0xff]  ;;  %v7033_v16 = vpack.c.bf16 %v2812_v13, %v2809_v12  ;;  %v2796_v12 = vld [vmem:[#allocation15 + $0x158] sm:$0xff]  ;;  %v2799_v13 = vld [vmem:[#allocation15 + $0x170] sm:$0xff] }
 0x627   :  { %v2766_v21 = vld [vmem:[#allocation15 + $0x68] sm:$0xff] }
 0x628   :  { %6808 = vmatpush1.bf16.msra.mxu0 %v6807_v36  ;;  %6872 = vmatpush1.bf16.msra.mxu1 %v6871_v37  ;;  %v2478_v36 = vld [vmem:[#allocation13 + $0x388] sm:$0xff] }
 0x629   :  { %6810 = vmatprep.subr.bf16.mxu0 %v6809_v38  ;;  %6874 = vmatprep.subr.bf16.mxu1 %v6873_v39  ;;  %v2482_v37 = vld [vmem:[#allocation13 + $0x3a8] sm:$0xff]  ;;  %v6827_v38 = vpack.c.bf16 %v2473_v30, %v2469_v28  ;;  %v6891_v39 = vpack.c.bf16 %v2475_v34, %v2471_v32  ;;  %v2815_v28 = vld [vmem:[#allocation15 + $0x1f0] sm:$0xff]  ;;  %v2768_v32 = vld [vmem:[#allocation15 + $0x78] sm:$0xff] }
 0x62a   :  { %v6829_v47 = vpack.c.bf16 %v2482_v37, %v2478_v36  ;;  %v2818_v30 = vld [vmem:[#allocation15 + $0x208] sm:$0xff]  ;;  %v2772_v37 = vld [vmem:[#allocation15 + $0x98] sm:$0xff] }
 0x62b   :  { %v7037_v20 = vpack.c.bf16 %v2818_v30, %v2815_v28  ;;  %v2808_v28 = vld [vmem:[#allocation15 + $0x1b8] sm:$0xff]  ;;  %v2811_v30 = vld [vmem:[#allocation15 + $0x1d0] sm:$0xff] }
 0x62c   :  { %6812 = vmatpush1.bf16.msra.mxu0 %v6811_v49  ;;  %6876 = vmatpush1.bf16.msra.mxu1 %v6875_v27  ;;  %v2486_v49 = vld [vmem:[#allocation13 + $0x3c8] sm:$0xff] }
 0x62d   :  { %6814 = vmatprep.subr.bf16.mxu0 %v6813_v54  ;;  %6878 = vmatprep.subr.bf16.mxu1 %v6877_v56  ;;  %v2490_v27 = vld [vmem:[#allocation13 + $0x3e8] sm:$0xff]  ;;  %v6831_v54 = vpack.c.bf16 %v2481_v41, %v2477_v40  ;;  %v6895_v56 = vpack.c.bf16 %v2483_v46, %v2479_v45  ;;  %v2771_v41 = vld [vmem:[#allocation15 + $0x90] sm:$0xff] }
 0x62e   :  { %v6833_v42 = vpack.c.bf16 %v2490_v27, %v2486_v49  ;;  %v2778_v46 = vld [vmem:[#allocation15 + $0xc8] sm:$0xff]  ;;  %v2773_v27 = vld [vmem:[#allocation15 + $0xa0] sm:$0xff] }
 0x630   :  { %6816 = vmatpush1.bf16.msra.mxu0 %v6815_v61  ;;  %6880 = vmatpush1.bf16.msra.mxu1 %v6879_v62  ;;  %v2754_v61 = vld [vmem:[#allocation15 + $0x8] sm:$0xff]  ;;  %v2757_v62 = vld [vmem:[#allocation15 + $0x20] sm:$0xff] }
 0x631   :  { %6818 = vmatprep.subr.bf16.mxu0 %v6817_v2  ;;  %6882 = vmatprep.subr.bf16.mxu1 %v6881_v3  ;;  %v6835_v2 = vpack.c.bf16 %v2489_v58, %v2485_v57  ;;  %v6899_v3 = vpack.c.bf16 %v2491_v60, %v2487_v59  ;;  %v6901_v4 = vpack.c.bf16 %v2757_v62, %v2754_v61  ;;  %v2777_v57 = vld [vmem:[#allocation15 + $0xc0] sm:$0xff]  ;;  %v2779_v60 = vld [vmem:[#allocation15 + $0xd0] sm:$0xff]  ;;  %v2782_v61 = vld [vmem:[#allocation15 + $0xe8] sm:$0xff] }
 0x632   :  { %v7043_v58 = vpack.c.bf16 %v2776_v52, %v2773_v27  ;;  %v2784_v62 = vld [vmem:[#allocation15 + $0xf8] sm:$0xff]  ;;  %v2825_v52 = vld [vmem:[#allocation15 + $0x240] sm:$0xff] }
 0x634   :  { %6820 = vmatpush1.bf16.msra.mxu0 %v6819_v10  ;;  %6884 = vmatpush1.bf16.msra.mxu1 %v6883_v11  ;;  %v2758_v10 = vld [vmem:[#allocation15 + $0x28] sm:$0xff]  ;;  %v2763_v11 = vld [vmem:[#allocation15 + $0x50] sm:$0xff] }
 0x635   :  { %6822 = vmatprep.subr.bf16.mxu0 %v6821_v14  ;;  %6886 = vmatprep.subr.bf16.mxu1 %v6885_v15  ;;  %v6903_v14 = vpack.c.bf16 %v2756_v6, %v2753_v5  ;;  %v2759_v15 = vld [vmem:[#allocation15 + $0x30] sm:$0xff]  ;;  %v7031_v18 = vpack.c.bf16 %v2758_v10, %v2755_v9  ;;  %v6905_v19 = vpack.c.bf16 %v2763_v11, %v2760_v8  ;;  %v2786_v5 = vld [vmem:[#allocation15 + $0x108] sm:$0xff]  ;;  %v2789_v10 = vld [vmem:[#allocation15 + $0x120] sm:$0xff] }
 0x636   :  { %v2790_v6 = vld [vmem:[#allocation15 + $0x128] sm:$0xff]  ;;  %v2792_v11 = vld [vmem:[#allocation15 + $0x138] sm:$0xff] }
 0x638   :  { %6824 = vmatpush1.bf16.msra.mxu0 %v6823_v24  ;;  %6888 = vmatpush1.bf16.msra.mxu1 %v6887_v26  ;;  %v2764_v24 = vld [vmem:[#allocation15 + $0x58] sm:$0xff]  ;;  %v2769_v26 = vld [vmem:[#allocation15 + $0x80] sm:$0xff] }
 0x639   :  { %6826 = vmatprep.subr.bf16.mxu0 %v6825_v31  ;;  %6890 = vmatprep.subr.bf16.mxu1 %v6889_v35  ;;  %v6907_v31 = vpack.c.bf16 %v2762_v17, %v2759_v15  ;;  %v2765_v35 = vld [vmem:[#allocation15 + $0x60] sm:$0xff]  ;;  %v7035_v34 = vpack.c.bf16 %v2764_v24, %v2761_v22  ;;  %v6909_v36 = vpack.c.bf16 %v2769_v26, %v2766_v21  ;;  %v2795_v17 = vld [vmem:[#allocation15 + $0x150] sm:$0xff]  ;;  %v2804_v26 = vld [vmem:[#allocation15 + $0x198] sm:$0xff] }
 0x63a   :  { %v6911_v40 = vpack.c.bf16 %v2768_v32, %v2765_v35  ;;  %v6929_v15 = vpack.c.bf16 %v2799_v13, %v2796_v12  ;;  %v2805_v21 = vld [vmem:[#allocation15 + $0x1a0] sm:$0xff]  ;;  %v6937_v35 = vpack.c.bf16 %v2811_v30, %v2808_v28  ;;  %v2807_v32 = vld [vmem:[#allocation15 + $0x1b0] sm:$0xff]  ;;  %v2800_v28 = vld [vmem:[#allocation15 + $0x178] sm:$0xff] }
 0x63b   :  { %v2801_v24 = vld [vmem:[#allocation15 + $0x180] sm:$0xff] }
 0x63c   :  { %6828 = vmatpush1.bf16.msra.mxu0 %v6827_v38  ;;  %6892 = vmatpush1.bf16.msra.mxu1 %v6891_v39  ;;  %v2775_v38 = vld [vmem:[#allocation15 + $0xb0] sm:$0xff]  ;;  %v2821_v39 = vld [vmem:[#allocation15 + $0x220] sm:$0xff] }
 0x63d   :  { %6830 = vmatprep.subr.bf16.mxu0 %v6829_v47  ;;  %6894 = vmatprep.subr.bf16.mxu1 %v6893_v43  ;;  %v2774_v47 = vld [vmem:[#allocation15 + $0xa8] sm:$0xff]  ;;  %v6913_v45 = vpack.c.bf16 %v2775_v38, %v2772_v37  ;;  %v2817_v37 = vld [vmem:[#allocation15 + $0x200] sm:$0xff]  ;;  %v2816_v38 = vld [vmem:[#allocation15 + $0x1f8] sm:$0xff] }
 0x640   :  { %6832 = vmatpush1.bf16.msra.mxu0 %v6831_v54  ;;  %6896 = vmatpush1.bf16.msra.mxu1 %v6895_v56  ;;  %v2827_v54 = vld [vmem:[#allocation15 + $0x250] sm:$0xff]  ;;  %v2830_v56 = vld [vmem:[#allocation15 + $0x268] sm:$0xff] }
 0x641   :  { %6834 = vmatprep.subr.bf16.mxu0 %v6833_v42  ;;  %6898 = vmatprep.subr.bf16.mxu1 %v6897_v55  ;;  %v6917_v42 = vpack.c.bf16 %v2781_v53, %v2778_v46  ;;  %v2780_v55 = vld [vmem:[#allocation15 + $0xd8] sm:$0xff]  ;;  %v7045_v59 = vpack.c.bf16 %v2830_v56, %v2827_v54  ;;  %v2829_v46 = vld [vmem:[#allocation15 + $0x260] sm:$0xff] }
 0x642   :  { %v6919_v44 = vpack.c.bf16 %v2780_v55, %v2777_v57  ;;  %v2828_v53 = vld [vmem:[#allocation15 + $0x258] sm:$0xff]  ;;  %v2833_v57 = vld [vmem:[#allocation15 + $0x280] sm:$0xff]  ;;  %v2831_v55 = vld [vmem:[#allocation15 + $0x270] sm:$0xff] }
 0x643   :  { %v6951_v54 = vpack.c.bf16 %v2828_v53, %v2825_v52  ;;  %v2832_v56 = vld [vmem:[#allocation15 + $0x278] sm:$0xff] }
 0x644   :  { %6836 = vmatpush1.bf16.msra.mxu0 %v6835_v2  ;;  %6900 = vmatpush1.bf16.msra.mxu1 %v6899_v3  ;;  %v7047_v2 = vpack.c.bf16 %v2782_v61, %v2779_v60  ;;  %v6921_v3 = vpack.c.bf16 %v2787_v1, %v2784_v62  ;;  %v2785_v62 = vld [vmem:[#allocation15 + $0x100] sm:$0xff]  ;;  %v2788_v1 = vld [vmem:[#allocation15 + $0x118] sm:$0xff] }
 0x645   :  { %6902 = vmatprep.subr.bf16.mxu0 %v6901_v4  ;;  %7030 = vmatprep.subr.bf16.mxu1 %v7029_v7  ;;  %v2783_v4 = vld [vmem:[#allocation15 + $0xf0] sm:$0xff]  ;;  %v2793_v7 = vld [vmem:[#allocation15 + $0x140] sm:$0xff] }
 0x646   :  { %v6923_v8 = vpack.c.bf16 %v2786_v5, %v2783_v4  ;;  %v6925_v9 = vpack.c.bf16 %v2793_v7, %v2790_v6  ;;  %v2839_v4 = vld [vmem:[#allocation15 + $0x2b0] sm:$0xff]  ;;  %v2842_v6 = vld [vmem:[#allocation15 + $0x2c8] sm:$0xff]  ;;  %v2837_v7 = vld [vmem:[#allocation15 + $0x2a0] sm:$0xff] }
 0x647   :  { %2558 = vmatmul.mubr.f32.vlgmr.msra.gmra.mrb[14].mxu0 %v9253_v33  ;;  %2635 = vmatmul.mubr.f32.vlgmr.msra.gmra.mrb[14].mxu1 %v9253_v33  ;;  %v2770_v33 = vld [vmem:[#allocation15 + $0x88] sm:$0xff] }
 0x648   :  { %2563 = vmatprep.mubr.f32.mxu0 %v9263_v51  ;;  %2640 = vmatprep.mubr.f32.mxu1 %v9263_v51  ;;  %v2824_v51 = vld [vmem:[#allocation15 + $0x238] sm:$0xff]  ;;  %v7039_v43 = vpack.c.bf16 %v2770_v33, %v2767_v29  ;;  %v2813_v33 = vld [vmem:[#allocation15 + $0x1e0] sm:$0xff] }
 0x649   :  { %6904 = vmatpush1.bf16.msra.mxu0 %v6903_v14  ;;  %7032 = vmatpush3.bf16.msra.mxu1 %v7031_v18  ;;  %v7041_v49 = vpack.c.bf16 %v2824_v51, %v2821_v39  ;;  %v6927_v14 = vpack.c.bf16 %v2792_v11, %v2789_v10  ;;  %v2798_v18 = vld [vmem:[#allocation15 + $0x168] sm:$0xff]  ;;  %v2820_v39 = vld [vmem:[#allocation15 + $0x218] sm:$0xff]  ;;  %v2823_v51 = vld [vmem:[#allocation15 + $0x230] sm:$0xff] }
 0x64a   :  { %6906 = vmatprep.subr.bf16.mxu0 %v6905_v19  ;;  %7034 = vmatprep.subr.bf16.mxu1 %v7033_v16  ;;  %v2802_v19 = vld [vmem:[#allocation15 + $0x188] sm:$0xff]  ;;  %v6931_v16 = vpack.c.bf16 %v2798_v18, %v2795_v17  ;;  %v2791_v10 = vld [vmem:[#allocation15 + $0x130] sm:$0xff]  ;;  %v2845_v17 = vld [vmem:[#allocation15 + $0x2e0] sm:$0xff] }
 0x64b   :  { %2564 = vmatmul.mubr.f32.gmra.mrb[16].mxu0 %v9261_v23  ;;  %2641 = vmatmul.mubr.f32.gmra.mrb[16].mxu1 %v9261_v23  ;;  %v6915_v23 = vpack.c.bf16 %v2774_v47, %v2771_v41  ;;  %v6933_v22 = vpack.c.bf16 %v2805_v21, %v2802_v19  ;;  %v6945_v41 = vpack.c.bf16 %v2823_v51, %v2820_v39  ;;  %v2819_v47 = vld [vmem:[#allocation15 + $0x210] sm:$0xff]  ;;  %v2794_v11 = vld [vmem:[#allocation15 + $0x148] sm:$0xff]  ;;  %v2848_v19 = vld [vmem:[#allocation15 + $0x2f8] sm:$0xff] }
 0x64c   :  { %v7055_v13 = vpack.c.bf16 %v2794_v11, %v2791_v10  ;;  %v2843_v21 = vld [vmem:[#allocation15 + $0x2d0] sm:$0xff]  ;;  %v2854_v11 = vld [vmem:[#allocation15 + $0x328] sm:$0xff] }
 0x64d   :  { %6908 = vmatpush1.bf16.msra.mxu0 %v6907_v31  ;;  %7036 = vmatpush3.bf16.msra.mxu1 %v7035_v34  ;;  %v6935_v31 = vpack.c.bf16 %v2804_v26, %v2801_v24  ;;  %v2810_v34 = vld [vmem:[#allocation15 + $0x1c8] sm:$0xff]  ;;  %v2797_v26 = vld [vmem:[#allocation15 + $0x160] sm:$0xff]  ;;  %v2851_v10 = vld [vmem:[#allocation15 + $0x310] sm:$0xff] }
 0x64e   :  { %6910 = vmatprep.subr.bf16.mxu0 %v6909_v36  ;;  %7038 = vmatprep.subr.bf16.mxu1 %v7037_v20  ;;  %v2814_v36 = vld [vmem:[#allocation15 + $0x1e8] sm:$0xff]  ;;  %v6939_v20 = vpack.c.bf16 %v2810_v34, %v2807_v32  ;;  %v7059_v30 = vpack.c.bf16 %v2800_v28, %v2797_v26  ;;  %v2899_v32 = vld [vmem:[#allocation15 + $0x490] sm:$0xff]  ;;  %v7063_v26 = vpack.c.bf16 %v2854_v11, %v2851_v10 }
 0x64f   :  { %v6941_v29 = vpack.c.bf16 %v2817_v37, %v2814_v36  ;;  %v2902_v36 = vld [vmem:[#allocation15 + $0x4a8] sm:$0xff]  ;;  %v2867_v10 = vld [vmem:[#allocation15 + $0x390] sm:$0xff] }
 0x650   :  { %v7061_v37 = vpack.c.bf16 %v2902_v36, %v2899_v32  ;;  %v2858_v36 = vld [vmem:[#allocation15 + $0x348] sm:$0xff] }
 0x651   :  { %6912 = vmatpush1.bf16.msra.mxu0 %v6911_v40  ;;  %7040 = vmatpush3.bf16.msra.mxu1 %v7039_v43  ;;  %v6943_v40 = vpack.c.bf16 %v2816_v38, %v2813_v33  ;;  %v2822_v43 = vld [vmem:[#allocation15 + $0x228] sm:$0xff]  ;;  %v9310_v38 = vld [vmem:[%s9621_s3] sm:$0xf] }
 0x652   :  { %6914 = vmatprep.subr.bf16.mxu0 %v6913_v45  ;;  %7042 = vmatprep.subr.bf16.mxu1 %v7041_v49  ;;  %v2826_v45 = vld [vmem:[#allocation15 + $0x248] sm:$0xff]  ;;  %v6947_v49 = vpack.c.bf16 %v2822_v43, %v2819_v47  ;;  %v9321_v47 = vld [vmem:[%s9622_s22] sm:$0xf] }
 0x653   :  { %v6949_v27 = vpack.c.bf16 %v2829_v46, %v2826_v45  ;;  %v2870_v11 = vld [vmem:[#allocation15 + $0x3a8] sm:$0xff] }
 0x655   :  { %6916 = vmatpush1.bf16.msra.mxu0 %v6915_v23  ;;  %7044 = vmatpush3.bf16.msra.mxu1 %v7043_v58  ;;  %v2835_v23 = vld [vmem:[#allocation15 + $0x290] sm:$0xff] }
 0x656   :  { %6918 = vmatprep.subr.bf16.mxu0 %v6917_v42  ;;  %7046 = vmatprep.subr.bf16.mxu1 %v7045_v59  ;;  %v6953_v58 = vpack.c.bf16 %v2835_v23, %v2832_v56  ;;  %v2836_v42 = vld [vmem:[#allocation15 + $0x298] sm:$0xff]  ;;  %v2834_v59 = vld [vmem:[#allocation15 + $0x288] sm:$0xff]  ;;  %v2694_v23 = vrot.slane %v9310_v38, %v9206_v50 }
 0x657   :  { %v7049_v60 = vpack.c.bf16 %v2836_v42, %v2833_v57  ;;  %v6955_v61 = vpack.c.bf16 %v2834_v59, %v2831_v55 }
 0x659   :  { %6920 = vmatpush1.bf16.msra.mxu0 %v6919_v44  ;;  %7048 = vmatpush3.bf16.msra.mxu1 %v7047_v2  ;;  %v7051_v44 = vpack.c.bf16 %v2788_v1, %v2785_v62  ;;  %v2838_v2 = vld [vmem:[#allocation15 + $0x2a8] sm:$0xff] }
 0x65a   :  { %6922 = vmatprep.subr.bf16.mxu0 %v6921_v3  ;;  %7050 = vmatprep.subr.bf16.mxu1 %v7049_v60  ;;  %v2841_v3 = vld [vmem:[#allocation15 + $0x2c0] sm:$0xff]  ;;  %v2724_v60 = vrot.slane %v9321_v47, %v9206_v50 }
 0x65b   :  { %v6957_v5 = vpack.c.bf16 %v2841_v3, %v2838_v2  ;;  %v9354_v3 = vrot.slane %v9310_v38, %v9275_v25 }
 0x65d   :  { %6924 = vmatpush1.bf16.msra.mxu0 %v6923_v8  ;;  %7052 = vmatpush3.bf16.msra.mxu1 %v7051_v44  ;;  %v7053_v8 = vpack.c.bf16 %v2842_v6, %v2839_v4  ;;  %v2849_v6 = vld [vmem:[#allocation15 + $0x300] sm:$0xff] }
 0x65e   :  { %6926 = vmatprep.subr.bf16.mxu0 %v6925_v9  ;;  %v2840_v9 = vld [vmem:[#allocation15 + $0x2b8] sm:$0xff] }
 0x65f   :  { %v6959_v12 = vpack.c.bf16 %v2840_v9, %v2837_v7  ;;  %7054 = vmatprep.subr.bf16.mxu1 %v7053_v8  ;;  %v2852_v7 = vld [vmem:[#allocation15 + $0x318] sm:$0xff] }
 0x661   :  { %6928 = vmatpush1.bf16.msra.mxu0 %v6927_v14  ;;  %v2844_v14 = vld [vmem:[#allocation15 + $0x2d8] sm:$0xff]  ;;  %7056 = vmatpush3.bf16.msra.mxu1 %v7055_v13 }
 0x662   :  { %6930 = vmatprep.subr.bf16.mxu0 %v6929_v15  ;;  %v2847_v15 = vld [vmem:[#allocation15 + $0x2f0] sm:$0xff] }
 0x663   :  { %v6961_v18 = vpack.c.bf16 %v2847_v15, %v2844_v14  ;;  %v2859_v15 = vld [vmem:[#allocation15 + $0x350] sm:$0xff] }
 0x665   :  { %6932 = vmatpush1.bf16.msra.mxu0 %v6931_v16  ;;  %v2846_v16 = vld [vmem:[#allocation15 + $0x2e8] sm:$0xff] }
 0x666   :  { %6934 = vmatprep.subr.bf16.mxu0 %v6933_v22  ;;  %v7057_v22 = vpack.c.bf16 %v2848_v19, %v2845_v17  ;;  %v6963_v24 = vpack.c.bf16 %v2846_v16, %v2843_v21  ;;  %v2905_v17 = vld [vmem:[#allocation15 + $0x4c0] sm:$0xff]  ;;  %v9366_v16 = vrot.slane %v9321_v47, %v9275_v25 }
 0x668   :  { %7058 = vmatprep.subr.bf16.mxu1 %v7057_v22 }
 0x669   :  { %6936 = vmatpush1.bf16.msra.mxu0 %v6935_v31  ;;  %v2850_v31 = vld [vmem:[#allocation15 + $0x308] sm:$0xff]  ;;  %7060 = vmatpush3.bf16.msra.mxu1 %v7059_v30  ;;  %v2855_v30 = vld [vmem:[#allocation15 + $0x330] sm:$0xff] }
 0x66a   :  { %6938 = vmatprep.subr.bf16.mxu0 %v6937_v35  ;;  %v2853_v35 = vld [vmem:[#allocation15 + $0x320] sm:$0xff]  ;;  %7062 = vmatprep.subr.bf16.mxu1 %v7061_v37 }
 0x66b   :  { %v6965_v34 = vpack.c.bf16 %v2853_v35, %v2850_v31  ;;  %v2857_v37 = vld [vmem:[#allocation15 + $0x340] sm:$0xff] }
 0x66d   :  { %6940 = vmatpush1.bf16.msra.mxu0 %v6939_v20  ;;  %v9302_v20 = vld [vmem:[#allocation12] sm:$0xf] }
 0x66e   :  { %6942 = vmatprep.subr.bf16.mxu0 %v6941_v29  ;;  %v9305_v29 = vld [vmem:[%s9620_s18] sm:$0xf]  ;;  %v2040_v33 = vrot.slane %v9302_v20, %v9202_v48  ;;  %v2044_v39 = vrot.slane %v9302_v20, %v9206_v50  ;;  %v9316_v51 = vrot.slane %v9302_v20, %v9275_v25 }
 0x66f   :  { %v2664_v45 = vrot.slane %v9305_v29, %v9206_v50  ;;  %v9331_v53 = vrot.slane %v9305_v29, %v9275_v25 }
 0x671   :  { %6944 = vmatpush1.bf16.msra.mxu0 %v6943_v40  ;;  %v2660_v40 = vrot.slane %v9305_v29, %v9202_v48 }
 0x672   :  { %6946 = vmatprep.subr.bf16.mxu0 %v6945_v41 }
 0x675   :  { %6948 = vmatpush1.bf16.msra.mxu0 %v6947_v49  ;;  %v2690_v49 = vrot.slane %v9310_v38, %v9202_v48 }
 0x676   :  { %6950 = vmatprep.subr.bf16.mxu0 %v6949_v27 }
 0x679   :  { %6952 = vmatpush1.bf16.msra.mxu0 %v6951_v54 }
 0x67a   :  { %6954 = vmatprep.subr.bf16.mxu0 %v6953_v58  ;;  %v2720_v58 = vrot.slane %v9321_v47, %v9202_v48 }
 0x67d   :  { %6956 = vmatpush1.bf16.msra.mxu0 %v6955_v61 }
 0x67e   :  { %6958 = vmatprep.subr.bf16.mxu0 %v6957_v5 }
 0x681   :  { %6960 = vmatpush1.bf16.msra.mxu0 %v6959_v12  ;;  %v2856_v12 = vld [vmem:[#allocation15 + $0x338] sm:$0xff] }
 0x682   :  { %6962 = vmatprep.subr.bf16.mxu0 %v6961_v18  ;;  %v2908_v18 = vld [vmem:[#allocation15 + $0x4d8] sm:$0xff]  ;;  %v6969_v35 = vpack.c.bf16 %v2859_v15, %v2856_v12  ;;  %v2869_v15 = vld [vmem:[#allocation15 + $0x3a0] sm:$0xff] }
 0x683   :  { %v7065_v32 = vpack.c.bf16 %v2908_v18, %v2905_v17  ;;  %v2872_v17 = vld [vmem:[#allocation15 + $0x3b8] sm:$0xff]  ;;  %v2874_v18 = vld [vmem:[#allocation15 + $0x3c8] sm:$0xff] }
 0x685   :  { %6964 = vmatpush1.bf16.msra.mxu0 %v6963_v24  ;;  %v6967_v24 = vpack.c.bf16 %v2852_v7, %v2849_v6 }
 0x686   :  { %6966 = vmatprep.subr.bf16.mxu0 %v6965_v34 }
 0x71a   :  { %v2559_v41 = vpop.f32.mrb[14].mxu0  ;;  %v9323_v43 = vpop.f32.mrb[14].mxu1 }
 0x71b   :  { %v7965_v46 = vadd.f32 %v2559_v41, %v2040_v33  ;;  %v2561_v27 = vpop.f32.mrb[15].mxu0  ;;  %v2638_v52 = vpop.f32.mrb[15].mxu1  ;;  %v2865_v41 = vld [vmem:[#allocation15 + $0x380] sm:$0xff] }
 0x71c   :  { %v7966_v54 = vadd.f32 %v2561_v27, %v2044_v39  ;;  %v7970_v56 = vadd.f32 %v2638_v52, %v9316_v51  ;;  %v6971_v27 = vpack.c.bf16 %v2858_v36, %v2855_v30  ;;  %v2876_v30 = vld [vmem:[#allocation15 + $0x3d8] sm:$0xff]  ;;  %v2878_v36 = vld [vmem:[#allocation15 + $0x3e8] sm:$0xff] }
 0x71d   :  { %v9336_v57 = vadd.f32 %v7965_v46, %v2660_v40  ;;  %v2914_v46 = vld [vmem:[#allocation15 + $0x508] sm:$0xff] }
 0x71e   :  { %v9340_v42 = vadd.f32 %v7966_v54, %v2664_v45  ;;  %v2565_v55 = vpop.f32.mrb[16].mxu0  ;;  %v9342_v59 = vpop.f32.mrb[16].mxu1  ;;  %v9348_v62 = vadd.f32 %v7970_v56, %v9331_v53  ;;  %v2861_v54 = vld [vmem:[#allocation15 + $0x360] sm:$0xff]  ;;  %v2864_v56 = vld [vmem:[#allocation15 + $0x378] sm:$0xff] }
 0x71f   :  { %v2707_v61 = vmul.f32 %v2690_v49, %v9336_v57  ;;  %v7967_v1 = vadd.f32 %v2565_v55, %v2040_v33  ;;  %v2567_v44 = vpop.f32.mrb[17].mxu0  ;;  %v9350_v2 = vpop.f32.mrb[17].mxu1  ;;  %v2860_v33 = vld [vmem:[#allocation15 + $0x358] sm:$0xff]  ;;  %v2866_v55 = vld [vmem:[#allocation15 + $0x388] sm:$0xff]  ;;  %v6975_v7 = vpack.c.bf16 %v2864_v56, %v2861_v54 }
 0x720   :  { %v7968_v4 = vadd.f32 %v2567_v44, %v2044_v39  ;;  %v2708_v5 = vmul.f32 %v2694_v23, %v9340_v42  ;;  %v2710_v21 = vmul.f32 %v9354_v3, %v9348_v62  ;;  %v7067_v52 = vpack.c.bf16 %v2860_v33, %v2857_v37  ;;  %v2871_v44 = vld [vmem:[#allocation15 + $0x3b0] sm:$0xff]  ;;  %v2880_v37 = vld [vmem:[#allocation15 + $0x3f8] sm:$0xff] }
 0x721   :  { %v2737_v8 = vadd.f32 %v2720_v58, %v2707_v61  ;;  %v9357_v9 = vadd.f32 %v7967_v1, %v2660_v40  ;;  %v2862_v40 = vld [vmem:[#allocation15 + $0x368] sm:$0xff]  ;;  %v2883_v33 = vld [vmem:[#allocation15 + $0x410] sm:$0xff]  ;;  %v2884_v56 = vld [vmem:[#allocation15 + $0x418] sm:$0xff] }
 0x722   :  { %v9359_v13 = vadd.f32 %v7968_v4, %v2664_v45  ;;  %v2738_v14 = vadd.f32 %v2724_v60, %v2708_v5  ;;  %v2740_v25 = vadd.f32 %v9366_v16, %v2710_v21  ;;  %v2911_v45 = vld [vmem:[#allocation15 + $0x4f0] sm:$0xff]  ;;  %v6973_v61 = vpack.c.bf16 %v2865_v41, %v2862_v40  ;;  %v2917_v4 = vld [vmem:[#allocation15 + $0x520] sm:$0xff]  ;;  %v2920_v5 = vld [vmem:[#allocation15 + $0x538] sm:$0xff] }
 0x723   :  { %v2711_v19 = vmul.f32 %v2690_v49, %v9357_v9  ;;  %v2745_v31 = vmax.f32 %v2737_v8, 0.0  ;;  %v7069_v1 = vpack.c.bf16 %v2914_v46, %v2911_v45  ;;  %v2923_v21 = vld [vmem:[#allocation15 + $0x550] sm:$0xff]  ;;  %v2932_v40 = vld [vmem:[#allocation15 + $0x598] sm:$0xff] }
 0x724   :  { %v2746_v22 = vmax.f32 %v2738_v14, 0.0  ;;  %v2712_v28 = vmul.f32 %v2694_v23, %v9359_v13  ;;  %v2748_v6 = vmax.f32 %v2740_v25, 0.0  ;;  %v7073_v14 = vpack.c.bf16 %v2920_v5, %v2917_v4  ;;  %v2879_v46 = vld [vmem:[#allocation15 + $0x3f0] sm:$0xff]  ;;  %v2885_v4 = vld [vmem:[#allocation15 + $0x420] sm:$0xff]  ;;  %v2888_v5 = vld [vmem:[#allocation15 + $0x438] sm:$0xff] }
 0x725   :  { %v2741_v34 = vadd.f32 %v2720_v58, %v2711_v19  ;;  %v2863_v58 = vld [vmem:[#allocation15 + $0x370] sm:$0xff]  ;;  %v2877_v19 = vld [vmem:[#allocation15 + $0x3e0] sm:$0xff]  ;;  %v2668_v25 = vrot.slane %v9305_v29, %v9211_v63 }
 0x726   :  { %3026 = vmatprep.mubr.f32.mxu0 %v2746_v22  ;;  %3180 = vmatprep.mubr.f32.mxu1 %v2746_v22  ;;  %v2742_v39 = vadd.f32 %v2724_v60, %v2712_v28  ;;  %v2868_v60 = vld [vmem:[#allocation15 + $0x398] sm:$0xff]  ;;  %v7071_v8 = vpack.c.bf16 %v2866_v55, %v2863_v58  ;;  %v2926_v22 = vld [vmem:[#allocation15 + $0x568] sm:$0xff]  ;;  %v2873_v28 = vld [vmem:[#allocation15 + $0x3c0] sm:$0xff]  ;;  %v7972_v55 = vadd.f32 %v9350_v2, %v9316_v51 }
 0x727   :  { %3027 = vmatmul.mubr.f32.vlgmr.msra.gmra.mrb[18].mxu0 %v2745_v31  ;;  %3181 = vmatmul.mubr.f32.vlgmr.msra.gmra.mrb[18].mxu1 %v2745_v31  ;;  %v2749_v23 = vmax.f32 %v2741_v34, 0.0  ;;  %v6977_v12 = vpack.c.bf16 %v2871_v44, %v2868_v60  ;;  %v2048_v31 = vrot.slane %v9302_v20, %v9211_v63  ;;  %v2875_v34 = vld [vmem:[#allocation15 + $0x3d0] sm:$0xff]  ;;  %v6983_v41 = vpack.c.bf16 %v2876_v30, %v2873_v28  ;;  %v2881_v20 = vld [vmem:[#allocation15 + $0x400] sm:$0xff]  ;;  %v2938_v60 = vld [vmem:[#allocation15 + $0x5c8] sm:$0xff] }
 0x728   :  { %6968 = vmatpush1.bf16.msra.mxu0 %v6967_v24  ;;  %7064 = vmatpush3.bf16.msra.mxu1 %v7063_v26  ;;  %v2750_v49 = vmax.f32 %v2742_v39, 0.0  ;;  %v6979_v24 = vpack.c.bf16 %v2870_v11, %v2867_v10  ;;  %v7075_v26 = vpack.c.bf16 %v2872_v17, %v2869_v15  ;;  %v2929_v39 = vld [vmem:[#allocation15 + $0x580] sm:$0xff]  ;;  %v7079_v45 = vpack.c.bf16 %v2878_v36, %v2875_v34  ;;  %v2935_v29 = vld [vmem:[#allocation15 + $0x5b0] sm:$0xff]  ;;  %v2890_v2 = vld [vmem:[#allocation15 + $0x448] sm:$0xff] }
 0x729   :  { %6970 = vmatprep.subr.bf16.mxu0 %v6969_v35  ;;  %7066 = vmatprep.subr.bf16.mxu1 %v7065_v32  ;;  %v6981_v35 = vpack.c.bf16 %v2877_v19, %v2874_v18  ;;  %v7077_v32 = vpack.c.bf16 %v2926_v22, %v2923_v21  ;;  %v7081_v54 = vpack.c.bf16 %v2932_v40, %v2929_v39  ;;  %v2889_v58 = vld [vmem:[#allocation15 + $0x440] sm:$0xff]  ;;  %v2892_v10 = vld [vmem:[#allocation15 + $0x458] sm:$0xff]  ;;  %v2895_v11 = vld [vmem:[#allocation15 + $0x470] sm:$0xff] }
 0x72a   :  { %3032 = vmatprep.mubr.f32.mxu0 %v2750_v49  ;;  %3185 = vmatprep.mubr.f32.mxu1 %v2750_v49  ;;  %v2882_v49 = vld [vmem:[#allocation15 + $0x408] sm:$0xff]  ;;  %v7083_v44 = vpack.c.bf16 %v2884_v56, %v2881_v20  ;;  %v7085_v51 = vpack.c.bf16 %v2938_v60, %v2935_v29  ;;  %v2728_v15 = vrot.slane %v9321_v47, %v9211_v63  ;;  %v2896_v28 = vld [vmem:[#allocation15 + $0x478] sm:$0xff]  ;;  %v2903_v20 = vld [vmem:[#allocation15 + $0x4b0] sm:$0xff] }
 0x72b   :  { %3033 = vmatmul.mubr.f32.gmra.mrb[20].mxu0 %v2749_v23  ;;  %3186 = vmatmul.mubr.f32.gmra.mrb[20].mxu1 %v2749_v23  ;;  %v2886_v23 = vld [vmem:[#allocation15 + $0x428] sm:$0xff]  ;;  %v6991_v17 = vpack.c.bf16 %v2888_v5, %v2885_v4  ;;  %v6993_v19 = vpack.c.bf16 %v2895_v11, %v2892_v10  ;;  %v2913_v56 = vld [vmem:[#allocation15 + $0x500] sm:$0xff]  ;;  %v2912_v29 = vld [vmem:[#allocation15 + $0x4f8] sm:$0xff] }
 0x72c   :  { %6972 = vmatpush1.bf16.msra.mxu0 %v6971_v27  ;;  %7068 = vmatpush3.bf16.msra.mxu1 %v7067_v52  ;;  %v7969_v27 = vadd.f32 %v9323_v43, %v2048_v31  ;;  %v6985_v52 = vpack.c.bf16 %v2883_v33, %v2880_v37  ;;  %v6989_v43 = vpack.c.bf16 %v2889_v58, %v2886_v23  ;;  %v2898_v30 = vld [vmem:[#allocation15 + $0x488] sm:$0xff]  ;;  %v2897_v37 = vld [vmem:[#allocation15 + $0x480] sm:$0xff]  ;;  %v2900_v33 = vld [vmem:[#allocation15 + $0x498] sm:$0xff] }
 0x72d   :  { %3103 = vmatprep.mubr.f32.mxu0 %v2748_v6  ;;  %3255 = vmatprep.mubr.f32.mxu1 %v2748_v6  ;;  %v2887_v6 = vld [vmem:[#allocation15 + $0x430] sm:$0xff]  ;;  %v2916_v60 = vld [vmem:[#allocation15 + $0x518] sm:$0xff]  ;;  %v2918_v4 = vld [vmem:[#allocation15 + $0x528] sm:$0xff] }
 0x72e   :  { %6974 = vmatprep.subr.bf16.mxu0 %v6973_v61  ;;  %7070 = vmatprep.subr.bf16.mxu1 %v7069_v1  ;;  %v2698_v61 = vrot.slane %v9310_v38, %v9211_v63  ;;  %v6987_v1 = vpack.c.bf16 %v2882_v49, %v2879_v46  ;;  %v9383_v38 = vadd.f32 %v7972_v55, %v9331_v53  ;;  %v2894_v53 = vld [vmem:[#allocation15 + $0x468] sm:$0xff]  ;;  %v2909_v55 = vld [vmem:[#allocation15 + $0x4e0] sm:$0xff]  ;;  %v2924_v10 = vld [vmem:[#allocation15 + $0x558] sm:$0xff] }
 0x72f   :  { %v7087_v18 = vpack.c.bf16 %v2890_v2, %v2887_v6  ;;  %v2922_v5 = vld [vmem:[#allocation15 + $0x548] sm:$0xff]  ;;  %v2925_v6 = vld [vmem:[#allocation15 + $0x560] sm:$0xff]  ;;  %v2928_v11 = vld [vmem:[#allocation15 + $0x578] sm:$0xff] }
 0x730   :  { %6976 = vmatpush1.bf16.msra.mxu0 %v6975_v7  ;;  %7072 = vmatpush3.bf16.msra.mxu1 %v7071_v8  ;;  %v9379_v7 = vadd.f32 %v7969_v27, %v2668_v25  ;;  %v7971_v8 = vadd.f32 %v9342_v59, %v2048_v31  ;;  %v2891_v59 = vld [vmem:[#allocation15 + $0x450] sm:$0xff]  ;;  %v2901_v31 = vld [vmem:[#allocation15 + $0x4a0] sm:$0xff]  ;;  %v2714_v47 = vmul.f32 %v9354_v3, %v9383_v38  ;;  %v2906_v27 = vld [vmem:[#allocation15 + $0x4c8] sm:$0xff] }
 0x731   :  { %6978 = vmatprep.subr.bf16.mxu0 %v6977_v12  ;;  %7074 = vmatprep.subr.bf16.mxu1 %v7073_v14  ;;  %v2941_v12 = vld [vmem:[#allocation15 + $0x5e0] sm:$0xff]  ;;  %v2944_v14 = vld [vmem:[#allocation15 + $0x5f8] sm:$0xff]  ;;  %v6997_v36 = vpack.c.bf16 %v2901_v31, %v2898_v30  ;;  %v6999_v3 = vpack.c.bf16 %v2900_v33, %v2897_v37  ;;  %v2943_v30 = vld [vmem:[#allocation15 + $0x5f0] sm:$0xff] }
 0x732   :  { %v2709_v21 = vmul.f32 %v2698_v61, %v9379_v7  ;;  %v9388_v22 = vadd.f32 %v7971_v8, %v2668_v25  ;;  %v9396_v40 = vadd.f32 %v9366_v16, %v2714_v47  ;;  %v2904_v25 = vld [vmem:[#allocation15 + $0x4b8] sm:$0xff]  ;;  %v7003_v16 = vpack.c.bf16 %v2906_v27, %v2903_v20  ;;  %v2921_v2 = vld [vmem:[#allocation15 + $0x540] sm:$0xff]  ;;  %v3281_v20 = vld [vmem:[#allocation16 + $0x48] sm:$0xff] }
 0x733   :  { %v3276_v37 = vld [vmem:[#allocation16 + $0x20] sm:$0xff]  ;;  %v3285_v27 = vld [vmem:[#allocation16 + $0x68] sm:$0xff] }
 0x734   :  { %6980 = vmatpush1.bf16.msra.mxu0 %v6979_v24  ;;  %7076 = vmatpush3.bf16.msra.mxu1 %v7075_v26  ;;  %v7089_v24 = vpack.c.bf16 %v2944_v14, %v2941_v12  ;;  %v2893_v26 = vld [vmem:[#allocation15 + $0x460] sm:$0xff]  ;;  %v9392_v34 = vadd.f32 %v2728_v15, %v2709_v21  ;;  %v2713_v39 = vmul.f32 %v2698_v61, %v9388_v22  ;;  %v2919_v61 = vld [vmem:[#allocation15 + $0x530] sm:$0xff] }
 0x735   :  { %6982 = vmatprep.subr.bf16.mxu0 %v6981_v35  ;;  %7078 = vmatprep.subr.bf16.mxu1 %v7077_v32  ;;  %v6995_v35 = vpack.c.bf16 %v2894_v53, %v2891_v59  ;;  %v7091_v32 = vpack.c.bf16 %v2896_v28, %v2893_v26  ;;  %v2931_v12 = vld [vmem:[#allocation15 + $0x590] sm:$0xff]  ;;  %v7015_v14 = vpack.c.bf16 %v2924_v10, %v2921_v2  ;;  %v2937_v59 = vld [vmem:[#allocation15 + $0x5c0] sm:$0xff]  ;;  %v2936_v26 = vld [vmem:[#allocation15 + $0x5b8] sm:$0xff] }
 0x736   :  { %v2743_v49 = vadd.f32 %v2728_v15, %v2713_v39  ;;  %v7017_v15 = vpack.c.bf16 %v2931_v12, %v2928_v11  ;;  %v2933_v53 = vld [vmem:[#allocation15 + $0x5a0] sm:$0xff]  ;;  %v2940_v28 = vld [vmem:[#allocation15 + $0x5d8] sm:$0xff]  ;;  %v3302_v11 = vld [vmem:[#allocation16 + $0xf0] sm:$0xff] }
 0x737   :  { %v7023_v31 = vpack.c.bf16 %v2936_v26, %v2933_v53  ;;  %v7025_v47 = vpack.c.bf16 %v2943_v30, %v2940_v28  ;;  %v3272_v39 = vld [vmem:[#allocation16] sm:$0xff]  ;;  %v3305_v12 = vld [vmem:[#allocation16 + $0x108] sm:$0xff]  ;;  %v3318_v53 = vld [vmem:[#allocation16 + $0x170] sm:$0xff] }
 0x738   :  { %6984 = vmatpush1.bf16.msra.mxu0 %v6983_v41  ;;  %7080 = vmatpush3.bf16.msra.mxu1 %v7079_v45  ;;  %v2907_v41 = vld [vmem:[#allocation15 + $0x4d0] sm:$0xff]  ;;  %v2747_v45 = vmax.f32 %v9392_v34, 0.0  ;;  %v2751_v23 = vmax.f32 %v2743_v49, 0.0  ;;  %v3317_v30 = vld [vmem:[#allocation16 + $0x168] sm:$0xff] }
 0x739   :  { %6986 = vmatprep.subr.bf16.mxu0 %v6985_v52  ;;  %7082 = vmatprep.subr.bf16.mxu1 %v7081_v54  ;;  %v7001_v46 = vpack.c.bf16 %v2907_v41, %v2904_v25  ;;  %v2752_v52 = vmax.f32 %v9396_v40, 0.0  ;;  %v2910_v54 = vld [vmem:[#allocation15 + $0x4e8] sm:$0xff]  ;;  %v3275_v40 = vld [vmem:[#allocation16 + $0x18] sm:$0xff]  ;;  %v3278_v49 = vld [vmem:[#allocation16 + $0x30] sm:$0xff] }
 0x73a   :  { %v7005_v58 = vpack.c.bf16 %v2913_v56, %v2910_v54  ;;  %v7095_v25 = vpack.c.bf16 %v3275_v40, %v3272_v39  ;;  %v3279_v41 = vld [vmem:[#allocation16 + $0x38] sm:$0xff]  ;;  %v7099_v54 = vpack.c.bf16 %v3281_v20, %v3278_v49  ;;  %v3288_v56 = vld [vmem:[#allocation16 + $0x80] sm:$0xff]  ;;  %v3314_v28 = vld [vmem:[#allocation16 + $0x150] sm:$0xff] }
 0x73b   :  { %v3330_v49 = vld [vmem:[#allocation16 + $0x1d0] sm:$0xff]  ;;  %v3328_v20 = vld [vmem:[#allocation16 + $0x1c0] sm:$0xff] }
 0x73c   :  { %6988 = vmatpush1.bf16.msra.mxu0 %v6987_v1  ;;  %7084 = vmatpush3.bf16.msra.mxu1 %v7083_v44  ;;  %v7007_v1 = vpack.c.bf16 %v2912_v29, %v2909_v55  ;;  %v7009_v44 = vpack.c.bf16 %v2919_v61, %v2916_v60  ;;  %v3290_v60 = vld [vmem:[#allocation16 + $0x90] sm:$0xff]  ;;  %v3293_v61 = vld [vmem:[#allocation16 + $0xa8] sm:$0xff] }
 0x73d   :  { %6990 = vmatprep.subr.bf16.mxu0 %v6989_v43  ;;  %7086 = vmatprep.subr.bf16.mxu1 %v7085_v51  ;;  %v2915_v43 = vld [vmem:[#allocation15 + $0x510] sm:$0xff]  ;;  %v7013_v51 = vpack.c.bf16 %v2925_v6, %v2922_v5  ;;  %v3296_v5 = vld [vmem:[#allocation16 + $0xc0] sm:$0xff]  ;;  %v3299_v6 = vld [vmem:[#allocation16 + $0xd8] sm:$0xff] }
 0x73e   :  { %v7011_v8 = vpack.c.bf16 %v2918_v4, %v2915_v43  ;;  %v7107_v43 = vpack.c.bf16 %v3293_v61, %v3290_v60  ;;  %v7111_v2 = vpack.c.bf16 %v3299_v6, %v3296_v5  ;;  %v3336_v60 = vld [vmem:[#allocation16 + $0x200] sm:$0xff]  ;;  %v3334_v61 = vld [vmem:[#allocation16 + $0x1f0] sm:$0xff] }
 0x740   :  { %6992 = vmatpush1.bf16.msra.mxu0 %v6991_v17  ;;  %7088 = vmatpush3.bf16.msra.mxu1 %v7087_v18  ;;  %v2927_v17 = vld [vmem:[#allocation15 + $0x570] sm:$0xff]  ;;  %v2930_v18 = vld [vmem:[#allocation15 + $0x588] sm:$0xff] }
 0x741   :  { %6994 = vmatprep.subr.bf16.mxu0 %v6993_v19  ;;  %7090 = vmatprep.subr.bf16.mxu1 %v7089_v24  ;;  %v2934_v19 = vld [vmem:[#allocation15 + $0x5a8] sm:$0xff]  ;;  %v7019_v21 = vpack.c.bf16 %v2930_v18, %v2927_v17  ;;  %v7115_v17 = vpack.c.bf16 %v3305_v12, %v3302_v11  ;;  %v3342_v11 = vld [vmem:[#allocation16 + $0x230] sm:$0xff]  ;;  %v3340_v12 = vld [vmem:[#allocation16 + $0x220] sm:$0xff] }
 0x742   :  { %v7021_v24 = vpack.c.bf16 %v2937_v59, %v2934_v19  ;;  %v3308_v19 = vld [vmem:[#allocation16 + $0x120] sm:$0xff]  ;;  %v3311_v59 = vld [vmem:[#allocation16 + $0x138] sm:$0xff] }
 0x744   :  { %6996 = vmatpush1.bf16.msra.mxu0 %v6995_v35  ;;  %7092 = vmatpush3.bf16.msra.mxu1 %v7091_v32  ;;  %v2939_v35 = vld [vmem:[#allocation15 + $0x5d0] sm:$0xff]  ;;  %v2942_v32 = vld [vmem:[#allocation15 + $0x5e8] sm:$0xff] }
 0x745   :  { %6998 = vmatprep.subr.bf16.mxu0 %v6997_v36  ;;  %v7027_v34 = vpack.c.bf16 %v2942_v32, %v2939_v35  ;;  %v3273_v36 = vld [vmem:[#allocation16 + $0x8] sm:$0xff]  ;;  %v3324_v35 = vld [vmem:[#allocation16 + $0x1a0] sm:$0xff]  ;;  %v3322_v32 = vld [vmem:[#allocation16 + $0x190] sm:$0xff] }
 0x746   :  { %v7093_v33 = vpack.c.bf16 %v3276_v37, %v3273_v36  ;;  %v3325_v36 = vld [vmem:[#allocation16 + $0x1a8] sm:$0xff]  ;;  %v3320_v37 = vld [vmem:[#allocation16 + $0x180] sm:$0xff] }
 0x747   :  { %3256 = vmatmul.mubr.f32.vlgmr.msra.gmra.mrb[22].mxu1 %v2747_v45  ;;  %v7189_v39 = vpack.c.bf16 %v3325_v36, %v3322_v32  ;;  %v3298_v36 = vld [vmem:[#allocation16 + $0xd0] sm:$0xff] }
 0x748   :  { %7000 = vmatpush1.bf16.msra.mxu0 %v6999_v3  ;;  %3260 = vmatprep.mubr.f32.mxu1 %v2752_v52  ;;  %v3282_v3 = vld [vmem:[#allocation16 + $0x50] sm:$0xff] }
 0x749   :  { %7002 = vmatprep.subr.bf16.mxu0 %v7001_v46  ;;  %7094 = vmatprep.subr.bf16.mxu1 %v7093_v33  ;;  %v7097_v46 = vpack.c.bf16 %v3282_v3, %v3279_v41  ;;  %v3323_v33 = vld [vmem:[#allocation16 + $0x198] sm:$0xff]  ;;  %v3277_v41 = vld [vmem:[#allocation16 + $0x28] sm:$0xff] }
 0x74a   :  { %7096 = vmatpush1.bf16.msra.mxu1 %v7095_v25  ;;  %v7127_v40 = vpack.c.bf16 %v3323_v33, %v3320_v37  ;;  %v3274_v25 = vld [vmem:[#allocation16 + $0x10] sm:$0xff]  ;;  %v3301_v37 = vld [vmem:[#allocation16 + $0xe8] sm:$0xff]  ;;  %v3351_v33 = vld [vmem:[#allocation16 + $0x278] sm:$0xff] }
 0x74b   :  { %3261 = vmatmul.mubr.f32.gmra.mrb[24].mxu1 %v2751_v23  ;;  %7098 = vmatprep.subr.bf16.mxu1 %v7097_v46  ;;  %v7191_v3 = vpack.c.bf16 %v3277_v41, %v3274_v25  ;;  %v3327_v46 = vld [vmem:[#allocation16 + $0x1b8] sm:$0xff] }
 0x74c   :  { %7004 = vmatpush1.bf16.msra.mxu0 %v7003_v16  ;;  %v3284_v16 = vld [vmem:[#allocation16 + $0x60] sm:$0xff]  ;;  %v3355_v41 = vld [vmem:[#allocation16 + $0x298] sm:$0xff] }
 0x74d   :  { %7006 = vmatprep.subr.bf16.mxu0 %v7005_v58  ;;  %v3294_v58 = vld [vmem:[#allocation16 + $0xb0] sm:$0xff] }
 0x74e   :  { %7100 = vmatpush1.bf16.msra.mxu1 %v7099_v54  ;;  %v3331_v54 = vld [vmem:[#allocation16 + $0x1d8] sm:$0xff] }
 0x750   :  { %7008 = vmatpush1.bf16.msra.mxu0 %v7007_v1  ;;  %v3297_v1 = vld [vmem:[#allocation16 + $0xc8] sm:$0xff] }
 0x751   :  { %7010 = vmatprep.subr.bf16.mxu0 %v7009_v44  ;;  %v3300_v44 = vld [vmem:[#allocation16 + $0xe0] sm:$0xff] }
 0x752   :  { %v7109_v4 = vpack.c.bf16 %v3300_v44, %v3297_v1  ;;  %v3337_v44 = vld [vmem:[#allocation16 + $0x208] sm:$0xff] }
 0x753   :  { %v7197_v5 = vpack.c.bf16 %v3337_v44, %v3334_v61  ;;  %v3359_v61 = vld [vmem:[#allocation16 + $0x2b8] sm:$0xff]  ;;  %v3310_v44 = vld [vmem:[#allocation16 + $0x130] sm:$0xff] }
 0x754   :  { %7012 = vmatpush1.bf16.msra.mxu0 %v7011_v8  ;;  %v3303_v8 = vld [vmem:[#allocation16 + $0xf8] sm:$0xff] }
 0x755   :  { %7014 = vmatprep.subr.bf16.mxu0 %v7013_v51  ;;  %v3306_v51 = vld [vmem:[#allocation16 + $0x110] sm:$0xff] }
 0x756   :  { %v7113_v10 = vpack.c.bf16 %v3306_v51, %v3303_v8  ;;  %v3286_v8 = vld [vmem:[#allocation16 + $0x70] sm:$0xff]  ;;  %v3289_v51 = vld [vmem:[#allocation16 + $0x88] sm:$0xff] }
 0x758   :  { %7016 = vmatpush1.bf16.msra.mxu0 %v7015_v14  ;;  %v3309_v14 = vld [vmem:[#allocation16 + $0x128] sm:$0xff] }
 0x759   :  { %7018 = vmatprep.subr.bf16.mxu0 %v7017_v15  ;;  %v3312_v15 = vld [vmem:[#allocation16 + $0x140] sm:$0xff] }
 0x75a   :  { %v7117_v18 = vpack.c.bf16 %v3312_v15, %v3309_v14  ;;  %v3343_v14 = vld [vmem:[#allocation16 + $0x238] sm:$0xff] }
 0x75c   :  { %7020 = vmatpush1.bf16.msra.mxu0 %v7019_v21  ;;  %v7119_v21 = vpack.c.bf16 %v3311_v59, %v3308_v19  ;;  %v3341_v19 = vld [vmem:[#allocation16 + $0x228] sm:$0xff]  ;;  %v3292_v59 = vld [vmem:[#allocation16 + $0xa0] sm:$0xff] }
 0x75d   :  { %7022 = vmatprep.subr.bf16.mxu0 %v7021_v24  ;;  %v3315_v24 = vld [vmem:[#allocation16 + $0x158] sm:$0xff] }
 0x75e   :  { %v7121_v26 = vpack.c.bf16 %v3318_v53, %v3315_v24  ;;  %v3295_v24 = vld [vmem:[#allocation16 + $0xb8] sm:$0xff]  ;;  %v3345_v53 = vld [vmem:[#allocation16 + $0x248] sm:$0xff] }
 0x760   :  { %7024 = vmatpush1.bf16.msra.mxu0 %v7023_v31  ;;  %v7123_v31 = vpack.c.bf16 %v3317_v30, %v3314_v28  ;;  %v7203_v28 = vpack.c.bf16 %v3295_v24, %v3292_v59  ;;  %v3369_v59 = vld [vmem:[#allocation16 + $0x308] sm:$0xff]  ;;  %v3370_v24 = vld [vmem:[#allocation16 + $0x310] sm:$0xff] }
 0x761   :  { %7026 = vmatprep.subr.bf16.mxu0 %v7025_v47  ;;  %v3321_v47 = vld [vmem:[#allocation16 + $0x188] sm:$0xff] }
 0x764   :  { %7028 = vmatpush1.bf16.msra.mxu0 %v7027_v34  ;;  %v7125_v34 = vpack.c.bf16 %v3324_v35, %v3321_v47  ;;  %v3349_v47 = vld [vmem:[#allocation16 + $0x268] sm:$0xff]  ;;  %v3344_v35 = vld [vmem:[#allocation16 + $0x240] sm:$0xff] }
 0x765   :  { %7190 = vmatprep.subr.bf16.mxu0 %v7189_v39  ;;  %v3354_v39 = vld [vmem:[#allocation16 + $0x290] sm:$0xff] }
 0x767   :  { %3104 = vmatmul.mubr.f32.vlgmr.msra.gmra.mrb[18].mxu0 %v2747_v45  ;;  %v3287_v45 = vld [vmem:[#allocation16 + $0x78] sm:$0xff] }
 0x768   :  { %3109 = vmatprep.mubr.f32.mxu0 %v2752_v52  ;;  %v7101_v52 = vpack.c.bf16 %v3288_v56, %v3285_v27  ;;  %v7103_v55 = vpack.c.bf16 %v3287_v45, %v3284_v16  ;;  %7192 = vmatpush3.bf16.msra.mxu0 %v7191_v3  ;;  %v7129_v27 = vpack.c.bf16 %v3330_v49, %v3327_v46  ;;  %v3326_v56 = vld [vmem:[#allocation16 + $0x1b0] sm:$0xff]  ;;  %v3329_v16 = vld [vmem:[#allocation16 + $0x1c8] sm:$0xff] }
 0x769   :  { %v7193_v45 = vpack.c.bf16 %v3331_v54, %v3328_v20  ;;  %v7207_v3 = vpack.c.bf16 %v3301_v37, %v3298_v36  ;;  %v7145_v46 = vpack.c.bf16 %v3354_v39, %v3351_v33  ;;  %v3350_v49 = vld [vmem:[#allocation16 + $0x270] sm:$0xff]  ;;  %v3353_v20 = vld [vmem:[#allocation16 + $0x288] sm:$0xff] }
 0x76a   :  { %7102 = vmatprep.subr.bf16.mxu1 %v7101_v52  ;;  %v7131_v52 = vpack.c.bf16 %v3329_v16, %v3326_v56  ;;  %v3307_v56 = vld [vmem:[#allocation16 + $0x118] sm:$0xff]  ;;  %v3357_v16 = vld [vmem:[#allocation16 + $0x2a8] sm:$0xff]  ;;  %v2945_v36 = vld [vmem:[%s9623_s9] sm:$0x7] }
 0x76b   :  { %3110 = vmatmul.mubr.f32.gmra.mrb[20].mxu0 %v2751_v23  ;;  %v3291_v23 = vld [vmem:[#allocation16 + $0x98] sm:$0xff]  ;;  %7104 = vmatpush1.bf16.msra.mxu1 %v7103_v55  ;;  %v2958_v37 = vrot.slane %v2945_v36, %v9211_v63 }
 0x76c   :  { %v7105_v29 = vpack.c.bf16 %v3294_v58, %v3291_v23  ;;  %v3280_v23 = vld [vmem:[#allocation16 + $0x40] sm:$0xff]  ;;  %v3283_v58 = vld [vmem:[#allocation16 + $0x58] sm:$0xff]  ;;  %7194 = vmatprep.subr.bf16.mxu0 %v7193_v45 }
 0x76d   :  { %v7195_v55 = vpack.c.bf16 %v3283_v58, %v3280_v23  ;;  %v3360_v45 = vld [vmem:[#allocation16 + $0x2c0] sm:$0xff]  ;;  %v3361_v23 = vld [vmem:[#allocation16 + $0x2c8] sm:$0xff]  ;;  %v7147_v58 = vpack.c.bf16 %v3353_v20, %v3350_v49 }
 0x76e   :  { %7106 = vmatprep.subr.bf16.mxu1 %v7105_v29  ;;  %v3333_v29 = vld [vmem:[#allocation16 + $0x1e8] sm:$0xff] }
 0x76f   :  { %7108 = vmatpush1.bf16.msra.mxu1 %v7107_v43  ;;  %v7133_v1 = vpack.c.bf16 %v3336_v60, %v3333_v29  ;;  %v3332_v43 = vld [vmem:[#allocation16 + $0x1e0] sm:$0xff]  ;;  %7196 = vmatpush3.bf16.msra.mxu0 %v7195_v55  ;;  %v7149_v29 = vpack.c.bf16 %v3360_v45, %v3357_v16 }
 0x770   :  { %7110 = vmatprep.subr.bf16.mxu1 %v7109_v4  ;;  %v3335_v4 = vld [vmem:[#allocation16 + $0x1f8] sm:$0xff]  ;;  %7198 = vmatprep.subr.bf16.mxu0 %v7197_v5  ;;  %v3356_v60 = vld [vmem:[#allocation16 + $0x2a0] sm:$0xff] }
 0x771   :  { %v7135_v6 = vpack.c.bf16 %v3335_v4, %v3332_v43  ;;  %v3313_v43 = vld [vmem:[#allocation16 + $0x148] sm:$0xff]  ;;  %v7151_v4 = vpack.c.bf16 %v3359_v61, %v3356_v60  ;;  %v3378_v60 = vld [vmem:[#allocation16 + $0x350] sm:$0xff]  ;;  %v3376_v61 = vld [vmem:[#allocation16 + $0x340] sm:$0xff] }
 0x772   :  { %v7215_v5 = vpack.c.bf16 %v3313_v43, %v3310_v44 }
 0x773   :  { %7112 = vmatpush1.bf16.msra.mxu1 %v7111_v2  ;;  %v3339_v2 = vld [vmem:[#allocation16 + $0x218] sm:$0xff] }
 0x774   :  { %7114 = vmatprep.subr.bf16.mxu1 %v7113_v10  ;;  %v7199_v10 = vpack.c.bf16 %v3289_v51, %v3286_v8  ;;  %v7137_v15 = vpack.c.bf16 %v3342_v11, %v3339_v2  ;;  %v3366_v8 = vld [vmem:[#allocation16 + $0x2f0] sm:$0xff]  ;;  %v3364_v51 = vld [vmem:[#allocation16 + $0x2e0] sm:$0xff] }
 0x775   :  { %v3362_v11 = vld [vmem:[#allocation16 + $0x2d0] sm:$0xff] }
 0x776   :  { %7200 = vmatpush3.bf16.msra.mxu0 %v7199_v10  ;;  %v3367_v10 = vld [vmem:[#allocation16 + $0x2f8] sm:$0xff] }
 0x777   :  { %7116 = vmatpush1.bf16.msra.mxu1 %v7115_v17  ;;  %v7201_v17 = vpack.c.bf16 %v3343_v14, %v3340_v12  ;;  %v3365_v12 = vld [vmem:[#allocation16 + $0x2e8] sm:$0xff]  ;;  %v7217_v14 = vpack.c.bf16 %v3367_v10, %v3364_v51  ;;  %v3374_v10 = vld [vmem:[#allocation16 + $0x330] sm:$0xff] }
 0x778   :  { %7118 = vmatprep.subr.bf16.mxu1 %v7117_v18  ;;  %v3338_v18 = vld [vmem:[#allocation16 + $0x210] sm:$0xff] }
 0x779   :  { %7202 = vmatprep.subr.bf16.mxu0 %v7201_v17  ;;  %v3316_v17 = vld [vmem:[#allocation16 + $0x160] sm:$0xff] }
 0x77a   :  { %7204 = vmatpush3.bf16.msra.mxu0 %v7203_v28 }
 0x77b   :  { %7120 = vmatpush1.bf16.msra.mxu1 %v7119_v21  ;;  %v7139_v21 = vpack.c.bf16 %v3341_v19, %v3338_v18  ;;  %v3319_v18 = vld [vmem:[#allocation16 + $0x178] sm:$0xff] }
 0x77c   :  { %7122 = vmatprep.subr.bf16.mxu1 %v7121_v26  ;;  %v3348_v26 = vld [vmem:[#allocation16 + $0x260] sm:$0xff]  ;;  %v7219_v19 = vpack.c.bf16 %v3319_v18, %v3316_v17  ;;  %v3382_v17 = vld [vmem:[#allocation16 + $0x370] sm:$0xff]  ;;  %v3385_v18 = vld [vmem:[#allocation16 + $0x388] sm:$0xff] }
 0x77d   :  { %v7141_v30 = vpack.c.bf16 %v3348_v26, %v3345_v53  ;;  %v3373_v26 = vld [vmem:[#allocation16 + $0x328] sm:$0xff] }
 0x77e   :  { %v7221_v28 = vpack.c.bf16 %v3373_v26, %v3370_v24  ;;  %v3383_v26 = vld [vmem:[#allocation16 + $0x378] sm:$0xff] }
 0x77f   :  { %7124 = vmatpush1.bf16.msra.mxu1 %v7123_v31  ;;  %v3346_v31 = vld [vmem:[#allocation16 + $0x250] sm:$0xff] }
 0x780   :  { %7126 = vmatprep.subr.bf16.mxu1 %v7125_v34  ;;  %v7205_v32 = vpack.c.bf16 %v3349_v47, %v3346_v31  ;;  %v3347_v34 = vld [vmem:[#allocation16 + $0x258] sm:$0xff] }
 0x781   :  { %v7143_v25 = vpack.c.bf16 %v3347_v34, %v3344_v35 }
 0x782   :  { %7206 = vmatprep.subr.bf16.mxu0 %v7205_v32 }
 0x783   :  { %7128 = vmatpush1.bf16.msra.mxu1 %v7127_v40  ;;  %v3352_v40 = vld [vmem:[#allocation16 + $0x280] sm:$0xff]  ;;  %7208 = vmatpush3.bf16.msra.mxu0 %v7207_v3 }
 0x784   :  { %7130 = vmatprep.subr.bf16.mxu1 %v7129_v27  ;;  %v3304_v27 = vld [vmem:[#allocation16 + $0x100] sm:$0xff]  ;;  %v7209_v54 = vpack.c.bf16 %v3355_v41, %v3352_v40 }
 0x785   :  { %v7211_v55 = vpack.c.bf16 %v3307_v56, %v3304_v27  ;;  %v2954_v56 = vrot.slane %v2945_v36, %v9206_v50 }
 0x786   :  { %7210 = vmatprep.subr.bf16.mxu0 %v7209_v54  ;;  %v2950_v54 = vrot.slane %v2945_v36, %v9202_v48 }
 0x787   :  { %7132 = vmatpush1.bf16.msra.mxu1 %v7131_v52  ;;  %v3358_v52 = vld [vmem:[#allocation16 + $0x2b0] sm:$0xff]  ;;  %7212 = vmatpush3.bf16.msra.mxu0 %v7211_v55  ;;  %v3375_v55 = vld [vmem:[#allocation16 + $0x338] sm:$0xff] }
 0x788   :  { %7134 = vmatprep.subr.bf16.mxu1 %v7133_v1  ;;  %v7213_v1 = vpack.c.bf16 %v3361_v23, %v3358_v52  ;;  %v3368_v23 = vld [vmem:[#allocation16 + $0x300] sm:$0xff]  ;;  %v7161_v51 = vpack.c.bf16 %v3378_v60, %v3375_v55 }
 0x78a   :  { %7214 = vmatprep.subr.bf16.mxu0 %v7213_v1  ;;  %v3379_v1 = vld [vmem:[#allocation16 + $0x358] sm:$0xff] }
 0x78b   :  { %7136 = vmatpush1.bf16.msra.mxu1 %v7135_v6  ;;  %v3363_v6 = vld [vmem:[#allocation16 + $0x2d8] sm:$0xff]  ;;  %7216 = vmatpush3.bf16.msra.mxu0 %v7215_v5 }
 0x78c   :  { %7138 = vmatprep.subr.bf16.mxu1 %v7137_v15  ;;  %v7153_v2 = vpack.c.bf16 %v3366_v8, %v3363_v6  ;;  %v7155_v15 = vpack.c.bf16 %v3365_v12, %v3362_v11  ;;  %7218 = vmatprep.subr.bf16.mxu0 %v7217_v14  ;;  %v3377_v11 = vld [vmem:[#allocation16 + $0x348] sm:$0xff] }
 0x78d   :  { %v3381_v14 = vld [vmem:[#allocation16 + $0x368] sm:$0xff] }
 0x78f   :  { %7140 = vmatpush1.bf16.msra.mxu1 %v7139_v21  ;;  %v3372_v21 = vld [vmem:[#allocation16 + $0x320] sm:$0xff]  ;;  %7220 = vmatpush3.bf16.msra.mxu0 %v7219_v19 }
 0x790   :  { %7142 = vmatprep.subr.bf16.mxu1 %v7141_v30  ;;  %v7157_v53 = vpack.c.bf16 %v3372_v21, %v3369_v59  ;;  %7222 = vmatprep.subr.bf16.mxu0 %v7221_v28  ;;  %v7163_v59 = vpack.c.bf16 %v3377_v11, %v3374_v10  ;;  %v3407_v10 = vld [vmem:[#allocation16 + $0x438] sm:$0xff] }
 0x791   :  { %v3411_v11 = vld [vmem:[#allocation16 + $0x458] sm:$0xff] }
 0x793   :  { %7144 = vmatpush1.bf16.msra.mxu1 %v7143_v25 }
 0x794   :  { %7146 = vmatprep.subr.bf16.mxu1 %v7145_v46 }
 0x797   :  { %7148 = vmatpush1.bf16.msra.mxu1 %v7147_v58  ;;  %v3371_v58 = vld [vmem:[#allocation16 + $0x318] sm:$0xff] }
 0x798   :  { %7150 = vmatprep.subr.bf16.mxu1 %v7149_v29 }
 0x79b   :  { %7152 = vmatpush1.bf16.msra.mxu1 %v7151_v4  ;;  %v7159_v4 = vpack.c.bf16 %v3371_v58, %v3368_v23  ;;  %v3400_v23 = vld [vmem:[#allocation16 + $0x400] sm:$0xff]  ;;  %v3403_v58 = vld [vmem:[#allocation16 + $0x418] sm:$0xff] }
 0x79c   :  { %7154 = vmatprep.subr.bf16.mxu1 %v7153_v2  ;;  %v7225_v2 = vpack.c.bf16 %v3379_v1, %v3376_v61  ;;  %v7241_v60 = vpack.c.bf16 %v3403_v58, %v3400_v23  ;;  %v3398_v61 = vld [vmem:[#allocation16 + $0x3f0] sm:$0xff]  ;;  %v3401_v1 = vld [vmem:[#allocation16 + $0x408] sm:$0xff] }
 0x79d   :  { %v3750_v23 = vld [vmem:[#allocation19 + $0x68] sm:$0xff]  ;;  %v3753_v58 = vld [vmem:[#allocation19 + $0x80] sm:$0xff] }
 0x79f   :  { %7156 = vmatpush1.bf16.msra.mxu1 %v7155_v15  ;;  %v3384_v15 = vld [vmem:[#allocation16 + $0x380] sm:$0xff] }
 0x7a0   :  { %7158 = vmatprep.subr.bf16.mxu1 %v7157_v53  ;;  %v7165_v24 = vpack.c.bf16 %v3384_v15, %v3381_v14  ;;  %v3380_v53 = vld [vmem:[#allocation16 + $0x360] sm:$0xff]  ;;  %v3415_v15 = vld [vmem:[#allocation16 + $0x478] sm:$0xff] }
 0x7a1   :  { %v3412_v14 = vld [vmem:[#allocation16 + $0x460] sm:$0xff] }
 0x7fa   :  { %v5872_v30 = vpop.f32.mrb[18].mxu1 }
 0x7fb   :  { %v5873_v31 = vpop.f32.mrb[19].mxu1 }
 0x7fc   :  { %v5874_v47 = vadd.f32 %v5873_v31, %v5872_v30  ;;  %v3387_v30 = vld [vmem:[#allocation16 + $0x398] sm:$0xff]  ;;  %v7229_v31 = vpack.c.bf16 %v3385_v18, %v3382_v17 }
 0x7fe   :  { %v5875_v35 = vpop.f32.mrb[20].mxu1  ;;  %v3183_v40 = vadd.f32 %v5874_v47, %v2958_v37  ;;  %v3390_v47 = vld [vmem:[#allocation16 + $0x3b0] sm:$0xff] }
 0x7ff   :  { %v5876_v32 = vpop.f32.mrb[21].mxu1  ;;  %v7169_v36 = vpack.c.bf16 %v3390_v47, %v3387_v30  ;;  %v3790_v30 = vld [vmem:[#allocation19 + $0x1a8] sm:$0xff]  ;;  %v3737_v47 = vld [vmem:[#allocation19] sm:$0xff] }
 0x800   :  { %v5877_v34 = vadd.f32 %v5876_v32, %v5875_v35  ;;  %v3388_v35 = vld [vmem:[#allocation16 + $0x3a0] sm:$0xff]  ;;  %v3391_v32 = vld [vmem:[#allocation16 + $0x3b8] sm:$0xff] }
 0x802   :  { %v3188_v49 = vadd.f32 %v5877_v34, %v2958_v37  ;;  %v7233_v37 = vpack.c.bf16 %v3391_v32, %v3388_v35 }
 0x81a   :  { %v5910_v33 = vpop.f32.mrb[22].mxu1 }
 0x81b   :  { %v5911_v39 = vpop.f32.mrb[23].mxu1 }
 0x81c   :  { %v5912_v25 = vadd.f32 %v5911_v39, %v5910_v33  ;;  %v3386_v33 = vld [vmem:[#allocation16 + $0x390] sm:$0xff]  ;;  %v3389_v39 = vld [vmem:[#allocation16 + $0x3a8] sm:$0xff] }
 0x81e   :  { %v9402_v41 = vadd.f32 %v5912_v25, %v3183_v40  ;;  %v5913_v3 = vpop.f32.mrb[24].mxu1  ;;  %v3393_v40 = vld [vmem:[#allocation16 + $0x3c8] sm:$0xff]  ;;  %v3396_v25 = vld [vmem:[#allocation16 + $0x3e0] sm:$0xff] }
 0x81f   :  { %v5914_v46 = vpop.f32.mrb[25].mxu1 }
 0x820   :  { %v5915_v20 = vadd.f32 %v5914_v46, %v5913_v3  ;;  %v3268_v34 = vmax.f32 %v9402_v41, 0.0  ;;  %v3394_v3 = vld [vmem:[#allocation16 + $0x3d0] sm:$0xff]  ;;  %v3397_v46 = vld [vmem:[#allocation16 + $0x3e8] sm:$0xff] }
 0x821   :  { %v3754_v41 = vld [vmem:[#allocation19 + $0x88] sm:$0xff] }
 0x822   :  { %v9404_v27 = vadd.f32 %v5915_v20, %v3188_v49  ;;  %v7171_v49 = vpack.c.bf16 %v3389_v39, %v3386_v33  ;;  %v7173_v20 = vpack.c.bf16 %v3396_v25, %v3393_v40  ;;  %v3744_v33 = vld [vmem:[#allocation19 + $0x38] sm:$0xff]  ;;  %v3747_v39 = vld [vmem:[#allocation19 + $0x50] sm:$0xff]  ;;  %v3793_v40 = vld [vmem:[#allocation19 + $0x1c0] sm:$0xff] }
 0x823   :  { %v3796_v25 = vld [vmem:[#allocation19 + $0x1d8] sm:$0xff] }
 0x83a   :  { %v3105_v16 = vpop.f32.mrb[18].mxu0 }
 0x83b   :  { %v7973_v45 = vadd.f32 %v3105_v16, %v2950_v54  ;;  %v3107_v52 = vpop.f32.mrb[19].mxu0  ;;  %v3395_v16 = vld [vmem:[#allocation16 + $0x3d8] sm:$0xff] }
 0x83c   :  { %v7974_v29 = vadd.f32 %v3107_v52, %v2954_v56  ;;  %v3402_v52 = vld [vmem:[#allocation16 + $0x410] sm:$0xff] }
 0x83d   :  { %v3266_v5 = vmax.f32 %v7973_v45, 0.0  ;;  %v3399_v45 = vld [vmem:[#allocation16 + $0x3f8] sm:$0xff] }
 0x83e   :  { %v3267_v44 = vmax.f32 %v7974_v29, 0.0  ;;  %v3111_v43 = vpop.f32.mrb[20].mxu0  ;;  %v7177_v29 = vpack.c.bf16 %v3402_v52, %v3399_v45  ;;  %v7385_v45 = vpack.c.bf16 %v3796_v25, %v3793_v40  ;;  %v3748_v52 = vld [vmem:[#allocation19 + $0x58] sm:$0xff]  ;;  %v3767_v25 = vld [vmem:[#allocation19 + $0xf0] sm:$0xff] }
 0x83f   :  { %v7975_v6 = vadd.f32 %v3111_v43, %v2950_v54  ;;  %v3113_v8 = vpop.f32.mrb[21].mxu0  ;;  %v7237_v54 = vpack.c.bf16 %v3397_v46, %v3394_v3  ;;  %v3408_v43 = vld [vmem:[#allocation16 + $0x440] sm:$0xff] }
 0x840   :  { %v7976_v12 = vadd.f32 %v3113_v8, %v2954_v56  ;;  %3497 = vmatprep.mubr.f32.mxu1 %v3267_v44  ;;  %3651 = vmatprep.mubr.f32.mxu0 %v3267_v44  ;;  %v3392_v56 = vld [vmem:[#allocation16 + $0x3c0] sm:$0xff]  ;;  %v3405_v44 = vld [vmem:[#allocation16 + $0x428] sm:$0xff] }
 0x841   :  { %3498 = vmatmul.mubr.f32.vlgmr.msra.gmra.mrb[26].mxu1 %v3266_v5  ;;  %3652 = vmatmul.mubr.f32.vlgmr.msra.gmra.mrb[22].mxu0 %v3266_v5  ;;  %v3269_v21 = vmax.f32 %v7975_v6, 0.0  ;;  %v7175_v55 = vpack.c.bf16 %v3395_v16, %v3392_v56  ;;  %v3409_v5 = vld [vmem:[#allocation16 + $0x448] sm:$0xff]  ;;  %v7179_v6 = vpack.c.bf16 %v3401_v1, %v3398_v61  ;;  %v7181_v8 = vpack.c.bf16 %v3408_v43, %v3405_v44  ;;  %v3752_v44 = vld [vmem:[#allocation19 + $0x78] sm:$0xff]  ;;  %v3751_v43 = vld [vmem:[#allocation19 + $0x70] sm:$0xff] }
 0x842   :  { %v3270_v19 = vmax.f32 %v7976_v12, 0.0  ;;  %7160 = vmatpush1.bf16.msra.mxu1 %v7159_v4  ;;  %7224 = vmatpush3.bf16.msra.mxu0 %v7221_v28  ;;  %v7167_v28 = vpack.c.bf16 %v3383_v26, %v3380_v53  ;;  %v3406_v4 = vld [vmem:[#allocation16 + $0x430] sm:$0xff]  ;;  %v3741_v53 = vld [vmem:[#allocation19 + $0x20] sm:$0xff]  ;;  %v7257_v16 = vpack.c.bf16 %v3747_v39, %v3744_v33  ;;  %v7261_v61 = vpack.c.bf16 %v3753_v58, %v3750_v23 }
 0x843   :  { %7162 = vmatprep.subr.bf16.mxu1 %v7161_v51  ;;  %7226 = vmatprep.subr.bf16.mxu0 %v7225_v2  ;;  %v7245_v51 = vpack.c.bf16 %v3409_v5, %v3406_v4  ;;  %v3414_v12 = vld [vmem:[#allocation16 + $0x470] sm:$0xff]  ;;  %v3745_v56 = vld [vmem:[#allocation19 + $0x40] sm:$0xff] }
 0x844   :  { %3503 = vmatprep.mubr.f32.mxu1 %v3270_v19  ;;  %3656 = vmatprep.mubr.f32.mxu0 %v3270_v19  ;;  %v7185_v18 = vpack.c.bf16 %v3414_v12, %v3411_v11  ;;  %v7249_v19 = vpack.c.bf16 %v3415_v15, %v3412_v14  ;;  %v3787_v26 = vld [vmem:[#allocation19 + $0x190] sm:$0xff]  ;;  %v3749_v1 = vld [vmem:[#allocation19 + $0x60] sm:$0xff]  ;;  %v3758_v12 = vld [vmem:[#allocation19 + $0xa8] sm:$0xff] }
 0x845   :  { %3504 = vmatmul.mubr.f32.gmra.mrb[28].mxu1 %v3269_v21  ;;  %3657 = vmatmul.mubr.f32.gmra.mrb[24].mxu0 %v3269_v21  ;;  %v3413_v21 = vld [vmem:[#allocation16 + $0x468] sm:$0xff]  ;;  %v7381_v32 = vpack.c.bf16 %v3790_v30, %v3787_v26  ;;  %v3759_v5 = vld [vmem:[#allocation19 + $0xb0] sm:$0xff]  ;;  %v3764_v30 = vld [vmem:[#allocation19 + $0xd8] sm:$0xff] }
 0x846   :  { %7164 = vmatpush1.bf16.msra.mxu1 %v7163_v59  ;;  %7228 = vmatpush3.bf16.msra.mxu0 %v7225_v2  ;;  %v3404_v2 = vld [vmem:[#allocation16 + $0x420] sm:$0xff]  ;;  %v3410_v59 = vld [vmem:[#allocation16 + $0x450] sm:$0xff] }
 0x847   :  { %6122 = vmatprep.mubr.f32.mxu0 %v3268_v34  ;;  %7166 = vmatprep.subr.bf16.mxu1 %v7165_v24  ;;  %v7183_v17 = vpack.c.bf16 %v3407_v10, %v3404_v2  ;;  %v3738_v24 = vld [vmem:[#allocation19 + $0x8] sm:$0xff]  ;;  %v7391_v2 = vpack.c.bf16 %v3754_v41, %v3751_v43  ;;  %v3755_v11 = vld [vmem:[#allocation19 + $0x90] sm:$0xff]  ;;  %v3757_v14 = vld [vmem:[#allocation19 + $0xa0] sm:$0xff] }
 0x848   :  { %7230 = vmatprep.subr.bf16.mxu0 %v7229_v31  ;;  %3574 = vmatprep.mubr.f32.mxu1 %v8743_v0  ;;  %v7253_v35 = vpack.c.bf16 %v3741_v53, %v3738_v24  ;;  %v7267_v24 = vpack.c.bf16 %v3758_v12, %v3755_v11  ;;  %v3761_v26 = vld [vmem:[#allocation19 + $0xc0] sm:$0xff]  ;;  %v3786_v11 = vld [vmem:[#allocation19 + $0x188] sm:$0xff] }
 0x849   :  { %v7271_v33 = vpack.c.bf16 %v3764_v30, %v3761_v26  ;;  %v3829_v43 = vld [vmem:[#allocation19 + $0x2e0] sm:$0xff]  ;;  %v3792_v26 = vld [vmem:[#allocation19 + $0x1b8] sm:$0xff]  ;;  %v3795_v30 = vld [vmem:[#allocation19 + $0x1d0] sm:$0xff] }
 0x84a   :  { %7168 = vmatpush1.bf16.msra.mxu1 %v7167_v28  ;;  %7232 = vmatpush3.bf16.msra.mxu0 %v7229_v31  ;;  %v7187_v31 = vpack.c.bf16 %v3413_v21, %v3410_v59  ;;  %v3740_v28 = vld [vmem:[#allocation19 + $0x18] sm:$0xff]  ;;  %v3811_v59 = vld [vmem:[#allocation19 + $0x250] sm:$0xff]  ;;  %v3814_v21 = vld [vmem:[#allocation19 + $0x268] sm:$0xff] }
 0x84b   :  { %7170 = vmatprep.subr.bf16.mxu1 %v7169_v36  ;;  %7234 = vmatprep.subr.bf16.mxu0 %v7233_v37  ;;  %v3739_v36 = vld [vmem:[#allocation19 + $0x10] sm:$0xff]  ;;  %v7255_v3 = vpack.c.bf16 %v3740_v28, %v3737_v47  ;;  %v7397_v47 = vpack.c.bf16 %v3814_v21, %v3811_v59  ;;  %v3789_v12 = vld [vmem:[#allocation19 + $0x1a0] sm:$0xff]  ;;  %v3788_v21 = vld [vmem:[#allocation19 + $0x198] sm:$0xff] }
 0x84c   :  { %v3771_v28 = vld [vmem:[#allocation19 + $0x110] sm:$0xff]  ;;  %v3785_v59 = vld [vmem:[#allocation19 + $0x180] sm:$0xff] }
 0x84e   :  { %7172 = vmatpush1.bf16.msra.mxu1 %v7171_v49  ;;  %7236 = vmatpush3.bf16.msra.mxu0 %v7233_v37  ;;  %v3742_v37 = vld [vmem:[#allocation19 + $0x28] sm:$0xff]  ;;  %v3271_v49 = vmax.f32 %v9404_v27, 0.0  ;;  %v7387_v27 = vpack.c.bf16 %v3748_v52, %v3745_v56  ;;  %v3777_v56 = vld [vmem:[#allocation19 + $0x140] sm:$0xff] }
 0x84f   :  { %7174 = vmatprep.subr.bf16.mxu1 %v7173_v20  ;;  %7238 = vmatprep.subr.bf16.mxu0 %v7237_v54  ;;  %v7383_v46 = vpack.c.bf16 %v3742_v37, %v3739_v36  ;;  %v3743_v20 = vld [vmem:[#allocation19 + $0x30] sm:$0xff]  ;;  %v3817_v36 = vld [vmem:[#allocation19 + $0x280] sm:$0xff]  ;;  %v3820_v37 = vld [vmem:[#allocation19 + $0x298] sm:$0xff] }
 0x852   :  { %7176 = vmatpush1.bf16.msra.mxu1 %v7175_v55  ;;  %7240 = vmatpush3.bf16.msra.mxu0 %v7237_v54  ;;  %v3746_v54 = vld [vmem:[#allocation19 + $0x48] sm:$0xff]  ;;  %v3799_v55 = vld [vmem:[#allocation19 + $0x1f0] sm:$0xff] }
 0x853   :  { %7178 = vmatprep.subr.bf16.mxu1 %v7177_v29  ;;  %7242 = vmatprep.subr.bf16.mxu0 %v7241_v60  ;;  %v3802_v29 = vld [vmem:[#allocation19 + $0x208] sm:$0xff] }
 0x854   :  { %v7389_v4 = vpack.c.bf16 %v3802_v29, %v3799_v55  ;;  %v3773_v55 = vld [vmem:[#allocation19 + $0x120] sm:$0xff]  ;;  %v3776_v29 = vld [vmem:[#allocation19 + $0x138] sm:$0xff] }
 0x855   :  { %v7279_v41 = vpack.c.bf16 %v3776_v29, %v3773_v55  ;;  %v3804_v55 = vld [vmem:[#allocation19 + $0x218] sm:$0xff]  ;;  %v3807_v29 = vld [vmem:[#allocation19 + $0x230] sm:$0xff] }
 0x856   :  { %7180 = vmatpush1.bf16.msra.mxu1 %v7179_v6  ;;  %7244 = vmatpush3.bf16.msra.mxu0 %v7241_v60  ;;  %v7259_v60 = vpack.c.bf16 %v3746_v54, %v3743_v20  ;;  %v3805_v6 = vld [vmem:[#allocation19 + $0x220] sm:$0xff]  ;;  %v3772_v20 = vld [vmem:[#allocation19 + $0x118] sm:$0xff]  ;;  %v3774_v54 = vld [vmem:[#allocation19 + $0x128] sm:$0xff] }
 0x857   :  { %7182 = vmatprep.subr.bf16.mxu1 %v7181_v8  ;;  %7246 = vmatprep.subr.bf16.mxu0 %v7245_v51  ;;  %v3808_v8 = vld [vmem:[#allocation19 + $0x238] sm:$0xff]  ;;  %v7277_v58 = vpack.c.bf16 %v3777_v56, %v3774_v54  ;;  %v3797_v56 = vld [vmem:[#allocation19 + $0x1e0] sm:$0xff] }
 0x858   :  { %v7393_v15 = vpack.c.bf16 %v3808_v8, %v3805_v6  ;;  %v3779_v6 = vld [vmem:[#allocation19 + $0x150] sm:$0xff]  ;;  %v3782_v8 = vld [vmem:[#allocation19 + $0x168] sm:$0xff] }
 0x85a   :  { %7184 = vmatpush1.bf16.msra.mxu1 %v7183_v17  ;;  %7248 = vmatpush3.bf16.msra.mxu0 %v7245_v51  ;;  %v7263_v51 = vpack.c.bf16 %v3752_v44, %v3749_v1  ;;  %v3760_v17 = vld [vmem:[#allocation19 + $0xb8] sm:$0xff]  ;;  %v3783_v44 = vld [vmem:[#allocation19 + $0x170] sm:$0xff] }
 0x85b   :  { %7186 = vmatprep.subr.bf16.mxu1 %v7185_v18  ;;  %7250 = vmatprep.subr.bf16.mxu0 %v7249_v19  ;;  %v3762_v18 = vld [vmem:[#allocation19 + $0xc8] sm:$0xff]  ;;  %v3780_v1 = vld [vmem:[#allocation19 + $0x158] sm:$0xff] }
 0x85e   :  { %7188 = vmatpush1.bf16.msra.mxu1 %v7187_v31  ;;  %7252 = vmatpush3.bf16.msra.mxu0 %v7249_v19  ;;  %v3765_v19 = vld [vmem:[#allocation19 + $0xe0] sm:$0xff]  ;;  %v3763_v31 = vld [vmem:[#allocation19 + $0xd0] sm:$0xff] }
 0x85f   :  { %7254 = vmatprep.subr.bf16.mxu1 %v7253_v35  ;;  %7382 = vmatprep.subr.bf16.mxu0 %v7381_v32  ;;  %v7269_v53 = vpack.c.bf16 %v3765_v19, %v3762_v18  ;;  %v3766_v35 = vld [vmem:[#allocation19 + $0xe8] sm:$0xff]  ;;  %v3768_v32 = vld [vmem:[#allocation19 + $0xf8] sm:$0xff]  ;;  %v7285_v19 = vpack.c.bf16 %v3789_v12, %v3786_v11 }
 0x860   :  { %v7399_v39 = vpack.c.bf16 %v3766_v35, %v3763_v31  ;;  %v7273_v40 = vpack.c.bf16 %v3771_v28, %v3768_v32  ;;  %v3889_v31 = vld [vmem:[#allocation19 + $0x4c0] sm:$0xff]  ;;  %v7287_v35 = vpack.c.bf16 %v3788_v21, %v3785_v59  ;;  %v3791_v28 = vld [vmem:[#allocation19 + $0x1b0] sm:$0xff]  ;;  %v3816_v59 = vld [vmem:[#allocation19 + $0x278] sm:$0xff] }
 0x861   :  { %3575 = vmatmul.mubr.f32.vlgmr.msra.gmra.mrb[26].mxu1 %v3268_v34  ;;  %6123 = vmatmul.mubr.f32.vlgmr.msra.gmra.mrb[26].mxu0 %v3271_v49  ;;  %v3756_v34 = vld [vmem:[#allocation19 + $0x98] sm:$0xff]  ;;  %v3819_v21 = vld [vmem:[#allocation19 + $0x290] sm:$0xff] }
 0x862   :  { %7256 = vmatpush1.bf16.msra.mxu1 %v7255_v3  ;;  %7384 = vmatpush3.bf16.msra.mxu0 %v7383_v46  ;;  %v7265_v10 = vpack.c.bf16 %v3759_v5, %v3756_v34  ;;  %v3770_v3 = vld [vmem:[#allocation19 + $0x108] sm:$0xff]  ;;  %v3769_v46 = vld [vmem:[#allocation19 + $0x100] sm:$0xff]  ;;  %v7281_v5 = vpack.c.bf16 %v3783_v44, %v3780_v1  ;;  %v7297_v44 = vpack.c.bf16 %v3807_v29, %v3804_v55 }
 0x863   :  { %4147 = vmatprep.mubr.f32.mxu0 %v9340_v42  ;;  %3580 = vmatprep.mubr.f32.mxu1 %v8743_v0  ;;  %v7275_v52 = vpack.c.bf16 %v3770_v3, %v3767_v25  ;;  %v7403_v23 = vpack.c.bf16 %v3772_v20, %v3769_v46  ;;  %v3798_v25 = vld [vmem:[#allocation19 + $0x1e8] sm:$0xff]  ;;  %v3801_v3 = vld [vmem:[#allocation19 + $0x200] sm:$0xff]  ;;  %v3895_v46 = vld [vmem:[#allocation19 + $0x4f0] sm:$0xff] }
 0x864   :  { %7258 = vmatprep.subr.bf16.mxu1 %v7257_v16  ;;  %7386 = vmatprep.subr.bf16.mxu0 %v7385_v45  ;;  %v3823_v16 = vld [vmem:[#allocation19 + $0x2b0] sm:$0xff]  ;;  %v3826_v45 = vld [vmem:[#allocation19 + $0x2c8] sm:$0xff] }
 0x865   :  { %3581 = vmatmul.mubr.f32.gmra.mrb[28].mxu1 %v3271_v49  ;;  %v7401_v49 = vpack.c.bf16 %v3820_v37, %v3817_v36  ;;  %v3794_v36 = vld [vmem:[#allocation19 + $0x1c8] sm:$0xff]  ;;  %v7289_v37 = vpack.c.bf16 %v3795_v30, %v3792_v26  ;;  %v7305_v30 = vpack.c.bf16 %v3819_v21, %v3816_v59  ;;  %v3845_v59 = vld [vmem:[#allocation19 + $0x360] sm:$0xff]  ;;  %v3848_v21 = vld [vmem:[#allocation19 + $0x378] sm:$0xff] }
 0x866   :  { %7260 = vmatpush1.bf16.msra.mxu1 %v7259_v60  ;;  %3993 = vmatprep.mubr.f32.mxu1 %v9340_v42  ;;  %v7395_v42 = vpack.c.bf16 %v3760_v17, %v3757_v14  ;;  %v3775_v60 = vld [vmem:[#allocation19 + $0x130] sm:$0xff]  ;;  %v7283_v17 = vpack.c.bf16 %v3782_v8, %v3779_v6  ;;  %v7291_v20 = vpack.c.bf16 %v3794_v36, %v3791_v28  ;;  %v3810_v6 = vld [vmem:[#allocation19 + $0x248] sm:$0xff]  ;;  %v3813_v8 = vld [vmem:[#allocation19 + $0x260] sm:$0xff] }
 0x867   :  { %7388 = vmatpush3.bf16.msra.mxu0 %v7387_v27  ;;  %7262 = vmatprep.subr.bf16.mxu1 %v7261_v61  ;;  %v7405_v27 = vpack.c.bf16 %v3826_v45, %v3823_v16  ;;  %v3778_v61 = vld [vmem:[#allocation19 + $0x148] sm:$0xff]  ;;  %v3883_v14 = vld [vmem:[#allocation19 + $0x490] sm:$0xff]  ;;  %v3800_v16 = vld [vmem:[#allocation19 + $0x1f8] sm:$0xff]  ;;  %v7301_v12 = vpack.c.bf16 %v3813_v8, %v3810_v6 }
 0x868   :  { %7390 = vmatprep.subr.bf16.mxu0 %v7389_v4  ;;  %v3832_v4 = vld [vmem:[#allocation19 + $0x2f8] sm:$0xff]  ;;  %v7407_v34 = vpack.c.bf16 %v3778_v61, %v3775_v60  ;;  %v3847_v45 = vld [vmem:[#allocation19 + $0x370] sm:$0xff]  ;;  %v3901_v60 = vld [vmem:[#allocation19 + $0x520] sm:$0xff]  ;;  %v7295_v61 = vpack.c.bf16 %v3800_v16, %v3797_v56 }
 0x869   :  { %v3868_v28 = vld [vmem:[#allocation19 + $0x418] sm:$0xff]  ;;  %v3822_v36 = vld [vmem:[#allocation19 + $0x2a8] sm:$0xff]  ;;  %v3833_v6 = vld [vmem:[#allocation19 + $0x300] sm:$0xff] }
 0x86a   :  { %7264 = vmatpush1.bf16.msra.mxu1 %v7263_v51  ;;  %v3781_v51 = vld [vmem:[#allocation19 + $0x160] sm:$0xff]  ;;  %v3874_v56 = vld [vmem:[#allocation19 + $0x448] sm:$0xff]  ;;  %v3828_v16 = vld [vmem:[#allocation19 + $0x2d8] sm:$0xff] }
 0x86b   :  { %7392 = vmatpush3.bf16.msra.mxu0 %v7391_v2  ;;  %7266 = vmatprep.subr.bf16.mxu1 %v7265_v10  ;;  %v7409_v2 = vpack.c.bf16 %v3832_v4, %v3829_v43  ;;  %v3784_v10 = vld [vmem:[#allocation19 + $0x178] sm:$0xff]  ;;  %v3803_v43 = vld [vmem:[#allocation19 + $0x210] sm:$0xff]  ;;  %v3806_v4 = vld [vmem:[#allocation19 + $0x228] sm:$0xff] }
 0x86c   :  { %7394 = vmatprep.subr.bf16.mxu0 %v7393_v15  ;;  %v3886_v15 = vld [vmem:[#allocation19 + $0x4a8] sm:$0xff]  ;;  %v7411_v18 = vpack.c.bf16 %v3784_v10, %v3781_v51  ;;  %v3907_v51 = vld [vmem:[#allocation19 + $0x550] sm:$0xff]  ;;  %v7299_v10 = vpack.c.bf16 %v3806_v4, %v3803_v43  ;;  %v3837_v4 = vld [vmem:[#allocation19 + $0x320] sm:$0xff] }
 0x86d   :  { %v3834_v43 = vld [vmem:[#allocation19 + $0x308] sm:$0xff]  ;;  %v3836_v8 = vld [vmem:[#allocation19 + $0x318] sm:$0xff] }
 0x86e   :  { %7268 = vmatpush1.bf16.msra.mxu1 %v7267_v24  ;;  %v7413_v24 = vpack.c.bf16 %v3886_v15, %v3883_v14  ;;  %v3809_v14 = vld [vmem:[#allocation19 + $0x240] sm:$0xff]  ;;  %v3812_v15 = vld [vmem:[#allocation19 + $0x258] sm:$0xff] }
 0x86f   :  { %7396 = vmatpush3.bf16.msra.mxu0 %v7395_v42  ;;  %7270 = vmatprep.subr.bf16.mxu1 %v7269_v53  ;;  %v3835_v42 = vld [vmem:[#allocation19 + $0x310] sm:$0xff]  ;;  %v3838_v53 = vld [vmem:[#allocation19 + $0x328] sm:$0xff] }
 0x870   :  { %7398 = vmatprep.subr.bf16.mxu0 %v7397_v47  ;;  %v3892_v47 = vld [vmem:[#allocation19 + $0x4d8] sm:$0xff]  ;;  %v7415_v32 = vpack.c.bf16 %v3838_v53, %v3835_v42  ;;  %v7303_v53 = vpack.c.bf16 %v3812_v15, %v3809_v14  ;;  %v3842_v14 = vld [vmem:[#allocation19 + $0x348] sm:$0xff] }
 0x871   :  { %v3916_v42 = vld [vmem:[#allocation19 + $0x598] sm:$0xff]  ;;  %v3846_v15 = vld [vmem:[#allocation19 + $0x368] sm:$0xff] }
 0x872   :  { %7272 = vmatpush1.bf16.msra.mxu1 %v7271_v33  ;;  %v7417_v33 = vpack.c.bf16 %v3892_v47, %v3889_v31  ;;  %v3815_v31 = vld [vmem:[#allocation19 + $0x270] sm:$0xff]  ;;  %v3818_v47 = vld [vmem:[#allocation19 + $0x288] sm:$0xff] }
 0x873   :  { %7400 = vmatpush3.bf16.msra.mxu0 %v7399_v39  ;;  %7274 = vmatprep.subr.bf16.mxu1 %v7273_v40  ;;  %v3841_v39 = vld [vmem:[#allocation19 + $0x340] sm:$0xff]  ;;  %v3844_v40 = vld [vmem:[#allocation19 + $0x358] sm:$0xff] }
 0x874   :  { %7402 = vmatprep.subr.bf16.mxu0 %v7401_v49  ;;  %v3898_v49 = vld [vmem:[#allocation19 + $0x508] sm:$0xff]  ;;  %v7419_v54 = vpack.c.bf16 %v3844_v40, %v3841_v39  ;;  %v7307_v40 = vpack.c.bf16 %v3818_v47, %v3815_v31  ;;  %v3861_v31 = vld [vmem:[#allocation19 + $0x3e0] sm:$0xff] }
 0x875   :  { %v3922_v39 = vld [vmem:[#allocation19 + $0x5c8] sm:$0xff] }
 0x876   :  { %7276 = vmatpush1.bf16.msra.mxu1 %v7275_v52  ;;  %v7293_v52 = vpack.c.bf16 %v3801_v3, %v3798_v25 }
 0x877   :  { %7404 = vmatpush3.bf16.msra.mxu0 %v7403_v23  ;;  %7278 = vmatprep.subr.bf16.mxu1 %v7277_v58  ;;  %v7421_v23 = vpack.c.bf16 %v3898_v49, %v3895_v46  ;;  %v3850_v58 = vld [vmem:[#allocation19 + $0x388] sm:$0xff]  ;;  %v3821_v46 = vld [vmem:[#allocation19 + $0x2a0] sm:$0xff]  ;;  %v3824_v49 = vld [vmem:[#allocation19 + $0x2b8] sm:$0xff] }
 0x878   :  { %7406 = vmatprep.subr.bf16.mxu0 %v7405_v27  ;;  %v3904_v27 = vld [vmem:[#allocation19 + $0x538] sm:$0xff]  ;;  %v7423_v1 = vpack.c.bf16 %v3850_v58, %v3847_v45  ;;  %v3831_v45 = vld [vmem:[#allocation19 + $0x2f0] sm:$0xff]  ;;  %v7311_v58 = vpack.c.bf16 %v3824_v49, %v3821_v46  ;;  %v3869_v49 = vld [vmem:[#allocation19 + $0x420] sm:$0xff] }
 0x879   :  { %v7313_v29 = vpack.c.bf16 %v3831_v45, %v3828_v16 }
 0x87a   :  { %7280 = vmatpush1.bf16.msra.mxu1 %v7279_v41  ;;  %v3853_v41 = vld [vmem:[#allocation19 + $0x3a0] sm:$0xff] }
 0x87b   :  { %7408 = vmatpush3.bf16.msra.mxu0 %v7407_v34  ;;  %7282 = vmatprep.subr.bf16.mxu1 %v7281_v5  ;;  %v7425_v34 = vpack.c.bf16 %v3904_v27, %v3901_v60  ;;  %v3856_v5 = vld [vmem:[#allocation19 + $0x3b8] sm:$0xff]  ;;  %v3827_v60 = vld [vmem:[#allocation19 + $0x2d0] sm:$0xff]  ;;  %v3830_v27 = vld [vmem:[#allocation19 + $0x2e8] sm:$0xff] }
 0x87c   :  { %7410 = vmatprep.subr.bf16.mxu0 %v7409_v2  ;;  %v3910_v2 = vld [vmem:[#allocation19 + $0x568] sm:$0xff]  ;;  %v7427_v11 = vpack.c.bf16 %v3856_v5, %v3853_v41  ;;  %v7315_v41 = vpack.c.bf16 %v3830_v27, %v3827_v60  ;;  %v7317_v5 = vpack.c.bf16 %v3837_v4, %v3834_v43  ;;  %v3881_v27 = vld [vmem:[#allocation19 + $0x480] sm:$0xff] }
 0x87e   :  { %7284 = vmatpush1.bf16.msra.mxu1 %v7283_v17  ;;  %v3859_v17 = vld [vmem:[#allocation19 + $0x3d0] sm:$0xff] }
 0x87f   :  { %7412 = vmatpush3.bf16.msra.mxu0 %v7411_v18  ;;  %7286 = vmatprep.subr.bf16.mxu1 %v7285_v19  ;;  %v7429_v18 = vpack.c.bf16 %v3910_v2, %v3907_v51  ;;  %v3862_v19 = vld [vmem:[#allocation19 + $0x3e8] sm:$0xff]  ;;  %v3840_v51 = vld [vmem:[#allocation19 + $0x338] sm:$0xff]  ;;  %v3843_v2 = vld [vmem:[#allocation19 + $0x350] sm:$0xff] }
 0x880   :  { %7414 = vmatprep.subr.bf16.mxu0 %v7413_v24  ;;  %v3913_v24 = vld [vmem:[#allocation19 + $0x580] sm:$0xff]  ;;  %v7431_v26 = vpack.c.bf16 %v3862_v19, %v3859_v17 }
 0x881   :  { %v3849_v17 = vld [vmem:[#allocation19 + $0x380] sm:$0xff] }
 0x882   :  { %4148 = vmatmul.mubr.f32.vlgmr.msra.gmra.mrb[28].mxu0 %v9336_v57  ;;  %7288 = vmatpush1.bf16.msra.mxu1 %v7287_v35  ;;  %v3865_v35 = vld [vmem:[#allocation19 + $0x400] sm:$0xff]  ;;  %v7325_v19 = vpack.c.bf16 %v3849_v17, %v3846_v15  ;;  %v3899_v17 = vld [vmem:[#allocation19 + $0x510] sm:$0xff] }
 0x883   :  { %4152 = vmatprep.mubr.f32.mxu0 %v9359_v13  ;;  %7416 = vmatpush3.bf16.msra.mxu0 %v7415_v32  ;;  %v7433_v32 = vpack.c.bf16 %v3916_v42, %v3913_v24  ;;  %v7435_v25 = vpack.c.bf16 %v3868_v28, %v3865_v35  ;;  %v3852_v24 = vld [vmem:[#allocation19 + $0x398] sm:$0xff]  ;;  %v3855_v42 = vld [vmem:[#allocation19 + $0x3b0] sm:$0xff] }
 0x884   :  { %7290 = vmatprep.subr.bf16.mxu1 %v7289_v37  ;;  %7418 = vmatprep.subr.bf16.mxu0 %v7417_v33  ;;  %v3825_v37 = vld [vmem:[#allocation19 + $0x2c0] sm:$0xff]  ;;  %v3919_v33 = vld [vmem:[#allocation19 + $0x5b0] sm:$0xff]  ;;  %v3864_v28 = vld [vmem:[#allocation19 + $0x3f8] sm:$0xff] }
 0x885   :  { %v7309_v3 = vpack.c.bf16 %v3825_v37, %v3822_v36  ;;  %v3867_v36 = vld [vmem:[#allocation19 + $0x410] sm:$0xff] }
 0x886   :  { %4153 = vmatmul.mubr.f32.gmra.mrb[30].mxu0 %v9357_v9  ;;  %7292 = vmatpush1.bf16.msra.mxu1 %v7291_v20  ;;  %v3871_v20 = vld [vmem:[#allocation19 + $0x430] sm:$0xff] }
 0x887   :  { %7420 = vmatpush3.bf16.msra.mxu0 %v7419_v54  ;;  %4222 = vmatprep.mubr.f32.mxu0 %v9348_v62  ;;  %v7437_v54 = vpack.c.bf16 %v3922_v39, %v3919_v33  ;;  %v7439_v55 = vpack.c.bf16 %v3874_v56, %v3871_v20  ;;  %v3863_v33 = vld [vmem:[#allocation19 + $0x3f0] sm:$0xff]  ;;  %v3866_v39 = vld [vmem:[#allocation19 + $0x408] sm:$0xff]  ;;  %v3872_v20 = vld [vmem:[#allocation19 + $0x438] sm:$0xff] }
 0x888   :  { %7294 = vmatprep.subr.bf16.mxu1 %v7293_v52  ;;  %7422 = vmatprep.subr.bf16.mxu0 %v7421_v23  ;;  %v3925_v52 = vld [vmem:[#allocation19 + $0x5e0] sm:$0xff]  ;;  %v3928_v23 = vld [vmem:[#allocation19 + $0x5f8] sm:$0xff]  ;;  %v3879_v56 = vld [vmem:[#allocation19 + $0x470] sm:$0xff]  ;;  %v7343_v16 = vpack.c.bf16 %v3872_v20, %v3869_v49 }
 0x889   :  { %v4315_v49 = vld [vmem:[#allocation22 + $0x8] sm:$0xff]  ;;  %v4317_v20 = vld [vmem:[#allocation22 + $0x18] sm:$0xff] }
 0x88a   :  { %7296 = vmatpush1.bf16.msra.mxu1 %v7295_v61  ;;  %v3877_v61 = vld [vmem:[#allocation19 + $0x460] sm:$0xff] }
 0x88b   :  { %7424 = vmatpush3.bf16.msra.mxu0 %v7423_v1  ;;  %7298 = vmatprep.subr.bf16.mxu1 %v7297_v44  ;;  %v7441_v1 = vpack.c.bf16 %v3928_v23, %v3925_v52  ;;  %v3880_v44 = vld [vmem:[#allocation19 + $0x478] sm:$0xff]  ;;  %v3875_v52 = vld [vmem:[#allocation19 + $0x450] sm:$0xff]  ;;  %v3878_v23 = vld [vmem:[#allocation19 + $0x468] sm:$0xff] }
 0x88c   :  { %7426 = vmatprep.subr.bf16.mxu0 %v7425_v34  ;;  %v7443_v34 = vpack.c.bf16 %v3880_v44, %v3877_v61  ;;  %v3884_v61 = vld [vmem:[#allocation19 + $0x498] sm:$0xff]  ;;  %v3891_v44 = vld [vmem:[#allocation19 + $0x4d0] sm:$0xff] }
 0x88d   :  { %v7351_v43 = vpack.c.bf16 %v3884_v61, %v3881_v27  ;;  %v4325_v27 = vld [vmem:[#allocation22 + $0x58] sm:$0xff] }
 0x88e   :  { %7300 = vmatpush1.bf16.msra.mxu1 %v7299_v10  ;;  %v7319_v10 = vpack.c.bf16 %v3836_v8, %v3833_v6  ;;  %v3897_v6 = vld [vmem:[#allocation19 + $0x500] sm:$0xff] }
 0x88f   :  { %7428 = vmatpush3.bf16.msra.mxu0 %v7427_v11  ;;  %7302 = vmatprep.subr.bf16.mxu1 %v7301_v12  ;;  %v7321_v11 = vpack.c.bf16 %v3843_v2, %v3840_v51  ;;  %v3839_v12 = vld [vmem:[#allocation19 + $0x330] sm:$0xff]  ;;  %v3893_v2 = vld [vmem:[#allocation19 + $0x4e0] sm:$0xff] }
 0x890   :  { %7430 = vmatprep.subr.bf16.mxu0 %v7429_v18  ;;  %v7323_v18 = vpack.c.bf16 %v3842_v14, %v3839_v12  ;;  %v3903_v12 = vld [vmem:[#allocation19 + $0x530] sm:$0xff] }
 0x892   :  { %7304 = vmatpush1.bf16.msra.mxu1 %v7303_v53  ;;  %v3851_v53 = vld [vmem:[#allocation19 + $0x390] sm:$0xff] }
 0x893   :  { %7432 = vmatpush3.bf16.msra.mxu0 %v7431_v26  ;;  %7306 = vmatprep.subr.bf16.mxu1 %v7305_v30  ;;  %v3854_v26 = vld [vmem:[#allocation19 + $0x3a8] sm:$0xff] }
 0x894   :  { %7434 = vmatprep.subr.bf16.mxu0 %v7433_v32  ;;  %v3858_v30 = vld [vmem:[#allocation19 + $0x3c8] sm:$0xff]  ;;  %v7331_v47 = vpack.c.bf16 %v3854_v26, %v3851_v53  ;;  %v3857_v32 = vld [vmem:[#allocation19 + $0x3c0] sm:$0xff]  ;;  %v3915_v53 = vld [vmem:[#allocation19 + $0x590] sm:$0xff] }
 0x895   :  { %v7333_v35 = vpack.c.bf16 %v3861_v31, %v3858_v30  ;;  %v3911_v31 = vld [vmem:[#allocation19 + $0x570] sm:$0xff] }
 0x896   :  { %7308 = vmatpush1.bf16.msra.mxu1 %v7307_v40  ;;  %v3870_v40 = vld [vmem:[#allocation19 + $0x428] sm:$0xff] }
 0x897   :  { %7436 = vmatpush3.bf16.msra.mxu0 %v7435_v25  ;;  %7310 = vmatprep.subr.bf16.mxu1 %v7309_v3  ;;  %v3873_v25 = vld [vmem:[#allocation19 + $0x440] sm:$0xff]  ;;  %v7339_v3 = vpack.c.bf16 %v3866_v39, %v3863_v33  ;;  %v3927_v33 = vld [vmem:[#allocation19 + $0x5f0] sm:$0xff] }
 0x898   :  { %7438 = vmatprep.subr.bf16.mxu0 %v7437_v54  ;;  %v7341_v46 = vpack.c.bf16 %v3873_v25, %v3870_v40  ;;  %v3876_v54 = vld [vmem:[#allocation19 + $0x458] sm:$0xff]  ;;  %v3923_v25 = vld [vmem:[#allocation19 + $0x5d0] sm:$0xff] }
 0x899   :  { %v7345_v45 = vpack.c.bf16 %v3879_v56, %v3876_v54  ;;  %v7445_v54 = vpack.c.bf16 %v4317_v20, %v4315_v49  ;;  %v4314_v56 = vld [vmem:[#allocation22] sm:$0xff]  ;;  %v4353_v49 = vld [vmem:[#allocation22 + $0x138] sm:$0xff] }
 0x89a   :  { %7312 = vmatpush1.bf16.msra.mxu1 %v7311_v58  ;;  %v3882_v58 = vld [vmem:[#allocation19 + $0x488] sm:$0xff] }
 0x89b   :  { %7440 = vmatpush3.bf16.msra.mxu0 %v7439_v55  ;;  %7314 = vmatprep.subr.bf16.mxu1 %v7313_v29  ;;  %v3885_v55 = vld [vmem:[#allocation19 + $0x4a0] sm:$0xff]  ;;  %v7347_v29 = vpack.c.bf16 %v3878_v23, %v3875_v52  ;;  %v4319_v52 = vld [vmem:[#allocation22 + $0x28] sm:$0xff] }
 0x89c   :  { %7442 = vmatprep.subr.bf16.mxu0 %v7441_v1  ;;  %v7349_v60 = vpack.c.bf16 %v3885_v55, %v3882_v58  ;;  %v3888_v1 = vld [vmem:[#allocation19 + $0x4b8] sm:$0xff]  ;;  %v4318_v58 = vld [vmem:[#allocation22 + $0x20] sm:$0xff] }
 0x89d   :  { %v7353_v4 = vpack.c.bf16 %v3891_v44, %v3888_v1  ;;  %v4321_v23 = vld [vmem:[#allocation22 + $0x38] sm:$0xff]  ;;  %v4324_v1 = vld [vmem:[#allocation22 + $0x50] sm:$0xff] }
 0x89e   :  { %7316 = vmatpush1.bf16.msra.mxu1 %v7315_v41  ;;  %v3887_v41 = vld [vmem:[#allocation19 + $0x4b0] sm:$0xff]  ;;  %v7449_v55 = vpack.c.bf16 %v4321_v23, %v4319_v52  ;;  %v4329_v44 = vld [vmem:[#allocation22 + $0x78] sm:$0xff] }
 0x89f   :  { %7444 = vmatpush3.bf16.msra.mxu0 %v7443_v34  ;;  %7318 = vmatprep.subr.bf16.mxu1 %v7317_v5  ;;  %v3890_v34 = vld [vmem:[#allocation19 + $0x4c8] sm:$0xff]  ;;  %v4357_v52 = vld [vmem:[#allocation22 + $0x158] sm:$0xff] }
 0x8a0   :  { %v3894_v5 = vld [vmem:[#allocation19 + $0x4e8] sm:$0xff]  ;;  %v7355_v8 = vpack.c.bf16 %v3890_v34, %v3887_v41  ;;  %7446 = vmatprep.subr.bf16.mxu0 %v7445_v54  ;;  %v4328_v34 = vld [vmem:[#allocation22 + $0x70] sm:$0xff] }
 0x8a1   :  { %3994 = vmatmul.mubr.f32.vlgmr.msra.gmra.mrb[26].mxu1 %v9336_v57  ;;  %v7327_v57 = vpack.c.bf16 %v3848_v21, %v3845_v59  ;;  %v7357_v51 = vpack.c.bf16 %v3897_v6, %v3894_v5  ;;  %v3909_v59 = vld [vmem:[#allocation19 + $0x560] sm:$0xff]  ;;  %v4331_v5 = vld [vmem:[#allocation22 + $0x88] sm:$0xff] }
 0x8a2   :  { %4223 = vmatmul.mubr.f32.vlgmr.msra.gmra.mrb[32].mxu0 %v9379_v7  ;;  %3999 = vmatprep.mubr.f32.mxu1 %v9359_v13  ;;  %v7329_v13 = vpack.c.bf16 %v3855_v42, %v3852_v24  ;;  %v3905_v42 = vld [vmem:[#allocation19 + $0x540] sm:$0xff] }
 0x8a3   :  { %7320 = vmatpush1.bf16.msra.mxu1 %v7319_v10  ;;  %4227 = vmatprep.mubr.f32.mxu0 %v9383_v38  ;;  %v3896_v10 = vld [vmem:[#allocation19 + $0x4f8] sm:$0xff]  ;;  %v4326_v41 = vld [vmem:[#allocation22 + $0x60] sm:$0xff] }
 0x8a4   :  { %7322 = vmatprep.subr.bf16.mxu1 %v7321_v11  ;;  %v3900_v11 = vld [vmem:[#allocation19 + $0x518] sm:$0xff]  ;;  %v7359_v14 = vpack.c.bf16 %v3896_v10, %v3893_v2  ;;  %v4330_v2 = vld [vmem:[#allocation22 + $0x80] sm:$0xff] }
 0x8a5   :  { %4000 = vmatmul.mubr.f32.gmra.mrb[28].mxu1 %v9357_v9  ;;  %v3860_v9 = vld [vmem:[#allocation19 + $0x3d8] sm:$0xff]  ;;  %v7361_v15 = vpack.c.bf16 %v3903_v12, %v3900_v11  ;;  %v4335_v11 = vld [vmem:[#allocation22 + $0xa8] sm:$0xff] }
 0x8a6   :  { %4228 = vmatmul.mubr.f32.gmra.mrb[34].mxu0 %v9388_v22  ;;  %4070 = vmatprep.mubr.f32.mxu1 %v9348_v62  ;;  %v7335_v37 = vpack.c.bf16 %v3860_v9, %v3857_v32  ;;  %v7337_v62 = vpack.c.bf16 %v3867_v36, %v3864_v28  ;;  %v3921_v32 = vld [vmem:[#allocation19 + $0x5c0] sm:$0xff]  ;;  %v4332_v10 = vld [vmem:[#allocation22 + $0x90] sm:$0xff] }
 0x8a7   :  { %7324 = vmatpush1.bf16.msra.mxu1 %v7323_v18  ;;  %v3902_v18 = vld [vmem:[#allocation19 + $0x528] sm:$0xff]  ;;  %v3917_v36 = vld [vmem:[#allocation19 + $0x5a0] sm:$0xff] }
 0x8a8   :  { %7326 = vmatprep.subr.bf16.mxu1 %v7325_v19  ;;  %v3906_v19 = vld [vmem:[#allocation19 + $0x548] sm:$0xff]  ;;  %v7363_v21 = vpack.c.bf16 %v3902_v18, %v3899_v17  ;;  %v4333_v6 = vld [vmem:[#allocation22 + $0x98] sm:$0xff]  ;;  %v4336_v18 = vld [vmem:[#allocation22 + $0xb0] sm:$0xff] }
 0x8a9   :  { %v7365_v24 = vpack.c.bf16 %v3909_v59, %v3906_v19  ;;  %v4337_v12 = vld [vmem:[#allocation22 + $0xb8] sm:$0xff]  ;;  %v4334_v17 = vld [vmem:[#allocation22 + $0xa0] sm:$0xff]  ;;  %v4339_v19 = vld [vmem:[#allocation22 + $0xc8] sm:$0xff] }
 0x8aa   :  { %v4341_v59 = vld [vmem:[#allocation22 + $0xd8] sm:$0xff] }
 0x8ab   :  { %7328 = vmatpush1.bf16.msra.mxu1 %v7327_v57  ;;  %v3908_v57 = vld [vmem:[#allocation19 + $0x558] sm:$0xff] }
 0x8ac   :  { %7330 = vmatprep.subr.bf16.mxu1 %v7329_v13  ;;  %v3912_v13 = vld [vmem:[#allocation19 + $0x578] sm:$0xff]  ;;  %v7367_v26 = vpack.c.bf16 %v3908_v57, %v3905_v42  ;;  %v4338_v42 = vld [vmem:[#allocation22 + $0xc0] sm:$0xff] }
 0x8ad   :  { %v7369_v30 = vpack.c.bf16 %v3915_v53, %v3912_v13  ;;  %v4340_v57 = vld [vmem:[#allocation22 + $0xd0] sm:$0xff]  ;;  %v4343_v53 = vld [vmem:[#allocation22 + $0xe8] sm:$0xff] }
 0x8af   :  { %7332 = vmatpush1.bf16.msra.mxu1 %v7331_v47  ;;  %v3914_v47 = vld [vmem:[#allocation19 + $0x588] sm:$0xff] }
 0x8b0   :  { %7334 = vmatprep.subr.bf16.mxu1 %v7333_v35  ;;  %v3918_v35 = vld [vmem:[#allocation19 + $0x5a8] sm:$0xff]  ;;  %v7371_v9 = vpack.c.bf16 %v3914_v47, %v3911_v31  ;;  %v7471_v47 = vpack.c.bf16 %v4340_v57, %v4338_v42  ;;  %v4373_v42 = vld [vmem:[#allocation22 + $0x1d8] sm:$0xff] }
 0x8b1   :  { %v7373_v28 = vpack.c.bf16 %v3921_v32, %v3918_v35  ;;  %v4342_v32 = vld [vmem:[#allocation22 + $0xe0] sm:$0xff] }
 0x8b3   :  { %7336 = vmatpush1.bf16.msra.mxu1 %v7335_v37  ;;  %v3920_v37 = vld [vmem:[#allocation19 + $0x5b8] sm:$0xff] }
 0x8b4   :  { %7338 = vmatprep.subr.bf16.mxu1 %v7337_v62  ;;  %v3924_v62 = vld [vmem:[#allocation19 + $0x5d8] sm:$0xff]  ;;  %v7375_v39 = vpack.c.bf16 %v3920_v37, %v3917_v36  ;;  %v4347_v36 = vld [vmem:[#allocation22 + $0x108] sm:$0xff] }
 0x8b5   :  { %v7377_v40 = vpack.c.bf16 %v3927_v33, %v3924_v62  ;;  %v4349_v37 = vld [vmem:[#allocation22 + $0x118] sm:$0xff] }
 0x8b7   :  { %7340 = vmatpush1.bf16.msra.mxu1 %v7339_v3  ;;  %v3926_v3 = vld [vmem:[#allocation19 + $0x5e8] sm:$0xff] }
 0x8b8   :  { %7342 = vmatprep.subr.bf16.mxu1 %v7341_v46  ;;  %v7379_v46 = vpack.c.bf16 %v3926_v3, %v3923_v25  ;;  %v4346_v25 = vld [vmem:[#allocation22 + $0x100] sm:$0xff]  ;;  %v4348_v3 = vld [vmem:[#allocation22 + $0x110] sm:$0xff] }
 0x8b9   :  { %v7479_v20 = vpack.c.bf16 %v4348_v3, %v4346_v25 }
 0x8bb   :  { %7344 = vmatpush1.bf16.msra.mxu1 %v7343_v16  ;;  %v4316_v16 = vld [vmem:[#allocation22 + $0x10] sm:$0xff] }
 0x8bc   :  { %7346 = vmatprep.subr.bf16.mxu1 %v7345_v45  ;;  %v7447_v45 = vpack.c.bf16 %v4316_v16, %v4314_v56  ;;  %v4350_v56 = vld [vmem:[#allocation22 + $0x120] sm:$0xff]  ;;  %v4352_v16 = vld [vmem:[#allocation22 + $0x130] sm:$0xff] }
 0x8bd   :  { %v7483_v23 = vpack.c.bf16 %v4352_v16, %v4350_v56  ;;  %v4582_v56 = vld [vmem:[#allocation24 + $0x10] sm:$0xff]  ;;  %v4585_v16 = vld [vmem:[#allocation24 + $0x28] sm:$0xff] }
 0x8be   :  { %7448 = vmatpush1.bf16.msra.mxu0 %v7447_v45  ;;  %v4355_v45 = vld [vmem:[#allocation22 + $0x148] sm:$0xff] }
 0x8bf   :  { %7348 = vmatpush1.bf16.msra.mxu1 %v7347_v29  ;;  %v4320_v29 = vld [vmem:[#allocation22 + $0x30] sm:$0xff]  ;;  %7450 = vmatprep.subr.bf16.mxu0 %v7449_v55  ;;  %v4354_v55 = vld [vmem:[#allocation22 + $0x140] sm:$0xff] }
 0x8c0   :  { %7350 = vmatprep.subr.bf16.mxu1 %v7349_v60  ;;  %v4323_v60 = vld [vmem:[#allocation22 + $0x48] sm:$0xff] }
 0x8c1   :  { %v7453_v61 = vpack.c.bf16 %v4325_v27, %v4323_v60  ;;  %v4359_v60 = vld [vmem:[#allocation22 + $0x168] sm:$0xff]  ;;  %v4361_v27 = vld [vmem:[#allocation22 + $0x178] sm:$0xff] }
 0x8c3   :  { %7352 = vmatpush1.bf16.msra.mxu1 %v7351_v43 }
 0x8c4   :  { %7354 = vmatprep.subr.bf16.mxu1 %v7353_v4 }
 0x8c7   :  { %7356 = vmatpush1.bf16.msra.mxu1 %v7355_v8  ;;  %v7459_v8 = vpack.c.bf16 %v4328_v34, %v4326_v41  ;;  %v4362_v41 = vld [vmem:[#allocation22 + $0x180] sm:$0xff]  ;;  %v4364_v34 = vld [vmem:[#allocation22 + $0x190] sm:$0xff] }
 0x8c8   :  { %7358 = vmatprep.subr.bf16.mxu1 %v7357_v51  ;;  %v7461_v51 = vpack.c.bf16 %v4333_v6, %v4331_v5  ;;  %v9434_v5 = vld [vmem:[#allocation18] sm:$0x7]  ;;  %v7495_v6 = vpack.c.bf16 %v4364_v34, %v4362_v41  ;;  %v4594_v41 = vld [vmem:[#allocation24 + $0x70] sm:$0xff]  ;;  %v4597_v34 = vld [vmem:[#allocation24 + $0x88] sm:$0xff] }
 0x8cb   :  { %7360 = vmatpush1.bf16.msra.mxu1 %v7359_v14  ;;  %v7463_v14 = vpack.c.bf16 %v4332_v10, %v4330_v2  ;;  %v4369_v2 = vld [vmem:[#allocation22 + $0x1b8] sm:$0xff] }
 0x8cc   :  { %7362 = vmatprep.subr.bf16.mxu1 %v7361_v15  ;;  %v7465_v15 = vpack.c.bf16 %v4337_v12, %v4335_v11  ;;  %v4366_v12 = vld [vmem:[#allocation22 + $0x1a0] sm:$0xff] }
 0x8cf   :  { %7364 = vmatpush1.bf16.msra.mxu1 %v7363_v21  ;;  %v7467_v21 = vpack.c.bf16 %v4336_v18, %v4334_v17 }
 0x8d0   :  { %7366 = vmatprep.subr.bf16.mxu1 %v7365_v24  ;;  %v7469_v24 = vpack.c.bf16 %v4341_v59, %v4339_v19 }
 0x8d3   :  { %7368 = vmatpush1.bf16.msra.mxu1 %v7367_v26  ;;  %v4345_v26 = vld [vmem:[#allocation22 + $0xf8] sm:$0xff] }
 0x8d4   :  { %7370 = vmatprep.subr.bf16.mxu1 %v7369_v30  ;;  %v7473_v35 = vpack.c.bf16 %v4345_v26, %v4343_v53  ;;  %v4372_v53 = vld [vmem:[#allocation22 + $0x1d0] sm:$0xff] }
 0x8d7   :  { %7372 = vmatpush1.bf16.msra.mxu1 %v7371_v9  ;;  %v4344_v9 = vld [vmem:[#allocation22 + $0xf0] sm:$0xff] }
 0x8d8   :  { %7374 = vmatprep.subr.bf16.mxu1 %v7373_v28 }
 0x8db   :  { %7376 = vmatpush1.bf16.msra.mxu1 %v7375_v39  ;;  %v7475_v39 = vpack.c.bf16 %v4344_v9, %v4342_v32  ;;  %v4376_v32 = vld [vmem:[#allocation22 + $0x1f0] sm:$0xff] }
 0x8dc   :  { %7378 = vmatprep.subr.bf16.mxu1 %v7377_v40  ;;  %v7477_v40 = vpack.c.bf16 %v4349_v37, %v4347_v36  ;;  %v4381_v36 = vld [vmem:[#allocation22 + $0x218] sm:$0xff] }
 0x8df   :  { %7380 = vmatpush1.bf16.msra.mxu1 %v7379_v46  ;;  %v4351_v46 = vld [vmem:[#allocation22 + $0x128] sm:$0xff] }
 0x8e0   :  { %v7481_v54 = vpack.c.bf16 %v4353_v49, %v4351_v46  ;;  %v4581_v46 = vld [vmem:[#allocation24 + $0x8] sm:$0xff]  ;;  %v4583_v49 = vld [vmem:[#allocation24 + $0x18] sm:$0xff] }
 0x8e2   :  { %4071 = vmatmul.mubr.f32.vlgmr.msra.gmra.mrb[26].mxu1 %v9379_v7  ;;  %v7451_v7 = vpack.c.bf16 %v4320_v29, %v4318_v58  ;;  %v7485_v58 = vpack.c.bf16 %v4357_v52, %v4355_v45  ;;  %v4356_v29 = vld [vmem:[#allocation22 + $0x150] sm:$0xff]  ;;  %v4587_v45 = vld [vmem:[#allocation24 + $0x38] sm:$0xff] }
 0x8e3   :  { %4076 = vmatprep.mubr.f32.mxu1 %v9383_v38  ;;  %v4322_v38 = vld [vmem:[#allocation22 + $0x40] sm:$0xff] }
 0x8e4   :  { %7452 = vmatpush1.bf16.msra.mxu0 %v7451_v7  ;;  %v7455_v43 = vpack.c.bf16 %v4324_v1, %v4322_v38  ;;  %v7487_v7 = vpack.c.bf16 %v4356_v29, %v4354_v55  ;;  %v4358_v38 = vld [vmem:[#allocation22 + $0x160] sm:$0xff]  ;;  %v4360_v1 = vld [vmem:[#allocation22 + $0x170] sm:$0xff]  ;;  %v4589_v29 = vld [vmem:[#allocation24 + $0x48] sm:$0xff] }
 0x8e5   :  { %7454 = vmatprep.subr.bf16.mxu0 %v7453_v61  ;;  %v7489_v61 = vpack.c.bf16 %v4361_v27, %v4359_v60  ;;  %v4586_v55 = vld [vmem:[#allocation24 + $0x30] sm:$0xff]  ;;  %v4591_v60 = vld [vmem:[#allocation24 + $0x58] sm:$0xff] }
 0x8e6   :  { %4077 = vmatmul.mubr.f32.gmra.mrb[28].mxu1 %v9388_v22  ;;  %v4327_v22 = vld [vmem:[#allocation22 + $0x68] sm:$0xff] }
 0x8e7   :  { %v7457_v4 = vpack.c.bf16 %v4329_v44, %v4327_v22  ;;  %v4363_v22 = vld [vmem:[#allocation22 + $0x188] sm:$0xff]  ;;  %v4365_v44 = vld [vmem:[#allocation22 + $0x198] sm:$0xff] }
 0x8e8   :  { %7456 = vmatpush1.bf16.msra.mxu0 %v7455_v43  ;;  %v7491_v43 = vpack.c.bf16 %v4360_v1, %v4358_v38  ;;  %v4590_v38 = vld [vmem:[#allocation24 + $0x50] sm:$0xff]  ;;  %v4593_v1 = vld [vmem:[#allocation24 + $0x68] sm:$0xff] }
 0x8e9   :  { %7458 = vmatprep.subr.bf16.mxu0 %v7457_v4  ;;  %v7493_v4 = vpack.c.bf16 %v4365_v44, %v4363_v22  ;;  %v4595_v22 = vld [vmem:[#allocation24 + $0x78] sm:$0xff] }
 0x8ec   :  { %7460 = vmatpush1.bf16.msra.mxu0 %v7459_v8  ;;  %v3429_v8 = vrot.slane %v9434_v5, %v9211_v63 }
 0x8ed   :  { %7462 = vmatprep.subr.bf16.mxu0 %v7461_v51  ;;  %v4367_v51 = vld [vmem:[#allocation22 + $0x1a8] sm:$0xff] }
 0x8ee   :  { %v7497_v11 = vpack.c.bf16 %v4369_v2, %v4367_v51  ;;  %v4596_v2 = vld [vmem:[#allocation24 + $0x80] sm:$0xff] }
 0x8f0   :  { %7464 = vmatpush1.bf16.msra.mxu0 %v7463_v14  ;;  %v4368_v14 = vld [vmem:[#allocation22 + $0x1b0] sm:$0xff] }
 0x8f1   :  { %7466 = vmatprep.subr.bf16.mxu0 %v7465_v15  ;;  %v7499_v18 = vpack.c.bf16 %v4368_v14, %v4366_v12  ;;  %v4603_v12 = vld [vmem:[#allocation24 + $0xb8] sm:$0xff] }
 0x8f4   :  { %7468 = vmatpush1.bf16.msra.mxu0 %v7467_v21 }
 0x8f5   :  { %7470 = vmatprep.subr.bf16.mxu0 %v7469_v24  ;;  %v4371_v24 = vld [vmem:[#allocation22 + $0x1c8] sm:$0xff] }
 0x8f6   :  { %v7501_v57 = vpack.c.bf16 %v4373_v42, %v4371_v24  ;;  %v4600_v24 = vld [vmem:[#allocation24 + $0xa0] sm:$0xff]  ;;  %v4602_v42 = vld [vmem:[#allocation24 + $0xb0] sm:$0xff] }
 0x8f8   :  { %7472 = vmatpush1.bf16.msra.mxu0 %v7471_v47  ;;  %v4377_v47 = vld [vmem:[#allocation22 + $0x1f8] sm:$0xff] }
 0x8f9   :  { %7474 = vmatprep.subr.bf16.mxu0 %v7473_v35 }
 0x8fc   :  { %7476 = vmatpush1.bf16.msra.mxu0 %v7475_v39 }
 0x8fd   :  { %7478 = vmatprep.subr.bf16.mxu0 %v7477_v40 }
 0x900   :  { %7480 = vmatpush1.bf16.msra.mxu0 %v7479_v20  ;;  %v4580_v20 = vld [vmem:[#allocation24] sm:$0xff] }
 0x901   :  { %7482 = vmatprep.subr.bf16.mxu0 %v7481_v54  ;;  %v7541_v54 = vpack.c.bf16 %v4583_v49, %v4581_v46  ;;  %v7543_v52 = vpack.c.bf16 %v4582_v56, %v4580_v20  ;;  %v4610_v46 = vld [vmem:[#allocation24 + $0xf0] sm:$0xff]  ;;  %v4615_v49 = vld [vmem:[#allocation24 + $0x118] sm:$0xff]  ;;  %v4612_v56 = vld [vmem:[#allocation24 + $0x100] sm:$0xff] }
 0x903   :  { %7542 = vmatprep.subr.bf16.mxu1 %v7541_v54 }
 0x904   :  { %7484 = vmatpush1.bf16.msra.mxu0 %v7483_v23  ;;  %v7545_v23 = vpack.c.bf16 %v4587_v45, %v4585_v16  ;;  %7544 = vmatpush1.bf16.msra.mxu1 %v7543_v52  ;;  %v4614_v16 = vld [vmem:[#allocation24 + $0x110] sm:$0xff]  ;;  %v4617_v45 = vld [vmem:[#allocation24 + $0x128] sm:$0xff]  ;;  %v4619_v52 = vld [vmem:[#allocation24 + $0x138] sm:$0xff] }
 0x905   :  { %7486 = vmatprep.subr.bf16.mxu0 %v7485_v58  ;;  %v4584_v58 = vld [vmem:[#allocation24 + $0x20] sm:$0xff] }
 0x906   :  { %v7547_v27 = vpack.c.bf16 %v4586_v55, %v4584_v58  ;;  %7546 = vmatprep.subr.bf16.mxu1 %v7545_v23  ;;  %v7577_v23 = vpack.c.bf16 %v4619_v52, %v4617_v45  ;;  %v4618_v58 = vld [vmem:[#allocation24 + $0x130] sm:$0xff]  ;;  %v4621_v55 = vld [vmem:[#allocation24 + $0x148] sm:$0xff] }
 0x908   :  { %7488 = vmatpush1.bf16.msra.mxu0 %v7487_v7  ;;  %v7549_v7 = vpack.c.bf16 %v4591_v60, %v4589_v29  ;;  %7548 = vmatpush1.bf16.msra.mxu1 %v7547_v27  ;;  %v4623_v29 = vld [vmem:[#allocation24 + $0x158] sm:$0xff] }
 0x909   :  { %7490 = vmatprep.subr.bf16.mxu0 %v7489_v61  ;;  %v4588_v61 = vld [vmem:[#allocation24 + $0x40] sm:$0xff]  ;;  %v7581_v27 = vpack.c.bf16 %v4623_v29, %v4621_v55 }
 0x90a   :  { %v7551_v44 = vpack.c.bf16 %v4590_v38, %v4588_v61  ;;  %7550 = vmatprep.subr.bf16.mxu1 %v7549_v7  ;;  %v4620_v7 = vld [vmem:[#allocation24 + $0x140] sm:$0xff]  ;;  %v4622_v61 = vld [vmem:[#allocation24 + $0x150] sm:$0xff]  ;;  %v4625_v38 = vld [vmem:[#allocation24 + $0x168] sm:$0xff] }
 0x90c   :  { %7492 = vmatpush1.bf16.msra.mxu0 %v7491_v43  ;;  %v7553_v43 = vpack.c.bf16 %v4595_v22, %v4593_v1  ;;  %7552 = vmatpush1.bf16.msra.mxu1 %v7551_v44  ;;  %v4627_v1 = vld [vmem:[#allocation24 + $0x178] sm:$0xff]  ;;  %v7583_v22 = vpack.c.bf16 %v4622_v61, %v4620_v7 }
 0x90d   :  { %7494 = vmatprep.subr.bf16.mxu0 %v7493_v4  ;;  %v4592_v4 = vld [vmem:[#allocation24 + $0x60] sm:$0xff]  ;;  %v7585_v44 = vpack.c.bf16 %v4627_v1, %v4625_v38 }
 0x90e   :  { %7554 = vmatprep.subr.bf16.mxu1 %v7553_v43  ;;  %v4624_v43 = vld [vmem:[#allocation24 + $0x160] sm:$0xff] }
 0x910   :  { %7496 = vmatpush1.bf16.msra.mxu0 %v7495_v6  ;;  %v4599_v6 = vld [vmem:[#allocation24 + $0x98] sm:$0xff] }
 0x911   :  { %7498 = vmatprep.subr.bf16.mxu0 %v7497_v11  ;;  %v7557_v51 = vpack.c.bf16 %v4599_v6, %v4597_v34  ;;  %v4601_v11 = vld [vmem:[#allocation24 + $0xa8] sm:$0xff]  ;;  %v4631_v34 = vld [vmem:[#allocation24 + $0x198] sm:$0xff] }
 0x914   :  { %v5948_v13 = vpop.f32.mrb[22].mxu0  ;;  %7500 = vmatpush1.bf16.msra.mxu0 %v7499_v18 }
 0x915   :  { %v5949_v30 = vpop.f32.mrb[23].mxu0  ;;  %7502 = vmatprep.subr.bf16.mxu0 %v7501_v57  ;;  %v4605_v57 = vld [vmem:[#allocation24 + $0xc8] sm:$0xff] }
 0x916   :  { %v9432_v31 = vadd.f32 %v5949_v30, %v5948_v13  ;;  %v4370_v13 = vld [vmem:[#allocation22 + $0x1c0] sm:$0xff]  ;;  %v4375_v30 = vld [vmem:[#allocation22 + $0x1e8] sm:$0xff] }
 0x917   :  { %v7503_v26 = vpack.c.bf16 %v4372_v53, %v4370_v13  ;;  %v7505_v35 = vpack.c.bf16 %v4377_v47, %v4375_v30  ;;  %v4607_v13 = vld [vmem:[#allocation24 + $0xd8] sm:$0xff]  ;;  %v7563_v47 = vpack.c.bf16 %v4602_v42, %v4600_v24 }
 0x918   :  { %v5951_v28 = vpop.f32.mrb[24].mxu0  ;;  %v3654_v17 = vadd.f32 %v9432_v31, %v3429_v8  ;;  %v4374_v31 = vld [vmem:[#allocation22 + $0x1e0] sm:$0xff] }
 0x919   :  { %v5952_v62 = vpop.f32.mrb[25].mxu0  ;;  %7504 = vmatpush1.bf16.msra.mxu0 %v7503_v26  ;;  %v7507_v9 = vpack.c.bf16 %v4376_v32, %v4374_v31  ;;  %v7565_v32 = vpack.c.bf16 %v4607_v13, %v4605_v57  ;;  %v4636_v57 = vld [vmem:[#allocation24 + $0x1c0] sm:$0xff]  ;;  %v4638_v13 = vld [vmem:[#allocation24 + $0x1d0] sm:$0xff] }
 0x91a   :  { %v5953_v33 = vadd.f32 %v5952_v62, %v5951_v28  ;;  %7506 = vmatprep.subr.bf16.mxu0 %v7505_v35  ;;  %v4379_v28 = vld [vmem:[#allocation22 + $0x208] sm:$0xff] }
 0x91b   :  { %v7509_v37 = vpack.c.bf16 %v4381_v36, %v4379_v28  ;;  %v4606_v28 = vld [vmem:[#allocation24 + $0xd0] sm:$0xff]  ;;  %v4609_v36 = vld [vmem:[#allocation24 + $0xe8] sm:$0xff] }
 0x91c   :  { %v3659_v10 = vadd.f32 %v5953_v33, %v3429_v8  ;;  %v7555_v8 = vpack.c.bf16 %v4594_v41, %v4592_v4  ;;  %v4626_v4 = vld [vmem:[#allocation24 + $0x170] sm:$0xff]  ;;  %v4629_v41 = vld [vmem:[#allocation24 + $0x188] sm:$0xff] }
 0x91d   :  { %7508 = vmatpush1.bf16.msra.mxu0 %v7507_v9  ;;  %v4604_v9 = vld [vmem:[#allocation24 + $0xc0] sm:$0xff]  ;;  %v7587_v6 = vpack.c.bf16 %v4626_v4, %v4624_v43 }
 0x91e   :  { %7510 = vmatprep.subr.bf16.mxu0 %v7509_v37  ;;  %7556 = vmatpush1.bf16.msra.mxu1 %v7555_v8  ;;  %v4611_v37 = vld [vmem:[#allocation24 + $0xf8] sm:$0xff]  ;;  %v7589_v8 = vpack.c.bf16 %v4631_v34, %v4629_v41  ;;  %v4382_v4 = vld [vmem:[#allocation22 + $0x220] sm:$0xff]  ;;  %v4384_v41 = vld [vmem:[#allocation22 + $0x230] sm:$0xff] }
 0x91f   :  { %7558 = vmatprep.subr.bf16.mxu1 %v7557_v51  ;;  %v4628_v51 = vld [vmem:[#allocation24 + $0x180] sm:$0xff] }
 0x934   :  { %v6124_v15 = vpop.f32.mrb[26].mxu0 }
 0x935   :  { %v9439_v19 = vadd.f32 %v6124_v15, %v3659_v10  ;;  %v3728_v59 = vpop.f32.mrb[27].mxu0  ;;  %v4598_v10 = vld [vmem:[#allocation24 + $0x90] sm:$0xff] }
 0x936   :  { %v9441_v21 = vadd.f32 %v3728_v59, %v3654_v17  ;;  %v7559_v17 = vpack.c.bf16 %v4598_v10, %v4596_v2  ;;  %v7561_v59 = vpack.c.bf16 %v4603_v12, %v4601_v11  ;;  %v4630_v2 = vld [vmem:[#allocation24 + $0x190] sm:$0xff]  ;;  %v4633_v10 = vld [vmem:[#allocation24 + $0x1a8] sm:$0xff]  ;;  %v4635_v11 = vld [vmem:[#allocation24 + $0x1b8] sm:$0xff] }
 0x937   :  { %v7591_v12 = vpack.c.bf16 %v4630_v2, %v4628_v51  ;;  %v7515_v2 = vpack.c.bf16 %v4384_v41, %v4382_v4  ;;  %v4642_v4 = vld [vmem:[#allocation24 + $0x1f0] sm:$0xff] }
 0x938   :  { %7560 = vmatpush1.bf16.msra.mxu1 %v7559_v17  ;;  %v4634_v17 = vld [vmem:[#allocation24 + $0x1b0] sm:$0xff] }
 0x939   :  { %7562 = vmatprep.subr.bf16.mxu1 %v7561_v59  ;;  %v4639_v59 = vld [vmem:[#allocation24 + $0x1d8] sm:$0xff] }
 0x93c   :  { %7564 = vmatpush1.bf16.msra.mxu1 %v7563_v47  ;;  %v3425_v47 = vrot.slane %v9434_v5, %v9206_v50 }
 0x93d   :  { %7566 = vmatprep.subr.bf16.mxu1 %v7565_v32  ;;  %v9461_v32 = vld [vmem:[%s9624_s20] sm:$0x7] }
 0x955   :  { %v6004_v62 = vpop.f32.mrb[28].mxu0 }
 0x956   :  { %v6005_v33 = vpop.f32.mrb[29].mxu0 }
 0x957   :  { %v6006_v39 = vadd.f32 %v6005_v33, %v6004_v62  ;;  %v7567_v33 = vpack.c.bf16 %v4606_v28, %v4604_v9 }
 0x959   :  { %v6007_v40 = vpop.f32.mrb[30].mxu0  ;;  %7568 = vmatpush1.bf16.msra.mxu1 %v7567_v33  ;;  %v9468_v33 = vld [vmem:[%s9625_s23] sm:$0x7] }
 0x95a   :  { %v6008_v25 = vpop.f32.mrb[31].mxu0 }
 0x95b   :  { %v9443_v3 = vadd.f32 %v6008_v25, %v6007_v40  ;;  %v7569_v40 = vpack.c.bf16 %v4611_v37, %v4609_v36  ;;  %v4608_v25 = vld [vmem:[#allocation24 + $0xe0] sm:$0xff]  ;;  %v4267_v37 = vrot.slane %v9461_v32, %v9202_v48 }
 0x95c   :  { %v7571_v20 = vpack.c.bf16 %v4610_v46, %v4608_v25  ;;  %v4290_v46 = vrot.slane %v9468_v33, %v9202_v48 }
 0x95d   :  { %7570 = vmatprep.subr.bf16.mxu1 %v7569_v40 }
 0x95e   :  { %7572 = vmatpush1.bf16.msra.mxu1 %v7571_v20  ;;  %v4294_v20 = vrot.slane %v9468_v33, %v9206_v50 }
 0x975   :  { %v6042_v14 = vpop.f32.mrb[32].mxu0 }
 0x976   :  { %v6043_v15 = vpop.f32.mrb[33].mxu0 }
 0x977   :  { %v6044_v18 = vadd.f32 %v6043_v15, %v6042_v14  ;;  %v7593_v14 = vpack.c.bf16 %v4635_v11, %v4633_v10  ;;  %v4632_v15 = vld [vmem:[#allocation24 + $0x1a0] sm:$0xff] }
 0x978   :  { %v7595_v24 = vpack.c.bf16 %v4634_v17, %v4632_v15  ;;  %v4391_v15 = vld [vmem:[#allocation22 + $0x268] sm:$0xff]  ;;  %v4393_v17 = vld [vmem:[#allocation22 + $0x278] sm:$0xff] }
 0x979   :  { %v4225_v53 = vadd.f32 %v6044_v18, %v6006_v39  ;;  %v6045_v26 = vpop.f32.mrb[34].mxu0  ;;  %v4637_v18 = vld [vmem:[#allocation24 + $0x1c8] sm:$0xff] }
 0x97a   :  { %v6046_v30 = vpop.f32.mrb[35].mxu0  ;;  %v7597_v42 = vpack.c.bf16 %v4639_v59, %v4637_v18  ;;  %v7521_v59 = vpack.c.bf16 %v4393_v17, %v4391_v15  ;;  %v5046_v15 = vld [vmem:[#allocation27 + $0x38] sm:$0xff] }
 0x97b   :  { %v9446_v35 = vadd.f32 %v4225_v53, %v9441_v21  ;;  %v6047_v31 = vadd.f32 %v6046_v30, %v6045_v26  ;;  %v4613_v21 = vld [vmem:[#allocation24 + $0x108] sm:$0xff]  ;;  %v7599_v53 = vpack.c.bf16 %v4638_v13, %v4636_v57  ;;  %v3421_v26 = vrot.slane %v9434_v5, %v9202_v48  ;;  %v9454_v30 = vld [vmem:[#allocation21] sm:$0x7] }
 0x97c   :  { %v7573_v54 = vpack.c.bf16 %v4615_v49, %v4613_v21  ;;  %v4248_v28 = vrot.slane %v9454_v30, %v9206_v50  ;;  %v4271_v5 = vrot.slane %v9461_v32, %v9206_v50  ;;  %v4395_v57 = vld [vmem:[#allocation22 + $0x288] sm:$0xff]  ;;  %v4397_v13 = vld [vmem:[#allocation22 + $0x298] sm:$0xff] }
 0x97d   :  { %v4230_v62 = vadd.f32 %v6047_v31, %v9443_v3  ;;  %v7575_v3 = vpack.c.bf16 %v4614_v16, %v4612_v56  ;;  %v4244_v31 = vrot.slane %v9454_v30, %v9202_v48 }
 0x97e   :  { %7574 = vmatprep.subr.bf16.mxu1 %v7573_v54 }
 0x97f   :  { %v9450_v39 = vadd.f32 %v4230_v62, %v9439_v19  ;;  %v4616_v19 = vld [vmem:[#allocation24 + $0x120] sm:$0xff]  ;;  %7576 = vmatpush1.bf16.msra.mxu1 %v7575_v3 }
 0x980   :  { %v7579_v60 = vpack.c.bf16 %v4618_v58, %v4616_v19  ;;  %7578 = vmatprep.subr.bf16.mxu1 %v7577_v23  ;;  %v4378_v19 = vld [vmem:[#allocation22 + $0x200] sm:$0xff]  ;;  %v4380_v58 = vld [vmem:[#allocation22 + $0x210] sm:$0xff] }
 0x981   :  { %v7511_v1 = vpack.c.bf16 %v4380_v58, %v4378_v19 }
 0x983   :  { %7580 = vmatpush1.bf16.msra.mxu1 %v7579_v60  ;;  %v4383_v60 = vld [vmem:[#allocation22 + $0x228] sm:$0xff] }
 0x984   :  { %7582 = vmatprep.subr.bf16.mxu1 %v7581_v27  ;;  %v4385_v27 = vld [vmem:[#allocation22 + $0x238] sm:$0xff] }
 0x987   :  { %7584 = vmatpush1.bf16.msra.mxu1 %v7583_v22 }
 0x988   :  { %7586 = vmatprep.subr.bf16.mxu1 %v7585_v44  ;;  %v7513_v44 = vpack.c.bf16 %v4385_v27, %v4383_v60  ;;  %v4406_v27 = vld [vmem:[#allocation22 + $0x2e0] sm:$0xff] }
 0x98b   :  { %7588 = vmatpush1.bf16.msra.mxu1 %v7587_v6  ;;  %v4387_v6 = vld [vmem:[#allocation22 + $0x248] sm:$0xff] }
 0x98c   :  { %7590 = vmatprep.subr.bf16.mxu1 %v7589_v8  ;;  %v4389_v8 = vld [vmem:[#allocation22 + $0x258] sm:$0xff] }
 0x98d   :  { %v7517_v11 = vpack.c.bf16 %v4389_v8, %v4387_v6  ;;  %v4736_v6 = vld [vmem:[#allocation25 + $0x18] sm:$0xff] }
 0x98f   :  { %7592 = vmatpush1.bf16.msra.mxu1 %v7591_v12  ;;  %v4386_v12 = vld [vmem:[#allocation22 + $0x240] sm:$0xff] }
 0x990   :  { %7594 = vmatprep.subr.bf16.mxu1 %v7593_v14  ;;  %v4388_v14 = vld [vmem:[#allocation22 + $0x250] sm:$0xff] }
 0x991   :  { %v7519_v18 = vpack.c.bf16 %v4388_v14, %v4386_v12  ;;  %v5041_v12 = vld [vmem:[#allocation27 + $0x10] sm:$0xff]  ;;  %v5044_v14 = vld [vmem:[#allocation27 + $0x28] sm:$0xff] }
 0x993   :  { %7596 = vmatpush1.bf16.msra.mxu1 %v7595_v24  ;;  %v4390_v24 = vld [vmem:[#allocation22 + $0x260] sm:$0xff] }
 0x994   :  { %7598 = vmatprep.subr.bf16.mxu1 %v7597_v42  ;;  %v4392_v42 = vld [vmem:[#allocation22 + $0x270] sm:$0xff] }
 0x997   :  { %7600 = vmatpush1.bf16.msra.mxu1 %v7599_v53  ;;  %v7523_v53 = vpack.c.bf16 %v4392_v42, %v4390_v24  ;;  %v5045_v24 = vld [vmem:[#allocation27 + $0x30] sm:$0xff]  ;;  %v5048_v42 = vld [vmem:[#allocation27 + $0x48] sm:$0xff] }
 0x9b5   :  { %v4072_v9 = vpop.f32.mrb[26].mxu1 }
 0x9b6   :  { %v7977_v36 = vadd.f32 %v4072_v9, %v3421_v26  ;;  %v4074_v62 = vpop.f32.mrb[27].mxu1  ;;  %v4399_v9 = vld [vmem:[#allocation22 + $0x2a8] sm:$0xff] }
 0x9b7   :  { %v7978_v40 = vadd.f32 %v4074_v62, %v3425_v47 }
 0x9b8   :  { %v9472_v25 = vadd.f32 %v7977_v36, %v4244_v31 }
 0x9b9   :  { %v9476_v21 = vadd.f32 %v7978_v40, %v4248_v28  ;;  %v4078_v49 = vpop.f32.mrb[28].mxu1  ;;  %v4398_v40 = vld [vmem:[#allocation22 + $0x2a0] sm:$0xff] }
 0x9ba   :  { %v4279_v54 = vmul.f32 %v4267_v37, %v9472_v25  ;;  %v7979_v56 = vadd.f32 %v4078_v49, %v3421_v26  ;;  %v4080_v16 = vpop.f32.mrb[29].mxu1  ;;  %v7525_v26 = vpack.c.bf16 %v4397_v13, %v4395_v57  ;;  %v4405_v49 = vld [vmem:[#allocation22 + $0x2d8] sm:$0xff] }
 0x9bb   :  { %v4280_v45 = vmul.f32 %v4271_v5, %v9476_v21  ;;  %v7980_v52 = vadd.f32 %v4080_v16, %v3425_v47  ;;  %v4394_v47 = vld [vmem:[#allocation22 + $0x280] sm:$0xff]  ;;  %v5050_v57 = vld [vmem:[#allocation27 + $0x58] sm:$0xff] }
 0x9bc   :  { %v4302_v3 = vadd.f32 %v4290_v46, %v4279_v54  ;;  %v9482_v23 = vadd.f32 %v7979_v56, %v4244_v31  ;;  %v4396_v31 = vld [vmem:[#allocation22 + $0x290] sm:$0xff]  ;;  %v4275_v56 = vrot.slane %v9461_v32, %v9211_v63 }
 0x9bd   :  { %v9484_v55 = vadd.f32 %v7980_v52, %v4248_v28  ;;  %v4303_v29 = vadd.f32 %v4294_v20, %v4280_v45  ;;  %v4401_v28 = vld [vmem:[#allocation22 + $0x2b8] sm:$0xff]  ;;  %v7527_v36 = vpack.c.bf16 %v4396_v31, %v4394_v47  ;;  %v4402_v45 = vld [vmem:[#allocation22 + $0x2c0] sm:$0xff]  ;;  %v4404_v52 = vld [vmem:[#allocation22 + $0x2d0] sm:$0xff] }
 0x9be   :  { %v4282_v7 = vmul.f32 %v4267_v37, %v9482_v23  ;;  %v4308_v22 = vmax.f32 %v4302_v3, 0.0  ;;  %v4252_v37 = vrot.slane %v9454_v30, %v9211_v63  ;;  %v7529_v62 = vpack.c.bf16 %v4401_v28, %v4399_v9  ;;  %v4407_v3 = vld [vmem:[#allocation22 + $0x2e8] sm:$0xff]  ;;  %v4409_v30 = vld [vmem:[#allocation22 + $0x2f8] sm:$0xff]  ;;  %v4408_v32 = vld [vmem:[#allocation22 + $0x2f0] sm:$0xff] }
 0x9bf   :  { %v4283_v61 = vmul.f32 %v4271_v5, %v9484_v55  ;;  %v4309_v38 = vmax.f32 %v4303_v29, 0.0  ;;  %v4400_v5 = vld [vmem:[#allocation22 + $0x2b0] sm:$0xff]  ;;  %v7535_v19 = vpack.c.bf16 %v4404_v52, %v4402_v45  ;;  %v7537_v60 = vpack.c.bf16 %v4409_v30, %v4407_v3  ;;  %v5052_v31 = vld [vmem:[#allocation27 + $0x68] sm:$0xff]  ;;  %v5054_v9 = vld [vmem:[#allocation27 + $0x78] sm:$0xff] }
 0x9c0   :  { %v4305_v43 = vadd.f32 %v4290_v46, %v4282_v7  ;;  %v4403_v46 = vld [vmem:[#allocation22 + $0x2c8] sm:$0xff]  ;;  %v9492_v54 = vadd.f32 %v4252_v37, %v9446_v35  ;;  %v9498_v29 = vadd.f32 %v4252_v37, %v9450_v39  ;;  %v4298_v35 = vrot.slane %v9468_v33, %v9211_v63  ;;  %v4643_v63 = vld [vmem:[#allocation24 + $0x1f8] sm:$0xff]  ;;  %v5049_v47 = vld [vmem:[#allocation27 + $0x50] sm:$0xff] }
 0x9c1   :  { %4486 = vmatprep.mubr.f32.mxu0 %v4309_v38  ;;  %v4306_v34 = vadd.f32 %v4294_v20, %v4283_v61  ;;  %v7531_v20 = vpack.c.bf16 %v4400_v5, %v4398_v40  ;;  %v7533_v16 = vpack.c.bf16 %v4405_v49, %v4403_v46  ;;  %v7539_v7 = vpack.c.bf16 %v4408_v32, %v4406_v27  ;;  %v5051_v37 = vld [vmem:[#allocation27 + $0x60] sm:$0xff]  ;;  %v5056_v40 = vld [vmem:[#allocation27 + $0x88] sm:$0xff]  ;;  %v5058_v5 = vld [vmem:[#allocation27 + $0x98] sm:$0xff] }
 0x9c2   :  { %4487 = vmatmul.mubr.f32.vlgmr.msra.gmra.mrb[36].mxu0 %v4308_v22  ;;  %v4311_v10 = vmax.f32 %v4305_v43, 0.0  ;;  %v4281_v58 = vmul.f32 %v4275_v56, %v9492_v54  ;;  %v4284_v38 = vmul.f32 %v4275_v56, %v9498_v29  ;;  %v4640_v43 = vld [vmem:[#allocation24 + $0x1e0] sm:$0xff]  ;;  %v7717_v49 = vpack.c.bf16 %v5058_v5, %v5056_v40  ;;  %v5057_v56 = vld [vmem:[#allocation27 + $0x90] sm:$0xff]  ;;  %v5062_v45 = vld [vmem:[#allocation27 + $0xb8] sm:$0xff] }
 0x9c3   :  { %7512 = vmatpush1.bf16.msra.mxu0 %v7511_v1  ;;  %v4312_v51 = vmax.f32 %v4306_v34, 0.0  ;;  %v7603_v41 = vpack.c.bf16 %v4642_v4, %v4640_v43  ;;  %v4734_v34 = vld [vmem:[#allocation25 + $0x8] sm:$0xff]  ;;  %v5066_v27 = vld [vmem:[#allocation27 + $0xd8] sm:$0xff] }
 0x9c4   :  { %7514 = vmatprep.subr.bf16.mxu0 %v7513_v44  ;;  %v4304_v61 = vadd.f32 %v4298_v35, %v4281_v58  ;;  %v4307_v22 = vadd.f32 %v4298_v35, %v4284_v38  ;;  %v4641_v44 = vld [vmem:[#allocation24 + $0x1e8] sm:$0xff]  ;;  %v7605_v8 = vpack.c.bf16 %v4736_v6, %v4734_v34  ;;  %v5061_v58 = vld [vmem:[#allocation27 + $0xb0] sm:$0xff]  ;;  %v4733_v38 = vld [vmem:[#allocation25] sm:$0xff] }
 0x9c5   :  { %4492 = vmatprep.mubr.f32.mxu0 %v4312_v51  ;;  %v7601_v33 = vpack.c.bf16 %v4643_v63, %v4641_v44  ;;  %v5040_v51 = vld [vmem:[#allocation27 + $0x8] sm:$0xff]  ;;  %v5070_v4 = vld [vmem:[#allocation27 + $0xf8] sm:$0xff] }
 0x9c6   :  { %4493 = vmatmul.mubr.f32.gmra.mrb[38].mxu0 %v4311_v10  ;;  %v4310_v1 = vmax.f32 %v4304_v61, 0.0  ;;  %v4313_v39 = vmax.f32 %v4307_v22, 0.0  ;;  %v5039_v10 = vld [vmem:[#allocation27] sm:$0xff]  ;;  %v4410_v52 = vld [vmem:[%s9626_s26] sm:$0x3]  ;;  %v4740_v6 = vld [vmem:[#allocation25 + $0x38] sm:$0xff] }
 0x9c7   :  { %7516 = vmatpush1.bf16.msra.mxu0 %v7515_v2  ;;  %4563 = vmatprep.mubr.f32.mxu0 %v8743_v0  ;;  %v5042_v2 = vld [vmem:[#allocation27 + $0x18] sm:$0xff]  ;;  %v7703_v17 = vpack.c.bf16 %v5041_v12, %v5039_v10  ;;  %v4415_v35 = vrot.slane %v4410_v52, %v9202_v48  ;;  %v4419_v32 = vrot.slane %v4410_v52, %v9206_v50  ;;  %v5063_v22 = vld [vmem:[#allocation27 + $0xc0] sm:$0xff]  ;;  %v5068_v43 = vld [vmem:[#allocation27 + $0xe8] sm:$0xff] }
 0x9c8   :  { %7518 = vmatprep.subr.bf16.mxu0 %v7517_v11  ;;  %7602 = vmatprep.subr.bf16.mxu1 %v7601_v33  ;;  %v7701_v11 = vpack.c.bf16 %v5042_v2, %v5040_v51  ;;  %v4735_v33 = vld [vmem:[#allocation25 + $0x10] sm:$0xff]  ;;  %v4738_v34 = vld [vmem:[#allocation25 + $0x28] sm:$0xff]  ;;  %v5067_v12 = vld [vmem:[#allocation27 + $0xe0] sm:$0xff] }
 0x9c9   :  { %7604 = vmatpush1.bf16.msra.mxu1 %v7603_v41  ;;  %v7607_v10 = vpack.c.bf16 %v4735_v33, %v4733_v38  ;;  %v4752_v38 = vld [vmem:[#allocation25 + $0x98] sm:$0xff] }
 0x9ca   :  { %7606 = vmatprep.subr.bf16.mxu1 %v7605_v8 }
 0x9cb   :  { %7520 = vmatpush1.bf16.msra.mxu0 %v7519_v18  ;;  %v7705_v18 = vpack.c.bf16 %v5046_v15, %v5044_v14  ;;  %v5069_v14 = vld [vmem:[#allocation27 + $0xf0] sm:$0xff] }
 0x9cc   :  { %7522 = vmatprep.subr.bf16.mxu0 %v7521_v59  ;;  %v5043_v59 = vld [vmem:[#allocation27 + $0x20] sm:$0xff] }
 0x9cd   :  { %v7707_v13 = vpack.c.bf16 %v5045_v24, %v5043_v59  ;;  %v7609_v59 = vpack.c.bf16 %v4740_v6, %v4738_v34  ;;  %v4737_v24 = vld [vmem:[#allocation25 + $0x20] sm:$0xff]  ;;  %v4754_v34 = vld [vmem:[#allocation25 + $0xa8] sm:$0xff]  ;;  %v4756_v6 = vld [vmem:[#allocation25 + $0xb8] sm:$0xff] }
 0x9cf   :  { %7524 = vmatpush1.bf16.msra.mxu0 %v7523_v53  ;;  %v7709_v53 = vpack.c.bf16 %v5050_v57, %v5048_v42  ;;  %v4739_v42 = vld [vmem:[#allocation25 + $0x30] sm:$0xff]  ;;  %v4742_v57 = vld [vmem:[#allocation25 + $0x48] sm:$0xff] }
 0x9d0   :  { %7526 = vmatprep.subr.bf16.mxu0 %v7525_v26  ;;  %v5047_v26 = vld [vmem:[#allocation27 + $0x40] sm:$0xff] }
 0x9d1   :  { %v7711_v28 = vpack.c.bf16 %v5049_v47, %v5047_v26  ;;  %v5072_v26 = vld [vmem:[#allocation27 + $0x108] sm:$0xff]  ;;  %v5074_v47 = vld [vmem:[#allocation27 + $0x118] sm:$0xff] }
 0x9d3   :  { %7528 = vmatpush1.bf16.msra.mxu0 %v7527_v36  ;;  %v7713_v36 = vpack.c.bf16 %v5054_v9, %v5052_v31  ;;  %v7731_v31 = vpack.c.bf16 %v5069_v14, %v5067_v12  ;;  %v5085_v12 = vld [vmem:[#allocation27 + $0x170] sm:$0xff]  ;;  %v7625_v14 = vpack.c.bf16 %v4756_v6, %v4754_v34  ;;  %v4781_v6 = vld [vmem:[#allocation25 + $0x180] sm:$0xff] }
 0x9d4   :  { %7530 = vmatprep.subr.bf16.mxu0 %v7529_v62  ;;  %v5053_v62 = vld [vmem:[#allocation27 + $0x70] sm:$0xff] }
 0x9d5   :  { %v7715_v46 = vpack.c.bf16 %v5053_v62, %v5051_v37  ;;  %v5071_v37 = vld [vmem:[#allocation27 + $0x100] sm:$0xff]  ;;  %v5073_v62 = vld [vmem:[#allocation27 + $0x110] sm:$0xff] }
 0x9d6   :  { %v7735_v52 = vpack.c.bf16 %v5073_v62, %v5071_v37 }
 0x9d7   :  { %7532 = vmatpush1.bf16.msra.mxu0 %v7531_v20  ;;  %v5055_v20 = vld [vmem:[#allocation27 + $0x80] sm:$0xff] }
 0x9d8   :  { %7534 = vmatprep.subr.bf16.mxu0 %v7533_v16  ;;  %v5060_v16 = vld [vmem:[#allocation27 + $0xa8] sm:$0xff]  ;;  %v7719_v3 = vpack.c.bf16 %v5057_v56, %v5055_v20  ;;  %v5078_v56 = vld [vmem:[#allocation27 + $0x138] sm:$0xff] }
 0x9d9   :  { %v7721_v30 = vpack.c.bf16 %v5062_v45, %v5060_v16  ;;  %v5076_v20 = vld [vmem:[#allocation27 + $0x128] sm:$0xff]  ;;  %v4748_v45 = vld [vmem:[#allocation25 + $0x78] sm:$0xff] }
 0x9da   :  { %v4746_v16 = vld [vmem:[#allocation25 + $0x68] sm:$0xff] }
 0x9db   :  { %7536 = vmatpush1.bf16.msra.mxu0 %v7535_v19  ;;  %v5059_v19 = vld [vmem:[#allocation27 + $0xa0] sm:$0xff] }
 0x9dc   :  { %7538 = vmatprep.subr.bf16.mxu0 %v7537_v60  ;;  %v5064_v60 = vld [vmem:[#allocation27 + $0xc8] sm:$0xff] }
 0x9df   :  { %7540 = vmatpush1.bf16.msra.mxu0 %v7539_v7  ;;  %v7723_v7 = vpack.c.bf16 %v5061_v58, %v5059_v19  ;;  %v7737_v19 = vpack.c.bf16 %v5078_v56, %v5076_v20  ;;  %v5075_v58 = vld [vmem:[#allocation27 + $0x120] sm:$0xff]  ;;  %v4768_v20 = vld [vmem:[#allocation25 + $0x118] sm:$0xff] }
 0x9e0   :  { %7702 = vmatprep.subr.bf16.mxu0 %v7701_v11  ;;  %v7729_v11 = vpack.c.bf16 %v5070_v4, %v5068_v43  ;;  %v4751_v43 = vld [vmem:[#allocation25 + $0x90] sm:$0xff]  ;;  %v5084_v4 = vld [vmem:[#allocation27 + $0x168] sm:$0xff] }
 0x9e2   :  { %4564 = vmatmul.mubr.f32.vlgmr.msra.gmra.mrb[36].mxu0 %v4310_v1  ;;  %v7725_v1 = vpack.c.bf16 %v5066_v27, %v5064_v60  ;;  %v7617_v60 = vpack.c.bf16 %v4748_v45, %v4746_v16  ;;  %v4747_v27 = vld [vmem:[#allocation25 + $0x70] sm:$0xff]  ;;  %v4765_v45 = vld [vmem:[#allocation25 + $0x100] sm:$0xff] }
 0x9e3   :  { %4569 = vmatprep.mubr.f32.mxu0 %v8743_v0  ;;  %7704 = vmatpush1.bf16.msra.mxu0 %v7703_v17 }
 0x9e4   :  { %7706 = vmatprep.subr.bf16.mxu0 %v7705_v18 }
 0x9e6   :  { %4570 = vmatmul.mubr.f32.gmra.mrb[38].mxu0 %v4313_v39  ;;  %v5065_v39 = vld [vmem:[#allocation27 + $0xd0] sm:$0xff] }
 0x9e7   :  { %7708 = vmatpush1.bf16.msra.mxu0 %v7707_v13  ;;  %v7727_v8 = vpack.c.bf16 %v5065_v39, %v5063_v22  ;;  %v4749_v39 = vld [vmem:[#allocation25 + $0x80] sm:$0xff] }
 0x9e8   :  { %7710 = vmatprep.subr.bf16.mxu0 %v7709_v53  ;;  %v4744_v53 = vld [vmem:[#allocation25 + $0x58] sm:$0xff] }
 0x9e9   :  { %v7613_v5 = vpack.c.bf16 %v4744_v53, %v4742_v57  ;;  %v5087_v53 = vld [vmem:[#allocation27 + $0x180] sm:$0xff] }
 0x9eb   :  { %7712 = vmatpush1.bf16.msra.mxu0 %v7711_v28  ;;  %v7611_v28 = vpack.c.bf16 %v4739_v42, %v4737_v24  ;;  %v4760_v24 = vld [vmem:[#allocation25 + $0xd8] sm:$0xff] }
 0x9ec   :  { %7714 = vmatprep.subr.bf16.mxu0 %v7713_v36  ;;  %v4741_v36 = vld [vmem:[#allocation25 + $0x40] sm:$0xff] }
 0x9ef   :  { %7716 = vmatpush1.bf16.msra.mxu0 %v7715_v46  ;;  %v4743_v46 = vld [vmem:[#allocation25 + $0x50] sm:$0xff] }
 0x9f0   :  { %7718 = vmatprep.subr.bf16.mxu0 %v7717_v49  ;;  %v7733_v49 = vpack.c.bf16 %v5074_v47, %v5072_v26  ;;  %v5089_v26 = vld [vmem:[#allocation27 + $0x190] sm:$0xff] }
 0x9f1   :  { %v7751_v37 = vpack.c.bf16 %v5089_v26, %v5087_v53 }
 0x9f3   :  { %7720 = vmatpush1.bf16.msra.mxu0 %v7719_v3  ;;  %v7615_v3 = vpack.c.bf16 %v4743_v46, %v4741_v36  ;;  %v4764_v36 = vld [vmem:[#allocation25 + $0xf8] sm:$0xff]  ;;  %v4763_v46 = vld [vmem:[#allocation25 + $0xf0] sm:$0xff] }
 0x9f4   :  { %7722 = vmatprep.subr.bf16.mxu0 %v7721_v30  ;;  %v4745_v30 = vld [vmem:[#allocation25 + $0x60] sm:$0xff] }
 0x9f5   :  { %v7619_v22 = vpack.c.bf16 %v4747_v27, %v4745_v30  ;;  %v4772_v30 = vld [vmem:[#allocation25 + $0x138] sm:$0xff]  ;;  %v4774_v27 = vld [vmem:[#allocation25 + $0x148] sm:$0xff] }
 0x9f7   :  { %7724 = vmatpush1.bf16.msra.mxu0 %v7723_v7  ;;  %v5082_v7 = vld [vmem:[#allocation27 + $0x158] sm:$0xff] }
 0x9f8   :  { %7726 = vmatprep.subr.bf16.mxu0 %v7725_v1 }
 0x9fb   :  { %7728 = vmatpush1.bf16.msra.mxu0 %v7727_v8 }
 0x9fc   :  { %7730 = vmatprep.subr.bf16.mxu0 %v7729_v11  ;;  %v5083_v11 = vld [vmem:[#allocation27 + $0x160] sm:$0xff] }
 0x9fd   :  { %v7747_v42 = vpack.c.bf16 %v5085_v12, %v5083_v11  ;;  %v4785_v12 = vld [vmem:[#allocation25 + $0x1a0] sm:$0xff] }
 0x9ff   :  { %7732 = vmatpush1.bf16.msra.mxu0 %v7731_v31  ;;  %v4757_v31 = vld [vmem:[#allocation25 + $0xc0] sm:$0xff] }
 0xa00   :  { %7734 = vmatprep.subr.bf16.mxu0 %v7733_v49  ;;  %v4766_v49 = vld [vmem:[#allocation25 + $0x108] sm:$0xff] }
 0xa01   :  { %v7637_v16 = vpack.c.bf16 %v4768_v20, %v4766_v49 }
 0xa03   :  { %7736 = vmatpush1.bf16.msra.mxu0 %v7735_v52  ;;  %v4767_v52 = vld [vmem:[#allocation25 + $0x110] sm:$0xff] }
 0xa04   :  { %7738 = vmatprep.subr.bf16.mxu0 %v7737_v19  ;;  %v7639_v19 = vpack.c.bf16 %v4767_v52, %v4765_v45  ;;  %v4806_v45 = vld [vmem:[#allocation25 + $0x248] sm:$0xff]  ;;  %v4808_v52 = vld [vmem:[#allocation25 + $0x258] sm:$0xff] }
 0xab5   :  { %v4565_v61 = vpop.f32.mrb[36].mxu0 }
 0xab6   :  { %v7981_v44 = vadd.f32 %v4565_v61, %v4415_v35  ;;  %v4567_v63 = vpop.f32.mrb[37].mxu0  ;;  %v4750_v61 = vld [vmem:[#allocation25 + $0x88] sm:$0xff] }
 0xab7   :  { %v7982_v41 = vadd.f32 %v4567_v63, %v4419_v32  ;;  %v5081_v63 = vld [vmem:[#allocation27 + $0x150] sm:$0xff]  ;;  %v7621_v33 = vpack.c.bf16 %v4752_v38, %v4750_v61  ;;  %v4773_v38 = vld [vmem:[#allocation25 + $0x140] sm:$0xff] }
 0xab8   :  { %v4576_v15 = vmax.f32 %v7981_v44, 0.0  ;;  %v5079_v44 = vld [vmem:[#allocation27 + $0x140] sm:$0xff] }
 0xab9   :  { %v4577_v51 = vmax.f32 %v7982_v41, 0.0  ;;  %v4571_v2 = vpop.f32.mrb[38].mxu0  ;;  %v5086_v41 = vld [vmem:[#allocation27 + $0x178] sm:$0xff]  ;;  %v7743_v8 = vpack.c.bf16 %v5081_v63, %v5079_v44  ;;  %v4777_v63 = vld [vmem:[#allocation25 + $0x160] sm:$0xff] }
 0xaba   :  { %v7983_v17 = vadd.f32 %v4571_v2, %v4415_v35  ;;  %v4573_v18 = vpop.f32.mrb[39].mxu0  ;;  %v5077_v35 = vld [vmem:[#allocation27 + $0x130] sm:$0xff]  ;;  %v4753_v2 = vld [vmem:[#allocation25 + $0xa0] sm:$0xff] }
 0xabb   :  { %v7984_v13 = vadd.f32 %v4573_v18, %v4419_v32  ;;  %4720 = vmatprep.mubr.f32.mxu1 %v4577_v51  ;;  %v5080_v32 = vld [vmem:[#allocation27 + $0x148] sm:$0xff]  ;;  %v7739_v1 = vpack.c.bf16 %v5077_v35, %v5075_v58  ;;  %v7623_v51 = vpack.c.bf16 %v4751_v43, %v4749_v39  ;;  %v5090_v18 = vld [vmem:[#allocation27 + $0x198] sm:$0xff]  ;;  %v4769_v35 = vld [vmem:[#allocation25 + $0x120] sm:$0xff] }
 0xabc   :  { %4721 = vmatmul.mubr.f32.vlgmr.msra.gmra.mrb[30].mxu1 %v4576_v15  ;;  %v4578_v40 = vmax.f32 %v7983_v17, 0.0  ;;  %v4755_v15 = vld [vmem:[#allocation25 + $0xb0] sm:$0xff]  ;;  %v5088_v17 = vld [vmem:[#allocation27 + $0x188] sm:$0xff]  ;;  %v4780_v39 = vld [vmem:[#allocation25 + $0x178] sm:$0xff] }
 0xabd   :  { %v4579_v9 = vmax.f32 %v7984_v13, 0.0  ;;  %7608 = vmatpush1.bf16.msra.mxu1 %v7607_v10  ;;  %7740 = vmatpush1.bf16.msra.mxu0 %v7739_v1  ;;  %v7745_v10 = vpack.c.bf16 %v5086_v41, %v5084_v4  ;;  %v7627_v57 = vpack.c.bf16 %v4755_v15, %v4753_v2  ;;  %v7749_v13 = vpack.c.bf16 %v5090_v18, %v5088_v17  ;;  %v4775_v1 = vld [vmem:[#allocation25 + $0x150] sm:$0xff]  ;;  %v4782_v43 = vld [vmem:[#allocation25 + $0x188] sm:$0xff]  ;;  %v4784_v4 = vld [vmem:[#allocation25 + $0x198] sm:$0xff] }
 0xabe   :  { %7610 = vmatprep.subr.bf16.mxu1 %v7609_v59  ;;  %v4758_v59 = vld [vmem:[#allocation25 + $0xc8] sm:$0xff]  ;;  %v7653_v34 = vpack.c.bf16 %v4784_v4, %v4782_v43  ;;  %v4788_v2 = vld [vmem:[#allocation25 + $0x1b8] sm:$0xff]  ;;  %v4819_v43 = vld [vmem:[#allocation25 + $0x2b0] sm:$0xff] }
 0xabf   :  { %4726 = vmatprep.mubr.f32.mxu1 %v4579_v9  ;;  %v7629_v47 = vpack.c.bf16 %v4760_v24, %v4758_v59  ;;  %v4759_v9 = vld [vmem:[#allocation25 + $0xd0] sm:$0xff]  ;;  %v4790_v15 = vld [vmem:[#allocation25 + $0x1c8] sm:$0xff]  ;;  %v4792_v17 = vld [vmem:[#allocation25 + $0x1d8] sm:$0xff] }
 0xac0   :  { %4727 = vmatmul.mubr.f32.gmra.mrb[32].mxu1 %v4578_v40  ;;  %v7631_v62 = vpack.c.bf16 %v4759_v9, %v4757_v31  ;;  %v7661_v59 = vpack.c.bf16 %v4792_v17, %v4790_v15  ;;  %v4789_v24 = vld [vmem:[#allocation25 + $0x1c0] sm:$0xff]  ;;  %v4795_v31 = vld [vmem:[#allocation25 + $0x1f0] sm:$0xff]  ;;  %v4798_v9 = vld [vmem:[#allocation25 + $0x208] sm:$0xff] }
 0xac1   :  { %7612 = vmatpush1.bf16.msra.mxu1 %v7611_v28  ;;  %4893 = vmatprep.mubr.f32.mxu1 %v9476_v21  ;;  %v7741_v21 = vpack.c.bf16 %v5082_v7, %v5080_v32  ;;  %v4762_v28 = vld [vmem:[#allocation25 + $0xe8] sm:$0xff]  ;;  %v4776_v32 = vld [vmem:[#allocation25 + $0x158] sm:$0xff]  ;;  %v4827_v15 = vld [vmem:[#allocation25 + $0x2f0] sm:$0xff] }
 0xac2   :  { %7614 = vmatprep.subr.bf16.mxu1 %v7613_v5  ;;  %v7633_v40 = vpack.c.bf16 %v4764_v36, %v4762_v28  ;;  %v4761_v5 = vld [vmem:[#allocation25 + $0xe0] sm:$0xff]  ;;  %v7645_v61 = vpack.c.bf16 %v4776_v32, %v4774_v27  ;;  %v4800_v28 = vld [vmem:[#allocation25 + $0x218] sm:$0xff]  ;;  %v4822_v4 = vld [vmem:[#allocation25 + $0x2c8] sm:$0xff] }
 0xac3   :  { %7742 = vmatprep.subr.bf16.mxu0 %v7741_v21  ;;  %v7635_v56 = vpack.c.bf16 %v4763_v46, %v4761_v5  ;;  %v7647_v21 = vpack.c.bf16 %v4775_v1, %v4773_v38  ;;  %v4802_v5 = vld [vmem:[#allocation25 + $0x228] sm:$0xff]  ;;  %v4804_v46 = vld [vmem:[#allocation25 + $0x238] sm:$0xff] }
 0xac4   :  { %7744 = vmatpush1.bf16.msra.mxu0 %v7743_v8  ;;  %v4783_v8 = vld [vmem:[#allocation25 + $0x190] sm:$0xff]  ;;  %v7673_v20 = vpack.c.bf16 %v4804_v46, %v4802_v5  ;;  %v5199_v5 = vld [vmem:[#allocation28 + $0x18] sm:$0xff] }
 0xac5   :  { %7616 = vmatpush1.bf16.msra.mxu1 %v7615_v3  ;;  %7746 = vmatprep.subr.bf16.mxu0 %v7745_v10  ;;  %v4770_v3 = vld [vmem:[#allocation25 + $0x128] sm:$0xff]  ;;  %v7655_v10 = vpack.c.bf16 %v4783_v8, %v4781_v6  ;;  %v4821_v8 = vld [vmem:[#allocation25 + $0x2c0] sm:$0xff] }
 0xac6   :  { %7618 = vmatprep.subr.bf16.mxu1 %v7617_v60  ;;  %v7641_v58 = vpack.c.bf16 %v4772_v30, %v4770_v3  ;;  %v4771_v60 = vld [vmem:[#allocation25 + $0x130] sm:$0xff]  ;;  %v7677_v30 = vpack.c.bf16 %v4808_v52, %v4806_v45 }
 0xac7   :  { %v7643_v7 = vpack.c.bf16 %v4771_v60, %v4769_v35  ;;  %v4810_v35 = vld [vmem:[#allocation25 + $0x268] sm:$0xff]  ;;  %v4812_v60 = vld [vmem:[#allocation25 + $0x278] sm:$0xff] }
 0xac8   :  { %7748 = vmatpush1.bf16.msra.mxu0 %v7747_v42  ;;  %v4791_v42 = vld [vmem:[#allocation25 + $0x1d0] sm:$0xff]  ;;  %v7681_v32 = vpack.c.bf16 %v4812_v60, %v4810_v35 }
 0xac9   :  { %7620 = vmatpush1.bf16.msra.mxu1 %v7619_v22  ;;  %7750 = vmatprep.subr.bf16.mxu0 %v7749_v13  ;;  %v4778_v22 = vld [vmem:[#allocation25 + $0x168] sm:$0xff]  ;;  %v4796_v13 = vld [vmem:[#allocation25 + $0x1f8] sm:$0xff]  ;;  %v7663_v53 = vpack.c.bf16 %v4791_v42, %v4789_v24  ;;  %v5091_v42 = vld [vmem:[#allocation27 + $0x1a0] sm:$0xff] }
 0xaca   :  { %7622 = vmatprep.subr.bf16.mxu1 %v7621_v33  ;;  %v7649_v44 = vpack.c.bf16 %v4780_v39, %v4778_v22  ;;  %v4779_v33 = vld [vmem:[#allocation25 + $0x170] sm:$0xff]  ;;  %v4813_v22 = vld [vmem:[#allocation25 + $0x280] sm:$0xff] }
 0xacb   :  { %v7651_v41 = vpack.c.bf16 %v4779_v33, %v4777_v63  ;;  %v4815_v39 = vld [vmem:[#allocation25 + $0x290] sm:$0xff]  ;;  %v4817_v33 = vld [vmem:[#allocation25 + $0x2a0] sm:$0xff] }
 0xacc   :  { %7752 = vmatpush1.bf16.msra.mxu0 %v7751_v37  ;;  %v7669_v37 = vpack.c.bf16 %v4800_v28, %v4798_v9  ;;  %v5097_v9 = vld [vmem:[#allocation27 + $0x1d0] sm:$0xff] }
 0xacd   :  { %7624 = vmatpush1.bf16.msra.mxu1 %v7623_v51  ;;  %v4786_v51 = vld [vmem:[#allocation25 + $0x1a8] sm:$0xff] }
 0xace   :  { %7626 = vmatprep.subr.bf16.mxu1 %v7625_v14  ;;  %v7657_v11 = vpack.c.bf16 %v4788_v2, %v4786_v51  ;;  %v4787_v14 = vld [vmem:[#allocation25 + $0x1b0] sm:$0xff]  ;;  %v4826_v2 = vld [vmem:[#allocation25 + $0x2e8] sm:$0xff] }
 0xacf   :  { %v7659_v18 = vpack.c.bf16 %v4787_v14, %v4785_v12  ;;  %v4823_v51 = vld [vmem:[#allocation25 + $0x2d0] sm:$0xff]  ;;  %v4825_v14 = vld [vmem:[#allocation25 + $0x2e0] sm:$0xff] }
 0xad0   :  { %v7699_v17 = vpack.c.bf16 %v4827_v15, %v4825_v14  ;;  %v5200_v15 = vld [vmem:[#allocation28 + $0x20] sm:$0xff] }
 0xad1   :  { %7628 = vmatpush1.bf16.msra.mxu1 %v7627_v57  ;;  %v4794_v57 = vld [vmem:[#allocation25 + $0x1e8] sm:$0xff] }
 0xad2   :  { %7630 = vmatprep.subr.bf16.mxu1 %v7629_v47  ;;  %v7665_v26 = vpack.c.bf16 %v4796_v13, %v4794_v57  ;;  %v4793_v47 = vld [vmem:[#allocation25 + $0x1e0] sm:$0xff]  ;;  %v5093_v57 = vld [vmem:[#allocation27 + $0x1b0] sm:$0xff] }
 0xad3   :  { %v7667_v36 = vpack.c.bf16 %v4795_v31, %v4793_v47  ;;  %v7755_v13 = vpack.c.bf16 %v5093_v57, %v5091_v42  ;;  %v5095_v31 = vld [vmem:[#allocation27 + $0x1c0] sm:$0xff] }
 0xad4   :  { %v7759_v28 = vpack.c.bf16 %v5097_v9, %v5095_v31  ;;  %v5209_v31 = vld [vmem:[#allocation28 + $0x68] sm:$0xff]  ;;  %v5211_v9 = vld [vmem:[#allocation28 + $0x78] sm:$0xff] }
 0xad5   :  { %7632 = vmatpush1.bf16.msra.mxu1 %v7631_v62  ;;  %v4797_v62 = vld [vmem:[#allocation25 + $0x200] sm:$0xff] }
 0xad6   :  { %7634 = vmatprep.subr.bf16.mxu1 %v7633_v40  ;;  %v4799_v40 = vld [vmem:[#allocation25 + $0x210] sm:$0xff] }
 0xad7   :  { %v7671_v49 = vpack.c.bf16 %v4799_v40, %v4797_v62  ;;  %v5197_v40 = vld [vmem:[#allocation28 + $0x8] sm:$0xff] }
 0xad8   :  { %v7765_v46 = vpack.c.bf16 %v5199_v5, %v5197_v40  ;;  %v5212_v5 = vld [vmem:[#allocation28 + $0x80] sm:$0xff] }
 0xad9   :  { %7636 = vmatpush1.bf16.msra.mxu1 %v7635_v56  ;;  %v4801_v56 = vld [vmem:[#allocation25 + $0x220] sm:$0xff] }
 0xada   :  { %7638 = vmatprep.subr.bf16.mxu1 %v7637_v16  ;;  %v4803_v16 = vld [vmem:[#allocation25 + $0x230] sm:$0xff] }
 0xadb   :  { %v7675_v3 = vpack.c.bf16 %v4803_v16, %v4801_v56  ;;  %v5003_v16 = vld [vmem:[%s9629_s0] sm:$0x3] }
 0xadc   :  { %v5008_v35 = vrot.slane %v5003_v16, %v9202_v48 }
 0xadd   :  { %7640 = vmatpush1.bf16.msra.mxu1 %v7639_v19  ;;  %v4805_v19 = vld [vmem:[#allocation25 + $0x240] sm:$0xff] }
 0xade   :  { %7642 = vmatprep.subr.bf16.mxu1 %v7641_v58  ;;  %v4807_v58 = vld [vmem:[#allocation25 + $0x250] sm:$0xff] }
 0xadf   :  { %v7679_v27 = vpack.c.bf16 %v4807_v58, %v4805_v19 }
 0xae1   :  { %7644 = vmatpush1.bf16.msra.mxu1 %v7643_v7  ;;  %v4809_v7 = vld [vmem:[#allocation25 + $0x260] sm:$0xff] }
 0xae2   :  { %7646 = vmatprep.subr.bf16.mxu1 %v7645_v61  ;;  %v4814_v61 = vld [vmem:[#allocation25 + $0x288] sm:$0xff] }
 0xae5   :  { %7648 = vmatpush1.bf16.msra.mxu1 %v7647_v21  ;;  %v4818_v21 = vld [vmem:[#allocation25 + $0x2a8] sm:$0xff] }
 0xae6   :  { %7650 = vmatprep.subr.bf16.mxu1 %v7649_v44  ;;  %v4820_v44 = vld [vmem:[#allocation25 + $0x2b8] sm:$0xff] }
 0xae7   :  { %v7689_v63 = vpack.c.bf16 %v4820_v44, %v4818_v21 }
 0xae9   :  { %7652 = vmatpush1.bf16.msra.mxu1 %v7651_v41  ;;  %v4824_v41 = vld [vmem:[#allocation25 + $0x2d8] sm:$0xff] }
 0xaea   :  { %7654 = vmatprep.subr.bf16.mxu1 %v7653_v34  ;;  %v7691_v34 = vpack.c.bf16 %v4819_v43, %v4817_v33  ;;  %v7693_v6 = vpack.c.bf16 %v4824_v41, %v4822_v4  ;;  %v5196_v33 = vld [vmem:[#allocation28] sm:$0xff]  ;;  %v5198_v43 = vld [vmem:[#allocation28 + $0x10] sm:$0xff] }
 0xaed   :  { %7656 = vmatpush1.bf16.msra.mxu1 %v7655_v10  ;;  %v4828_v10 = vld [vmem:[#allocation25 + $0x2f8] sm:$0xff] }
 0xaee   :  { %7658 = vmatprep.subr.bf16.mxu1 %v7657_v11  ;;  %v7695_v11 = vpack.c.bf16 %v4823_v51, %v4821_v8  ;;  %v7697_v12 = vpack.c.bf16 %v4828_v10, %v4826_v2  ;;  %v7767_v10 = vpack.c.bf16 %v5198_v43, %v5196_v33  ;;  %v5230_v33 = vld [vmem:[#allocation28 + $0x110] sm:$0xff]  ;;  %v5233_v43 = vld [vmem:[#allocation28 + $0x128] sm:$0xff] }
 0xaf1   :  { %7660 = vmatpush1.bf16.msra.mxu1 %v7659_v18  ;;  %v5092_v18 = vld [vmem:[#allocation27 + $0x1a8] sm:$0xff] }
 0xaf2   :  { %7662 = vmatprep.subr.bf16.mxu1 %v7661_v59  ;;  %v5094_v59 = vld [vmem:[#allocation27 + $0x1b8] sm:$0xff] }
 0xaf3   :  { %v7753_v24 = vpack.c.bf16 %v5094_v59, %v5092_v18  ;;  %v5205_v59 = vld [vmem:[#allocation28 + $0x48] sm:$0xff] }
 0xaf5   :  { %7664 = vmatpush1.bf16.msra.mxu1 %v7663_v53  ;;  %7754 = vmatprep.subr.bf16.mxu0 %v7753_v24  ;;  %v5096_v53 = vld [vmem:[#allocation27 + $0x1c8] sm:$0xff]  ;;  %v5207_v24 = vld [vmem:[#allocation28 + $0x58] sm:$0xff] }
 0xaf6   :  { %7666 = vmatprep.subr.bf16.mxu1 %v7665_v26  ;;  %7756 = vmatpush1.bf16.msra.mxu0 %v7755_v13  ;;  %v5098_v26 = vld [vmem:[#allocation27 + $0x1d8] sm:$0xff] }
 0xaf7   :  { %v7757_v47 = vpack.c.bf16 %v5098_v26, %v5096_v53  ;;  %v7773_v53 = vpack.c.bf16 %v5207_v24, %v5205_v59  ;;  %v5204_v26 = vld [vmem:[#allocation28 + $0x40] sm:$0xff] }
 0xaf9   :  { %7668 = vmatpush1.bf16.msra.mxu1 %v7667_v36  ;;  %7758 = vmatprep.subr.bf16.mxu0 %v7757_v47  ;;  %v5099_v36 = vld [vmem:[#allocation27 + $0x1e0] sm:$0xff]  ;;  %v5206_v47 = vld [vmem:[#allocation28 + $0x50] sm:$0xff] }
 0xafa   :  { %7670 = vmatprep.subr.bf16.mxu1 %v7669_v37  ;;  %7760 = vmatpush1.bf16.msra.mxu0 %v7759_v28  ;;  %v5101_v37 = vld [vmem:[#allocation27 + $0x1f0] sm:$0xff]  ;;  %v7775_v28 = vpack.c.bf16 %v5206_v47, %v5204_v26 }
 0xafb   :  { %v7763_v62 = vpack.c.bf16 %v5101_v37, %v5099_v36  ;;  %v5213_v36 = vld [vmem:[#allocation28 + $0x88] sm:$0xff]  ;;  %v5215_v37 = vld [vmem:[#allocation28 + $0x98] sm:$0xff] }
 0xafc   :  { %4894 = vmatmul.mubr.f32.vlgmr.msra.gmra.mrb[30].mxu1 %v9472_v25  ;;  %v4811_v25 = vld [vmem:[#allocation25 + $0x270] sm:$0xff]  ;;  %v7781_v40 = vpack.c.bf16 %v5215_v37, %v5213_v36  ;;  %v5248_v36 = vld [vmem:[#allocation28 + $0x1a0] sm:$0xff] }
 0xafd   :  { %4899 = vmatprep.mubr.f32.mxu1 %v9484_v55  ;;  %7672 = vmatpush1.bf16.msra.mxu1 %v7671_v49  ;;  %v4816_v55 = vld [vmem:[#allocation25 + $0x298] sm:$0xff]  ;;  %v7683_v38 = vpack.c.bf16 %v4811_v25, %v4809_v7  ;;  %v4644_v49 = vld [vmem:[%s9627_s14] sm:$0x3]  ;;  %v5250_v37 = vld [vmem:[#allocation28 + $0x1b0] sm:$0xff] }
 0xafe   :  { %7674 = vmatprep.subr.bf16.mxu1 %v7673_v20  ;;  %v7685_v1 = vpack.c.bf16 %v4816_v55, %v4814_v61  ;;  %v4987_v20 = vld [vmem:[%s9628_s8] sm:$0x3]  ;;  %v4649_v56 = vrot.slane %v4644_v49, %v9202_v48  ;;  %v4653_v45 = vrot.slane %v4644_v49, %v9206_v50 }
 0xaff   :  { %v4992_v52 = vrot.slane %v4987_v20, %v9202_v48  ;;  %v4996_v19 = vrot.slane %v4987_v20, %v9206_v50  ;;  %v5217_v49 = vld [vmem:[#allocation28 + $0xa8] sm:$0xff]  ;;  %v5219_v20 = vld [vmem:[#allocation28 + $0xb8] sm:$0xff] }
 0xb00   :  { %4900 = vmatmul.mubr.f32.gmra.mrb[32].mxu1 %v9482_v23  ;;  %v7687_v23 = vpack.c.bf16 %v4815_v39, %v4813_v22 }
 0xb01   :  { %7676 = vmatpush1.bf16.msra.mxu1 %v7675_v3  ;;  %4970 = vmatprep.mubr.f32.mxu1 %v8743_v0 }
 0xb02   :  { %7678 = vmatprep.subr.bf16.mxu1 %v7677_v30  ;;  %v5019_v30 = vld [vmem:[%s9630_s30] sm:$0x3] }
 0xb03   :  { %v5024_v25 = vrot.slane %v5019_v30, %v9202_v48 }
 0xb05   :  { %7680 = vmatpush1.bf16.msra.mxu1 %v7679_v27 }
 0xb06   :  { %7682 = vmatprep.subr.bf16.mxu1 %v7681_v32  ;;  %v5012_v32 = vrot.slane %v5003_v16, %v9206_v50  ;;  %v7785_v16 = vpack.c.bf16 %v5219_v20, %v5217_v49  ;;  %v5252_v49 = vld [vmem:[#allocation28 + $0x1c0] sm:$0xff]  ;;  %v5254_v20 = vld [vmem:[#allocation28 + $0x1d0] sm:$0xff] }
 0xb09   :  { %7684 = vmatpush1.bf16.msra.mxu1 %v7683_v38  ;;  %v5028_v38 = vrot.slane %v5019_v30, %v9206_v50  ;;  %v5223_v30 = vld [vmem:[#allocation28 + $0xd8] sm:$0xff] }
 0xb0a   :  { %7686 = vmatprep.subr.bf16.mxu1 %v7685_v1 }
 0xb0d   :  { %7688 = vmatpush1.bf16.msra.mxu1 %v7687_v23 }
 0xb0e   :  { %7690 = vmatprep.subr.bf16.mxu1 %v7689_v63 }
 0xb11   :  { %7692 = vmatpush1.bf16.msra.mxu1 %v7691_v34  ;;  %v5201_v34 = vld [vmem:[#allocation28 + $0x28] sm:$0xff] }
 0xb12   :  { %7694 = vmatprep.subr.bf16.mxu1 %v7693_v6  ;;  %v5203_v6 = vld [vmem:[#allocation28 + $0x38] sm:$0xff] }
 0xb13   :  { %v7769_v14 = vpack.c.bf16 %v5203_v6, %v5201_v34 }
 0xb15   :  { %7696 = vmatpush1.bf16.msra.mxu1 %v7695_v11 }
 0xb16   :  { %7698 = vmatprep.subr.bf16.mxu1 %v7697_v12 }
 0xb19   :  { %7700 = vmatpush1.bf16.msra.mxu1 %v7699_v17  ;;  %v5202_v17 = vld [vmem:[#allocation28 + $0x30] sm:$0xff] }
 0xb1a   :  { %v7771_v57 = vpack.c.bf16 %v5202_v17, %v5200_v15  ;;  %v5238_v15 = vld [vmem:[#allocation28 + $0x150] sm:$0xff]  ;;  %v5241_v17 = vld [vmem:[#allocation28 + $0x168] sm:$0xff] }
 0xb1c   :  { %4971 = vmatmul.mubr.f32.vlgmr.msra.gmra.mrb[30].mxu1 %v9492_v54  ;;  %v5102_v54 = vld [vmem:[#allocation27 + $0x1f8] sm:$0xff] }
 0xb1d   :  { %4976 = vmatprep.mubr.f32.mxu1 %v8743_v0  ;;  %v5100_v0 = vld [vmem:[#allocation27 + $0x1e8] sm:$0xff] }
 0xb20   :  { %4977 = vmatmul.mubr.f32.gmra.mrb[32].mxu1 %v9498_v29  ;;  %v7761_v29 = vpack.c.bf16 %v5102_v54, %v5100_v0  ;;  %v7777_v0 = vpack.c.bf16 %v5211_v9, %v5209_v31  ;;  %v5208_v54 = vld [vmem:[#allocation28 + $0x60] sm:$0xff]  ;;  %v5246_v9 = vld [vmem:[#allocation28 + $0x190] sm:$0xff] }
 0xb21   :  { %v5244_v31 = vld [vmem:[#allocation28 + $0x180] sm:$0xff] }
 0xb22   :  { %7762 = vmatprep.subr.bf16.mxu0 %v7761_v29  ;;  %v5210_v29 = vld [vmem:[#allocation28 + $0x70] sm:$0xff] }
 0xb23   :  { %7764 = vmatpush1.bf16.msra.mxu0 %v7763_v62  ;;  %v7779_v62 = vpack.c.bf16 %v5210_v29, %v5208_v54  ;;  %v7815_v54 = vpack.c.bf16 %v5246_v9, %v5244_v31  ;;  %v5403_v31 = vld [vmem:[#allocation33 + $0x70] sm:$0xff]  ;;  %v5406_v9 = vld [vmem:[#allocation33 + $0x88] sm:$0xff] }
 0xb24   :  { %7766 = vmatprep.subr.bf16.mxu0 %v7765_v46  ;;  %v5214_v46 = vld [vmem:[#allocation28 + $0x90] sm:$0xff] }
 0xbef   :  { %v4972_v3 = vpop.f32.mrb[30].mxu1 }
 0xbf0   :  { %v7985_v58 = vadd.f32 %v4972_v3, %v4649_v56  ;;  %v4974_v60 = vpop.f32.mrb[31].mxu1  ;;  %v5221_v3 = vld [vmem:[#allocation28 + $0xc8] sm:$0xff] }
 0xbf1   :  { %v7986_v27 = vadd.f32 %v4974_v60, %v4653_v45  ;;  %v5222_v60 = vld [vmem:[#allocation28 + $0xd0] sm:$0xff] }
 0xbf2   :  { %v9525_v7 = vadd.f32 %v7985_v58, %v4992_v52  ;;  %v7789_v58 = vpack.c.bf16 %v5223_v30, %v5221_v3  ;;  %v5256_v3 = vld [vmem:[#allocation28 + $0x1e0] sm:$0xff]  ;;  %v5258_v30 = vld [vmem:[#allocation28 + $0x1f0] sm:$0xff] }
 0xbf3   :  { %v9528_v61 = vadd.f32 %v7986_v27, %v4996_v19  ;;  %v4978_v55 = vpop.f32.mrb[32].mxu1  ;;  %v5225_v27 = vld [vmem:[#allocation28 + $0xe8] sm:$0xff] }
 0xbf4   :  { %v5015_v1 = vmul.f32 %v5008_v35, %v9525_v7  ;;  %v7987_v22 = vadd.f32 %v4978_v55, %v4649_v56  ;;  %v4980_v39 = vpop.f32.mrb[33].mxu1  ;;  %v7783_v56 = vpack.c.bf16 %v5214_v46, %v5212_v5  ;;  %v7819_v5 = vpack.c.bf16 %v5250_v37, %v5248_v36  ;;  %v5407_v36 = vld [vmem:[#allocation33 + $0x90] sm:$0xff]  ;;  %v5410_v37 = vld [vmem:[#allocation33 + $0xa8] sm:$0xff] }
 0xbf5   :  { %v5016_v21 = vmul.f32 %v5012_v32, %v9528_v61  ;;  %v7988_v44 = vadd.f32 %v4980_v39, %v4653_v45  ;;  %v5216_v45 = vld [vmem:[#allocation28 + $0xa0] sm:$0xff]  ;;  %v5231_v39 = vld [vmem:[#allocation28 + $0x118] sm:$0xff] }
 0xbf6   :  { %v5031_v23 = vadd.f32 %v5024_v25, %v5015_v1  ;;  %v9533_v63 = vadd.f32 %v7987_v22, %v4992_v52  ;;  %v5218_v52 = vld [vmem:[#allocation28 + $0xb0] sm:$0xff]  ;;  %v5229_v22 = vld [vmem:[#allocation28 + $0x108] sm:$0xff] }
 0xbf7   :  { %v9535_v4 = vadd.f32 %v7988_v44, %v4996_v19  ;;  %v5032_v41 = vadd.f32 %v5028_v38, %v5016_v21  ;;  %v7787_v19 = vpack.c.bf16 %v5218_v52, %v5216_v45  ;;  %v5226_v1 = vld [vmem:[#allocation28 + $0xf0] sm:$0xff]  ;;  %v7797_v44 = vpack.c.bf16 %v5231_v39, %v5229_v22  ;;  %v5259_v45 = vld [vmem:[#allocation28 + $0x1f8] sm:$0xff]  ;;  %v5389_v22 = vld [vmem:[#allocation33] sm:$0xff] }
 0xbf8   :  { %v5017_v8 = vmul.f32 %v5008_v35, %v9533_v63  ;;  %v5035_v11 = vmax.f32 %v5031_v23, 0.0  ;;  %v5220_v35 = vld [vmem:[#allocation28 + $0xc0] sm:$0xff]  ;;  %v5391_v39 = vld [vmem:[#allocation33 + $0x10] sm:$0xff] }
 0xbf9   :  { %v5018_v51 = vmul.f32 %v5012_v32, %v9535_v4  ;;  %v5036_v2 = vmax.f32 %v5032_v41, 0.0  ;;  %v5227_v32 = vld [vmem:[#allocation28 + $0xf8] sm:$0xff]  ;;  %v5228_v23 = vld [vmem:[#allocation28 + $0x100] sm:$0xff] }
 0xbfa   :  { %v5033_v12 = vadd.f32 %v5024_v25, %v5017_v8  ;;  %v7791_v25 = vpack.c.bf16 %v5222_v60, %v5220_v35  ;;  %v7793_v55 = vpack.c.bf16 %v5227_v32, %v5225_v27  ;;  %v5235_v41 = vld [vmem:[#allocation28 + $0x138] sm:$0xff]  ;;  %v7799_v34 = vpack.c.bf16 %v5230_v33, %v5228_v23  ;;  %v5232_v8 = vld [vmem:[#allocation28 + $0x120] sm:$0xff]  ;;  %v5103_v27 = vld [vmem:[%s9631_s29] sm:$0x3] }
 0xbfb   :  { %5179 = vmatprep.mubr.f32.mxu0 %v5036_v2  ;;  %v5034_v18 = vadd.f32 %v5028_v38, %v5018_v51  ;;  %v5224_v38 = vld [vmem:[#allocation28 + $0xe0] sm:$0xff]  ;;  %v7801_v6 = vpack.c.bf16 %v5235_v41, %v5233_v43  ;;  %v5234_v51 = vld [vmem:[#allocation28 + $0x130] sm:$0xff]  ;;  %v5237_v2 = vld [vmem:[#allocation28 + $0x148] sm:$0xff]  ;;  %v5108_v32 = vrot.slane %v5103_v27, %v9202_v48  ;;  %v7831_v41 = vpack.c.bf16 %v5391_v39, %v5389_v22 }
 0xbfc   :  { %5180 = vmatmul.mubr.f32.vlgmr.msra.gmra.mrb[40].mxu0 %v5035_v11  ;;  %v5037_v13 = vmax.f32 %v5033_v12, 0.0  ;;  %v7795_v21 = vpack.c.bf16 %v5226_v1, %v5224_v38  ;;  %v7803_v11 = vpack.c.bf16 %v5234_v51, %v5232_v8  ;;  %v5392_v35 = vld [vmem:[#allocation33 + $0x18] sm:$0xff]  ;;  %v5423_v22 = vld [vmem:[#allocation33 + $0x110] sm:$0xff]  ;;  %v5426_v39 = vld [vmem:[#allocation33 + $0x128] sm:$0xff] }
 0xbfd   :  { %v5038_v42 = vmax.f32 %v5034_v18, 0.0  ;;  %7768 = vmatpush1.bf16.msra.mxu0 %v7767_v10  ;;  %v5239_v10 = vld [vmem:[#allocation28 + $0x158] sm:$0xff] }
 0xbfe   :  { %7770 = vmatprep.subr.bf16.mxu0 %v7769_v14  ;;  %v7805_v12 = vpack.c.bf16 %v5239_v10, %v5237_v2  ;;  %v5236_v14 = vld [vmem:[#allocation28 + $0x140] sm:$0xff]  ;;  %v5243_v18 = vld [vmem:[#allocation28 + $0x178] sm:$0xff] }
 0xbff   :  { %5185 = vmatprep.mubr.f32.mxu0 %v5038_v42  ;;  %v7807_v59 = vpack.c.bf16 %v5238_v15, %v5236_v14  ;;  %v7809_v24 = vpack.c.bf16 %v5243_v18, %v5241_v17  ;;  %v5240_v42 = vld [vmem:[#allocation28 + $0x160] sm:$0xff]  ;;  %v5395_v10 = vld [vmem:[#allocation33 + $0x30] sm:$0xff] }
 0xc00   :  { %5186 = vmatmul.mubr.f32.gmra.mrb[42].mxu0 %v5037_v13  ;;  %v5245_v13 = vld [vmem:[#allocation28 + $0x188] sm:$0xff]  ;;  %v5396_v23 = vld [vmem:[#allocation33 + $0x38] sm:$0xff] }
 0xc01   :  { %7772 = vmatpush1.bf16.msra.mxu0 %v7771_v57  ;;  %v5242_v57 = vld [vmem:[#allocation28 + $0x170] sm:$0xff]  ;;  %v5393_v2 = vld [vmem:[#allocation33 + $0x20] sm:$0xff]  ;;  %v5400_v14 = vld [vmem:[#allocation33 + $0x58] sm:$0xff] }
 0xc02   :  { %7774 = vmatprep.subr.bf16.mxu0 %v7773_v53  ;;  %v5247_v53 = vld [vmem:[#allocation28 + $0x198] sm:$0xff]  ;;  %v7811_v26 = vpack.c.bf16 %v5242_v57, %v5240_v42  ;;  %v7835_v17 = vpack.c.bf16 %v5395_v10, %v5393_v2  ;;  %v5402_v57 = vld [vmem:[#allocation33 + $0x68] sm:$0xff] }
 0xc03   :  { %v7813_v47 = vpack.c.bf16 %v5247_v53, %v5245_v13  ;;  %v5399_v42 = vld [vmem:[#allocation33 + $0x50] sm:$0xff]  ;;  %v5404_v13 = vld [vmem:[#allocation33 + $0x78] sm:$0xff]  ;;  %v5434_v10 = vld [vmem:[#allocation33 + $0x168] sm:$0xff] }
 0xc04   :  { %v5431_v2 = vld [vmem:[#allocation33 + $0x150] sm:$0xff] }
 0xc05   :  { %7776 = vmatpush1.bf16.msra.mxu0 %v7775_v28  ;;  %v5249_v28 = vld [vmem:[#allocation28 + $0x1a8] sm:$0xff] }
 0xc06   :  { %7778 = vmatprep.subr.bf16.mxu0 %v7777_v0  ;;  %v5251_v0 = vld [vmem:[#allocation28 + $0x1b8] sm:$0xff] }
 0xc07   :  { %v7817_v29 = vpack.c.bf16 %v5251_v0, %v5249_v28  ;;  %v5408_v28 = vld [vmem:[#allocation33 + $0x98] sm:$0xff] }
 0xc09   :  { %7780 = vmatpush1.bf16.msra.mxu0 %v7779_v62  ;;  %v5253_v62 = vld [vmem:[#allocation28 + $0x1c8] sm:$0xff] }
 0xc0a   :  { %7782 = vmatprep.subr.bf16.mxu0 %v7781_v40  ;;  %v5255_v40 = vld [vmem:[#allocation28 + $0x1d8] sm:$0xff] }
 0xc0b   :  { %v7821_v46 = vpack.c.bf16 %v5255_v40, %v5253_v62  ;;  %v5412_v62 = vld [vmem:[#allocation33 + $0xb8] sm:$0xff] }
 0xc0d   :  { %7784 = vmatpush1.bf16.msra.mxu0 %v7783_v56  ;;  %v7823_v56 = vpack.c.bf16 %v5254_v20, %v5252_v49  ;;  %v5411_v49 = vld [vmem:[#allocation33 + $0xb0] sm:$0xff]  ;;  %v5414_v20 = vld [vmem:[#allocation33 + $0xc8] sm:$0xff] }
 0xc0e   :  { %7786 = vmatprep.subr.bf16.mxu0 %v7785_v16  ;;  %v5257_v16 = vld [vmem:[#allocation28 + $0x1e8] sm:$0xff] }
 0xc0f   :  { %v7825_v52 = vpack.c.bf16 %v5259_v45, %v5257_v16 }
 0xc11   :  { %7788 = vmatpush1.bf16.msra.mxu0 %v7787_v19  ;;  %v7827_v19 = vpack.c.bf16 %v5258_v30, %v5256_v3  ;;  %v5415_v3 = vld [vmem:[#allocation33 + $0xd0] sm:$0xff]  ;;  %v5418_v30 = vld [vmem:[#allocation33 + $0xe8] sm:$0xff] }
 0xc12   :  { %7790 = vmatprep.subr.bf16.mxu0 %v7789_v58  ;;  %v5390_v58 = vld [vmem:[#allocation33 + $0x8] sm:$0xff] }
 0xc13   :  { %v7829_v60 = vpack.c.bf16 %v5392_v35, %v5390_v58 }
 0xc15   :  { %7792 = vmatpush1.bf16.msra.mxu0 %v7791_v25  ;;  %v5112_v25 = vrot.slane %v5103_v27, %v9206_v50  ;;  %v5419_v27 = vld [vmem:[#allocation33 + $0xf0] sm:$0xff] }
 0xc16   :  { %7794 = vmatprep.subr.bf16.mxu0 %v7793_v55 }
 0xc19   :  { %7796 = vmatpush1.bf16.msra.mxu0 %v7795_v21 }
 0xc1a   :  { %7798 = vmatprep.subr.bf16.mxu0 %v7797_v44  ;;  %v5394_v44 = vld [vmem:[#allocation33 + $0x28] sm:$0xff] }
 0xc1b   :  { %v7833_v51 = vpack.c.bf16 %v5396_v23, %v5394_v44 }
 0xc1d   :  { %7800 = vmatpush1.bf16.msra.mxu0 %v7799_v34 }
 0xc1e   :  { %7802 = vmatprep.subr.bf16.mxu0 %v7801_v6 }
 0xc21   :  { %7804 = vmatpush1.bf16.msra.mxu0 %v7803_v11 }
 0xc22   :  { %7806 = vmatprep.subr.bf16.mxu0 %v7805_v12  ;;  %v5398_v12 = vld [vmem:[#allocation33 + $0x48] sm:$0xff] }
 0xc25   :  { %7808 = vmatpush1.bf16.msra.mxu0 %v7807_v59  ;;  %v7837_v59 = vpack.c.bf16 %v5400_v14, %v5398_v12 }
 0xc26   :  { %7810 = vmatprep.subr.bf16.mxu0 %v7809_v24  ;;  %v5397_v24 = vld [vmem:[#allocation33 + $0x40] sm:$0xff] }
 0xc27   :  { %v7839_v53 = vpack.c.bf16 %v5399_v42, %v5397_v24 }
 0xc29   :  { %7812 = vmatpush1.bf16.msra.mxu0 %v7811_v26  ;;  %v7841_v26 = vpack.c.bf16 %v5404_v13, %v5402_v57  ;;  %v5437_v57 = vld [vmem:[#allocation33 + $0x180] sm:$0xff]  ;;  %v5439_v13 = vld [vmem:[#allocation33 + $0x190] sm:$0xff] }
 0xc2a   :  { %7814 = vmatprep.subr.bf16.mxu0 %v7813_v47  ;;  %v5401_v47 = vld [vmem:[#allocation33 + $0x60] sm:$0xff] }
 0xc2b   :  { %v7843_v0 = vpack.c.bf16 %v5403_v31, %v5401_v47  ;;  %v5444_v47 = vld [vmem:[#allocation33 + $0x1b8] sm:$0xff] }
 0xc2d   :  { %7816 = vmatpush1.bf16.msra.mxu0 %v7815_v54  ;;  %v7845_v54 = vpack.c.bf16 %v5408_v28, %v5406_v9  ;;  %v5441_v9 = vld [vmem:[#allocation33 + $0x1a0] sm:$0xff]  ;;  %v5443_v28 = vld [vmem:[#allocation33 + $0x1b0] sm:$0xff] }
 0xc2e   :  { %7818 = vmatprep.subr.bf16.mxu0 %v7817_v29  ;;  %v5405_v29 = vld [vmem:[#allocation33 + $0x80] sm:$0xff] }
 0xc2f   :  { %v7847_v40 = vpack.c.bf16 %v5407_v36, %v5405_v29  ;;  %v5448_v29 = vld [vmem:[#allocation33 + $0x1d8] sm:$0xff] }
 0xc31   :  { %7820 = vmatpush1.bf16.msra.mxu0 %v7819_v5  ;;  %v7849_v5 = vpack.c.bf16 %v5412_v62, %v5410_v37  ;;  %v5445_v37 = vld [vmem:[#allocation33 + $0x1c0] sm:$0xff]  ;;  %v5447_v62 = vld [vmem:[#allocation33 + $0x1d0] sm:$0xff] }
 0xc32   :  { %7822 = vmatprep.subr.bf16.mxu0 %v7821_v46  ;;  %v5409_v46 = vld [vmem:[#allocation33 + $0xa0] sm:$0xff] }
 0xc33   :  { %v7851_v16 = vpack.c.bf16 %v5411_v49, %v5409_v46  ;;  %v5452_v46 = vld [vmem:[#allocation33 + $0x1f8] sm:$0xff] }
 0xc35   :  { %7824 = vmatpush1.bf16.msra.mxu0 %v7823_v56  ;;  %v5416_v56 = vld [vmem:[#allocation33 + $0xd8] sm:$0xff] }
 0xc36   :  { %7826 = vmatprep.subr.bf16.mxu0 %v7825_v52  ;;  %v7853_v45 = vpack.c.bf16 %v5416_v56, %v5414_v20  ;;  %v5413_v52 = vld [vmem:[#allocation33 + $0xc0] sm:$0xff]  ;;  %v5451_v56 = vld [vmem:[#allocation33 + $0x1f0] sm:$0xff] }
 0xc37   :  { %v7855_v58 = vpack.c.bf16 %v5415_v3, %v5413_v52  ;;  %v5449_v20 = vld [vmem:[#allocation33 + $0x1e0] sm:$0xff] }
 0xc38   :  { %v5549_v52 = vld [vmem:[#allocation36 + $0x18] sm:$0xff]  ;;  %v5546_v3 = vld [vmem:[#allocation36] sm:$0xff] }
 0xc39   :  { %7828 = vmatpush1.bf16.msra.mxu0 %v7827_v19  ;;  %v5420_v19 = vld [vmem:[#allocation33 + $0xf8] sm:$0xff] }
 0xc3a   :  { %7830 = vmatprep.subr.bf16.mxu0 %v7829_v60  ;;  %v7857_v35 = vpack.c.bf16 %v5420_v19, %v5418_v30  ;;  %v5417_v60 = vld [vmem:[#allocation33 + $0xe0] sm:$0xff]  ;;  %v5548_v19 = vld [vmem:[#allocation36 + $0x10] sm:$0xff] }
 0xccf   :  { %v5181_v55 = vpop.f32.mrb[40].mxu0 }
 0xcd0   :  { %v5182_v38 = vadd.f32 %v5181_v55, %v5108_v32  ;;  %v5183_v1 = vpop.f32.mrb[41].mxu0  ;;  %v7859_v55 = vpack.c.bf16 %v5419_v27, %v5417_v60  ;;  %v7895_v60 = vpack.c.bf16 %v5548_v19, %v5546_v3  ;;  %v5589_v3 = vld [vmem:[#allocation36 + $0x158] sm:$0xff] }
 0xcd1   :  { %v5184_v21 = vadd.f32 %v5183_v1, %v5112_v25  ;;  %v5421_v1 = vld [vmem:[#allocation33 + $0x100] sm:$0xff] }
 0xcd2   :  { %v5192_v34 = vmax.f32 %v5182_v38, 0.0  ;;  %v7863_v44 = vpack.c.bf16 %v5423_v22, %v5421_v1 }
 0xcd3   :  { %v5193_v33 = vmax.f32 %v5184_v21, 0.0  ;;  %v5187_v43 = vpop.f32.mrb[42].mxu0  ;;  %v5428_v21 = vld [vmem:[#allocation33 + $0x138] sm:$0xff] }
 0xcd4   :  { %v5188_v6 = vadd.f32 %v5187_v43, %v5108_v32  ;;  %v5189_v8 = vpop.f32.mrb[43].mxu0  ;;  %v5422_v32 = vld [vmem:[#allocation33 + $0x108] sm:$0xff]  ;;  %v7865_v23 = vpack.c.bf16 %v5428_v21, %v5426_v39  ;;  %v5427_v43 = vld [vmem:[#allocation33 + $0x130] sm:$0xff] }
 0xcd5   :  { %v5190_v11 = vadd.f32 %v5189_v8, %v5112_v25  ;;  %5336 = vmatprep.mubr.f32.mxu0 %v5193_v33  ;;  %v5424_v25 = vld [vmem:[#allocation33 + $0x118] sm:$0xff]  ;;  %v5425_v33 = vld [vmem:[#allocation33 + $0x120] sm:$0xff] }
 0xcd6   :  { %5337 = vmatmul.mubr.f32.vlgmr.msra.gmra.mrb[44].mxu0 %v5192_v34  ;;  %v5194_v18 = vmax.f32 %v5188_v6, 0.0  ;;  %v7861_v38 = vpack.c.bf16 %v5424_v25, %v5422_v32  ;;  %v5432_v34 = vld [vmem:[#allocation33 + $0x158] sm:$0xff]  ;;  %v7867_v6 = vpack.c.bf16 %v5427_v43, %v5425_v33  ;;  %v5550_v32 = vld [vmem:[#allocation36 + $0x20] sm:$0xff] }
 0xcd7   :  { %v5195_v15 = vmax.f32 %v5190_v11, 0.0  ;;  %7832 = vmatpush1.bf16.msra.mxu0 %v7831_v41  ;;  %v5430_v41 = vld [vmem:[#allocation33 + $0x148] sm:$0xff]  ;;  %v5436_v11 = vld [vmem:[#allocation33 + $0x178] sm:$0xff] }
 0xcd8   :  { %7834 = vmatprep.subr.bf16.mxu0 %v7833_v51  ;;  %v7869_v8 = vpack.c.bf16 %v5432_v34, %v5430_v41  ;;  %v5429_v51 = vld [vmem:[#allocation33 + $0x140] sm:$0xff]  ;;  %v7873_v14 = vpack.c.bf16 %v5436_v11, %v5434_v10  ;;  %v5552_v25 = vld [vmem:[#allocation36 + $0x30] sm:$0xff] }
 0xcd9   :  { %5342 = vmatprep.mubr.f32.mxu0 %v5195_v15  ;;  %v7871_v12 = vpack.c.bf16 %v5431_v2, %v5429_v51  ;;  %v5433_v15 = vld [vmem:[#allocation33 + $0x160] sm:$0xff]  ;;  %v7899_v1 = vpack.c.bf16 %v5552_v25, %v5550_v32  ;;  %v5556_v21 = vld [vmem:[#allocation36 + $0x50] sm:$0xff] }
 0xcda   :  { %5343 = vmatmul.mubr.f32.gmra.mrb[46].mxu0 %v5194_v18  ;;  %v5438_v18 = vld [vmem:[#allocation33 + $0x188] sm:$0xff]  ;;  %v5560_v34 = vld [vmem:[#allocation36 + $0x70] sm:$0xff] }
 0xcdb   :  { %7836 = vmatpush1.bf16.msra.mxu0 %v7835_v17  ;;  %v5435_v17 = vld [vmem:[#allocation33 + $0x170] sm:$0xff]  ;;  %v5554_v39 = vld [vmem:[#allocation36 + $0x40] sm:$0xff] }
 0xcdc   :  { %7838 = vmatprep.subr.bf16.mxu0 %v7837_v59  ;;  %v5440_v59 = vld [vmem:[#allocation33 + $0x198] sm:$0xff]  ;;  %v7875_v24 = vpack.c.bf16 %v5435_v17, %v5433_v15  ;;  %v7903_v33 = vpack.c.bf16 %v5556_v21, %v5554_v39  ;;  %v5558_v41 = vld [vmem:[#allocation36 + $0x60] sm:$0xff] }
 0xcdd   :  { %v7877_v42 = vpack.c.bf16 %v5440_v59, %v5438_v18  ;;  %v7907_v51 = vpack.c.bf16 %v5560_v34, %v5558_v41  ;;  %v5562_v10 = vld [vmem:[#allocation36 + $0x80] sm:$0xff]  ;;  %v5564_v11 = vld [vmem:[#allocation36 + $0x90] sm:$0xff] }
 0xcde   :  { %v7911_v15 = vpack.c.bf16 %v5564_v11, %v5562_v10  ;;  %v5566_v18 = vld [vmem:[#allocation36 + $0xa0] sm:$0xff]  ;;  %v5568_v59 = vld [vmem:[#allocation36 + $0xb0] sm:$0xff] }
 0xcdf   :  { %7840 = vmatpush1.bf16.msra.mxu0 %v7839_v53  ;;  %v7879_v53 = vpack.c.bf16 %v5439_v13, %v5437_v57  ;;  %v7915_v57 = vpack.c.bf16 %v5568_v59, %v5566_v18  ;;  %v5369_v59 = vld [vmem:[#allocation31] sm:$0x3] }
 0xce0   :  { %7842 = vmatprep.subr.bf16.mxu0 %v7841_v26  ;;  %v5442_v26 = vld [vmem:[#allocation33 + $0x1a8] sm:$0xff] }
 0xce1   :  { %v7881_v31 = vpack.c.bf16 %v5444_v47, %v5442_v26  ;;  %v5572_v26 = vld [vmem:[#allocation36 + $0xd0] sm:$0xff]  ;;  %v5575_v47 = vld [vmem:[#allocation36 + $0xe8] sm:$0xff] }
 0xce3   :  { %7844 = vmatpush1.bf16.msra.mxu0 %v7843_v0  ;;  %v7883_v0 = vpack.c.bf16 %v5443_v28, %v5441_v9 }
 0xce4   :  { %7846 = vmatprep.subr.bf16.mxu0 %v7845_v54  ;;  %v5446_v54 = vld [vmem:[#allocation33 + $0x1c8] sm:$0xff] }
 0xce5   :  { %v7885_v36 = vpack.c.bf16 %v5448_v29, %v5446_v54  ;;  %v5576_v54 = vld [vmem:[#allocation36 + $0xf0] sm:$0xff]  ;;  %v5579_v29 = vld [vmem:[#allocation36 + $0x108] sm:$0xff] }
 0xce7   :  { %7848 = vmatpush1.bf16.msra.mxu0 %v7847_v40  ;;  %v7887_v40 = vpack.c.bf16 %v5447_v62, %v5445_v37 }
 0xce8   :  { %7850 = vmatprep.subr.bf16.mxu0 %v7849_v5  ;;  %v5450_v5 = vld [vmem:[#allocation33 + $0x1e8] sm:$0xff] }
 0xce9   :  { %v7889_v49 = vpack.c.bf16 %v5452_v46, %v5450_v5  ;;  %v5580_v5 = vld [vmem:[#allocation36 + $0x110] sm:$0xff]  ;;  %v5583_v46 = vld [vmem:[#allocation36 + $0x128] sm:$0xff] }
 0xceb   :  { %7852 = vmatpush1.bf16.msra.mxu0 %v7851_v16  ;;  %v7891_v16 = vpack.c.bf16 %v5451_v56, %v5449_v20 }
 0xcec   :  { %7854 = vmatprep.subr.bf16.mxu0 %v7853_v45  ;;  %v5547_v45 = vld [vmem:[#allocation36 + $0x8] sm:$0xff] }
 0xced   :  { %v7893_v30 = vpack.c.bf16 %v5549_v52, %v5547_v45  ;;  %v5584_v45 = vld [vmem:[#allocation36 + $0x130] sm:$0xff]  ;;  %v5587_v52 = vld [vmem:[#allocation36 + $0x148] sm:$0xff] }
 0xcee   :  { %v7933_v19 = vpack.c.bf16 %v5589_v3, %v5587_v52  ;;  %v5602_v3 = vld [vmem:[#allocation36 + $0x1c0] sm:$0xff] }
 0xcef   :  { %7856 = vmatpush1.bf16.msra.mxu0 %v7855_v58  ;;  %v5551_v58 = vld [vmem:[#allocation36 + $0x28] sm:$0xff]  ;;  %7894 = vmatprep.subr.bf16.mxu1 %v7893_v30 }
 0xcf0   :  { %7858 = vmatprep.subr.bf16.mxu0 %v7857_v35  ;;  %v5553_v35 = vld [vmem:[#allocation36 + $0x38] sm:$0xff]  ;;  %7896 = vmatpush1.bf16.msra.mxu1 %v7895_v60  ;;  %v5591_v60 = vld [vmem:[#allocation36 + $0x168] sm:$0xff] }
 0xcf1   :  { %v7897_v27 = vpack.c.bf16 %v5553_v35, %v5551_v58  ;;  %v5586_v58 = vld [vmem:[#allocation36 + $0x140] sm:$0xff]  ;;  %v5588_v35 = vld [vmem:[#allocation36 + $0x150] sm:$0xff] }
 0xcf2   :  { %v7935_v32 = vpack.c.bf16 %v5588_v35, %v5586_v58  ;;  %v5609_v58 = vld [vmem:[#allocation36 + $0x1f8] sm:$0xff]  ;;  %v5606_v35 = vld [vmem:[#allocation36 + $0x1e0] sm:$0xff] }
 0xcf3   :  { %7860 = vmatpush1.bf16.msra.mxu0 %v7859_v55  ;;  %v5555_v55 = vld [vmem:[#allocation36 + $0x48] sm:$0xff]  ;;  %7898 = vmatprep.subr.bf16.mxu1 %v7897_v27  ;;  %v5593_v27 = vld [vmem:[#allocation36 + $0x178] sm:$0xff] }
 0xcf4   :  { %7862 = vmatprep.subr.bf16.mxu0 %v7861_v38  ;;  %v5557_v38 = vld [vmem:[#allocation36 + $0x58] sm:$0xff]  ;;  %7900 = vmatpush1.bf16.msra.mxu1 %v7899_v1  ;;  %v7937_v25 = vpack.c.bf16 %v5593_v27, %v5591_v60  ;;  %v5595_v1 = vld [vmem:[#allocation36 + $0x188] sm:$0xff]  ;;  %v5608_v60 = vld [vmem:[#allocation36 + $0x1f0] sm:$0xff] }
 0xcf5   :  { %v7901_v22 = vpack.c.bf16 %v5557_v38, %v5555_v55  ;;  %v5590_v55 = vld [vmem:[#allocation36 + $0x160] sm:$0xff]  ;;  %v5592_v38 = vld [vmem:[#allocation36 + $0x170] sm:$0xff]  ;;  %v7955_v27 = vpack.c.bf16 %v5608_v60, %v5606_v35 }
 0xcf6   :  { %v7939_v39 = vpack.c.bf16 %v5592_v38, %v5590_v55 }
 0xcf7   :  { %7864 = vmatpush1.bf16.msra.mxu0 %v7863_v44  ;;  %v5559_v44 = vld [vmem:[#allocation36 + $0x68] sm:$0xff]  ;;  %7902 = vmatprep.subr.bf16.mxu1 %v7901_v22  ;;  %v5597_v22 = vld [vmem:[#allocation36 + $0x198] sm:$0xff] }
 0xcf8   :  { %7866 = vmatprep.subr.bf16.mxu0 %v7865_v23  ;;  %v5561_v23 = vld [vmem:[#allocation36 + $0x78] sm:$0xff]  ;;  %7904 = vmatpush1.bf16.msra.mxu1 %v7903_v33  ;;  %v7941_v21 = vpack.c.bf16 %v5597_v22, %v5595_v1  ;;  %v5599_v33 = vld [vmem:[#allocation36 + $0x1a8] sm:$0xff] }
 0xcf9   :  { %v7905_v43 = vpack.c.bf16 %v5561_v23, %v5559_v44  ;;  %v5594_v44 = vld [vmem:[#allocation36 + $0x180] sm:$0xff]  ;;  %v5596_v23 = vld [vmem:[#allocation36 + $0x190] sm:$0xff] }
 0xcfa   :  { %v7943_v41 = vpack.c.bf16 %v5596_v23, %v5594_v44 }
 0xcfb   :  { %7868 = vmatpush1.bf16.msra.mxu0 %v7867_v6  ;;  %v5563_v6 = vld [vmem:[#allocation36 + $0x88] sm:$0xff]  ;;  %7906 = vmatprep.subr.bf16.mxu1 %v7905_v43  ;;  %v5601_v43 = vld [vmem:[#allocation36 + $0x1b8] sm:$0xff] }
 0xcfc   :  { %7870 = vmatprep.subr.bf16.mxu0 %v7869_v8  ;;  %v5565_v8 = vld [vmem:[#allocation36 + $0x98] sm:$0xff]  ;;  %7908 = vmatpush1.bf16.msra.mxu1 %v7907_v51  ;;  %v7945_v34 = vpack.c.bf16 %v5601_v43, %v5599_v33  ;;  %v5603_v51 = vld [vmem:[#allocation36 + $0x1c8] sm:$0xff] }
 0xcfd   :  { %v7909_v2 = vpack.c.bf16 %v5565_v8, %v5563_v6  ;;  %v5598_v6 = vld [vmem:[#allocation36 + $0x1a0] sm:$0xff]  ;;  %v5600_v8 = vld [vmem:[#allocation36 + $0x1b0] sm:$0xff] }
 0xcfe   :  { %v7947_v10 = vpack.c.bf16 %v5600_v8, %v5598_v6  ;;  %v5610_v8 = vld [vmem:[#allocation37] sm:$0x3] }
 0xcff   :  { %7872 = vmatpush1.bf16.msra.mxu0 %v7871_v12  ;;  %v5567_v12 = vld [vmem:[#allocation36 + $0xa8] sm:$0xff]  ;;  %7910 = vmatprep.subr.bf16.mxu1 %v7909_v2  ;;  %v5605_v2 = vld [vmem:[#allocation36 + $0x1d8] sm:$0xff] }
 0xd00   :  { %7874 = vmatprep.subr.bf16.mxu0 %v7873_v14  ;;  %v5569_v14 = vld [vmem:[#allocation36 + $0xb8] sm:$0xff]  ;;  %7912 = vmatpush1.bf16.msra.mxu1 %v7911_v15  ;;  %v7949_v11 = vpack.c.bf16 %v5605_v2, %v5603_v51  ;;  %v5615_v51 = vrot.slane %v5610_v8, %v9202_v48  ;;  %v5619_v2 = vrot.slane %v5610_v8, %v9206_v50 }
 0xd01   :  { %v7913_v17 = vpack.c.bf16 %v5569_v14, %v5567_v12  ;;  %v5260_v12 = vld [vmem:[%s9632_s2] sm:$0x3]  ;;  %v5353_v15 = vld [vmem:[#allocation30] sm:$0x3] }
 0xd02   :  { %v5265_v14 = vrot.slane %v5260_v12, %v9202_v48 }
 0xd03   :  { %7876 = vmatpush1.bf16.msra.mxu0 %v7875_v24  ;;  %v5571_v24 = vld [vmem:[#allocation36 + $0xc8] sm:$0xff]  ;;  %7914 = vmatprep.subr.bf16.mxu1 %v7913_v17  ;;  %v5269_v17 = vrot.slane %v5260_v12, %v9206_v50 }
 0xd04   :  { %7878 = vmatprep.subr.bf16.mxu0 %v7877_v42  ;;  %v5573_v42 = vld [vmem:[#allocation36 + $0xd8] sm:$0xff]  ;;  %7916 = vmatpush1.bf16.msra.mxu1 %v7915_v57 }
 0xd05   :  { %v7917_v13 = vpack.c.bf16 %v5573_v42, %v5571_v24  ;;  %v5358_v42 = vrot.slane %v5353_v15, %v9202_v48 }
 0xd07   :  { %7880 = vmatpush1.bf16.msra.mxu0 %v7879_v53  ;;  %v5570_v53 = vld [vmem:[#allocation36 + $0xc0] sm:$0xff]  ;;  %7918 = vmatprep.subr.bf16.mxu1 %v7917_v13 }
 0xd08   :  { %7882 = vmatprep.subr.bf16.mxu0 %v7881_v31  ;;  %v5577_v31 = vld [vmem:[#allocation36 + $0xf8] sm:$0xff]  ;;  %v7919_v9 = vpack.c.bf16 %v5572_v26, %v5570_v53  ;;  %v5362_v53 = vrot.slane %v5353_v15, %v9206_v50 }
 0xd09   :  { %v7921_v28 = vpack.c.bf16 %v5577_v31, %v5575_v47  ;;  %v5374_v47 = vrot.slane %v5369_v59, %v9202_v48 }
 0xd0a   :  { %7920 = vmatpush1.bf16.msra.mxu1 %v7919_v9 }
 0xd0b   :  { %7884 = vmatpush1.bf16.msra.mxu0 %v7883_v0  ;;  %v5574_v0 = vld [vmem:[#allocation36 + $0xe0] sm:$0xff]  ;;  %7922 = vmatprep.subr.bf16.mxu1 %v7921_v28  ;;  %v5378_v28 = vrot.slane %v5369_v59, %v9206_v50 }
 0xd0c   :  { %7886 = vmatprep.subr.bf16.mxu0 %v7885_v36  ;;  %v5581_v36 = vld [vmem:[#allocation36 + $0x118] sm:$0xff]  ;;  %v7923_v37 = vpack.c.bf16 %v5576_v54, %v5574_v0 }
 0xd0d   :  { %v7925_v62 = vpack.c.bf16 %v5581_v36, %v5579_v29 }
 0xd0e   :  { %7924 = vmatpush1.bf16.msra.mxu1 %v7923_v37 }
 0xd0f   :  { %7888 = vmatpush1.bf16.msra.mxu0 %v7887_v40  ;;  %v5578_v40 = vld [vmem:[#allocation36 + $0x100] sm:$0xff]  ;;  %7926 = vmatprep.subr.bf16.mxu1 %v7925_v62 }
 0xd10   :  { %7890 = vmatprep.subr.bf16.mxu0 %v7889_v49  ;;  %v5585_v49 = vld [vmem:[#allocation36 + $0x138] sm:$0xff]  ;;  %v7927_v20 = vpack.c.bf16 %v5580_v5, %v5578_v40 }
 0xd11   :  { %v7929_v56 = vpack.c.bf16 %v5585_v49, %v5583_v46 }
 0xd12   :  { %7928 = vmatpush1.bf16.msra.mxu1 %v7927_v20 }
 0xd13   :  { %7892 = vmatpush1.bf16.msra.mxu0 %v7891_v16  ;;  %v5582_v16 = vld [vmem:[#allocation36 + $0x120] sm:$0xff]  ;;  %7930 = vmatprep.subr.bf16.mxu1 %v7929_v56 }
 0xd14   :  { %v7931_v30 = vpack.c.bf16 %v5584_v45, %v5582_v16 }
 0xd16   :  { %7932 = vmatpush1.bf16.msra.mxu1 %v7931_v30  ;;  %v5604_v30 = vld [vmem:[#allocation36 + $0x1d0] sm:$0xff] }
 0xd17   :  { %7934 = vmatprep.subr.bf16.mxu1 %v7933_v19  ;;  %v7951_v19 = vpack.c.bf16 %v5604_v30, %v5602_v3 }
 0xd1a   :  { %7936 = vmatpush1.bf16.msra.mxu1 %v7935_v32  ;;  %v5453_v32 = vld [vmem:[#allocation34] sm:$0x3] }
 0xd1b   :  { %7938 = vmatprep.subr.bf16.mxu1 %v7937_v25  ;;  %v5458_v25 = vrot.slane %v5453_v32, %v9202_v48  ;;  %v5462_v55 = vrot.slane %v5453_v32, %v9206_v50 }
 0xd1e   :  { %7940 = vmatpush1.bf16.msra.mxu1 %v7939_v39 }
 0xd1f   :  { %7942 = vmatprep.subr.bf16.mxu1 %v7941_v21 }
 0xd22   :  { %7944 = vmatpush1.bf16.msra.mxu1 %v7943_v41 }
 0xd23   :  { %7946 = vmatprep.subr.bf16.mxu1 %v7945_v34 }
 0xd26   :  { %7948 = vmatpush1.bf16.msra.mxu1 %v7947_v10 }
 0xd27   :  { %7950 = vmatprep.subr.bf16.mxu1 %v7949_v11 }
 0xd2a   :  { %7952 = vmatpush1.bf16.msra.mxu1 %v7951_v19 }
 0xda9   :  { %v5338_v18 = vpop.f32.mrb[44].mxu0 }
 0xdaa   :  { %v5339_v24 = vadd.f32 %v5338_v18, %v5265_v14  ;;  %v5340_v57 = vpop.f32.mrb[45].mxu0 }
 0xdab   :  { %v5341_v13 = vadd.f32 %v5340_v57, %v5269_v17 }
 0xdac   :  { %v9548_v26 = vadd.f32 %v5339_v24, %v9525_v7 }
 0xdad   :  { %v9552_v31 = vadd.f32 %v5341_v13, %v9528_v61  ;;  %v5344_v9 = vpop.f32.mrb[46].mxu0 }
 0xdae   :  { %v5365_v0 = vmul.f32 %v5358_v42, %v9548_v26  ;;  %v5345_v54 = vadd.f32 %v5344_v9, %v5265_v14  ;;  %v5346_v29 = vpop.f32.mrb[47].mxu0 }
 0xdaf   :  { %v5366_v36 = vmul.f32 %v5362_v53, %v9552_v31  ;;  %v5347_v37 = vadd.f32 %v5346_v29, %v5269_v17 }
 0xdb0   :  { %v5381_v62 = vadd.f32 %v5374_v47, %v5365_v0  ;;  %v5351_v40 = vadd.f32 %v5345_v54, %v9533_v63  ;;  %v5607_v63 = vld [vmem:[#allocation36 + $0x1e8] sm:$0xff] }
 0xdb1   :  { %v5352_v7 = vadd.f32 %v5347_v37, %v9535_v4  ;;  %v5382_v5 = vadd.f32 %v5378_v28, %v5366_v36  ;;  %v7953_v4 = vpack.c.bf16 %v5609_v58, %v5607_v63 }
 0xdb2   :  { %v5367_v46 = vmul.f32 %v5358_v42, %v5351_v40  ;;  %v5385_v20 = vmax.f32 %v5381_v62, 0.0 }
 0xdb3   :  { %v5368_v49 = vmul.f32 %v5362_v53, %v5352_v7  ;;  %v5386_v61 = vmax.f32 %v5382_v5, 0.0  ;;  %7954 = vmatprep.subr.bf16.mxu1 %v7953_v4 }
 0xdb4   :  { %v5383_v56 = vadd.f32 %v5374_v47, %v5367_v46  ;;  %7956 = vmatpush1.bf16.msra.mxu1 %v7955_v27 }
 0xdb5   :  { %5529 = vmatprep.mubr.f32.mxu0 %v5386_v61  ;;  %v5384_v16 = vadd.f32 %v5378_v28, %v5368_v49 }
 0xdb6   :  { %5530 = vmatmul.mubr.f32.vlgmr.msra.gmra.mrb[48].mxu0 %v5385_v20  ;;  %v5387_v52 = vmax.f32 %v5383_v56, 0.0 }
 0xdb7   :  { %v5388_v45 = vmax.f32 %v5384_v16, 0.0 }
 0xdb9   :  { %5535 = vmatprep.mubr.f32.mxu0 %v5388_v45 }
 0xdba   :  { %5536 = vmatmul.mubr.f32.gmra.mrb[50].mxu0 %v5387_v52 }
 0xe89   :  { %v5531_v38 = vpop.f32.mrb[48].mxu0 }
 0xe8a   :  { %v5532_v1 = vadd.f32 %v5531_v38, %v5458_v25  ;;  %v5533_v22 = vpop.f32.mrb[49].mxu0 }
 0xe8b   :  { %v5534_v39 = vadd.f32 %v5533_v22, %v5462_v55 }
 0xe8c   :  { %v5542_v23 = vmax.f32 %v5532_v1, 0.0 }
 0xe8d   :  { %v5543_v21 = vmax.f32 %v5534_v39, 0.0  ;;  %v5537_v44 = vpop.f32.mrb[50].mxu0 }
 0xe8e   :  { %v5538_v33 = vadd.f32 %v5537_v44, %v5458_v25  ;;  %v5539_v43 = vpop.f32.mrb[51].mxu0 }
 0xe8f   :  { %v5540_v41 = vadd.f32 %v5539_v43, %v5462_v55  ;;  %5686 = vmatprep.mubr.f32.mxu1 %v5543_v21 }
 0xe90   :  { %5687 = vmatmul.mubr.f32.vlgmr.msra.gmra.mrb[34].mxu1 %v5542_v23  ;;  %v5544_v6 = vmax.f32 %v5538_v33, 0.0 }
 0xe91   :  { %v5545_v34 = vmax.f32 %v5540_v41, 0.0 }
 0xe93   :  { %5692 = vmatprep.mubr.f32.mxu1 %v5545_v34 }
 0xe94   :  { %5693 = vmatmul.mubr.f32.gmra.mrb[36].mxu1 %v5544_v6 }
 0xf63   :  { %v5688_v10 = vpop.f32.mrb[34].mxu1 }
 0xf64   :  { %v5689_v11 = vadd.f32 %v5688_v10, %v5615_v51  ;;  %v5690_v12 = vpop.f32.mrb[35].mxu1 }
 0xf65   :  { %v5691_v14 = vadd.f32 %v5690_v12, %v5619_v2 }
 0xf66   :  { %v5699_v15 = vadd.f32 %v5689_v11, %v9548_v26 }
 0xf67   :  { %v5700_v17 = vadd.f32 %v5691_v14, %v9552_v31  ;;  %v5694_v18 = vpop.f32.mrb[36].mxu1 }
 0xf68   :  { %5703 = vst [vmem:[%s8968_s27] sm:$0xff] %v5699_v15  ;;  %v5695_v59 = vadd.f32 %v5694_v18, %v5615_v51  ;;  %v5696_v24 = vpop.f32.mrb[37].mxu1 }
 0xf69   :  { %5704 = vst [vmem:[%s8968_s27 + $0x8] sm:$0xff] %v5700_v17  ;;  %v5697_v42 = vadd.f32 %v5696_v24, %v5619_v2 }
 0xf6a   :  { %v5701_v57 = vadd.f32 %v5695_v59, %v5351_v40 }
 0xf6b   :  { %v5702_v48 = vadd.f32 %v5697_v42, %v5352_v7 }
 0xf6c   :  { %5705 = vst [vmem:[%s8968_s27 + $0x10] sm:$0xff] %v5701_v57 }
 0xf6d   :  { %5706 = vst [vmem:[%s8968_s27 + $0x18] sm:$0xff] %v5702_v48 }
 0xf6e   :  { %5711 = vsyncpa [#allocation3], 1 }
 0xf6f   :  { %5712 = vsyncpa [#allocation5], 1 }
 0xf70   :  { %5713 = vsyncpa [#allocation8], 1 }
 0xf71   :  { %5714 = vsyncpa [#allocation11], 1 }
 0xf72   :  { %5715 = vsyncpa [#allocation14], 1 }
 0xf73   :  { %5716 = vsyncpa [#allocation17], 1 }
 0xf74   :  { %5717 = vsyncpa [#allocation20], 1 }
 0xf75   :  { %5718 = vsyncpa [#allocation23], 1 }
 0xf76   :  { %5719 = vsyncpa [#allocation26], 1 }
 0xf77   :  { %5720 = vsyncpa [#allocation29], 1 }
 0xf78   :  { %5721 = vsyncpa [#allocation32], 1 }
 0xf79   :  { %5722 = vsyncpa [#allocation35], 1 }
 0xf7a   :  { %5723 = vsyncpa [#allocation38], 1 }

</bundles_post_ra>
